<compile_context>
chip_gen: v5e
topology: v5e:2x2
jax: 0.10.0
libtpu: 0.0.40
codegen_flags: <defaults>
</compile_context>

<pallas_src>
import functools

import numpy as np
import jax
import jax.numpy as jnp
from jax.experimental import pallas as pl
from jax.experimental.pallas import tpu as pltpu


LAYER_SIZES = [64, 64, 128, 128, 128, 256, 256, 256, 512, 512, 512]
STRIDES = [1, 1, 2, 1, 1, 2, 1, 1, 2, 1, 1]   # static Python ints, never traced
BN_EPS = 1e-5


# ----------------------------------------------------------------------------
# Fused matmul kernel: out = maybe_relu(x @ w + shift)
# Grid = (M/tm, N/tn, K/tk); K is the reduction ("arbitrary", last) axis, the
# f32 accumulator lives in VMEM scratch, and the shift/ReLU epilogue is fused
# at the last K step.
# ----------------------------------------------------------------------------
def _fused_matmul_kernel(x_ref, w_ref, c_ref, o_ref, acc_ref, *, relu):
    k = pl.program_id(2)

    @pl.when(k == 0)
    def _():
        acc_ref[...] = jnp.zeros_like(acc_ref)

    acc_ref[...] += jnp.dot(x_ref[...], w_ref[...],
                            preferred_element_type=jnp.float32)

    @pl.when(k == pl.num_programs(2) - 1)
    def _():
        y = acc_ref[...] + c_ref[...]
        if relu:
            y = jnp.maximum(y, 0.0)
        o_ref[...] = y.astype(o_ref.dtype)


def _round_up(v, m):
    return (v + m - 1) // m * m


def _pad_to(x, mult, axis):
    pad = (-x.shape[axis]) % mult
    if pad == 0:
        return x
    cfg = [(0, 0)] * x.ndim
    cfg[axis] = (0, pad)
    return jnp.pad(x, cfg)


def _pick_tk(K):
    """Single reduction step when K is small; otherwise a 128-multiple <= 512
    that divides the 128-padded K evenly (no extra reduction padding)."""
    Kp = _round_up(K, 128)
    if Kp <= 1024:
        return Kp
    tk = 128
    for cand in (256, 384, 512):
        if Kp % cand == 0:
            tk = cand
    return tk


def _pick_tiles(M, K, N, tn_max):
    # bf16 operands -> keep the M (sublane) tile a multiple of 16; don't pad
    # tiny-M layers (M=2 FC rows, M=32 late conv maps) up to 128.
    tm = min(128, _round_up(M, 16))
    tk = _pick_tk(K)
    Np = _round_up(N, 128)
    tn = min(Np, tn_max)
    # Keep >= 2 parallel grid blocks when possible so both v7x TensorCores
    # (and megacore sharding on v5e/v6e) get work.
    if (_round_up(M, tm) // tm) * (Np // tn) < 2 and tn > 128:
        tn = 128
    return tm, tk, tn


def fused_matmul(x, w, shift, *, relu, out_dtype, tn_max=256):
    """maybe_relu(x @ w + shift) with x:(M,K) bf16, w:(K,N) bf16, shift:(N,)."""
    M, K = x.shape
    K2, N = w.shape
    assert K == K2
    tm, tk, tn = _pick_tiles(M, K, N, tn_max)

    xp = _pad_to(_pad_to(x, tm, 0), tk, 1)
    wp = _pad_to(_pad_to(w, tk, 0), tn, 1)
    cp = _pad_to(shift.reshape(1, -1).astype(jnp.float32), tn, 1)

    Mp, Kp = xp.shape
    Np = wp.shape[1]
    grid = (Mp // tm, Np // tn, Kp // tk)

    out_itemsize = np.dtype(out_dtype).itemsize
    cost = pl.CostEstimate(
        flops=2 * Mp * Np * Kp,
        transcendentals=0,
        bytes_accessed=int(xp.size * xp.dtype.itemsize
                           + wp.size * wp.dtype.itemsize
                           + Mp * Np * out_itemsize),
    )

    out = pl.pallas_call(
        functools.partial(_fused_matmul_kernel, relu=relu),
        out_shape=jax.ShapeDtypeStruct((Mp, Np), out_dtype),
        grid_spec=pltpu.PrefetchScalarGridSpec(
            num_scalar_prefetch=0,
            grid=grid,
            in_specs=[
                pl.BlockSpec((tm, tk), lambda i, j, k: (i, k)),
                pl.BlockSpec((tk, tn), lambda i, j, k: (k, j)),
                pl.BlockSpec((1, tn), lambda i, j, k: (0, j)),
            ],
            out_specs=pl.BlockSpec((tm, tn), lambda i, j, k: (i, j)),
            scratch_shapes=[pltpu.VMEM((tm, tn), jnp.float32)],
        ),
        compiler_params=pltpu.CompilerParams(
            dimension_semantics=("parallel", "parallel", "arbitrary"),
        ),
        cost_estimate=cost,
    )(xp, wp, cp)

    if Mp != M or Np != N:
        out = out[:M, :N]
    return out


# ----------------------------------------------------------------------------
# im2col glue (3x3 conv, padding=1) — single XLA gather, stays outside Pallas.
# Output feature ordering is (cin, ky, kx), matched by the weight layout below.
# ----------------------------------------------------------------------------
def extract_patches_3x3(x_nhwc, stride):
    n, h, w, c = x_nhwc.shape
    patches = jax.lax.conv_general_dilated_patches(
        x_nhwc,
        filter_shape=(3, 3),
        window_strides=(stride, stride),
        padding=((1, 1), (1, 1)),
        dimension_numbers=("NHWC", "HWIO", "NHWC"),
    )
    ho, wo = patches.shape[1], patches.shape[2]
    return patches.reshape(n * ho * wo, c * 9), ho, wo


# ----------------------------------------------------------------------------
# Parameter construction (deterministic, matches shapes/init scheme of model).
# Conv weights are stored pre-reshaped as (9*Cin, Cout) with the BN scale
# folded in; bias+BN shift collapse to a single per-channel shift.  FC weights
# are stored as (K, N).
# ----------------------------------------------------------------------------
def init_params(key, in_channel=3, num_classes=10):
    params = {"conv": [], "fc": []}
    cin = in_channel
    bn_scale = 1.0 / (1.0 + BN_EPS) ** 0.5        # gamma=1, running var=1
    for cout in LAYER_SIZES:
        key, wk = jax.random.split(key)
        fan_out = cout * 3 * 3                     # kaiming_normal_, fan_out
        std = (2.0 / fan_out) ** 0.5
        w = jax.random.normal(wk, (cout, cin, 3, 3), jnp.float32) * std
        b = jnp.zeros((cout,), jnp.float32)        # conv bias init = 0
        # (Cout, Cin, 3, 3) -> (Cin, 3, 3, Cout) -> (9*Cin, Cout): row index is
        # cin*9 + ky*3 + kx, matching conv_general_dilated_patches ordering.
        wmat = jnp.transpose(w, (1, 2, 3, 0)).reshape(cin * 9, cout)
        wmat = (wmat * bn_scale).astype(jnp.bfloat16)   # fold BN scale
        shift = b * bn_scale                            # fold bias; BN beta = 0
        params["conv"].append((wmat, shift))
        cin = cout
    for din, dout in [(512 * 4 * 4, 2048), (2048, 1024), (1024, num_classes)]:
        key, wk = jax.random.split(key)
        w = jax.random.normal(wk, (dout, din), jnp.float32) * 0.01
        b = jnp.zeros((dout,), jnp.float32)
        params["fc"].append((w.T.astype(jnp.bfloat16), b))   # stored as (K, N)
    return params


# ----------------------------------------------------------------------------
# Forward pass
# ----------------------------------------------------------------------------
def convnet_forward(x_nchw, params):
    x = jnp.transpose(x_nchw, (0, 2, 3, 1)).astype(jnp.bfloat16)  # NCHW -> NHWC
    nb = x.shape[0]

    for (wmat, shift), stride in zip(params["conv"], STRIDES):
        patches, ho, wo = extract_patches_3x3(x, stride)
        y = fused_matmul(patches, wmat, shift, relu=True,
                         out_dtype=jnp.bfloat16)
        x = y.reshape(nb, ho, wo, wmat.shape[1])

    # torch.flatten(x, start_dim=1) on NCHW  ==  NHWC -> NCHW -> reshape
    x = jnp.transpose(x, (0, 3, 1, 2)).reshape(nb, -1)

    for li, (wmat, bias) in enumerate(params["fc"]):
        relu = li < 2
        x = fused_matmul(x, wmat, bias, relu=relu,
                         out_dtype=jnp.bfloat16 if relu else jnp.float32,
                         tn_max=512)
    return x


if __name__ == "__main__":
    key = jax.random.PRNGKey(0)
    pkey, xkey = jax.random.split(key)
    params = init_params(pkey, in_channel=3, num_classes=10)

    # batch=2, channels=3, spatial=32 (required so the final feature map is
    # 512 x 4 x 4, as the FC head expects).
    x = jax.random.normal(xkey, (2, 3, 32, 32), jnp.float32)

    fwd = jax.jit(convnet_forward)
    out = fwd(x, params)
    jax.block_until_ready(out)
    assert out.shape == (2, 10), out.shape
    print("KERNEL_OK")
</pallas_src>

<mosaic_0001>
module attributes {stable_mosaic.version = 11 : i64} {
  func.func @_fused_matmul_kernel(%arg0: i32, %arg1: i32, %arg2: i32, %arg3: memref<128x128xbf16, #tpu.memory_space<vmem>>, %arg4: memref<128x128xbf16, #tpu.memory_space<vmem>>, %arg5: memref<1x128xf32, #tpu.memory_space<vmem>>, %arg6: memref<128x128xbf16, #tpu.memory_space<vmem>>, %arg7: memref<128x128xf32, #tpu.memory_space<vmem>>) attributes {dimension_semantics = [#tpu.dimension_semantics<parallel>, #tpu.dimension_semantics<parallel>, #tpu.dimension_semantics<arbitrary>], iteration_bounds = array<i64: 16, 1, 1>, scalar_prefetch = 0 : i64, scratch_operands = 1 : i64, tpu.core_type = #tpu.core_type<tc>, window_params = [{transform_indices = @transform_0, window_bounds = array<i64: 128, 128>}, {transform_indices = @transform_1, window_bounds = array<i64: 128, 128>}, {transform_indices = @transform_2, window_bounds = array<i64: 1, 128>}, {transform_indices = @transform_3, window_bounds = array<i64: 128, 128>}]} {
    %c0_i32 = arith.constant 0 : i32
    %0 = arith.cmpi eq, %arg2, %c0_i32 : i32
    %1 = arith.extui %0 : i1 to i32
    %c0_i32_0 = arith.constant 0 : i32
    %2 = arith.cmpi ne, %1, %c0_i32_0 : i32
    scf.if %2 {
      %cst_10 = arith.constant 0.000000e+00 : f32
      %12 = vector.broadcast %cst_10 : f32 to vector<128x128xf32>
      %c0_11 = arith.constant 0 : index
      %c0_12 = arith.constant 0 : index
      %13 = vector.load %arg7[%c0_11, %c0_12] : memref<128x128xf32, #tpu.memory_space<vmem>>, vector<128x128xf32>
      tpu.vector_store %arg7[%c0_11, %c0_12], %12 {strides = array<i32>} : memref<128x128xf32, #tpu.memory_space<vmem>>, vector<128x128xf32>,
    } else {
    }
    %c0 = arith.constant 0 : index
    %c0_1 = arith.constant 0 : index
    %3 = vector.load %arg7[%c0, %c0_1] : memref<128x128xf32, #tpu.memory_space<vmem>>, vector<128x128xf32>
    %c0_2 = arith.constant 0 : index
    %c0_3 = arith.constant 0 : index
    %4 = vector.load %arg3[%c0_2, %c0_3] : memref<128x128xbf16, #tpu.memory_space<vmem>>, vector<128x128xbf16>
    %c0_4 = arith.constant 0 : index
    %c0_5 = arith.constant 0 : index
    %5 = vector.load %arg4[%c0_4, %c0_5] : memref<128x128xbf16, #tpu.memory_space<vmem>>, vector<128x128xbf16>
    %cst = arith.constant dense<0.000000e+00> : vector<128x128xf32>
    %6 = tpu.matmul %4, %5, %cst {dimension_numbers = #tpu.dot_dimension_numbers<[1], [0], [0], [1], [0, 0, 1, 1], [], []>} : vector<128x128xbf16>, vector<128x128xbf16>, vector<128x128xf32> -> vector<128x128xf32>
    %7 = arith.addf %3, %6 : vector<128x128xf32>
    %c0_6 = arith.constant 0 : index
    %c0_7 = arith.constant 0 : index
    %8 = vector.load %arg7[%c0_6, %c0_7] : memref<128x128xf32, #tpu.memory_space<vmem>>, vector<128x128xf32>
    tpu.vector_store %arg7[%c0_6, %c0_7], %7 {strides = array<i32>} : memref<128x128xf32, #tpu.memory_space<vmem>>, vector<128x128xf32>,
    %c0_i32_8 = arith.constant 0 : i32
    %9 = arith.cmpi eq, %arg2, %c0_i32_8 : i32
    %10 = arith.extui %9 : i1 to i32
    %c0_i32_9 = arith.constant 0 : i32
    %11 = arith.cmpi ne, %10, %c0_i32_9 : i32
    scf.if %11 {
      %c0_10 = arith.constant 0 : index
      %c0_11 = arith.constant 0 : index
      %12 = vector.load %arg7[%c0_10, %c0_11] : memref<128x128xf32, #tpu.memory_space<vmem>>, vector<128x128xf32>
      %c0_12 = arith.constant 0 : index
      %c0_13 = arith.constant 0 : index
      %13 = vector.load %arg5[%c0_12, %c0_13] : memref<1x128xf32, #tpu.memory_space<vmem>>, vector<1x128xf32>
      %14 = vector.broadcast %13 : vector<1x128xf32> to vector<128x128xf32>
      %15 = arith.addf %12, %14 : vector<128x128xf32>
      %cst_14 = arith.constant 0.000000e+00 : f32
      %16 = vector.broadcast %cst_14 : f32 to vector<128x128xf32>
      %17 = arith.maximumf %15, %16 : vector<128x128xf32>
      %18 = arith.truncf %17 : vector<128x128xf32> to vector<128x128xbf16>
      %c0_15 = arith.constant 0 : index
      %c0_16 = arith.constant 0 : index
      %19 = vector.load %arg6[%c0_15, %c0_16] : memref<128x128xbf16, #tpu.memory_space<vmem>>, vector<128x128xbf16>
      tpu.vector_store %arg6[%c0_15, %c0_16], %18 {strides = array<i32>} : memref<128x128xbf16, #tpu.memory_space<vmem>>, vector<128x128xbf16>,
    } else {
    }
    return
  }
  func.func @transform_0(%arg0: i32, %arg1: i32, %arg2: i32) -> (i32, i32) {
    %c0_i32 = arith.constant 0 : i32
    return %arg0, %arg2 : i32, i32
  }
  func.func @transform_1(%arg0: i32, %arg1: i32, %arg2: i32) -> (i32, i32) {
    %c0_i32 = arith.constant 0 : i32
    return %arg2, %arg1 : i32, i32
  }
  func.func @transform_2(%arg0: i32, %arg1: i32, %arg2: i32) -> (i32, i32) {
    %c0_i32 = arith.constant 0 : i32
    %c0_i32_0 = arith.constant 0 : i32
    return %c0_i32, %arg1 : i32, i32
  }
  func.func @transform_3(%arg0: i32, %arg1: i32, %arg2: i32) -> (i32, i32) {
    %c0_i32 = arith.constant 0 : i32
    return %arg0, %arg1 : i32, i32
  }
}

module attributes {stable_mosaic.version = 11 : i64} {
  func.func @_fused_matmul_kernel(%arg0: i32, %arg1: i32, %arg2: i32, %arg3: memref<128x640xbf16, #tpu.memory_space<vmem>>, %arg4: memref<640x128xbf16, #tpu.memory_space<vmem>>, %arg5: memref<1x128xf32, #tpu.memory_space<vmem>>, %arg6: memref<128x128xbf16, #tpu.memory_space<vmem>>, %arg7: memref<128x128xf32, #tpu.memory_space<vmem>>) attributes {dimension_semantics = [#tpu.dimension_semantics<parallel>, #tpu.dimension_semantics<parallel>, #tpu.dimension_semantics<arbitrary>], iteration_bounds = array<i64: 16, 1, 1>, scalar_prefetch = 0 : i64, scratch_operands = 1 : i64, tpu.core_type = #tpu.core_type<tc>, window_params = [{transform_indices = @transform_0, window_bounds = array<i64: 128, 640>}, {transform_indices = @transform_1, window_bounds = array<i64: 640, 128>}, {transform_indices = @transform_2, window_bounds = array<i64: 1, 128>}, {transform_indices = @transform_3, window_bounds = array<i64: 128, 128>}]} {
    %c0_i32 = arith.constant 0 : i32
    %0 = arith.cmpi eq, %arg2, %c0_i32 : i32
    %1 = arith.extui %0 : i1 to i32
    %c0_i32_0 = arith.constant 0 : i32
    %2 = arith.cmpi ne, %1, %c0_i32_0 : i32
    scf.if %2 {
      %cst_10 = arith.constant 0.000000e+00 : f32
      %12 = vector.broadcast %cst_10 : f32 to vector<128x128xf32>
      %c0_11 = arith.constant 0 : index
      %c0_12 = arith.constant 0 : index
      %13 = vector.load %arg7[%c0_11, %c0_12] : memref<128x128xf32, #tpu.memory_space<vmem>>, vector<128x128xf32>
      tpu.vector_store %arg7[%c0_11, %c0_12], %12 {strides = array<i32>} : memref<128x128xf32, #tpu.memory_space<vmem>>, vector<128x128xf32>,
    } else {
    }
    %c0 = arith.constant 0 : index
    %c0_1 = arith.constant 0 : index
    %3 = vector.load %arg7[%c0, %c0_1] : memref<128x128xf32, #tpu.memory_space<vmem>>, vector<128x128xf32>
    %c0_2 = arith.constant 0 : index
    %c0_3 = arith.constant 0 : index
    %4 = vector.load %arg3[%c0_2, %c0_3] : memref<128x640xbf16, #tpu.memory_space<vmem>>, vector<128x640xbf16>
    %c0_4 = arith.constant 0 : index
    %c0_5 = arith.constant 0 : index
    %5 = vector.load %arg4[%c0_4, %c0_5] : memref<640x128xbf16, #tpu.memory_space<vmem>>, vector<640x128xbf16>
    %cst = arith.constant dense<0.000000e+00> : vector<128x128xf32>
    %6 = tpu.matmul %4, %5, %cst {dimension_numbers = #tpu.dot_dimension_numbers<[1], [0], [0], [1], [0, 0, 1, 1], [], []>} : vector<128x640xbf16>, vector<640x128xbf16>, vector<128x128xf32> -> vector<128x128xf32>
    %7 = arith.addf %3, %6 : vector<128x128xf32>
    %c0_6 = arith.constant 0 : index
    %c0_7 = arith.constant 0 : index
    %8 = vector.load %arg7[%c0_6, %c0_7] : memref<128x128xf32, #tpu.memory_space<vmem>>, vector<128x128xf32>
    tpu.vector_store %arg7[%c0_6, %c0_7], %7 {strides = array<i32>} : memref<128x128xf32, #tpu.memory_space<vmem>>, vector<128x128xf32>,
    %c0_i32_8 = arith.constant 0 : i32
    %9 = arith.cmpi eq, %arg2, %c0_i32_8 : i32
    %10 = arith.extui %9 : i1 to i32
    %c0_i32_9 = arith.constant 0 : i32
    %11 = arith.cmpi ne, %10, %c0_i32_9 : i32
    scf.if %11 {
      %c0_10 = arith.constant 0 : index
      %c0_11 = arith.constant 0 : index
      %12 = vector.load %arg7[%c0_10, %c0_11] : memref<128x128xf32, #tpu.memory_space<vmem>>, vector<128x128xf32>
      %c0_12 = arith.constant 0 : index
      %c0_13 = arith.constant 0 : index
      %13 = vector.load %arg5[%c0_12, %c0_13] : memref<1x128xf32, #tpu.memory_space<vmem>>, vector<1x128xf32>
      %14 = vector.broadcast %13 : vector<1x128xf32> to vector<128x128xf32>
      %15 = arith.addf %12, %14 : vector<128x128xf32>
      %cst_14 = arith.constant 0.000000e+00 : f32
      %16 = vector.broadcast %cst_14 : f32 to vector<128x128xf32>
      %17 = arith.maximumf %15, %16 : vector<128x128xf32>
      %18 = arith.truncf %17 : vector<128x128xf32> to vector<128x128xbf16>
      %c0_15 = arith.constant 0 : index
      %c0_16 = arith.constant 0 : index
      %19 = vector.load %arg6[%c0_15, %c0_16] : memref<128x128xbf16, #tpu.memory_space<vmem>>, vector<128x128xbf16>
      tpu.vector_store %arg6[%c0_15, %c0_16], %18 {strides = array<i32>} : memref<128x128xbf16, #tpu.memory_space<vmem>>, vector<128x128xbf16>,
    } else {
    }
    return
  }
  func.func @transform_0(%arg0: i32, %arg1: i32, %arg2: i32) -> (i32, i32) {
    %c0_i32 = arith.constant 0 : i32
    return %arg0, %arg2 : i32, i32
  }
  func.func @transform_1(%arg0: i32, %arg1: i32, %arg2: i32) -> (i32, i32) {
    %c0_i32 = arith.constant 0 : i32
    return %arg2, %arg1 : i32, i32
  }
  func.func @transform_2(%arg0: i32, %arg1: i32, %arg2: i32) -> (i32, i32) {
    %c0_i32 = arith.constant 0 : i32
    %c0_i32_0 = arith.constant 0 : i32
    return %c0_i32, %arg1 : i32, i32
  }
  func.func @transform_3(%arg0: i32, %arg1: i32, %arg2: i32) -> (i32, i32) {
    %c0_i32 = arith.constant 0 : i32
    return %arg0, %arg1 : i32, i32
  }
}

module attributes {stable_mosaic.version = 11 : i64} {
  func.func @_fused_matmul_kernel(%arg0: i32, %arg1: i32, %arg2: i32, %arg3: memref<128x640xbf16, #tpu.memory_space<vmem>>, %arg4: memref<640x128xbf16, #tpu.memory_space<vmem>>, %arg5: memref<1x128xf32, #tpu.memory_space<vmem>>, %arg6: memref<128x128xbf16, #tpu.memory_space<vmem>>, %arg7: memref<128x128xf32, #tpu.memory_space<vmem>>) attributes {dimension_semantics = [#tpu.dimension_semantics<parallel>, #tpu.dimension_semantics<parallel>, #tpu.dimension_semantics<arbitrary>], iteration_bounds = array<i64: 4, 1, 1>, scalar_prefetch = 0 : i64, scratch_operands = 1 : i64, tpu.core_type = #tpu.core_type<tc>, window_params = [{transform_indices = @transform_0, window_bounds = array<i64: 128, 640>}, {transform_indices = @transform_1, window_bounds = array<i64: 640, 128>}, {transform_indices = @transform_2, window_bounds = array<i64: 1, 128>}, {transform_indices = @transform_3, window_bounds = array<i64: 128, 128>}]} {
    %c0_i32 = arith.constant 0 : i32
    %0 = arith.cmpi eq, %arg2, %c0_i32 : i32
    %1 = arith.extui %0 : i1 to i32
    %c0_i32_0 = arith.constant 0 : i32
    %2 = arith.cmpi ne, %1, %c0_i32_0 : i32
    scf.if %2 {
      %cst_10 = arith.constant 0.000000e+00 : f32
      %12 = vector.broadcast %cst_10 : f32 to vector<128x128xf32>
      %c0_11 = arith.constant 0 : index
      %c0_12 = arith.constant 0 : index
      %13 = vector.load %arg7[%c0_11, %c0_12] : memref<128x128xf32, #tpu.memory_space<vmem>>, vector<128x128xf32>
      tpu.vector_store %arg7[%c0_11, %c0_12], %12 {strides = array<i32>} : memref<128x128xf32, #tpu.memory_space<vmem>>, vector<128x128xf32>,
    } else {
    }
    %c0 = arith.constant 0 : index
    %c0_1 = arith.constant 0 : index
    %3 = vector.load %arg7[%c0, %c0_1] : memref<128x128xf32, #tpu.memory_space<vmem>>, vector<128x128xf32>
    %c0_2 = arith.constant 0 : index
    %c0_3 = arith.constant 0 : index
    %4 = vector.load %arg3[%c0_2, %c0_3] : memref<128x640xbf16, #tpu.memory_space<vmem>>, vector<128x640xbf16>
    %c0_4 = arith.constant 0 : index
    %c0_5 = arith.constant 0 : index
    %5 = vector.load %arg4[%c0_4, %c0_5] : memref<640x128xbf16, #tpu.memory_space<vmem>>, vector<640x128xbf16>
    %cst = arith.constant dense<0.000000e+00> : vector<128x128xf32>
    %6 = tpu.matmul %4, %5, %cst {dimension_numbers = #tpu.dot_dimension_numbers<[1], [0], [0], [1], [0, 0, 1, 1], [], []>} : vector<128x640xbf16>, vector<640x128xbf16>, vector<128x128xf32> -> vector<128x128xf32>
    %7 = arith.addf %3, %6 : vector<128x128xf32>
    %c0_6 = arith.constant 0 : index
    %c0_7 = arith.constant 0 : index
    %8 = vector.load %arg7[%c0_6, %c0_7] : memref<128x128xf32, #tpu.memory_space<vmem>>, vector<128x128xf32>
    tpu.vector_store %arg7[%c0_6, %c0_7], %7 {strides = array<i32>} : memref<128x128xf32, #tpu.memory_space<vmem>>, vector<128x128xf32>,
    %c0_i32_8 = arith.constant 0 : i32
    %9 = arith.cmpi eq, %arg2, %c0_i32_8 : i32
    %10 = arith.extui %9 : i1 to i32
    %c0_i32_9 = arith.constant 0 : i32
    %11 = arith.cmpi ne, %10, %c0_i32_9 : i32
    scf.if %11 {
      %c0_10 = arith.constant 0 : index
      %c0_11 = arith.constant 0 : index
      %12 = vector.load %arg7[%c0_10, %c0_11] : memref<128x128xf32, #tpu.memory_space<vmem>>, vector<128x128xf32>
      %c0_12 = arith.constant 0 : index
      %c0_13 = arith.constant 0 : index
      %13 = vector.load %arg5[%c0_12, %c0_13] : memref<1x128xf32, #tpu.memory_space<vmem>>, vector<1x128xf32>
      %14 = vector.broadcast %13 : vector<1x128xf32> to vector<128x128xf32>
      %15 = arith.addf %12, %14 : vector<128x128xf32>
      %cst_14 = arith.constant 0.000000e+00 : f32
      %16 = vector.broadcast %cst_14 : f32 to vector<128x128xf32>
      %17 = arith.maximumf %15, %16 : vector<128x128xf32>
      %18 = arith.truncf %17 : vector<128x128xf32> to vector<128x128xbf16>
      %c0_15 = arith.constant 0 : index
      %c0_16 = arith.constant 0 : index
      %19 = vector.load %arg6[%c0_15, %c0_16] : memref<128x128xbf16, #tpu.memory_space<vmem>>, vector<128x128xbf16>
      tpu.vector_store %arg6[%c0_15, %c0_16], %18 {strides = array<i32>} : memref<128x128xbf16, #tpu.memory_space<vmem>>, vector<128x128xbf16>,
    } else {
    }
    return
  }
  func.func @transform_0(%arg0: i32, %arg1: i32, %arg2: i32) -> (i32, i32) {
    %c0_i32 = arith.constant 0 : i32
    return %arg0, %arg2 : i32, i32
  }
  func.func @transform_1(%arg0: i32, %arg1: i32, %arg2: i32) -> (i32, i32) {
    %c0_i32 = arith.constant 0 : i32
    return %arg2, %arg1 : i32, i32
  }
  func.func @transform_2(%arg0: i32, %arg1: i32, %arg2: i32) -> (i32, i32) {
    %c0_i32 = arith.constant 0 : i32
    %c0_i32_0 = arith.constant 0 : i32
    return %c0_i32, %arg1 : i32, i32
  }
  func.func @transform_3(%arg0: i32, %arg1: i32, %arg2: i32) -> (i32, i32) {
    %c0_i32 = arith.constant 0 : i32
    return %arg0, %arg1 : i32, i32
  }
}

module attributes {stable_mosaic.version = 11 : i64} {
  func.func @_fused_matmul_kernel(%arg0: i32, %arg1: i32, %arg2: i32, %arg3: memref<128x384xbf16, #tpu.memory_space<vmem>>, %arg4: memref<384x128xbf16, #tpu.memory_space<vmem>>, %arg5: memref<1x128xf32, #tpu.memory_space<vmem>>, %arg6: memref<128x128xbf16, #tpu.memory_space<vmem>>, %arg7: memref<128x128xf32, #tpu.memory_space<vmem>>) attributes {dimension_semantics = [#tpu.dimension_semantics<parallel>, #tpu.dimension_semantics<parallel>, #tpu.dimension_semantics<arbitrary>], iteration_bounds = array<i64: 4, 1, 3>, scalar_prefetch = 0 : i64, scratch_operands = 1 : i64, tpu.core_type = #tpu.core_type<tc>, window_params = [{transform_indices = @transform_0, window_bounds = array<i64: 128, 384>}, {transform_indices = @transform_1, window_bounds = array<i64: 384, 128>}, {transform_indices = @transform_2, window_bounds = array<i64: 1, 128>}, {transform_indices = @transform_3, window_bounds = array<i64: 128, 128>}]} {
    %c0_i32 = arith.constant 0 : i32
    %0 = arith.cmpi eq, %arg2, %c0_i32 : i32
    %1 = arith.extui %0 : i1 to i32
    %c0_i32_0 = arith.constant 0 : i32
    %2 = arith.cmpi ne, %1, %c0_i32_0 : i32
    scf.if %2 {
      %cst_9 = arith.constant 0.000000e+00 : f32
      %12 = vector.broadcast %cst_9 : f32 to vector<128x128xf32>
      %c0_10 = arith.constant 0 : index
      %c0_11 = arith.constant 0 : index
      %13 = vector.load %arg7[%c0_10, %c0_11] : memref<128x128xf32, #tpu.memory_space<vmem>>, vector<128x128xf32>
      tpu.vector_store %arg7[%c0_10, %c0_11], %12 {strides = array<i32>} : memref<128x128xf32, #tpu.memory_space<vmem>>, vector<128x128xf32>,
    } else {
    }
    %c0 = arith.constant 0 : index
    %c0_1 = arith.constant 0 : index
    %3 = vector.load %arg7[%c0, %c0_1] : memref<128x128xf32, #tpu.memory_space<vmem>>, vector<128x128xf32>
    %c0_2 = arith.constant 0 : index
    %c0_3 = arith.constant 0 : index
    %4 = vector.load %arg3[%c0_2, %c0_3] : memref<128x384xbf16, #tpu.memory_space<vmem>>, vector<128x384xbf16>
    %c0_4 = arith.constant 0 : index
    %c0_5 = arith.constant 0 : index
    %5 = vector.load %arg4[%c0_4, %c0_5] : memref<384x128xbf16, #tpu.memory_space<vmem>>, vector<384x128xbf16>
    %cst = arith.constant dense<0.000000e+00> : vector<128x128xf32>
    %6 = tpu.matmul %4, %5, %cst {dimension_numbers = #tpu.dot_dimension_numbers<[1], [0], [0], [1], [0, 0, 1, 1], [], []>} : vector<128x384xbf16>, vector<384x128xbf16>, vector<128x128xf32> -> vector<128x128xf32>
    %7 = arith.addf %3, %6 : vector<128x128xf32>
    %c0_6 = arith.constant 0 : index
    %c0_7 = arith.constant 0 : index
    %8 = vector.load %arg7[%c0_6, %c0_7] : memref<128x128xf32, #tpu.memory_space<vmem>>, vector<128x128xf32>
    tpu.vector_store %arg7[%c0_6, %c0_7], %7 {strides = array<i32>} : memref<128x128xf32, #tpu.memory_space<vmem>>, vector<128x128xf32>,
    %c2_i32 = arith.constant 2 : i32
    %9 = arith.cmpi eq, %arg2, %c2_i32 : i32
    %10 = arith.extui %9 : i1 to i32
    %c0_i32_8 = arith.constant 0 : i32
    %11 = arith.cmpi ne, %10, %c0_i32_8 : i32
    scf.if %11 {
      %c0_9 = arith.constant 0 : index
      %c0_10 = arith.constant 0 : index
      %12 = vector.load %arg7[%c0_9, %c0_10] : memref<128x128xf32, #tpu.memory_space<vmem>>, vector<128x128xf32>
      %c0_11 = arith.constant 0 : index
      %c0_12 = arith.constant 0 : index
      %13 = vector.load %arg5[%c0_11, %c0_12] : memref<1x128xf32, #tpu.memory_space<vmem>>, vector<1x128xf32>
      %14 = vector.broadcast %13 : vector<1x128xf32> to vector<128x128xf32>
      %15 = arith.addf %12, %14 : vector<128x128xf32>
      %cst_13 = arith.constant 0.000000e+00 : f32
      %16 = vector.broadcast %cst_13 : f32 to vector<128x128xf32>
      %17 = arith.maximumf %15, %16 : vector<128x128xf32>
      %18 = arith.truncf %17 : vector<128x128xf32> to vector<128x128xbf16>
      %c0_14 = arith.constant 0 : index
      %c0_15 = arith.constant 0 : index
      %19 = vector.load %arg6[%c0_14, %c0_15] : memref<128x128xbf16, #tpu.memory_space<vmem>>, vector<128x128xbf16>
      tpu.vector_store %arg6[%c0_14, %c0_15], %18 {strides = array<i32>} : memref<128x128xbf16, #tpu.memory_space<vmem>>, vector<128x128xbf16>,
    } else {
    }
    return
  }
  func.func @transform_0(%arg0: i32, %arg1: i32, %arg2: i32) -> (i32, i32) {
    %c0_i32 = arith.constant 0 : i32
    return %arg0, %arg2 : i32, i32
  }
  func.func @transform_1(%arg0: i32, %arg1: i32, %arg2: i32) -> (i32, i32) {
    %c0_i32 = arith.constant 0 : i32
    return %arg2, %arg1 : i32, i32
  }
  func.func @transform_2(%arg0: i32, %arg1: i32, %arg2: i32) -> (i32, i32) {
    %c0_i32 = arith.constant 0 : i32
    %c0_i32_0 = arith.constant 0 : i32
    return %c0_i32, %arg1 : i32, i32
  }
  func.func @transform_3(%arg0: i32, %arg1: i32, %arg2: i32) -> (i32, i32) {
    %c0_i32 = arith.constant 0 : i32
    return %arg0, %arg1 : i32, i32
  }
}

module attributes {stable_mosaic.version = 11 : i64} {
  func.func @_fused_matmul_kernel(%arg0: i32, %arg1: i32, %arg2: i32, %arg3: memref<128x384xbf16, #tpu.memory_space<vmem>>, %arg4: memref<384x128xbf16, #tpu.memory_space<vmem>>, %arg5: memref<1x128xf32, #tpu.memory_space<vmem>>, %arg6: memref<128x128xbf16, #tpu.memory_space<vmem>>, %arg7: memref<128x128xf32, #tpu.memory_space<vmem>>) attributes {dimension_semantics = [#tpu.dimension_semantics<parallel>, #tpu.dimension_semantics<parallel>, #tpu.dimension_semantics<arbitrary>], iteration_bounds = array<i64: 1, 2, 3>, scalar_prefetch = 0 : i64, scratch_operands = 1 : i64, tpu.core_type = #tpu.core_type<tc>, window_params = [{transform_indices = @transform_0, window_bounds = array<i64: 128, 384>}, {transform_indices = @transform_1, window_bounds = array<i64: 384, 128>}, {transform_indices = @transform_2, window_bounds = array<i64: 1, 128>}, {transform_indices = @transform_3, window_bounds = array<i64: 128, 128>}]} {
    %c0_i32 = arith.constant 0 : i32
    %0 = arith.cmpi eq, %arg2, %c0_i32 : i32
    %1 = arith.extui %0 : i1 to i32
    %c0_i32_0 = arith.constant 0 : i32
    %2 = arith.cmpi ne, %1, %c0_i32_0 : i32
    scf.if %2 {
      %cst_9 = arith.constant 0.000000e+00 : f32
      %12 = vector.broadcast %cst_9 : f32 to vector<128x128xf32>
      %c0_10 = arith.constant 0 : index
      %c0_11 = arith.constant 0 : index
      %13 = vector.load %arg7[%c0_10, %c0_11] : memref<128x128xf32, #tpu.memory_space<vmem>>, vector<128x128xf32>
      tpu.vector_store %arg7[%c0_10, %c0_11], %12 {strides = array<i32>} : memref<128x128xf32, #tpu.memory_space<vmem>>, vector<128x128xf32>,
    } else {
    }
    %c0 = arith.constant 0 : index
    %c0_1 = arith.constant 0 : index
    %3 = vector.load %arg7[%c0, %c0_1] : memref<128x128xf32, #tpu.memory_space<vmem>>, vector<128x128xf32>
    %c0_2 = arith.constant 0 : index
    %c0_3 = arith.constant 0 : index
    %4 = vector.load %arg3[%c0_2, %c0_3] : memref<128x384xbf16, #tpu.memory_space<vmem>>, vector<128x384xbf16>
    %c0_4 = arith.constant 0 : index
    %c0_5 = arith.constant 0 : index
    %5 = vector.load %arg4[%c0_4, %c0_5] : memref<384x128xbf16, #tpu.memory_space<vmem>>, vector<384x128xbf16>
    %cst = arith.constant dense<0.000000e+00> : vector<128x128xf32>
    %6 = tpu.matmul %4, %5, %cst {dimension_numbers = #tpu.dot_dimension_numbers<[1], [0], [0], [1], [0, 0, 1, 1], [], []>} : vector<128x384xbf16>, vector<384x128xbf16>, vector<128x128xf32> -> vector<128x128xf32>
    %7 = arith.addf %3, %6 : vector<128x128xf32>
    %c0_6 = arith.constant 0 : index
    %c0_7 = arith.constant 0 : index
    %8 = vector.load %arg7[%c0_6, %c0_7] : memref<128x128xf32, #tpu.memory_space<vmem>>, vector<128x128xf32>
    tpu.vector_store %arg7[%c0_6, %c0_7], %7 {strides = array<i32>} : memref<128x128xf32, #tpu.memory_space<vmem>>, vector<128x128xf32>,
    %c2_i32 = arith.constant 2 : i32
    %9 = arith.cmpi eq, %arg2, %c2_i32 : i32
    %10 = arith.extui %9 : i1 to i32
    %c0_i32_8 = arith.constant 0 : i32
    %11 = arith.cmpi ne, %10, %c0_i32_8 : i32
    scf.if %11 {
      %c0_9 = arith.constant 0 : index
      %c0_10 = arith.constant 0 : index
      %12 = vector.load %arg7[%c0_9, %c0_10] : memref<128x128xf32, #tpu.memory_space<vmem>>, vector<128x128xf32>
      %c0_11 = arith.constant 0 : index
      %c0_12 = arith.constant 0 : index
      %13 = vector.load %arg5[%c0_11, %c0_12] : memref<1x128xf32, #tpu.memory_space<vmem>>, vector<1x128xf32>
      %14 = vector.broadcast %13 : vector<1x128xf32> to vector<128x128xf32>
      %15 = arith.addf %12, %14 : vector<128x128xf32>
      %cst_13 = arith.constant 0.000000e+00 : f32
      %16 = vector.broadcast %cst_13 : f32 to vector<128x128xf32>
      %17 = arith.maximumf %15, %16 : vector<128x128xf32>
      %18 = arith.truncf %17 : vector<128x128xf32> to vector<128x128xbf16>
      %c0_14 = arith.constant 0 : index
      %c0_15 = arith.constant 0 : index
      %19 = vector.load %arg6[%c0_14, %c0_15] : memref<128x128xbf16, #tpu.memory_space<vmem>>, vector<128x128xbf16>
      tpu.vector_store %arg6[%c0_14, %c0_15], %18 {strides = array<i32>} : memref<128x128xbf16, #tpu.memory_space<vmem>>, vector<128x128xbf16>,
    } else {
    }
    return
  }
  func.func @transform_0(%arg0: i32, %arg1: i32, %arg2: i32) -> (i32, i32) {
    %c0_i32 = arith.constant 0 : i32
    return %arg0, %arg2 : i32, i32
  }
  func.func @transform_1(%arg0: i32, %arg1: i32, %arg2: i32) -> (i32, i32) {
    %c0_i32 = arith.constant 0 : i32
    return %arg2, %arg1 : i32, i32
  }
  func.func @transform_2(%arg0: i32, %arg1: i32, %arg2: i32) -> (i32, i32) {
    %c0_i32 = arith.constant 0 : i32
    %c0_i32_0 = arith.constant 0 : i32
    return %c0_i32, %arg1 : i32, i32
  }
  func.func @transform_3(%arg0: i32, %arg1: i32, %arg2: i32) -> (i32, i32) {
    %c0_i32 = arith.constant 0 : i32
    return %arg0, %arg1 : i32, i32
  }
}

module attributes {stable_mosaic.version = 11 : i64} {
  func.func @_fused_matmul_kernel(%arg0: i32, %arg1: i32, %arg2: i32, %arg3: memref<128x384xbf16, #tpu.memory_space<vmem>>, %arg4: memref<384x128xbf16, #tpu.memory_space<vmem>>, %arg5: memref<1x128xf32, #tpu.memory_space<vmem>>, %arg6: memref<128x128xbf16, #tpu.memory_space<vmem>>, %arg7: memref<128x128xf32, #tpu.memory_space<vmem>>) attributes {dimension_semantics = [#tpu.dimension_semantics<parallel>, #tpu.dimension_semantics<parallel>, #tpu.dimension_semantics<arbitrary>], iteration_bounds = array<i64: 1, 2, 6>, scalar_prefetch = 0 : i64, scratch_operands = 1 : i64, tpu.core_type = #tpu.core_type<tc>, window_params = [{transform_indices = @transform_0, window_bounds = array<i64: 128, 384>}, {transform_indices = @transform_1, window_bounds = array<i64: 384, 128>}, {transform_indices = @transform_2, window_bounds = array<i64: 1, 128>}, {transform_indices = @transform_3, window_bounds = array<i64: 128, 128>}]} {
    %c0_i32 = arith.constant 0 : i32
    %0 = arith.cmpi eq, %arg2, %c0_i32 : i32
    %1 = arith.extui %0 : i1 to i32
    %c0_i32_0 = arith.constant 0 : i32
    %2 = arith.cmpi ne, %1, %c0_i32_0 : i32
    scf.if %2 {
      %cst_9 = arith.constant 0.000000e+00 : f32
      %12 = vector.broadcast %cst_9 : f32 to vector<128x128xf32>
      %c0_10 = arith.constant 0 : index
      %c0_11 = arith.constant 0 : index
      %13 = vector.load %arg7[%c0_10, %c0_11] : memref<128x128xf32, #tpu.memory_space<vmem>>, vector<128x128xf32>
      tpu.vector_store %arg7[%c0_10, %c0_11], %12 {strides = array<i32>} : memref<128x128xf32, #tpu.memory_space<vmem>>, vector<128x128xf32>,
    } else {
    }
    %c0 = arith.constant 0 : index
    %c0_1 = arith.constant 0 : index
    %3 = vector.load %arg7[%c0, %c0_1] : memref<128x128xf32, #tpu.memory_space<vmem>>, vector<128x128xf32>
    %c0_2 = arith.constant 0 : index
    %c0_3 = arith.constant 0 : index
    %4 = vector.load %arg3[%c0_2, %c0_3] : memref<128x384xbf16, #tpu.memory_space<vmem>>, vector<128x384xbf16>
    %c0_4 = arith.constant 0 : index
    %c0_5 = arith.constant 0 : index
    %5 = vector.load %arg4[%c0_4, %c0_5] : memref<384x128xbf16, #tpu.memory_space<vmem>>, vector<384x128xbf16>
    %cst = arith.constant dense<0.000000e+00> : vector<128x128xf32>
    %6 = tpu.matmul %4, %5, %cst {dimension_numbers = #tpu.dot_dimension_numbers<[1], [0], [0], [1], [0, 0, 1, 1], [], []>} : vector<128x384xbf16>, vector<384x128xbf16>, vector<128x128xf32> -> vector<128x128xf32>
    %7 = arith.addf %3, %6 : vector<128x128xf32>
    %c0_6 = arith.constant 0 : index
    %c0_7 = arith.constant 0 : index
    %8 = vector.load %arg7[%c0_6, %c0_7] : memref<128x128xf32, #tpu.memory_space<vmem>>, vector<128x128xf32>
    tpu.vector_store %arg7[%c0_6, %c0_7], %7 {strides = array<i32>} : memref<128x128xf32, #tpu.memory_space<vmem>>, vector<128x128xf32>,
    %c5_i32 = arith.constant 5 : i32
    %9 = arith.cmpi eq, %arg2, %c5_i32 : i32
    %10 = arith.extui %9 : i1 to i32
    %c0_i32_8 = arith.constant 0 : i32
    %11 = arith.cmpi ne, %10, %c0_i32_8 : i32
    scf.if %11 {
      %c0_9 = arith.constant 0 : index
      %c0_10 = arith.constant 0 : index
      %12 = vector.load %arg7[%c0_9, %c0_10] : memref<128x128xf32, #tpu.memory_space<vmem>>, vector<128x128xf32>
      %c0_11 = arith.constant 0 : index
      %c0_12 = arith.constant 0 : index
      %13 = vector.load %arg5[%c0_11, %c0_12] : memref<1x128xf32, #tpu.memory_space<vmem>>, vector<1x128xf32>
      %14 = vector.broadcast %13 : vector<1x128xf32> to vector<128x128xf32>
      %15 = arith.addf %12, %14 : vector<128x128xf32>
      %cst_13 = arith.constant 0.000000e+00 : f32
      %16 = vector.broadcast %cst_13 : f32 to vector<128x128xf32>
      %17 = arith.maximumf %15, %16 : vector<128x128xf32>
      %18 = arith.truncf %17 : vector<128x128xf32> to vector<128x128xbf16>
      %c0_14 = arith.constant 0 : index
      %c0_15 = arith.constant 0 : index
      %19 = vector.load %arg6[%c0_14, %c0_15] : memref<128x128xbf16, #tpu.memory_space<vmem>>, vector<128x128xbf16>
      tpu.vector_store %arg6[%c0_14, %c0_15], %18 {strides = array<i32>} : memref<128x128xbf16, #tpu.memory_space<vmem>>, vector<128x128xbf16>,
    } else {
    }
    return
  }
  func.func @transform_0(%arg0: i32, %arg1: i32, %arg2: i32) -> (i32, i32) {
    %c0_i32 = arith.constant 0 : i32
    return %arg0, %arg2 : i32, i32
  }
  func.func @transform_1(%arg0: i32, %arg1: i32, %arg2: i32) -> (i32, i32) {
    %c0_i32 = arith.constant 0 : i32
    return %arg2, %arg1 : i32, i32
  }
  func.func @transform_2(%arg0: i32, %arg1: i32, %arg2: i32) -> (i32, i32) {
    %c0_i32 = arith.constant 0 : i32
    %c0_i32_0 = arith.constant 0 : i32
    return %c0_i32, %arg1 : i32, i32
  }
  func.func @transform_3(%arg0: i32, %arg1: i32, %arg2: i32) -> (i32, i32) {
    %c0_i32 = arith.constant 0 : i32
    return %arg0, %arg1 : i32, i32
  }
}

module attributes {stable_mosaic.version = 11 : i64} {
  func.func @_fused_matmul_kernel(%arg0: i32, %arg1: i32, %arg2: i32, %arg3: memref<32x384xbf16, #tpu.memory_space<vmem>>, %arg4: memref<384x256xbf16, #tpu.memory_space<vmem>>, %arg5: memref<1x256xf32, #tpu.memory_space<vmem>>, %arg6: memref<32x256xbf16, #tpu.memory_space<vmem>>, %arg7: memref<32x256xf32, #tpu.memory_space<vmem>>) attributes {dimension_semantics = [#tpu.dimension_semantics<parallel>, #tpu.dimension_semantics<parallel>, #tpu.dimension_semantics<arbitrary>], iteration_bounds = array<i64: 1, 2, 6>, scalar_prefetch = 0 : i64, scratch_operands = 1 : i64, tpu.core_type = #tpu.core_type<tc>, window_params = [{transform_indices = @transform_0, window_bounds = array<i64: 32, 384>}, {transform_indices = @transform_1, window_bounds = array<i64: 384, 256>}, {transform_indices = @transform_2, window_bounds = array<i64: 1, 256>}, {transform_indices = @transform_3, window_bounds = array<i64: 32, 256>}]} {
    %c0_i32 = arith.constant 0 : i32
    %0 = arith.cmpi eq, %arg2, %c0_i32 : i32
    %1 = arith.extui %0 : i1 to i32
    %c0_i32_0 = arith.constant 0 : i32
    %2 = arith.cmpi ne, %1, %c0_i32_0 : i32
    scf.if %2 {
      %cst_9 = arith.constant 0.000000e+00 : f32
      %12 = vector.broadcast %cst_9 : f32 to vector<32x256xf32>
      %c0_10 = arith.constant 0 : index
      %c0_11 = arith.constant 0 : index
      %13 = vector.load %arg7[%c0_10, %c0_11] : memref<32x256xf32, #tpu.memory_space<vmem>>, vector<32x256xf32>
      tpu.vector_store %arg7[%c0_10, %c0_11], %12 {strides = array<i32>} : memref<32x256xf32, #tpu.memory_space<vmem>>, vector<32x256xf32>,
    } else {
    }
    %c0 = arith.constant 0 : index
    %c0_1 = arith.constant 0 : index
    %3 = vector.load %arg7[%c0, %c0_1] : memref<32x256xf32, #tpu.memory_space<vmem>>, vector<32x256xf32>
    %c0_2 = arith.constant 0 : index
    %c0_3 = arith.constant 0 : index
    %4 = vector.load %arg3[%c0_2, %c0_3] : memref<32x384xbf16, #tpu.memory_space<vmem>>, vector<32x384xbf16>
    %c0_4 = arith.constant 0 : index
    %c0_5 = arith.constant 0 : index
    %5 = vector.load %arg4[%c0_4, %c0_5] : memref<384x256xbf16, #tpu.memory_space<vmem>>, vector<384x256xbf16>
    %cst = arith.constant dense<0.000000e+00> : vector<32x256xf32>
    %6 = tpu.matmul %4, %5, %cst {dimension_numbers = #tpu.dot_dimension_numbers<[1], [0], [0], [1], [0, 0, 1, 1], [], []>} : vector<32x384xbf16>, vector<384x256xbf16>, vector<32x256xf32> -> vector<32x256xf32>
    %7 = arith.addf %3, %6 : vector<32x256xf32>
    %c0_6 = arith.constant 0 : index
    %c0_7 = arith.constant 0 : index
    %8 = vector.load %arg7[%c0_6, %c0_7] : memref<32x256xf32, #tpu.memory_space<vmem>>, vector<32x256xf32>
    tpu.vector_store %arg7[%c0_6, %c0_7], %7 {strides = array<i32>} : memref<32x256xf32, #tpu.memory_space<vmem>>, vector<32x256xf32>,
    %c5_i32 = arith.constant 5 : i32
    %9 = arith.cmpi eq, %arg2, %c5_i32 : i32
    %10 = arith.extui %9 : i1 to i32
    %c0_i32_8 = arith.constant 0 : i32
    %11 = arith.cmpi ne, %10, %c0_i32_8 : i32
    scf.if %11 {
      %c0_9 = arith.constant 0 : index
      %c0_10 = arith.constant 0 : index
      %12 = vector.load %arg7[%c0_9, %c0_10] : memref<32x256xf32, #tpu.memory_space<vmem>>, vector<32x256xf32>
      %c0_11 = arith.constant 0 : index
      %c0_12 = arith.constant 0 : index
      %13 = vector.load %arg5[%c0_11, %c0_12] : memref<1x256xf32, #tpu.memory_space<vmem>>, vector<1x256xf32>
      %14 = vector.broadcast %13 : vector<1x256xf32> to vector<32x256xf32>
      %15 = arith.addf %12, %14 : vector<32x256xf32>
      %cst_13 = arith.constant 0.000000e+00 : f32
      %16 = vector.broadcast %cst_13 : f32 to vector<32x256xf32>
      %17 = arith.maximumf %15, %16 : vector<32x256xf32>
      %18 = arith.truncf %17 : vector<32x256xf32> to vector<32x256xbf16>
      %c0_14 = arith.constant 0 : index
      %c0_15 = arith.constant 0 : index
      %19 = vector.load %arg6[%c0_14, %c0_15] : memref<32x256xbf16, #tpu.memory_space<vmem>>, vector<32x256xbf16>
      tpu.vector_store %arg6[%c0_14, %c0_15], %18 {strides = array<i32>} : memref<32x256xbf16, #tpu.memory_space<vmem>>, vector<32x256xbf16>,
    } else {
    }
    return
  }
  func.func @transform_0(%arg0: i32, %arg1: i32, %arg2: i32) -> (i32, i32) {
    %c0_i32 = arith.constant 0 : i32
    return %arg0, %arg2 : i32, i32
  }
  func.func @transform_1(%arg0: i32, %arg1: i32, %arg2: i32) -> (i32, i32) {
    %c0_i32 = arith.constant 0 : i32
    return %arg2, %arg1 : i32, i32
  }
  func.func @transform_2(%arg0: i32, %arg1: i32, %arg2: i32) -> (i32, i32) {
    %c0_i32 = arith.constant 0 : i32
    %c0_i32_0 = arith.constant 0 : i32
    return %c0_i32, %arg1 : i32, i32
  }
  func.func @transform_3(%arg0: i32, %arg1: i32, %arg2: i32) -> (i32, i32) {
    %c0_i32 = arith.constant 0 : i32
    return %arg0, %arg1 : i32, i32
  }
}

module attributes {stable_mosaic.version = 11 : i64} {
  func.func @_fused_matmul_kernel(%arg0: i32, %arg1: i32, %arg2: i32, %arg3: memref<32x512xbf16, #tpu.memory_space<vmem>>, %arg4: memref<512x256xbf16, #tpu.memory_space<vmem>>, %arg5: memref<1x256xf32, #tpu.memory_space<vmem>>, %arg6: memref<32x256xbf16, #tpu.memory_space<vmem>>, %arg7: memref<32x256xf32, #tpu.memory_space<vmem>>) attributes {dimension_semantics = [#tpu.dimension_semantics<parallel>, #tpu.dimension_semantics<parallel>, #tpu.dimension_semantics<arbitrary>], iteration_bounds = array<i64: 1, 2, 9>, scalar_prefetch = 0 : i64, scratch_operands = 1 : i64, tpu.core_type = #tpu.core_type<tc>, window_params = [{transform_indices = @transform_0, window_bounds = array<i64: 32, 512>}, {transform_indices = @transform_1, window_bounds = array<i64: 512, 256>}, {transform_indices = @transform_2, window_bounds = array<i64: 1, 256>}, {transform_indices = @transform_3, window_bounds = array<i64: 32, 256>}]} {
    %c0_i32 = arith.constant 0 : i32
    %0 = arith.cmpi eq, %arg2, %c0_i32 : i32
    %1 = arith.extui %0 : i1 to i32
    %c0_i32_0 = arith.constant 0 : i32
    %2 = arith.cmpi ne, %1, %c0_i32_0 : i32
    scf.if %2 {
      %cst_9 = arith.constant 0.000000e+00 : f32
      %12 = vector.broadcast %cst_9 : f32 to vector<32x256xf32>
      %c0_10 = arith.constant 0 : index
      %c0_11 = arith.constant 0 : index
      %13 = vector.load %arg7[%c0_10, %c0_11] : memref<32x256xf32, #tpu.memory_space<vmem>>, vector<32x256xf32>
      tpu.vector_store %arg7[%c0_10, %c0_11], %12 {strides = array<i32>} : memref<32x256xf32, #tpu.memory_space<vmem>>, vector<32x256xf32>,
    } else {
    }
    %c0 = arith.constant 0 : index
    %c0_1 = arith.constant 0 : index
    %3 = vector.load %arg7[%c0, %c0_1] : memref<32x256xf32, #tpu.memory_space<vmem>>, vector<32x256xf32>
    %c0_2 = arith.constant 0 : index
    %c0_3 = arith.constant 0 : index
    %4 = vector.load %arg3[%c0_2, %c0_3] : memref<32x512xbf16, #tpu.memory_space<vmem>>, vector<32x512xbf16>
    %c0_4 = arith.constant 0 : index
    %c0_5 = arith.constant 0 : index
    %5 = vector.load %arg4[%c0_4, %c0_5] : memref<512x256xbf16, #tpu.memory_space<vmem>>, vector<512x256xbf16>
    %cst = arith.constant dense<0.000000e+00> : vector<32x256xf32>
    %6 = tpu.matmul %4, %5, %cst {dimension_numbers = #tpu.dot_dimension_numbers<[1], [0], [0], [1], [0, 0, 1, 1], [], []>} : vector<32x512xbf16>, vector<512x256xbf16>, vector<32x256xf32> -> vector<32x256xf32>
    %7 = arith.addf %3, %6 : vector<32x256xf32>
    %c0_6 = arith.constant 0 : index
    %c0_7 = arith.constant 0 : index
    %8 = vector.load %arg7[%c0_6, %c0_7] : memref<32x256xf32, #tpu.memory_space<vmem>>, vector<32x256xf32>
    tpu.vector_store %arg7[%c0_6, %c0_7], %7 {strides = array<i32>} : memref<32x256xf32, #tpu.memory_space<vmem>>, vector<32x256xf32>,
    %c8_i32 = arith.constant 8 : i32
    %9 = arith.cmpi eq, %arg2, %c8_i32 : i32
    %10 = arith.extui %9 : i1 to i32
    %c0_i32_8 = arith.constant 0 : i32
    %11 = arith.cmpi ne, %10, %c0_i32_8 : i32
    scf.if %11 {
      %c0_9 = arith.constant 0 : index
      %c0_10 = arith.constant 0 : index
      %12 = vector.load %arg7[%c0_9, %c0_10] : memref<32x256xf32, #tpu.memory_space<vmem>>, vector<32x256xf32>
      %c0_11 = arith.constant 0 : index
      %c0_12 = arith.constant 0 : index
      %13 = vector.load %arg5[%c0_11, %c0_12] : memref<1x256xf32, #tpu.memory_space<vmem>>, vector<1x256xf32>
      %14 = vector.broadcast %13 : vector<1x256xf32> to vector<32x256xf32>
      %15 = arith.addf %12, %14 : vector<32x256xf32>
      %cst_13 = arith.constant 0.000000e+00 : f32
      %16 = vector.broadcast %cst_13 : f32 to vector<32x256xf32>
      %17 = arith.maximumf %15, %16 : vector<32x256xf32>
      %18 = arith.truncf %17 : vector<32x256xf32> to vector<32x256xbf16>
      %c0_14 = arith.constant 0 : index
      %c0_15 = arith.constant 0 : index
      %19 = vector.load %arg6[%c0_14, %c0_15] : memref<32x256xbf16, #tpu.memory_space<vmem>>, vector<32x256xbf16>
      tpu.vector_store %arg6[%c0_14, %c0_15], %18 {strides = array<i32>} : memref<32x256xbf16, #tpu.memory_space<vmem>>, vector<32x256xbf16>,
    } else {
    }
    return
  }
  func.func @transform_0(%arg0: i32, %arg1: i32, %arg2: i32) -> (i32, i32) {
    %c0_i32 = arith.constant 0 : i32
    return %arg0, %arg2 : i32, i32
  }
  func.func @transform_1(%arg0: i32, %arg1: i32, %arg2: i32) -> (i32, i32) {
    %c0_i32 = arith.constant 0 : i32
    return %arg2, %arg1 : i32, i32
  }
  func.func @transform_2(%arg0: i32, %arg1: i32, %arg2: i32) -> (i32, i32) {
    %c0_i32 = arith.constant 0 : i32
    %c0_i32_0 = arith.constant 0 : i32
    return %c0_i32, %arg1 : i32, i32
  }
  func.func @transform_3(%arg0: i32, %arg1: i32, %arg2: i32) -> (i32, i32) {
    %c0_i32 = arith.constant 0 : i32
    return %arg0, %arg1 : i32, i32
  }
}

module attributes {stable_mosaic.version = 11 : i64} {
  func.func @_fused_matmul_kernel(%arg0: i32, %arg1: i32, %arg2: i32, %arg3: memref<16x512xbf16, #tpu.memory_space<vmem>>, %arg4: memref<512x512xbf16, #tpu.memory_space<vmem>>, %arg5: memref<1x512xf32, #tpu.memory_space<vmem>>, %arg6: memref<16x512xbf16, #tpu.memory_space<vmem>>, %arg7: memref<16x512xf32, #tpu.memory_space<vmem>>) attributes {dimension_semantics = [#tpu.dimension_semantics<parallel>, #tpu.dimension_semantics<parallel>, #tpu.dimension_semantics<arbitrary>], iteration_bounds = array<i64: 1, 4, 16>, scalar_prefetch = 0 : i64, scratch_operands = 1 : i64, tpu.core_type = #tpu.core_type<tc>, window_params = [{transform_indices = @transform_0, window_bounds = array<i64: 16, 512>}, {transform_indices = @transform_1, window_bounds = array<i64: 512, 512>}, {transform_indices = @transform_2, window_bounds = array<i64: 1, 512>}, {transform_indices = @transform_3, window_bounds = array<i64: 16, 512>}]} {
    %c0_i32 = arith.constant 0 : i32
    %0 = arith.cmpi eq, %arg2, %c0_i32 : i32
    %1 = arith.extui %0 : i1 to i32
    %c0_i32_0 = arith.constant 0 : i32
    %2 = arith.cmpi ne, %1, %c0_i32_0 : i32
    scf.if %2 {
      %cst_9 = arith.constant 0.000000e+00 : f32
      %12 = vector.broadcast %cst_9 : f32 to vector<16x512xf32>
      %c0_10 = arith.constant 0 : index
      %c0_11 = arith.constant 0 : index
      %13 = vector.load %arg7[%c0_10, %c0_11] : memref<16x512xf32, #tpu.memory_space<vmem>>, vector<16x512xf32>
      tpu.vector_store %arg7[%c0_10, %c0_11], %12 {strides = array<i32>} : memref<16x512xf32, #tpu.memory_space<vmem>>, vector<16x512xf32>,
    } else {
    }
    %c0 = arith.constant 0 : index
    %c0_1 = arith.constant 0 : index
    %3 = vector.load %arg7[%c0, %c0_1] : memref<16x512xf32, #tpu.memory_space<vmem>>, vector<16x512xf32>
    %c0_2 = arith.constant 0 : index
    %c0_3 = arith.constant 0 : index
    %4 = vector.load %arg3[%c0_2, %c0_3] : memref<16x512xbf16, #tpu.memory_space<vmem>>, vector<16x512xbf16>
    %c0_4 = arith.constant 0 : index
    %c0_5 = arith.constant 0 : index
    %5 = vector.load %arg4[%c0_4, %c0_5] : memref<512x512xbf16, #tpu.memory_space<vmem>>, vector<512x512xbf16>
    %cst = arith.constant dense<0.000000e+00> : vector<16x512xf32>
    %6 = tpu.matmul %4, %5, %cst {dimension_numbers = #tpu.dot_dimension_numbers<[1], [0], [0], [1], [0, 0, 1, 1], [], []>} : vector<16x512xbf16>, vector<512x512xbf16>, vector<16x512xf32> -> vector<16x512xf32>
    %7 = arith.addf %3, %6 : vector<16x512xf32>
    %c0_6 = arith.constant 0 : index
    %c0_7 = arith.constant 0 : index
    %8 = vector.load %arg7[%c0_6, %c0_7] : memref<16x512xf32, #tpu.memory_space<vmem>>, vector<16x512xf32>
    tpu.vector_store %arg7[%c0_6, %c0_7], %7 {strides = array<i32>} : memref<16x512xf32, #tpu.memory_space<vmem>>, vector<16x512xf32>,
    %c15_i32 = arith.constant 15 : i32
    %9 = arith.cmpi eq, %arg2, %c15_i32 : i32
    %10 = arith.extui %9 : i1 to i32
    %c0_i32_8 = arith.constant 0 : i32
    %11 = arith.cmpi ne, %10, %c0_i32_8 : i32
    scf.if %11 {
      %c0_9 = arith.constant 0 : index
      %c0_10 = arith.constant 0 : index
      %12 = vector.load %arg7[%c0_9, %c0_10] : memref<16x512xf32, #tpu.memory_space<vmem>>, vector<16x512xf32>
      %c0_11 = arith.constant 0 : index
      %c0_12 = arith.constant 0 : index
      %13 = vector.load %arg5[%c0_11, %c0_12] : memref<1x512xf32, #tpu.memory_space<vmem>>, vector<1x512xf32>
      %14 = vector.broadcast %13 : vector<1x512xf32> to vector<16x512xf32>
      %15 = arith.addf %12, %14 : vector<16x512xf32>
      %cst_13 = arith.constant 0.000000e+00 : f32
      %16 = vector.broadcast %cst_13 : f32 to vector<16x512xf32>
      %17 = arith.maximumf %15, %16 : vector<16x512xf32>
      %18 = arith.truncf %17 : vector<16x512xf32> to vector<16x512xbf16>
      %c0_14 = arith.constant 0 : index
      %c0_15 = arith.constant 0 : index
      %19 = vector.load %arg6[%c0_14, %c0_15] : memref<16x512xbf16, #tpu.memory_space<vmem>>, vector<16x512xbf16>
      tpu.vector_store %arg6[%c0_14, %c0_15], %18 {strides = array<i32>} : memref<16x512xbf16, #tpu.memory_space<vmem>>, vector<16x512xbf16>,
    } else {
    }
    return
  }
  func.func @transform_0(%arg0: i32, %arg1: i32, %arg2: i32) -> (i32, i32) {
    %c0_i32 = arith.constant 0 : i32
    return %arg0, %arg2 : i32, i32
  }
  func.func @transform_1(%arg0: i32, %arg1: i32, %arg2: i32) -> (i32, i32) {
    %c0_i32 = arith.constant 0 : i32
    return %arg2, %arg1 : i32, i32
  }
  func.func @transform_2(%arg0: i32, %arg1: i32, %arg2: i32) -> (i32, i32) {
    %c0_i32 = arith.constant 0 : i32
    %c0_i32_0 = arith.constant 0 : i32
    return %c0_i32, %arg1 : i32, i32
  }
  func.func @transform_3(%arg0: i32, %arg1: i32, %arg2: i32) -> (i32, i32) {
    %c0_i32 = arith.constant 0 : i32
    return %arg0, %arg1 : i32, i32
  }
}

module attributes {stable_mosaic.version = 11 : i64} {
  func.func @_fused_matmul_kernel(%arg0: i32, %arg1: i32, %arg2: i32, %arg3: memref<16x512xbf16, #tpu.memory_space<vmem>>, %arg4: memref<512x512xbf16, #tpu.memory_space<vmem>>, %arg5: memref<1x512xf32, #tpu.memory_space<vmem>>, %arg6: memref<16x512xbf16, #tpu.memory_space<vmem>>, %arg7: memref<16x512xf32, #tpu.memory_space<vmem>>) attributes {dimension_semantics = [#tpu.dimension_semantics<parallel>, #tpu.dimension_semantics<parallel>, #tpu.dimension_semantics<arbitrary>], iteration_bounds = array<i64: 1, 2, 4>, scalar_prefetch = 0 : i64, scratch_operands = 1 : i64, tpu.core_type = #tpu.core_type<tc>, window_params = [{transform_indices = @transform_0, window_bounds = array<i64: 16, 512>}, {transform_indices = @transform_1, window_bounds = array<i64: 512, 512>}, {transform_indices = @transform_2, window_bounds = array<i64: 1, 512>}, {transform_indices = @transform_3, window_bounds = array<i64: 16, 512>}]} {
    %c0_i32 = arith.constant 0 : i32
    %0 = arith.cmpi eq, %arg2, %c0_i32 : i32
    %1 = arith.extui %0 : i1 to i32
    %c0_i32_0 = arith.constant 0 : i32
    %2 = arith.cmpi ne, %1, %c0_i32_0 : i32
    scf.if %2 {
      %cst_9 = arith.constant 0.000000e+00 : f32
      %12 = vector.broadcast %cst_9 : f32 to vector<16x512xf32>
      %c0_10 = arith.constant 0 : index
      %c0_11 = arith.constant 0 : index
      %13 = vector.load %arg7[%c0_10, %c0_11] : memref<16x512xf32, #tpu.memory_space<vmem>>, vector<16x512xf32>
      tpu.vector_store %arg7[%c0_10, %c0_11], %12 {strides = array<i32>} : memref<16x512xf32, #tpu.memory_space<vmem>>, vector<16x512xf32>,
    } else {
    }
    %c0 = arith.constant 0 : index
    %c0_1 = arith.constant 0 : index
    %3 = vector.load %arg7[%c0, %c0_1] : memref<16x512xf32, #tpu.memory_space<vmem>>, vector<16x512xf32>
    %c0_2 = arith.constant 0 : index
    %c0_3 = arith.constant 0 : index
    %4 = vector.load %arg3[%c0_2, %c0_3] : memref<16x512xbf16, #tpu.memory_space<vmem>>, vector<16x512xbf16>
    %c0_4 = arith.constant 0 : index
    %c0_5 = arith.constant 0 : index
    %5 = vector.load %arg4[%c0_4, %c0_5] : memref<512x512xbf16, #tpu.memory_space<vmem>>, vector<512x512xbf16>
    %cst = arith.constant dense<0.000000e+00> : vector<16x512xf32>
    %6 = tpu.matmul %4, %5, %cst {dimension_numbers = #tpu.dot_dimension_numbers<[1], [0], [0], [1], [0, 0, 1, 1], [], []>} : vector<16x512xbf16>, vector<512x512xbf16>, vector<16x512xf32> -> vector<16x512xf32>
    %7 = arith.addf %3, %6 : vector<16x512xf32>
    %c0_6 = arith.constant 0 : index
    %c0_7 = arith.constant 0 : index
    %8 = vector.load %arg7[%c0_6, %c0_7] : memref<16x512xf32, #tpu.memory_space<vmem>>, vector<16x512xf32>
    tpu.vector_store %arg7[%c0_6, %c0_7], %7 {strides = array<i32>} : memref<16x512xf32, #tpu.memory_space<vmem>>, vector<16x512xf32>,
    %c3_i32 = arith.constant 3 : i32
    %9 = arith.cmpi eq, %arg2, %c3_i32 : i32
    %10 = arith.extui %9 : i1 to i32
    %c0_i32_8 = arith.constant 0 : i32
    %11 = arith.cmpi ne, %10, %c0_i32_8 : i32
    scf.if %11 {
      %c0_9 = arith.constant 0 : index
      %c0_10 = arith.constant 0 : index
      %12 = vector.load %arg7[%c0_9, %c0_10] : memref<16x512xf32, #tpu.memory_space<vmem>>, vector<16x512xf32>
      %c0_11 = arith.constant 0 : index
      %c0_12 = arith.constant 0 : index
      %13 = vector.load %arg5[%c0_11, %c0_12] : memref<1x512xf32, #tpu.memory_space<vmem>>, vector<1x512xf32>
      %14 = vector.broadcast %13 : vector<1x512xf32> to vector<16x512xf32>
      %15 = arith.addf %12, %14 : vector<16x512xf32>
      %cst_13 = arith.constant 0.000000e+00 : f32
      %16 = vector.broadcast %cst_13 : f32 to vector<16x512xf32>
      %17 = arith.maximumf %15, %16 : vector<16x512xf32>
      %18 = arith.truncf %17 : vector<16x512xf32> to vector<16x512xbf16>
      %c0_14 = arith.constant 0 : index
      %c0_15 = arith.constant 0 : index
      %19 = vector.load %arg6[%c0_14, %c0_15] : memref<16x512xbf16, #tpu.memory_space<vmem>>, vector<16x512xbf16>
      tpu.vector_store %arg6[%c0_14, %c0_15], %18 {strides = array<i32>} : memref<16x512xbf16, #tpu.memory_space<vmem>>, vector<16x512xbf16>,
    } else {
    }
    return
  }
  func.func @transform_0(%arg0: i32, %arg1: i32, %arg2: i32) -> (i32, i32) {
    %c0_i32 = arith.constant 0 : i32
    return %arg0, %arg2 : i32, i32
  }
  func.func @transform_1(%arg0: i32, %arg1: i32, %arg2: i32) -> (i32, i32) {
    %c0_i32 = arith.constant 0 : i32
    return %arg2, %arg1 : i32, i32
  }
  func.func @transform_2(%arg0: i32, %arg1: i32, %arg2: i32) -> (i32, i32) {
    %c0_i32 = arith.constant 0 : i32
    %c0_i32_0 = arith.constant 0 : i32
    return %c0_i32, %arg1 : i32, i32
  }
  func.func @transform_3(%arg0: i32, %arg1: i32, %arg2: i32) -> (i32, i32) {
    %c0_i32 = arith.constant 0 : i32
    return %arg0, %arg1 : i32, i32
  }
}

module attributes {stable_mosaic.version = 11 : i64} {
  func.func @_fused_matmul_kernel(%arg0: i32, %arg1: i32, %arg2: i32, %arg3: memref<16x1024xbf16, #tpu.memory_space<vmem>>, %arg4: memref<1024x128xbf16, #tpu.memory_space<vmem>>, %arg5: memref<1x128xf32, #tpu.memory_space<vmem>>, %arg6: memref<16x128xf32, #tpu.memory_space<vmem>>, %arg7: memref<16x128xf32, #tpu.memory_space<vmem>>) attributes {dimension_semantics = [#tpu.dimension_semantics<parallel>, #tpu.dimension_semantics<parallel>, #tpu.dimension_semantics<arbitrary>], iteration_bounds = array<i64: 1, 1, 1>, scalar_prefetch = 0 : i64, scratch_operands = 1 : i64, tpu.core_type = #tpu.core_type<tc>, window_params = [{transform_indices = @transform_0, window_bounds = array<i64: 16, 1024>}, {transform_indices = @transform_1, window_bounds = array<i64: 1024, 128>}, {transform_indices = @transform_2, window_bounds = array<i64: 1, 128>}, {transform_indices = @transform_3, window_bounds = array<i64: 16, 128>}]} {
    %c0_i32 = arith.constant 0 : i32
    %0 = arith.cmpi eq, %arg2, %c0_i32 : i32
    %1 = arith.extui %0 : i1 to i32
    %c0_i32_0 = arith.constant 0 : i32
    %2 = arith.cmpi ne, %1, %c0_i32_0 : i32
    scf.if %2 {
      %cst_10 = arith.constant 0.000000e+00 : f32
      %12 = vector.broadcast %cst_10 : f32 to vector<16x128xf32>
      %c0_11 = arith.constant 0 : index
      %c0_12 = arith.constant 0 : index
      %13 = vector.load %arg7[%c0_11, %c0_12] : memref<16x128xf32, #tpu.memory_space<vmem>>, vector<16x128xf32>
      tpu.vector_store %arg7[%c0_11, %c0_12], %12 {strides = array<i32>} : memref<16x128xf32, #tpu.memory_space<vmem>>, vector<16x128xf32>,
    } else {
    }
    %c0 = arith.constant 0 : index
    %c0_1 = arith.constant 0 : index
    %3 = vector.load %arg7[%c0, %c0_1] : memref<16x128xf32, #tpu.memory_space<vmem>>, vector<16x128xf32>
    %c0_2 = arith.constant 0 : index
    %c0_3 = arith.constant 0 : index
    %4 = vector.load %arg3[%c0_2, %c0_3] : memref<16x1024xbf16, #tpu.memory_space<vmem>>, vector<16x1024xbf16>
    %c0_4 = arith.constant 0 : index
    %c0_5 = arith.constant 0 : index
    %5 = vector.load %arg4[%c0_4, %c0_5] : memref<1024x128xbf16, #tpu.memory_space<vmem>>, vector<1024x128xbf16>
    %cst = arith.constant dense<0.000000e+00> : vector<16x128xf32>
    %6 = tpu.matmul %4, %5, %cst {dimension_numbers = #tpu.dot_dimension_numbers<[1], [0], [0], [1], [0, 0, 1, 1], [], []>} : vector<16x1024xbf16>, vector<1024x128xbf16>, vector<16x128xf32> -> vector<16x128xf32>
    %7 = arith.addf %3, %6 : vector<16x128xf32>
    %c0_6 = arith.constant 0 : index
    %c0_7 = arith.constant 0 : index
    %8 = vector.load %arg7[%c0_6, %c0_7] : memref<16x128xf32, #tpu.memory_space<vmem>>, vector<16x128xf32>
    tpu.vector_store %arg7[%c0_6, %c0_7], %7 {strides = array<i32>} : memref<16x128xf32, #tpu.memory_space<vmem>>, vector<16x128xf32>,
    %c0_i32_8 = arith.constant 0 : i32
    %9 = arith.cmpi eq, %arg2, %c0_i32_8 : i32
    %10 = arith.extui %9 : i1 to i32
    %c0_i32_9 = arith.constant 0 : i32
    %11 = arith.cmpi ne, %10, %c0_i32_9 : i32
    scf.if %11 {
      %c0_10 = arith.constant 0 : index
      %c0_11 = arith.constant 0 : index
      %12 = vector.load %arg7[%c0_10, %c0_11] : memref<16x128xf32, #tpu.memory_space<vmem>>, vector<16x128xf32>
      %c0_12 = arith.constant 0 : index
      %c0_13 = arith.constant 0 : index
      %13 = vector.load %arg5[%c0_12, %c0_13] : memref<1x128xf32, #tpu.memory_space<vmem>>, vector<1x128xf32>
      %14 = vector.broadcast %13 : vector<1x128xf32> to vector<16x128xf32>
      %15 = arith.addf %12, %14 : vector<16x128xf32>
      %c0_14 = arith.constant 0 : index
      %c0_15 = arith.constant 0 : index
      %16 = vector.load %arg6[%c0_14, %c0_15] : memref<16x128xf32, #tpu.memory_space<vmem>>, vector<16x128xf32>
      tpu.vector_store %arg6[%c0_14, %c0_15], %15 {strides = array<i32>} : memref<16x128xf32, #tpu.memory_space<vmem>>, vector<16x128xf32>,
    } else {
    }
    return
  }
  func.func @transform_0(%arg0: i32, %arg1: i32, %arg2: i32) -> (i32, i32) {
    %c0_i32 = arith.constant 0 : i32
    return %arg0, %arg2 : i32, i32
  }
  func.func @transform_1(%arg0: i32, %arg1: i32, %arg2: i32) -> (i32, i32) {
    %c0_i32 = arith.constant 0 : i32
    return %arg2, %arg1 : i32, i32
  }
  func.func @transform_2(%arg0: i32, %arg1: i32, %arg2: i32) -> (i32, i32) {
    %c0_i32 = arith.constant 0 : i32
    %c0_i32_0 = arith.constant 0 : i32
    return %c0_i32, %arg1 : i32, i32
  }
  func.func @transform_3(%arg0: i32, %arg1: i32, %arg2: i32) -> (i32, i32) {
    %c0_i32 = arith.constant 0 : i32
    return %arg0, %arg1 : i32, i32
  }
}

</mosaic_0001>

<bundles_post_ra>
// kernel: convnet_forward.14
= control target key start
LH: loop header
LB: loop body
LE: loop exit
PB: predicated region body
PF: predicated region fallthrough
CT: control target
= control target key end

     0   :  { %s935_s12 = smov 0   ;;  %s937_s13 = smov 0   ;;  %s1015_s0 = inlined_call_operand.vmem [shape: bf16[2048,128], index: 0, kind: input, shape index: {}]   ;;  %s1016_s1 = inlined_call_operand.vmem [shape: bf16[128,128], index: 1, kind: input, shape index: {}]   ;;  %s1017_s2 = inlined_call_operand.vmem [shape: f32[1,128], index: 2, kind: input, shape index: {}]   ;;  %s1018_s3 = inlined_call_operand.vmem [shape: bf16[2048,128], index: 3, kind: output, shape index: {}]  }
   0x1   :  { %s939_s14 = smov 0  }
   0x2 LB: > { %s32_s15 = sadd.s32 1, %s909_s13  ;;  %p708_p0 = scmp.ge.s32.totalorder %s913_s14, 1  ;;  %s913_s14 = sphi %s939_s14, %s13_s14   ;;  %s909_s13 = sphi %s937_s13, %s1020_s13   ;;  %s905_s12 = sphi %s935_s12, %s1019_s12  }
   0x3   : > { %p34_p1 = scmp.ge.s32.totalorder %s32_s15, 16  ;;  %p188_p2 = scmp.lt.s32.totalorder %s913_s14, 17 }
   0x5   : > { %s1022_s15 = smov (%p34_p1, %s32_s15), 0  ;;  %p189_p3 = pnand %p708_p0, %p188_p2 }
   0x6   : > { %s709_s24 = sshll.u32 (!%p189_p3), %s905_s12, 4 }
   0x7   : > { %192 = sbr.rel (%p189_p3) target bundleno = 209 (0xd1), region = 32  ;;  %p230_p4 = scmp.lt.s32.totalorder (!%p189_p3), %s709_s24, 255 }
   0xc   : > { %v794_v0 = vld [vmem:[%s1016_s1 + $0x38] sm:$0xff]  ;;  %v793_v1 = vld [vmem:[%s1016_s1 + $0x30] sm:$0xff]  ;;  %v792_v2 = vld [vmem:[%s1016_s1 + $0x28] sm:$0xff]  ;;  %s1024_s24 = smov (!%p230_p4, %s709_s24), 255 }
   0xd   : > { %423 = vmatpush.bf16.msra.mxu0 %v794_v0  ;;  %842 = vmatpush.bf16.msra.mxu1 %v794_v0  ;;  %v791_v3 = vld [vmem:[%s1016_s1 + $0x20] sm:$0xff]  ;;  %v790_v4 = vld [vmem:[%s1016_s1 + $0x18] sm:$0xff]  ;;  %v789_v5 = vld [vmem:[%s1016_s1 + $0x10] sm:$0xff]  ;;  %s710_s4 = sshll.u32 %s1024_s24, 2 }
   0xe   : > { %843 = vmatpush.bf16.msra.mxu2 %v794_v0  ;;  %844 = vmatpush.bf16.msra.mxu3 %v794_v0  ;;  %v788_v6 = vld [vmem:[%s1016_s1 + $0x8] sm:$0xff]  ;;  %v787_v7 = vld [vmem:[%s1016_s1] sm:$0xff]  ;;  %s236_s9 = scalar_lea.vmem %s1015_s0, %s710_s4  ;;  %s996_s17 = scalar_lea.vmem %s1018_s3, %s710_s4 }
   0xf   : > { %v779_v8 = vld [vmem:[%s236_s9] sm:$0xff]  ;;  %v781_v9 = vld [vmem:[%s236_s9 + $0x10] sm:$0xff]  ;;  %v780_v12 = vld [vmem:[%s236_s9 + $0x8] sm:$0xff] }
  0x10   : > { %v783_v10 = vld [vmem:[%s236_s9 + $0x20] sm:$0xff]  ;;  %v785_v11 = vld [vmem:[%s236_s9 + $0x30] sm:$0xff]  ;;  %v782_v13 = vld [vmem:[%s236_s9 + $0x18] sm:$0xff] }
  0x11   : > { %424 = vmatpush.bf16.msra.mxu0 %v793_v1  ;;  %845 = vmatpush.bf16.msra.mxu1 %v793_v1  ;;  %v784_v14 = vld [vmem:[%s236_s9 + $0x28] sm:$0xff]  ;;  %v786_v15 = vld [vmem:[%s236_s9 + $0x38] sm:$0xff]  ;;  %v890_v18 = vld [vmem:[%s1017_s2] ss:$0 sm:$0xff] }
  0x12   : > { %846 = vmatpush.bf16.msra.mxu2 %v793_v1  ;;  %847 = vmatpush.bf16.msra.mxu3 %v793_v1 }
  0x15   : > { %425 = vmatpush.bf16.msra.mxu0 %v792_v2  ;;  %848 = vmatpush.bf16.msra.mxu1 %v792_v2 }
  0x16   : > { %849 = vmatpush.bf16.msra.mxu2 %v792_v2  ;;  %850 = vmatpush.bf16.msra.mxu3 %v792_v2 }
  0x19   : > { %426 = vmatpush.bf16.msra.mxu0 %v791_v3  ;;  %851 = vmatpush.bf16.msra.mxu1 %v791_v3 }
  0x1a   : > { %852 = vmatpush.bf16.msra.mxu2 %v791_v3  ;;  %853 = vmatpush.bf16.msra.mxu3 %v791_v3 }
  0x1d   : > { %427 = vmatpush.bf16.msra.mxu0 %v790_v4  ;;  %854 = vmatpush.bf16.msra.mxu1 %v790_v4 }
  0x1e   : > { %855 = vmatpush.bf16.msra.mxu2 %v790_v4  ;;  %856 = vmatpush.bf16.msra.mxu3 %v790_v4 }
  0x21   : > { %428 = vmatpush.bf16.msra.mxu0 %v789_v5  ;;  %857 = vmatpush.bf16.msra.mxu1 %v789_v5 }
  0x22   : > { %858 = vmatpush.bf16.msra.mxu2 %v789_v5  ;;  %859 = vmatpush.bf16.msra.mxu3 %v789_v5 }
  0x25   : > { %429 = vmatpush.bf16.msra.mxu0 %v788_v6  ;;  %860 = vmatpush.bf16.msra.mxu1 %v788_v6 }
  0x26   : > { %861 = vmatpush.bf16.msra.mxu2 %v788_v6  ;;  %862 = vmatpush.bf16.msra.mxu3 %v788_v6 }
  0x29   : > { %430 = vmatpush.bf16.msra.mxu0 %v787_v7  ;;  %863 = vmatpush.bf16.msra.mxu1 %v787_v7 }
  0x2a   : > { %864 = vmatpush.bf16.msra.mxu2 %v787_v7  ;;  %865 = vmatpush.bf16.msra.mxu3 %v787_v7 }
  0x2c   : > { %431 = vmatmul.bf16.vlgmr.msra.gmra.mxu0 %v779_v8  ;;  %441 = vmatmul.bf16.vlgmr.msra.gmra.mxu1 %v781_v9 }
  0x2d   : > { %451 = vmatmul.bf16.vlgmr.msra.gmra.mxu2 %v783_v10  ;;  %461 = vmatmul.bf16.vlgmr.msra.gmra.mxu3 %v785_v11 }
  0x3c   : > { %436 = vmatmul.bf16.gmra.mxu0 %v780_v12  ;;  %446 = vmatmul.bf16.gmra.mxu1 %v782_v13 }
  0x3d   : > { %456 = vmatmul.bf16.gmra.mxu2 %v784_v14  ;;  %466 = vmatmul.bf16.gmra.mxu3 %v786_v15 }
  0xa9   : > { %v432_v16 = vpop.f32.mrf.mxu0  ;;  %v442_v17 = vpop.f32.mrf.mxu1 }
  0xaa   : > { %v527_v19 = vadd.f32 %v890_v18, %v432_v16  ;;  %v531_v20 = vadd.f32 %v890_v18, %v442_v17 }
  0xac   : > { %v543_v27 = vmax.f32 %v527_v19, 0.0  ;;  %v547_v28 = vmax.f32 %v531_v20, 0.0 }
  0xb0   : > { %v452_v21 = vpop.f32.mrf.mxu2  ;;  %v462_v22 = vpop.f32.mrf.mxu3 }
  0xb1   : > { %v434_v23 = vpop.f32.mrf.mxu0  ;;  %v444_v24 = vpop.f32.mrf.mxu1  ;;  %v535_v33 = vadd.f32 %v890_v18, %v452_v21  ;;  %v539_v34 = vadd.f32 %v890_v18, %v462_v22 }
  0xb2   : > { %v528_v25 = vadd.f32 %v890_v18, %v434_v23  ;;  %v532_v26 = vadd.f32 %v890_v18, %v444_v24 }
  0xb3   : > { %v551_v41 = vmax.f32 %v535_v33, 0.0  ;;  %v555_v42 = vmax.f32 %v539_v34, 0.0 }
  0xb4   : > { %v544_v29 = vmax.f32 %v528_v25, 0.0  ;;  %v548_v30 = vmax.f32 %v532_v26, 0.0 }
  0xb6   : > { %v798_v31 = vpack.c.bf16 %v544_v29, %v543_v27  ;;  %v808_v32 = vpack.c.bf16 %v548_v30, %v547_v28 }
  0xb8   : > { %799 = vst [vmem:[%s996_s17] sm:$0xff] %v798_v31   ;;  %v454_v35 = vpop.f32.mrf.mxu2  ;;  %v464_v36 = vpop.f32.mrf.mxu3 }
  0xb9   : > { %836 = vst [vmem:[%s996_s17 + $0x10] sm:$0xff] %v808_v32   ;;  %v536_v37 = vadd.f32 %v890_v18, %v454_v35  ;;  %v540_v38 = vadd.f32 %v890_v18, %v464_v36  ;;  %v437_v39 = vpop.f32.mrf.mxu0  ;;  %v447_v40 = vpop.f32.mrf.mxu1 }
  0xba   : > { %v529_v47 = vadd.f32 %v890_v18, %v437_v39  ;;  %v533_v48 = vadd.f32 %v890_v18, %v447_v40 }
  0xbb   : > { %v552_v43 = vmax.f32 %v536_v37, 0.0  ;;  %v556_v44 = vmax.f32 %v540_v38, 0.0 }
  0xbc   : > { %v545_v55 = vmax.f32 %v529_v47, 0.0  ;;  %v549_v56 = vmax.f32 %v533_v48, 0.0 }
  0xbd   : > { %v818_v45 = vpack.c.bf16 %v552_v43, %v551_v41  ;;  %v828_v46 = vpack.c.bf16 %v556_v44, %v555_v42 }
  0xbf   : > { %838 = vst [vmem:[%s996_s17 + $0x20] sm:$0xff] %v818_v45  }
  0xc0   : > { %840 = vst [vmem:[%s996_s17 + $0x30] sm:$0xff] %v828_v46   ;;  %v457_v49 = vpop.f32.mrf.mxu2  ;;  %v467_v50 = vpop.f32.mrf.mxu3 }
  0xc1   : > { %v439_v51 = vpop.f32.mrf.mxu0  ;;  %v449_v52 = vpop.f32.mrf.mxu1  ;;  %v537_v61 = vadd.f32 %v890_v18, %v457_v49  ;;  %v541_v62 = vadd.f32 %v890_v18, %v467_v50 }
  0xc2   : > { %v530_v53 = vadd.f32 %v890_v18, %v439_v51  ;;  %v534_v54 = vadd.f32 %v890_v18, %v449_v52 }
  0xc3   : > { %v553_v3 = vmax.f32 %v537_v61, 0.0  ;;  %v557_v4 = vmax.f32 %v541_v62, 0.0 }
  0xc4   : > { %v546_v57 = vmax.f32 %v530_v53, 0.0  ;;  %v550_v58 = vmax.f32 %v534_v54, 0.0 }
  0xc6   : > { %v803_v59 = vpack.c.bf16 %v546_v57, %v545_v55  ;;  %v813_v60 = vpack.c.bf16 %v550_v58, %v549_v56 }
  0xc8   : > { %835 = vst [vmem:[%s996_s17 + $0x8] sm:$0xff] %v803_v59   ;;  %v459_v63 = vpop.f32.mrf.mxu2  ;;  %v469_v0 = vpop.f32.mrf.mxu3 }
  0xc9   : > { %837 = vst [vmem:[%s996_s17 + $0x18] sm:$0xff] %v813_v60   ;;  %v538_v1 = vadd.f32 %v890_v18, %v459_v63  ;;  %v542_v2 = vadd.f32 %v890_v18, %v469_v0 }
  0xcb   : > { %v554_v5 = vmax.f32 %v538_v1, 0.0  ;;  %v558_v6 = vmax.f32 %v542_v2, 0.0 }
  0xcd   : > { %v823_v7 = vpack.c.bf16 %v554_v5, %v553_v3  ;;  %v833_v8 = vpack.c.bf16 %v558_v6, %v557_v4 }
  0xcf   : > { %839 = vst [vmem:[%s996_s17 + $0x28] sm:$0xff] %v823_v7  }
  0xd0   : > { %841 = vst [vmem:[%s996_s17 + $0x38] sm:$0xff] %v833_v8  }
  0xd1 PF: > { %s13_s14 = sadd.s32 1, %s913_s14   ;;  %s1019_s12 = smov %s909_s13 }
  0xd2   : > { %p10_p5 = scmp.ge.s32.totalorder %s13_s14, 18   ;;  %s1020_s13 = smov %s1022_s15 }
  0xd4   :  { %12 = sbr.rel (!%p10_p5) target bundleno = 2 (0x2), region = 76 }

// kernel: convnet_forward.15
= control target key start
LH: loop header
LB: loop body
LE: loop exit
PB: predicated region body
PF: predicated region fallthrough
CT: control target
= control target key end

     0   :  { %s1911_s12 = smov 0   ;;  %s1913_s13 = smov 0   ;;  %s2220_s0 = inlined_call_operand.vmem [shape: bf16[2048,640], index: 0, kind: input, shape index: {}]   ;;  %s2221_s1 = inlined_call_operand.vmem [shape: bf16[640,128], index: 1, kind: input, shape index: {}]   ;;  %s2222_s2 = inlined_call_operand.vmem [shape: f32[1,128], index: 2, kind: input, shape index: {}]   ;;  %s2223_s3 = inlined_call_operand.vmem [shape: bf16[2048,128], index: 3, kind: output, shape index: {}]  }
   0x1   :  { %s1915_s14 = smov 0  }
   0x2 LB: > { %s32_s15 = sadd.s32 1, %s1885_s13  ;;  %p1363_p0 = scmp.ge.s32.totalorder %s1889_s14, 1  ;;  %s1889_s14 = sphi %s1915_s14, %s13_s14   ;;  %s1885_s13 = sphi %s1913_s13, %s2225_s13   ;;  %s1881_s12 = sphi %s1911_s12, %s2224_s12  }
   0x3   : > { %p34_p1 = scmp.ge.s32.totalorder %s32_s15, 16  ;;  %p191_p2 = scmp.lt.s32.totalorder %s1889_s14, 17 }
   0x5   : > { %s2227_s15 = smov (%p34_p1, %s32_s15), 0  ;;  %p192_p3 = pnand %p1363_p0, %p191_p2 }
   0x6   : > { %s1364_s22 = sshll.u32 (!%p192_p3), %s1881_s12, 4 }
   0x7   : > { %195 = sbr.rel (%p192_p3) target bundleno = 341 (0x155), region = 32  ;;  %p236_p4 = scmp.lt.s32.totalorder (!%p192_p3), %s1364_s22, 255 }
   0xc   : > { %v1737_v0 = vld [vmem:[%s2221_s1 + $0x38] sm:$0xff]  ;;  %v1736_v1 = vld [vmem:[%s2221_s1 + $0x30] sm:$0xff]  ;;  %v1735_v2 = vld [vmem:[%s2221_s1 + $0x28] sm:$0xff]  ;;  %s2229_s22 = smov (!%p236_p4, %s1364_s22), 255 }
   0xd   : > { %1817 = vmatpush.bf16.msra.mxu1 %v1737_v0  ;;  %1818 = vmatpush.bf16.msra.mxu2 %v1737_v0  ;;  %v1734_v3 = vld [vmem:[%s2221_s1 + $0x20] sm:$0xff]  ;;  %v1733_v4 = vld [vmem:[%s2221_s1 + $0x18] sm:$0xff]  ;;  %v1732_v5 = vld [vmem:[%s2221_s1 + $0x10] sm:$0xff]  ;;  %s1841_s29 = smul.u32 20, %s2229_s22  ;;  %s1367_s9 = sshll.u32 %s2229_s22, 2 }
   0xe   : > { %1819 = vmatpush.bf16.msra.mxu3 %v1737_v0  ;;  %879 = vmatpush.bf16.msra.mxu0 %v1737_v0  ;;  %v1731_v6 = vld [vmem:[%s2221_s1 + $0x8] sm:$0xff]  ;;  %v1730_v7 = vld [vmem:[%s2221_s1] sm:$0xff]  ;;  %v1753_v16 = vld [vmem:[%s2221_s1 + $0xb8] sm:$0xff]  ;;  %s2175_s12 = scalar_lea.vmem %s2223_s3, %s1367_s9 }
   0xf   : > { %s1959_s7 = scalar_lea.vmem %s2220_s0, %s1841_s29  ;;  %v1745_v17 = vld [vmem:[%s2221_s1 + $0x78] sm:$0xff]  ;;  %v1752_v24 = vld [vmem:[%s2221_s1 + $0xb0] sm:$0xff]  ;;  %v1751_v28 = vld [vmem:[%s2221_s1 + $0xa8] sm:$0xff] }
  0x10   : > { %v1410_v8 = vld [vmem:[%s1959_s7 + $0x50] sm:$0xf]  ;;  %v1702_v9 = vld [vmem:[%s1959_s7 + $0x60] sm:$0xf0]  ;;  %v1450_v10 = vld [vmem:[%s1959_s7 + $0xa0] sm:$0xf] }
  0x11   : > { %1820 = vmatpush.bf16.msra.mxu1 %v1736_v1  ;;  %1821 = vmatpush.bf16.msra.mxu2 %v1736_v1  ;;  %v1712_v11 = vld [vmem:[%s1959_s7 + $0xb0] sm:$0xf0]  ;;  %v1490_v12 = vld [vmem:[%s1959_s7 + $0xf0] sm:$0xf]  ;;  %v1722_v13 = vld [vmem:[%s1959_s7 + $0x100] sm:$0xf0]  ;;  %v1411_v18 = vor.u32 %v1702_v9, %v1410_v8 }
  0x12   : > { %1822 = vmatpush.bf16.msra.mxu3 %v1736_v1  ;;  %880 = vmatpush.bf16.msra.mxu0 %v1736_v1  ;;  %v1370_v14 = vld [vmem:[%s1959_s7] sm:$0xf]  ;;  %v1692_v15 = vld [vmem:[%s1959_s7 + $0x10] sm:$0xf0]  ;;  %v1451_v19 = vor.u32 %v1712_v11, %v1450_v10  ;;  %v1491_v20 = vor.u32 %v1722_v13, %v1490_v12  ;;  %v1761_v22 = vld [vmem:[%s2221_s1 + $0xf8] sm:$0xff] }
  0x13   : > { %v1371_v21 = vor.u32 %v1692_v15, %v1370_v14  ;;  %v1769_v23 = vld [vmem:[%s2221_s1 + $0x138] sm:$0xff]  ;;  %v1744_v25 = vld [vmem:[%s2221_s1 + $0x70] sm:$0xff]  ;;  %v1743_v29 = vld [vmem:[%s2221_s1 + $0x68] sm:$0xff] }
  0x14   : > { %v1760_v26 = vld [vmem:[%s2221_s1 + $0xf0] sm:$0xff]  ;;  %v1759_v30 = vld [vmem:[%s2221_s1 + $0xe8] sm:$0xff]  ;;  %v1750_v32 = vld [vmem:[%s2221_s1 + $0xa0] sm:$0xff] }
  0x15   : > { %1823 = vmatpush.bf16.msra.mxu1 %v1735_v2  ;;  %1824 = vmatpush.bf16.msra.mxu2 %v1735_v2  ;;  %v1768_v27 = vld [vmem:[%s2221_s1 + $0x130] sm:$0xff]  ;;  %v1767_v31 = vld [vmem:[%s2221_s1 + $0x128] sm:$0xff]  ;;  %v1742_v33 = vld [vmem:[%s2221_s1 + $0x60] sm:$0xff] }
  0x16   : > { %1825 = vmatpush.bf16.msra.mxu3 %v1735_v2  ;;  %881 = vmatpush.bf16.msra.mxu0 %v1735_v2  ;;  %v1758_v34 = vld [vmem:[%s2221_s1 + $0xe0] sm:$0xff]  ;;  %v1430_v36 = vld [vmem:[%s1959_s7 + $0x78] sm:$0xf]  ;;  %v1707_v37 = vld [vmem:[%s1959_s7 + $0x88] sm:$0xf0] }
  0x17   : > { %v1766_v35 = vld [vmem:[%s2221_s1 + $0x120] sm:$0xff]  ;;  %v1470_v38 = vld [vmem:[%s1959_s7 + $0xc8] sm:$0xf]  ;;  %v1717_v39 = vld [vmem:[%s1959_s7 + $0xd8] sm:$0xf0]  ;;  %v1431_v46 = vor.u32 %v1707_v37, %v1430_v36 }
  0x18   : > { %v1510_v40 = vld [vmem:[%s1959_s7 + $0x118] sm:$0xf]  ;;  %v1727_v41 = vld [vmem:[%s1959_s7 + $0x128] sm:$0xf0]  ;;  %v1390_v42 = vld [vmem:[%s1959_s7 + $0x28] sm:$0xf]  ;;  %v1471_v47 = vor.u32 %v1717_v39, %v1470_v38 }
  0x19   : > { %1826 = vmatpush.bf16.msra.mxu1 %v1734_v3  ;;  %1827 = vmatpush.bf16.msra.mxu2 %v1734_v3  ;;  %v1697_v43 = vld [vmem:[%s1959_s7 + $0x38] sm:$0xf0]  ;;  %v1511_v48 = vor.u32 %v1727_v41, %v1510_v40  ;;  %v1748_v52 = vld [vmem:[%s2221_s1 + $0x90] sm:$0xff]  ;;  %v1747_v56 = vld [vmem:[%s2221_s1 + $0x88] sm:$0xff] }
  0x1a   : > { %1828 = vmatpush.bf16.msra.mxu3 %v1734_v3  ;;  %882 = vmatpush.bf16.msra.mxu0 %v1734_v3  ;;  %v1749_v44 = vld [vmem:[%s2221_s1 + $0x98] sm:$0xff]  ;;  %v1391_v49 = vor.u32 %v1697_v43, %v1390_v42  ;;  %v1740_v53 = vld [vmem:[%s2221_s1 + $0x50] sm:$0xff]  ;;  %v1739_v57 = vld [vmem:[%s2221_s1 + $0x48] sm:$0xff] }
  0x1b   : > { %v1741_v45 = vld [vmem:[%s2221_s1 + $0x58] sm:$0xff]  ;;  %v1756_v54 = vld [vmem:[%s2221_s1 + $0xd0] sm:$0xff]  ;;  %v1755_v58 = vld [vmem:[%s2221_s1 + $0xc8] sm:$0xff] }
  0x1c   : > { %v1757_v50 = vld [vmem:[%s2221_s1 + $0xd8] sm:$0xff]  ;;  %v1764_v55 = vld [vmem:[%s2221_s1 + $0x110] sm:$0xff]  ;;  %v1763_v59 = vld [vmem:[%s2221_s1 + $0x108] sm:$0xff] }
  0x1d   : > { %1829 = vmatpush.bf16.msra.mxu1 %v1733_v4  ;;  %1830 = vmatpush.bf16.msra.mxu2 %v1733_v4  ;;  %v1765_v51 = vld [vmem:[%s2221_s1 + $0x118] sm:$0xff]  ;;  %v1746_v60 = vld [vmem:[%s2221_s1 + $0x80] sm:$0xff]  ;;  %v1378_v2 = vld [vmem:[%s1959_s7 + $0x8] sm:$0xf] }
  0x1e   : > { %1831 = vmatpush.bf16.msra.mxu3 %v1733_v4  ;;  %883 = vmatpush.bf16.msra.mxu0 %v1733_v4  ;;  %v1738_v61 = vld [vmem:[%s2221_s1 + $0x40] sm:$0xff]  ;;  %v1372_v1 = vld [vmem:[%s1959_s7 + $0x14] sm:$0xf0]  ;;  %v1693_v3 = vld [vmem:[%s1959_s7 + $0x18] sm:$0xf0] }
  0x1f   : > { %v1754_v62 = vld [vmem:[%s2221_s1 + $0xc0] sm:$0xff]  ;;  %v1691_v4 = vld [vmem:[%s1959_s7 + $0xc] sm:$0xf]  ;;  %v1379_v9 = vor.u32 %v1693_v3, %v1378_v2  ;;  %v1398_v14 = vld [vmem:[%s1959_s7 + $0x30] sm:$0xf] }
  0x20   : > { %v1762_v63 = vld [vmem:[%s2221_s1 + $0x100] sm:$0xff]  ;;  %v1695_v12 = vld [vmem:[%s1959_s7 + $0x2c] sm:$0xf]  ;;  %v1705_v36 = vld [vmem:[%s1959_s7 + $0x7c] sm:$0xf] }
  0x21   : > { %1832 = vmatpush.bf16.msra.mxu1 %v1732_v5  ;;  %1833 = vmatpush.bf16.msra.mxu2 %v1732_v5  ;;  %v1690_v0 = vld [vmem:[%s1959_s7 + $0x4] sm:$0xf]  ;;  %v1392_v13 = vld [vmem:[%s1959_s7 + $0x3c] sm:$0xf0]  ;;  %v1432_v37 = vld [vmem:[%s1959_s7 + $0x8c] sm:$0xf0] }
  0x22   : > { %1834 = vmatpush.bf16.msra.mxu3 %v1732_v5  ;;  %884 = vmatpush.bf16.msra.mxu0 %v1732_v5  ;;  %v1380_v5 = vld [vmem:[%s1959_s7 + $0x1c] sm:$0xf0]  ;;  %v1375_v8 = vor.u32 %v1690_v0, %v1372_v1  ;;  %v1698_v15 = vld [vmem:[%s1959_s7 + $0x40] sm:$0xf0]  ;;  %v1708_v39 = vld [vmem:[%s1959_s7 + $0x90] sm:$0xf0] }
  0x23   : > { %v1383_v10 = vor.u32 %v1691_v4, %v1380_v5  ;;  %v1438_v38 = vld [vmem:[%s1959_s7 + $0x80] sm:$0xf]  ;;  %v1706_v40 = vld [vmem:[%s1959_s7 + $0x84] sm:$0xf]  ;;  %v1440_v41 = vld [vmem:[%s1959_s7 + $0x94] sm:$0xf0] }
  0x24   : > { %v1446_v42 = vld [vmem:[%s1959_s7 + $0x88] sm:$0xf]  ;;  %v1709_v43 = vld [vmem:[%s1959_s7 + $0x98] sm:$0xf0]  ;;  %v1716_v0 = vld [vmem:[%s1959_s7 + $0xd4] sm:$0xf] }
  0x25   : > { %1835 = vmatpush.bf16.msra.mxu1 %v1731_v6  ;;  %1836 = vmatpush.bf16.msra.mxu2 %v1731_v6  ;;  %v1480_v1 = vld [vmem:[%s1959_s7 + $0xe4] sm:$0xf0]  ;;  %v1486_v2 = vld [vmem:[%s1959_s7 + $0xd8] sm:$0xf]  ;;  %v1719_v3 = vld [vmem:[%s1959_s7 + $0xe8] sm:$0xf0] }
  0x26   : > { %1837 = vmatpush.bf16.msra.mxu3 %v1731_v6  ;;  %885 = vmatpush.bf16.msra.mxu0 %v1731_v6  ;;  %v1386_v6 = vld [vmem:[%s1959_s7 + $0x10] sm:$0xf] }
  0x29   : > { %1838 = vmatpush.bf16.msra.mxu1 %v1730_v7  ;;  %1839 = vmatpush.bf16.msra.mxu2 %v1730_v7 }
  0x2a   : > { %1840 = vmatpush.bf16.msra.mxu3 %v1730_v7  ;;  %886 = vmatpush.bf16.msra.mxu0 %v1730_v7  ;;  %v1694_v7 = vld [vmem:[%s1959_s7 + $0x20] sm:$0xf0] }
  0x2b   : > { %v1387_v11 = vor.u32 %v1694_v7, %v1386_v6  ;;  %v1483_v6 = vor.u32 %v1716_v0, %v1480_v1  ;;  %v1487_v7 = vor.u32 %v1719_v3, %v1486_v2 }
  0x2c   : > { %897 = vmatmul.bf16.vlgmr.msra.gmra.mxu1 %v1411_v18  ;;  %907 = vmatmul.bf16.vlgmr.msra.gmra.mxu2 %v1451_v19  ;;  %v1406_v18 = vld [vmem:[%s1959_s7 + $0x38] sm:$0xf]  ;;  %v1699_v19 = vld [vmem:[%s1959_s7 + $0x48] sm:$0xf0] }
  0x2d   : > { %977 = vmatpush.bf16.msrb.mxu2 %v1753_v16  ;;  %928 = vmatpush.bf16.msrb.mxu1 %v1745_v17  ;;  %v1696_v16 = vld [vmem:[%s1959_s7 + $0x34] sm:$0xf]  ;;  %v1400_v17 = vld [vmem:[%s1959_s7 + $0x44] sm:$0xf0] }
  0x2e   : > { %917 = vmatmul.bf16.vlgmr.msra.gmra.mxu3 %v1491_v20  ;;  %887 = vmatmul.bf16.vlgmr.msra.gmra.mxu0 %v1371_v21  ;;  %v1395_v20 = vor.u32 %v1695_v12, %v1392_v13  ;;  %v1399_v21 = vor.u32 %v1698_v15, %v1398_v14  ;;  %v1721_v12 = vld [vmem:[%s1959_s7 + $0xfc] sm:$0xf]  ;;  %v1500_v13 = vld [vmem:[%s1959_s7 + $0x10c] sm:$0xf0]  ;;  %v1506_v14 = vld [vmem:[%s1959_s7 + $0x100] sm:$0xf] }
  0x2f   : > { %1026 = vmatpush.bf16.msrb.mxu3 %v1761_v22  ;;  %1075 = vmatpush.bf16.msrb.mxu0 %v1769_v23  ;;  %v1403_v22 = vor.u32 %v1696_v16, %v1400_v17  ;;  %v1407_v23 = vor.u32 %v1699_v19, %v1406_v18  ;;  %v1724_v15 = vld [vmem:[%s1959_s7 + $0x110] sm:$0xf0]  ;;  %v1503_v19 = vor.u32 %v1721_v12, %v1500_v13 }
  0x31   : > { %978 = vmatpush.bf16.msrb.mxu2 %v1752_v24  ;;  %929 = vmatpush.bf16.msrb.mxu1 %v1744_v25  ;;  %v1700_v24 = vld [vmem:[%s1959_s7 + $0x54] sm:$0xf]  ;;  %v1412_v25 = vld [vmem:[%s1959_s7 + $0x64] sm:$0xf0] }
  0x33   : > { %1027 = vmatpush.bf16.msrb.mxu3 %v1760_v26  ;;  %1076 = vmatpush.bf16.msrb.mxu0 %v1768_v27  ;;  %v1418_v26 = vld [vmem:[%s1959_s7 + $0x58] sm:$0xf]  ;;  %v1703_v27 = vld [vmem:[%s1959_s7 + $0x68] sm:$0xf0] }
  0x35   : > { %979 = vmatpush.bf16.msrb.mxu2 %v1751_v28  ;;  %930 = vmatpush.bf16.msrb.mxu1 %v1743_v29  ;;  %v1701_v28 = vld [vmem:[%s1959_s7 + $0x5c] sm:$0xf]  ;;  %v1420_v29 = vld [vmem:[%s1959_s7 + $0x6c] sm:$0xf0] }
  0x37   : > { %1028 = vmatpush.bf16.msrb.mxu3 %v1759_v30  ;;  %1077 = vmatpush.bf16.msrb.mxu0 %v1767_v31  ;;  %v1426_v30 = vld [vmem:[%s1959_s7 + $0x60] sm:$0xf]  ;;  %v1704_v31 = vld [vmem:[%s1959_s7 + $0x70] sm:$0xf0] }
  0x39   : > { %980 = vmatpush.bf16.msrb.mxu2 %v1750_v32  ;;  %931 = vmatpush.bf16.msrb.mxu1 %v1742_v33  ;;  %v1415_v32 = vor.u32 %v1700_v24, %v1412_v25  ;;  %v1419_v33 = vor.u32 %v1703_v27, %v1418_v26  ;;  %v1725_v26 = vld [vmem:[%s1959_s7 + $0x11c] sm:$0xf]  ;;  %v1512_v27 = vld [vmem:[%s1959_s7 + $0x12c] sm:$0xf0] }
  0x3b   : > { %1029 = vmatpush.bf16.msrb.mxu3 %v1758_v34  ;;  %1078 = vmatpush.bf16.msrb.mxu0 %v1766_v35  ;;  %v1423_v34 = vor.u32 %v1701_v28, %v1420_v29  ;;  %v1427_v35 = vor.u32 %v1704_v31, %v1426_v30  ;;  %v1518_v28 = vld [vmem:[%s1959_s7 + $0x120] sm:$0xf]  ;;  %v1728_v29 = vld [vmem:[%s1959_s7 + $0x130] sm:$0xf0]  ;;  %v1726_v30 = vld [vmem:[%s1959_s7 + $0x124] sm:$0xf] }
  0x3c   : > { %902 = vmatmul.bf16.gmra.mxu1 %v1431_v46  ;;  %912 = vmatmul.bf16.gmra.mxu2 %v1471_v47  ;;  %v1443_v46 = vor.u32 %v1706_v40, %v1440_v41  ;;  %v1447_v47 = vor.u32 %v1709_v43, %v1446_v42  ;;  %v1520_v31 = vld [vmem:[%s1959_s7 + $0x134] sm:$0xf0] }
  0x3d   : > { %981 = vmatpush.bf16.msrb.mxu2 %v1749_v44  ;;  %932 = vmatpush.bf16.msrb.mxu1 %v1741_v45  ;;  %v1435_v44 = vor.u32 %v1705_v36, %v1432_v37  ;;  %v1439_v45 = vor.u32 %v1708_v39, %v1438_v38  ;;  %v1515_v36 = vor.u32 %v1725_v26, %v1512_v27 }
  0x3e   : > { %922 = vmatmul.bf16.gmra.mxu3 %v1511_v48  ;;  %892 = vmatmul.bf16.gmra.mxu0 %v1391_v49  ;;  %v1710_v48 = vld [vmem:[%s1959_s7 + $0xa4] sm:$0xf]  ;;  %v1452_v49 = vld [vmem:[%s1959_s7 + $0xb4] sm:$0xf0]  ;;  %v1519_v37 = vor.u32 %v1728_v29, %v1518_v28  ;;  %v1523_v39 = vor.u32 %v1726_v30, %v1520_v31 }
  0x3f   : > { %1030 = vmatpush.bf16.msrb.mxu3 %v1757_v50  ;;  %1079 = vmatpush.bf16.msrb.mxu0 %v1765_v51  ;;  %v1458_v50 = vld [vmem:[%s1959_s7 + $0xa8] sm:$0xf]  ;;  %v1713_v51 = vld [vmem:[%s1959_s7 + $0xb8] sm:$0xf0] }
  0x41   : > { %982 = vmatpush.bf16.msrb.mxu2 %v1748_v52  ;;  %933 = vmatpush.bf16.msrb.mxu1 %v1740_v53  ;;  %v1711_v52 = vld [vmem:[%s1959_s7 + $0xac] sm:$0xf]  ;;  %v1460_v53 = vld [vmem:[%s1959_s7 + $0xbc] sm:$0xf0] }
  0x43   : > { %1031 = vmatpush.bf16.msrb.mxu3 %v1756_v54  ;;  %1080 = vmatpush.bf16.msrb.mxu0 %v1764_v55  ;;  %v1466_v54 = vld [vmem:[%s1959_s7 + $0xb0] sm:$0xf]  ;;  %v1714_v55 = vld [vmem:[%s1959_s7 + $0xc0] sm:$0xf0] }
  0x45   : > { %983 = vmatpush.bf16.msrb.mxu2 %v1747_v56  ;;  %934 = vmatpush.bf16.msrb.mxu1 %v1739_v57  ;;  %v1455_v56 = vor.u32 %v1710_v48, %v1452_v49  ;;  %v1459_v57 = vor.u32 %v1713_v51, %v1458_v50 }
  0x47   : > { %1032 = vmatpush.bf16.msrb.mxu3 %v1755_v58  ;;  %1081 = vmatpush.bf16.msrb.mxu0 %v1763_v59  ;;  %v1463_v58 = vor.u32 %v1711_v52, %v1460_v53  ;;  %v1467_v59 = vor.u32 %v1714_v55, %v1466_v54 }
  0x49   : > { %984 = vmatpush.bf16.msrb.mxu2 %v1746_v60  ;;  %935 = vmatpush.bf16.msrb.mxu1 %v1738_v61  ;;  %v1715_v60 = vld [vmem:[%s1959_s7 + $0xcc] sm:$0xf]  ;;  %v1472_v61 = vld [vmem:[%s1959_s7 + $0xdc] sm:$0xf0] }
  0x4a   : > { %v1475_v4 = vor.u32 %v1715_v60, %v1472_v61  ;;  %v2167_v60 = vld [vmem:[%s2222_s2] ss:$0 sm:$0xff] }
  0x4b   : > { %1033 = vmatpush.bf16.msrb.mxu3 %v1754_v62  ;;  %1082 = vmatpush.bf16.msrb.mxu0 %v1762_v63  ;;  %v1478_v62 = vld [vmem:[%s1959_s7 + $0xd0] sm:$0xf]  ;;  %v1718_v63 = vld [vmem:[%s1959_s7 + $0xe0] sm:$0xf0] }
  0x4c   : > { %936 = vmatmul.bf16.vlgmr.msrb.gmra.mxu1 %v1375_v8  ;;  %985 = vmatmul.bf16.vlgmr.msrb.gmra.mxu2 %v1379_v9  ;;  %v1479_v5 = vor.u32 %v1718_v63, %v1478_v62  ;;  %v1720_v8 = vld [vmem:[%s1959_s7 + $0xf4] sm:$0xf]  ;;  %v1492_v9 = vld [vmem:[%s1959_s7 + $0x104] sm:$0xf0] }
  0x4d   : > { %v1495_v16 = vor.u32 %v1720_v8, %v1492_v9 }
  0x4e   : > { %1034 = vmatmul.bf16.vlgmr.msrb.gmra.mxu3 %v1383_v10  ;;  %1083 = vmatmul.bf16.vlgmr.msrb.gmra.mxu0 %v1387_v11  ;;  %v1498_v10 = vld [vmem:[%s1959_s7 + $0xf8] sm:$0xf]  ;;  %v1723_v11 = vld [vmem:[%s1959_s7 + $0x108] sm:$0xf0] }
  0x4f   : > { %v1499_v17 = vor.u32 %v1723_v11, %v1498_v10 }
  0x5c   : > { %941 = vmatmul.bf16.gmra.mxu1 %v1395_v20  ;;  %990 = vmatmul.bf16.gmra.mxu2 %v1399_v21  ;;  %v1507_v20 = vor.u32 %v1724_v15, %v1506_v14 }
  0x5e   : > { %1039 = vmatmul.bf16.gmra.mxu3 %v1403_v22  ;;  %1088 = vmatmul.bf16.gmra.mxu0 %v1407_v23 }
  0x6c   : > { %946 = vmatmul.bf16.gmra.mxu1 %v1415_v32  ;;  %995 = vmatmul.bf16.gmra.mxu2 %v1419_v33  ;;  %v1526_v32 = vld [vmem:[%s1959_s7 + $0x128] sm:$0xf]  ;;  %v1729_v33 = vld [vmem:[%s1959_s7 + $0x138] sm:$0xf0] }
  0x6d   : > { %v1527_v40 = vor.u32 %v1729_v33, %v1526_v32 }
  0x6e   : > { %1044 = vmatmul.bf16.gmra.mxu3 %v1423_v34  ;;  %1093 = vmatmul.bf16.gmra.mxu0 %v1427_v35 }
  0x7c   : > { %951 = vmatmul.bf16.gmra.mxu1 %v1435_v44  ;;  %1000 = vmatmul.bf16.gmra.mxu2 %v1439_v45 }
  0x7e   : > { %1049 = vmatmul.bf16.gmra.mxu3 %v1443_v46  ;;  %1098 = vmatmul.bf16.gmra.mxu0 %v1447_v47 }
  0x8c   : > { %956 = vmatmul.bf16.gmra.mxu1 %v1455_v56  ;;  %1005 = vmatmul.bf16.gmra.mxu2 %v1459_v57 }
  0x8e   : > { %1054 = vmatmul.bf16.gmra.mxu3 %v1463_v58  ;;  %1103 = vmatmul.bf16.gmra.mxu0 %v1467_v59 }
  0x9c   : > { %961 = vmatmul.bf16.gmra.mxu1 %v1475_v4  ;;  %1010 = vmatmul.bf16.gmra.mxu2 %v1479_v5 }
  0x9e   : > { %1059 = vmatmul.bf16.gmra.mxu3 %v1483_v6  ;;  %1108 = vmatmul.bf16.gmra.mxu0 %v1487_v7 }
  0xa9   : > { %v2132_v18 = vpop.f32.mrf.mxu1 }
  0xab   : > { %v888_v21 = vpop.f32.mrf.mxu0 }
  0xac   : > { %966 = vmatmul.bf16.gmra.mxu1 %v1495_v16  ;;  %1015 = vmatmul.bf16.gmra.mxu2 %v1499_v17 }
  0xae   : > { %1064 = vmatmul.bf16.gmra.mxu3 %v1503_v19  ;;  %1113 = vmatmul.bf16.gmra.mxu0 %v1507_v20 }
  0xaf   : > { %v2134_v22 = vpop.f32.mrf.mxu2 }
  0xb1   : > { %v2136_v23 = vpop.f32.mrf.mxu3  ;;  %v2138_v24 = vpop.f32.mrf.mxu1 }
  0xb3   : > { %v890_v25 = vpop.f32.mrf.mxu0 }
  0xb7   : > { %v2148_v34 = vpop.f32.mrf.mxu2 }
  0xb9   : > { %v2150_v35 = vpop.f32.mrf.mxu3  ;;  %v2152_v38 = vpop.f32.mrf.mxu1 }
  0xbb   : > { %v893_v41 = vpop.f32.mrf.mxu0 }
  0xbc   : > { %971 = vmatmul.bf16.gmra.mxu1 %v1515_v36  ;;  %1020 = vmatmul.bf16.gmra.mxu2 %v1519_v37 }
  0xbe   : > { %1069 = vmatmul.bf16.gmra.mxu3 %v1523_v39  ;;  %1118 = vmatmul.bf16.gmra.mxu0 %v1527_v40 }
  0xbf   : > { %v2154_v42 = vpop.f32.mrf.mxu2 }
  0xc1   : > { %v2156_v43 = vpop.f32.mrf.mxu3  ;;  %v2158_v44 = vpop.f32.mrf.mxu1 }
  0xc3   : > { %v895_v45 = vpop.f32.mrf.mxu0 }
  0xc7   : > { %v2160_v46 = vpop.f32.mrf.mxu2 }
  0xc9   : > { %v2162_v47 = vpop.f32.mrf.mxu3  ;;  %v937_v48 = vpop.f32.mrf.mxu1 }
  0xca   : > { %v938_v50 = vadd.f32 %v937_v48, %v888_v21 }
  0xcb   : > { %v1084_v49 = vpop.f32.mrf.mxu0 }
  0xcf   : > { %v986_v51 = vpop.f32.mrf.mxu2 }
  0xd0   : > { %v987_v52 = vadd.f32 %v986_v51, %v938_v50 }
  0xd1   : > { %v1035_v53 = vpop.f32.mrf.mxu3  ;;  %v939_v54 = vpop.f32.mrf.mxu1 }
  0xd2   : > { %v1036_v56 = vadd.f32 %v1035_v53, %v987_v52  ;;  %v940_v57 = vadd.f32 %v939_v54, %v890_v25 }
  0xd3   : > { %v1086_v55 = vpop.f32.mrf.mxu0 }
  0xd4   : > { %v1085_v59 = vadd.f32 %v1084_v49, %v1036_v56 }
  0xd6   : > { %v1179_v2 = vadd.f32 %v2167_v60, %v1085_v59 }
  0xd7   : > { %v988_v58 = vpop.f32.mrf.mxu2 }
  0xd8   : > { %v989_v61 = vadd.f32 %v988_v58, %v940_v57  ;;  %v1195_v7 = vmax.f32 %v1179_v2, 0.0 }
  0xd9   : > { %v1037_v62 = vpop.f32.mrf.mxu3  ;;  %v942_v63 = vpop.f32.mrf.mxu1 }
  0xda   : > { %v1038_v0 = vadd.f32 %v1037_v62, %v989_v61  ;;  %v943_v5 = vadd.f32 %v942_v63, %v893_v41 }
  0xdb   : > { %v1089_v1 = vpop.f32.mrf.mxu0 }
  0xdc   : > { %v1087_v3 = vadd.f32 %v1086_v55, %v1038_v0 }
  0xde   : > { %v1180_v4 = vadd.f32 %v2167_v60, %v1087_v3 }
  0xdf   : > { %v991_v6 = vpop.f32.mrf.mxu2 }
  0xe0   : > { %v1196_v8 = vmax.f32 %v1180_v4, 0.0  ;;  %v992_v9 = vadd.f32 %v991_v6, %v943_v5 }
  0xe1   : > { %v1040_v10 = vpop.f32.mrf.mxu3  ;;  %v944_v11 = vpop.f32.mrf.mxu1 }
  0xe2   : > { %v1773_v12 = vpack.c.bf16 %v1196_v8, %v1195_v7  ;;  %v1041_v14 = vadd.f32 %v1040_v10, %v992_v9  ;;  %v945_v15 = vadd.f32 %v944_v11, %v895_v45 }
  0xe3   : > { %v1091_v13 = vpop.f32.mrf.mxu0 }
  0xe4   : > { %1774 = vst [vmem:[%s2175_s12] sm:$0xff] %v1773_v12   ;;  %v1090_v17 = vadd.f32 %v1089_v1, %v1041_v14 }
  0xe6   : > { %v1181_v27 = vadd.f32 %v2167_v60, %v1090_v17 }
  0xe7   : > { %v993_v16 = vpop.f32.mrf.mxu2 }
  0xe8   : > { %v994_v19 = vadd.f32 %v993_v16, %v945_v15  ;;  %v1197_v32 = vmax.f32 %v1181_v27, 0.0 }
  0xe9   : > { %v1042_v20 = vpop.f32.mrf.mxu3  ;;  %v947_v21 = vpop.f32.mrf.mxu1 }
  0xea   : > { %v1043_v25 = vadd.f32 %v1042_v20, %v994_v19  ;;  %v948_v30 = vadd.f32 %v947_v21, %v2132_v18 }
  0xeb   : > { %v1094_v26 = vpop.f32.mrf.mxu0 }
  0xec   : > { %v1092_v28 = vadd.f32 %v1091_v13, %v1043_v25 }
  0xee   : > { %v1182_v29 = vadd.f32 %v2167_v60, %v1092_v28 }
  0xef   : > { %v996_v31 = vpop.f32.mrf.mxu2 }
  0xf0   : > { %v1198_v33 = vmax.f32 %v1182_v29, 0.0  ;;  %v997_v36 = vadd.f32 %v996_v31, %v948_v30 }
  0xf1   : > { %v1045_v37 = vpop.f32.mrf.mxu3  ;;  %v949_v39 = vpop.f32.mrf.mxu1 }
  0xf2   : > { %v1778_v40 = vpack.c.bf16 %v1198_v33, %v1197_v32  ;;  %v1046_v45 = vadd.f32 %v1045_v37, %v997_v36  ;;  %v950_v48 = vadd.f32 %v949_v39, %v2138_v24 }
  0xf3   : > { %v1096_v41 = vpop.f32.mrf.mxu0 }
  0xf4   : > { %1810 = vst [vmem:[%s2175_s12 + $0x8] sm:$0xff] %v1778_v40   ;;  %v1095_v50 = vadd.f32 %v1094_v26, %v1046_v45 }
  0xf6   : > { %v1183_v55 = vadd.f32 %v2167_v60, %v1095_v50 }
  0xf7   : > { %v998_v49 = vpop.f32.mrf.mxu2 }
  0xf8   : > { %v999_v51 = vadd.f32 %v998_v49, %v950_v48  ;;  %v1199_v61 = vmax.f32 %v1183_v55, 0.0 }
  0xf9   : > { %v1047_v52 = vpop.f32.mrf.mxu3  ;;  %v952_v53 = vpop.f32.mrf.mxu1 }
  0xfa   : > { %v1048_v54 = vadd.f32 %v1047_v52, %v999_v51  ;;  %v953_v58 = vadd.f32 %v952_v53, %v2152_v38 }
  0xfb   : > { %v1099_v18 = vpop.f32.mrf.mxu0 }
  0xfc   : > { %v1097_v56 = vadd.f32 %v1096_v41, %v1048_v54 }
  0xfe   : > { %v1184_v57 = vadd.f32 %v2167_v60, %v1097_v56 }
  0xff   : > { %v1001_v59 = vpop.f32.mrf.mxu2 }
 0x100   : > { %v1200_v62 = vmax.f32 %v1184_v57, 0.0  ;;  %v1002_v63 = vadd.f32 %v1001_v59, %v953_v58 }
 0x101   : > { %v1050_v24 = vpop.f32.mrf.mxu3  ;;  %v954_v0 = vpop.f32.mrf.mxu1 }
 0x102   : > { %v1783_v1 = vpack.c.bf16 %v1200_v62, %v1199_v61  ;;  %v1051_v3 = vadd.f32 %v1050_v24, %v1002_v63  ;;  %v955_v4 = vadd.f32 %v954_v0, %v2158_v44 }
 0x103   : > { %v1101_v2 = vpop.f32.mrf.mxu0 }
 0x104   : > { %1811 = vst [vmem:[%s2175_s12 + $0x10] sm:$0xff] %v1783_v1   ;;  %v1100_v6 = vadd.f32 %v1099_v18, %v1051_v3 }
 0x106   : > { %v1185_v11 = vadd.f32 %v2167_v60, %v1100_v6 }
 0x107   : > { %v1003_v5 = vpop.f32.mrf.mxu2 }
 0x108   : > { %v1004_v7 = vadd.f32 %v1003_v5, %v955_v4  ;;  %v1201_v16 = vmax.f32 %v1185_v11, 0.0 }
 0x109   : > { %v1052_v8 = vpop.f32.mrf.mxu3  ;;  %v957_v9 = vpop.f32.mrf.mxu1 }
 0x10a   : > { %v1053_v10 = vadd.f32 %v1052_v8, %v1004_v7  ;;  %v958_v14 = vadd.f32 %v957_v9, %v2134_v22 }
 0x10b   : > { %v1104_v38 = vpop.f32.mrf.mxu0 }
 0x10c   : > { %v1102_v12 = vadd.f32 %v1101_v2, %v1053_v10 }
 0x10e   : > { %v1186_v13 = vadd.f32 %v2167_v60, %v1102_v12 }
 0x10f   : > { %v1006_v15 = vpop.f32.mrf.mxu2 }
 0x110   : > { %v1202_v17 = vmax.f32 %v1186_v13, 0.0  ;;  %v1007_v19 = vadd.f32 %v1006_v15, %v958_v14 }
 0x111   : > { %v1055_v44 = vpop.f32.mrf.mxu3  ;;  %v959_v20 = vpop.f32.mrf.mxu1 }
 0x112   : > { %v1788_v21 = vpack.c.bf16 %v1202_v17, %v1201_v16  ;;  %v1056_v26 = vadd.f32 %v1055_v44, %v1007_v19  ;;  %v960_v27 = vadd.f32 %v959_v20, %v2148_v34 }
 0x113   : > { %v1106_v25 = vpop.f32.mrf.mxu0 }
 0x114   : > { %1812 = vst [vmem:[%s2175_s12 + $0x18] sm:$0xff] %v1788_v21   ;;  %v1105_v29 = vadd.f32 %v1104_v38, %v1056_v26 }
 0x116   : > { %v1187_v36 = vadd.f32 %v2167_v60, %v1105_v29 }
 0x117   : > { %v1008_v28 = vpop.f32.mrf.mxu2 }
 0x118   : > { %v1009_v30 = vadd.f32 %v1008_v28, %v960_v27  ;;  %v1203_v45 = vmax.f32 %v1187_v36, 0.0 }
 0x119   : > { %v1057_v31 = vpop.f32.mrf.mxu3  ;;  %v962_v32 = vpop.f32.mrf.mxu1 }
 0x11a   : > { %v1058_v33 = vadd.f32 %v1057_v31, %v1009_v30  ;;  %v963_v40 = vadd.f32 %v962_v32, %v2154_v42 }
 0x11b   : > { %v1109_v22 = vpop.f32.mrf.mxu0 }
 0x11c   : > { %v1107_v37 = vadd.f32 %v1106_v25, %v1058_v33 }
 0x11e   : > { %v1188_v39 = vadd.f32 %v2167_v60, %v1107_v37 }
 0x11f   : > { %v1011_v41 = vpop.f32.mrf.mxu2 }
 0x120   : > { %v1204_v48 = vmax.f32 %v1188_v39, 0.0  ;;  %v1012_v49 = vadd.f32 %v1011_v41, %v963_v40 }
 0x121   : > { %v1060_v34 = vpop.f32.mrf.mxu3  ;;  %v964_v50 = vpop.f32.mrf.mxu1 }
 0x122   : > { %v1793_v51 = vpack.c.bf16 %v1204_v48, %v1203_v45  ;;  %v1061_v53 = vadd.f32 %v1060_v34, %v1012_v49  ;;  %v965_v54 = vadd.f32 %v964_v50, %v2160_v46 }
 0x123   : > { %v1111_v52 = vpop.f32.mrf.mxu0 }
 0x124   : > { %1813 = vst [vmem:[%s2175_s12 + $0x20] sm:$0xff] %v1793_v51   ;;  %v1110_v55 = vadd.f32 %v1109_v22, %v1061_v53 }
 0x126   : > { %v1189_v42 = vadd.f32 %v2167_v60, %v1110_v55 }
 0x127   : > { %v1013_v18 = vpop.f32.mrf.mxu2 }
 0x128   : > { %v1014_v56 = vadd.f32 %v1013_v18, %v965_v54  ;;  %v1205_v1 = vmax.f32 %v1189_v42, 0.0 }
 0x129   : > { %v1062_v57 = vpop.f32.mrf.mxu3  ;;  %v967_v58 = vpop.f32.mrf.mxu1 }
 0x12a   : > { %v1063_v59 = vadd.f32 %v1062_v57, %v1014_v56  ;;  %v968_v24 = vadd.f32 %v967_v58, %v2136_v23 }
 0x12b   : > { %v1114_v62 = vpop.f32.mrf.mxu0 }
 0x12c   : > { %v1112_v61 = vadd.f32 %v1111_v52, %v1063_v59 }
 0x12e   : > { %v1190_v63 = vadd.f32 %v2167_v60, %v1112_v61 }
 0x12f   : > { %v1016_v0 = vpop.f32.mrf.mxu2 }
 0x130   : > { %v1206_v2 = vmax.f32 %v1190_v63, 0.0  ;;  %v1017_v3 = vadd.f32 %v1016_v0, %v968_v24 }
 0x131   : > { %v1065_v46 = vpop.f32.mrf.mxu3  ;;  %v969_v4 = vpop.f32.mrf.mxu1 }
 0x132   : > { %v1798_v5 = vpack.c.bf16 %v1206_v2, %v1205_v1  ;;  %v1066_v6 = vadd.f32 %v1065_v46, %v1017_v3  ;;  %v970_v7 = vadd.f32 %v969_v4, %v2150_v35 }
 0x133   : > { %v1116_v8 = vpop.f32.mrf.mxu0 }
 0x134   : > { %1814 = vst [vmem:[%s2175_s12 + $0x28] sm:$0xff] %v1798_v5   ;;  %v1115_v10 = vadd.f32 %v1114_v62, %v1066_v6 }
 0x136   : > { %v1191_v23 = vadd.f32 %v2167_v60, %v1115_v10 }
 0x137   : > { %v1018_v9 = vpop.f32.mrf.mxu2 }
 0x138   : > { %v1019_v38 = vadd.f32 %v1018_v9, %v970_v7  ;;  %v1207_v19 = vmax.f32 %v1191_v23, 0.0 }
 0x139   : > { %v1067_v11 = vpop.f32.mrf.mxu3  ;;  %v972_v12 = vpop.f32.mrf.mxu1 }
 0x13a   : > { %v1068_v13 = vadd.f32 %v1067_v11, %v1019_v38  ;;  %v973_v16 = vadd.f32 %v972_v12, %v2156_v43 }
 0x13b   : > { %v1119_v21 = vpop.f32.mrf.mxu0 }
 0x13c   : > { %v1117_v14 = vadd.f32 %v1116_v8, %v1068_v13 }
 0x13e   : > { %v1192_v15 = vadd.f32 %v2167_v60, %v1117_v14 }
 0x13f   : > { %v1021_v17 = vpop.f32.mrf.mxu2 }
 0x140   : > { %v1208_v44 = vmax.f32 %v1192_v15, 0.0  ;;  %v1022_v20 = vadd.f32 %v1021_v17, %v973_v16 }
 0x141   : > { %v1070_v35 = vpop.f32.mrf.mxu3  ;;  %v974_v26 = vpop.f32.mrf.mxu1 }
 0x142   : > { %v1803_v25 = vpack.c.bf16 %v1208_v44, %v1207_v19  ;;  %v1071_v27 = vadd.f32 %v1070_v35, %v1022_v20  ;;  %v975_v28 = vadd.f32 %v974_v26, %v2162_v47 }
 0x143   : > { %v1121_v22 = vpop.f32.mrf.mxu0 }
 0x144   : > { %1815 = vst [vmem:[%s2175_s12 + $0x30] sm:$0xff] %v1803_v25   ;;  %v1120_v30 = vadd.f32 %v1119_v21, %v1071_v27 }
 0x146   : > { %v1193_v43 = vadd.f32 %v2167_v60, %v1120_v30 }
 0x147   : > { %v1023_v29 = vpop.f32.mrf.mxu2 }
 0x148   : > { %v1024_v31 = vadd.f32 %v1023_v29, %v975_v28  ;;  %v1209_v39 = vmax.f32 %v1193_v43, 0.0 }
 0x149   : > { %v1072_v32 = vpop.f32.mrf.mxu3 }
 0x14a   : > { %v1073_v33 = vadd.f32 %v1072_v32, %v1024_v31 }
 0x14c   : > { %v1122_v36 = vadd.f32 %v1121_v22, %v1073_v33 }
 0x14e   : > { %v1194_v37 = vadd.f32 %v2167_v60, %v1122_v36 }
 0x150   : > { %v1210_v40 = vmax.f32 %v1194_v37, 0.0 }
 0x152   : > { %v1808_v41 = vpack.c.bf16 %v1210_v40, %v1209_v39 }
 0x154   : > { %1816 = vst [vmem:[%s2175_s12 + $0x38] sm:$0xff] %v1808_v41  }
 0x155 PF: > { %s13_s14 = sadd.s32 1, %s1889_s14   ;;  %s2224_s12 = smov %s1885_s13 }
 0x156   : > { %p10_p5 = scmp.ge.s32.totalorder %s13_s14, 18   ;;  %s2225_s13 = smov %s2227_s15 }
 0x158   :  { %12 = sbr.rel (!%p10_p5) target bundleno = 2 (0x2), region = 76 }

// kernel: convnet_forward.16
= control target key start
LH: loop header
LB: loop body
LE: loop exit
PB: predicated region body
PF: predicated region fallthrough
CT: control target
= control target key end

     0   :  { %s1911_s12 = smov 0   ;;  %s1913_s13 = smov 0   ;;  %s2220_s0 = inlined_call_operand.vmem [shape: bf16[512,640], index: 0, kind: input, shape index: {}]   ;;  %s2221_s1 = inlined_call_operand.vmem [shape: bf16[640,128], index: 1, kind: input, shape index: {}]   ;;  %s2222_s2 = inlined_call_operand.vmem [shape: f32[1,128], index: 2, kind: input, shape index: {}]   ;;  %s2223_s3 = inlined_call_operand.vmem [shape: bf16[512,128], index: 3, kind: output, shape index: {}]  }
   0x1   :  { %s1915_s14 = smov 0  }
   0x2 LB: > { %s32_s15 = sadd.s32 1, %s1885_s13  ;;  %p1363_p0 = scmp.ge.s32.totalorder %s1889_s14, 1  ;;  %s1889_s14 = sphi %s1915_s14, %s13_s14   ;;  %s1885_s13 = sphi %s1913_s13, %s2225_s13   ;;  %s1881_s12 = sphi %s1911_s12, %s2224_s12  }
   0x3   : > { %p34_p1 = scmp.ge.s32.totalorder %s32_s15, 4  ;;  %p191_p2 = scmp.lt.s32.totalorder %s1889_s14, 5 }
   0x5   : > { %s2227_s15 = smov (%p34_p1, %s32_s15), 0  ;;  %p192_p3 = pnand %p1363_p0, %p191_p2 }
   0x6   : > { %s1364_s22 = sshll.u32 (!%p192_p3), %s1881_s12, 4 }
   0x7   : > { %195 = sbr.rel (%p192_p3) target bundleno = 341 (0x155), region = 32  ;;  %p236_p4 = scmp.lt.s32.totalorder (!%p192_p3), %s1364_s22, 63 }
   0xc   : > { %v1737_v0 = vld [vmem:[%s2221_s1 + $0x38] sm:$0xff]  ;;  %v1736_v1 = vld [vmem:[%s2221_s1 + $0x30] sm:$0xff]  ;;  %v1735_v2 = vld [vmem:[%s2221_s1 + $0x28] sm:$0xff]  ;;  %s2229_s22 = smov (!%p236_p4, %s1364_s22), 63 }
   0xd   : > { %1817 = vmatpush.bf16.msra.mxu1 %v1737_v0  ;;  %1818 = vmatpush.bf16.msra.mxu2 %v1737_v0  ;;  %v1734_v3 = vld [vmem:[%s2221_s1 + $0x20] sm:$0xff]  ;;  %v1733_v4 = vld [vmem:[%s2221_s1 + $0x18] sm:$0xff]  ;;  %v1732_v5 = vld [vmem:[%s2221_s1 + $0x10] sm:$0xff]  ;;  %s1841_s29 = smul.u32 20, %s2229_s22  ;;  %s1367_s9 = sshll.u32 %s2229_s22, 2 }
   0xe   : > { %1819 = vmatpush.bf16.msra.mxu3 %v1737_v0  ;;  %879 = vmatpush.bf16.msra.mxu0 %v1737_v0  ;;  %v1731_v6 = vld [vmem:[%s2221_s1 + $0x8] sm:$0xff]  ;;  %v1730_v7 = vld [vmem:[%s2221_s1] sm:$0xff]  ;;  %v1753_v16 = vld [vmem:[%s2221_s1 + $0xb8] sm:$0xff]  ;;  %s2175_s12 = scalar_lea.vmem %s2223_s3, %s1367_s9 }
   0xf   : > { %s1959_s7 = scalar_lea.vmem %s2220_s0, %s1841_s29  ;;  %v1745_v17 = vld [vmem:[%s2221_s1 + $0x78] sm:$0xff]  ;;  %v1752_v24 = vld [vmem:[%s2221_s1 + $0xb0] sm:$0xff]  ;;  %v1751_v28 = vld [vmem:[%s2221_s1 + $0xa8] sm:$0xff] }
  0x10   : > { %v1410_v8 = vld [vmem:[%s1959_s7 + $0x50] sm:$0xf]  ;;  %v1702_v9 = vld [vmem:[%s1959_s7 + $0x60] sm:$0xf0]  ;;  %v1450_v10 = vld [vmem:[%s1959_s7 + $0xa0] sm:$0xf] }
  0x11   : > { %1820 = vmatpush.bf16.msra.mxu1 %v1736_v1  ;;  %1821 = vmatpush.bf16.msra.mxu2 %v1736_v1  ;;  %v1712_v11 = vld [vmem:[%s1959_s7 + $0xb0] sm:$0xf0]  ;;  %v1490_v12 = vld [vmem:[%s1959_s7 + $0xf0] sm:$0xf]  ;;  %v1722_v13 = vld [vmem:[%s1959_s7 + $0x100] sm:$0xf0]  ;;  %v1411_v18 = vor.u32 %v1702_v9, %v1410_v8 }
  0x12   : > { %1822 = vmatpush.bf16.msra.mxu3 %v1736_v1  ;;  %880 = vmatpush.bf16.msra.mxu0 %v1736_v1  ;;  %v1370_v14 = vld [vmem:[%s1959_s7] sm:$0xf]  ;;  %v1692_v15 = vld [vmem:[%s1959_s7 + $0x10] sm:$0xf0]  ;;  %v1451_v19 = vor.u32 %v1712_v11, %v1450_v10  ;;  %v1491_v20 = vor.u32 %v1722_v13, %v1490_v12  ;;  %v1761_v22 = vld [vmem:[%s2221_s1 + $0xf8] sm:$0xff] }
  0x13   : > { %v1371_v21 = vor.u32 %v1692_v15, %v1370_v14  ;;  %v1769_v23 = vld [vmem:[%s2221_s1 + $0x138] sm:$0xff]  ;;  %v1744_v25 = vld [vmem:[%s2221_s1 + $0x70] sm:$0xff]  ;;  %v1743_v29 = vld [vmem:[%s2221_s1 + $0x68] sm:$0xff] }
  0x14   : > { %v1760_v26 = vld [vmem:[%s2221_s1 + $0xf0] sm:$0xff]  ;;  %v1759_v30 = vld [vmem:[%s2221_s1 + $0xe8] sm:$0xff]  ;;  %v1750_v32 = vld [vmem:[%s2221_s1 + $0xa0] sm:$0xff] }
  0x15   : > { %1823 = vmatpush.bf16.msra.mxu1 %v1735_v2  ;;  %1824 = vmatpush.bf16.msra.mxu2 %v1735_v2  ;;  %v1768_v27 = vld [vmem:[%s2221_s1 + $0x130] sm:$0xff]  ;;  %v1767_v31 = vld [vmem:[%s2221_s1 + $0x128] sm:$0xff]  ;;  %v1742_v33 = vld [vmem:[%s2221_s1 + $0x60] sm:$0xff] }
  0x16   : > { %1825 = vmatpush.bf16.msra.mxu3 %v1735_v2  ;;  %881 = vmatpush.bf16.msra.mxu0 %v1735_v2  ;;  %v1758_v34 = vld [vmem:[%s2221_s1 + $0xe0] sm:$0xff]  ;;  %v1430_v36 = vld [vmem:[%s1959_s7 + $0x78] sm:$0xf]  ;;  %v1707_v37 = vld [vmem:[%s1959_s7 + $0x88] sm:$0xf0] }
  0x17   : > { %v1766_v35 = vld [vmem:[%s2221_s1 + $0x120] sm:$0xff]  ;;  %v1470_v38 = vld [vmem:[%s1959_s7 + $0xc8] sm:$0xf]  ;;  %v1717_v39 = vld [vmem:[%s1959_s7 + $0xd8] sm:$0xf0]  ;;  %v1431_v46 = vor.u32 %v1707_v37, %v1430_v36 }
  0x18   : > { %v1510_v40 = vld [vmem:[%s1959_s7 + $0x118] sm:$0xf]  ;;  %v1727_v41 = vld [vmem:[%s1959_s7 + $0x128] sm:$0xf0]  ;;  %v1390_v42 = vld [vmem:[%s1959_s7 + $0x28] sm:$0xf]  ;;  %v1471_v47 = vor.u32 %v1717_v39, %v1470_v38 }
  0x19   : > { %1826 = vmatpush.bf16.msra.mxu1 %v1734_v3  ;;  %1827 = vmatpush.bf16.msra.mxu2 %v1734_v3  ;;  %v1697_v43 = vld [vmem:[%s1959_s7 + $0x38] sm:$0xf0]  ;;  %v1511_v48 = vor.u32 %v1727_v41, %v1510_v40  ;;  %v1748_v52 = vld [vmem:[%s2221_s1 + $0x90] sm:$0xff]  ;;  %v1747_v56 = vld [vmem:[%s2221_s1 + $0x88] sm:$0xff] }
  0x1a   : > { %1828 = vmatpush.bf16.msra.mxu3 %v1734_v3  ;;  %882 = vmatpush.bf16.msra.mxu0 %v1734_v3  ;;  %v1749_v44 = vld [vmem:[%s2221_s1 + $0x98] sm:$0xff]  ;;  %v1391_v49 = vor.u32 %v1697_v43, %v1390_v42  ;;  %v1740_v53 = vld [vmem:[%s2221_s1 + $0x50] sm:$0xff]  ;;  %v1739_v57 = vld [vmem:[%s2221_s1 + $0x48] sm:$0xff] }
  0x1b   : > { %v1741_v45 = vld [vmem:[%s2221_s1 + $0x58] sm:$0xff]  ;;  %v1756_v54 = vld [vmem:[%s2221_s1 + $0xd0] sm:$0xff]  ;;  %v1755_v58 = vld [vmem:[%s2221_s1 + $0xc8] sm:$0xff] }
  0x1c   : > { %v1757_v50 = vld [vmem:[%s2221_s1 + $0xd8] sm:$0xff]  ;;  %v1764_v55 = vld [vmem:[%s2221_s1 + $0x110] sm:$0xff]  ;;  %v1763_v59 = vld [vmem:[%s2221_s1 + $0x108] sm:$0xff] }
  0x1d   : > { %1829 = vmatpush.bf16.msra.mxu1 %v1733_v4  ;;  %1830 = vmatpush.bf16.msra.mxu2 %v1733_v4  ;;  %v1765_v51 = vld [vmem:[%s2221_s1 + $0x118] sm:$0xff]  ;;  %v1746_v60 = vld [vmem:[%s2221_s1 + $0x80] sm:$0xff]  ;;  %v1378_v2 = vld [vmem:[%s1959_s7 + $0x8] sm:$0xf] }
  0x1e   : > { %1831 = vmatpush.bf16.msra.mxu3 %v1733_v4  ;;  %883 = vmatpush.bf16.msra.mxu0 %v1733_v4  ;;  %v1738_v61 = vld [vmem:[%s2221_s1 + $0x40] sm:$0xff]  ;;  %v1372_v1 = vld [vmem:[%s1959_s7 + $0x14] sm:$0xf0]  ;;  %v1693_v3 = vld [vmem:[%s1959_s7 + $0x18] sm:$0xf0] }
  0x1f   : > { %v1754_v62 = vld [vmem:[%s2221_s1 + $0xc0] sm:$0xff]  ;;  %v1691_v4 = vld [vmem:[%s1959_s7 + $0xc] sm:$0xf]  ;;  %v1379_v9 = vor.u32 %v1693_v3, %v1378_v2  ;;  %v1398_v14 = vld [vmem:[%s1959_s7 + $0x30] sm:$0xf] }
  0x20   : > { %v1762_v63 = vld [vmem:[%s2221_s1 + $0x100] sm:$0xff]  ;;  %v1695_v12 = vld [vmem:[%s1959_s7 + $0x2c] sm:$0xf]  ;;  %v1705_v36 = vld [vmem:[%s1959_s7 + $0x7c] sm:$0xf] }
  0x21   : > { %1832 = vmatpush.bf16.msra.mxu1 %v1732_v5  ;;  %1833 = vmatpush.bf16.msra.mxu2 %v1732_v5  ;;  %v1690_v0 = vld [vmem:[%s1959_s7 + $0x4] sm:$0xf]  ;;  %v1392_v13 = vld [vmem:[%s1959_s7 + $0x3c] sm:$0xf0]  ;;  %v1432_v37 = vld [vmem:[%s1959_s7 + $0x8c] sm:$0xf0] }
  0x22   : > { %1834 = vmatpush.bf16.msra.mxu3 %v1732_v5  ;;  %884 = vmatpush.bf16.msra.mxu0 %v1732_v5  ;;  %v1380_v5 = vld [vmem:[%s1959_s7 + $0x1c] sm:$0xf0]  ;;  %v1375_v8 = vor.u32 %v1690_v0, %v1372_v1  ;;  %v1698_v15 = vld [vmem:[%s1959_s7 + $0x40] sm:$0xf0]  ;;  %v1708_v39 = vld [vmem:[%s1959_s7 + $0x90] sm:$0xf0] }
  0x23   : > { %v1383_v10 = vor.u32 %v1691_v4, %v1380_v5  ;;  %v1438_v38 = vld [vmem:[%s1959_s7 + $0x80] sm:$0xf]  ;;  %v1706_v40 = vld [vmem:[%s1959_s7 + $0x84] sm:$0xf]  ;;  %v1440_v41 = vld [vmem:[%s1959_s7 + $0x94] sm:$0xf0] }
  0x24   : > { %v1446_v42 = vld [vmem:[%s1959_s7 + $0x88] sm:$0xf]  ;;  %v1709_v43 = vld [vmem:[%s1959_s7 + $0x98] sm:$0xf0]  ;;  %v1716_v0 = vld [vmem:[%s1959_s7 + $0xd4] sm:$0xf] }
  0x25   : > { %1835 = vmatpush.bf16.msra.mxu1 %v1731_v6  ;;  %1836 = vmatpush.bf16.msra.mxu2 %v1731_v6  ;;  %v1480_v1 = vld [vmem:[%s1959_s7 + $0xe4] sm:$0xf0]  ;;  %v1486_v2 = vld [vmem:[%s1959_s7 + $0xd8] sm:$0xf]  ;;  %v1719_v3 = vld [vmem:[%s1959_s7 + $0xe8] sm:$0xf0] }
  0x26   : > { %1837 = vmatpush.bf16.msra.mxu3 %v1731_v6  ;;  %885 = vmatpush.bf16.msra.mxu0 %v1731_v6  ;;  %v1386_v6 = vld [vmem:[%s1959_s7 + $0x10] sm:$0xf] }
  0x29   : > { %1838 = vmatpush.bf16.msra.mxu1 %v1730_v7  ;;  %1839 = vmatpush.bf16.msra.mxu2 %v1730_v7 }
  0x2a   : > { %1840 = vmatpush.bf16.msra.mxu3 %v1730_v7  ;;  %886 = vmatpush.bf16.msra.mxu0 %v1730_v7  ;;  %v1694_v7 = vld [vmem:[%s1959_s7 + $0x20] sm:$0xf0] }
  0x2b   : > { %v1387_v11 = vor.u32 %v1694_v7, %v1386_v6  ;;  %v1483_v6 = vor.u32 %v1716_v0, %v1480_v1  ;;  %v1487_v7 = vor.u32 %v1719_v3, %v1486_v2 }
  0x2c   : > { %897 = vmatmul.bf16.vlgmr.msra.gmra.mxu1 %v1411_v18  ;;  %907 = vmatmul.bf16.vlgmr.msra.gmra.mxu2 %v1451_v19  ;;  %v1406_v18 = vld [vmem:[%s1959_s7 + $0x38] sm:$0xf]  ;;  %v1699_v19 = vld [vmem:[%s1959_s7 + $0x48] sm:$0xf0] }
  0x2d   : > { %977 = vmatpush.bf16.msrb.mxu2 %v1753_v16  ;;  %928 = vmatpush.bf16.msrb.mxu1 %v1745_v17  ;;  %v1696_v16 = vld [vmem:[%s1959_s7 + $0x34] sm:$0xf]  ;;  %v1400_v17 = vld [vmem:[%s1959_s7 + $0x44] sm:$0xf0] }
  0x2e   : > { %917 = vmatmul.bf16.vlgmr.msra.gmra.mxu3 %v1491_v20  ;;  %887 = vmatmul.bf16.vlgmr.msra.gmra.mxu0 %v1371_v21  ;;  %v1395_v20 = vor.u32 %v1695_v12, %v1392_v13  ;;  %v1399_v21 = vor.u32 %v1698_v15, %v1398_v14  ;;  %v1721_v12 = vld [vmem:[%s1959_s7 + $0xfc] sm:$0xf]  ;;  %v1500_v13 = vld [vmem:[%s1959_s7 + $0x10c] sm:$0xf0]  ;;  %v1506_v14 = vld [vmem:[%s1959_s7 + $0x100] sm:$0xf] }
  0x2f   : > { %1026 = vmatpush.bf16.msrb.mxu3 %v1761_v22  ;;  %1075 = vmatpush.bf16.msrb.mxu0 %v1769_v23  ;;  %v1403_v22 = vor.u32 %v1696_v16, %v1400_v17  ;;  %v1407_v23 = vor.u32 %v1699_v19, %v1406_v18  ;;  %v1724_v15 = vld [vmem:[%s1959_s7 + $0x110] sm:$0xf0]  ;;  %v1503_v19 = vor.u32 %v1721_v12, %v1500_v13 }
  0x31   : > { %978 = vmatpush.bf16.msrb.mxu2 %v1752_v24  ;;  %929 = vmatpush.bf16.msrb.mxu1 %v1744_v25  ;;  %v1700_v24 = vld [vmem:[%s1959_s7 + $0x54] sm:$0xf]  ;;  %v1412_v25 = vld [vmem:[%s1959_s7 + $0x64] sm:$0xf0] }
  0x33   : > { %1027 = vmatpush.bf16.msrb.mxu3 %v1760_v26  ;;  %1076 = vmatpush.bf16.msrb.mxu0 %v1768_v27  ;;  %v1418_v26 = vld [vmem:[%s1959_s7 + $0x58] sm:$0xf]  ;;  %v1703_v27 = vld [vmem:[%s1959_s7 + $0x68] sm:$0xf0] }
  0x35   : > { %979 = vmatpush.bf16.msrb.mxu2 %v1751_v28  ;;  %930 = vmatpush.bf16.msrb.mxu1 %v1743_v29  ;;  %v1701_v28 = vld [vmem:[%s1959_s7 + $0x5c] sm:$0xf]  ;;  %v1420_v29 = vld [vmem:[%s1959_s7 + $0x6c] sm:$0xf0] }
  0x37   : > { %1028 = vmatpush.bf16.msrb.mxu3 %v1759_v30  ;;  %1077 = vmatpush.bf16.msrb.mxu0 %v1767_v31  ;;  %v1426_v30 = vld [vmem:[%s1959_s7 + $0x60] sm:$0xf]  ;;  %v1704_v31 = vld [vmem:[%s1959_s7 + $0x70] sm:$0xf0] }
  0x39   : > { %980 = vmatpush.bf16.msrb.mxu2 %v1750_v32  ;;  %931 = vmatpush.bf16.msrb.mxu1 %v1742_v33  ;;  %v1415_v32 = vor.u32 %v1700_v24, %v1412_v25  ;;  %v1419_v33 = vor.u32 %v1703_v27, %v1418_v26  ;;  %v1725_v26 = vld [vmem:[%s1959_s7 + $0x11c] sm:$0xf]  ;;  %v1512_v27 = vld [vmem:[%s1959_s7 + $0x12c] sm:$0xf0] }
  0x3b   : > { %1029 = vmatpush.bf16.msrb.mxu3 %v1758_v34  ;;  %1078 = vmatpush.bf16.msrb.mxu0 %v1766_v35  ;;  %v1423_v34 = vor.u32 %v1701_v28, %v1420_v29  ;;  %v1427_v35 = vor.u32 %v1704_v31, %v1426_v30  ;;  %v1518_v28 = vld [vmem:[%s1959_s7 + $0x120] sm:$0xf]  ;;  %v1728_v29 = vld [vmem:[%s1959_s7 + $0x130] sm:$0xf0]  ;;  %v1726_v30 = vld [vmem:[%s1959_s7 + $0x124] sm:$0xf] }
  0x3c   : > { %902 = vmatmul.bf16.gmra.mxu1 %v1431_v46  ;;  %912 = vmatmul.bf16.gmra.mxu2 %v1471_v47  ;;  %v1443_v46 = vor.u32 %v1706_v40, %v1440_v41  ;;  %v1447_v47 = vor.u32 %v1709_v43, %v1446_v42  ;;  %v1520_v31 = vld [vmem:[%s1959_s7 + $0x134] sm:$0xf0] }
  0x3d   : > { %981 = vmatpush.bf16.msrb.mxu2 %v1749_v44  ;;  %932 = vmatpush.bf16.msrb.mxu1 %v1741_v45  ;;  %v1435_v44 = vor.u32 %v1705_v36, %v1432_v37  ;;  %v1439_v45 = vor.u32 %v1708_v39, %v1438_v38  ;;  %v1515_v36 = vor.u32 %v1725_v26, %v1512_v27 }
  0x3e   : > { %922 = vmatmul.bf16.gmra.mxu3 %v1511_v48  ;;  %892 = vmatmul.bf16.gmra.mxu0 %v1391_v49  ;;  %v1710_v48 = vld [vmem:[%s1959_s7 + $0xa4] sm:$0xf]  ;;  %v1452_v49 = vld [vmem:[%s1959_s7 + $0xb4] sm:$0xf0]  ;;  %v1519_v37 = vor.u32 %v1728_v29, %v1518_v28  ;;  %v1523_v39 = vor.u32 %v1726_v30, %v1520_v31 }
  0x3f   : > { %1030 = vmatpush.bf16.msrb.mxu3 %v1757_v50  ;;  %1079 = vmatpush.bf16.msrb.mxu0 %v1765_v51  ;;  %v1458_v50 = vld [vmem:[%s1959_s7 + $0xa8] sm:$0xf]  ;;  %v1713_v51 = vld [vmem:[%s1959_s7 + $0xb8] sm:$0xf0] }
  0x41   : > { %982 = vmatpush.bf16.msrb.mxu2 %v1748_v52  ;;  %933 = vmatpush.bf16.msrb.mxu1 %v1740_v53  ;;  %v1711_v52 = vld [vmem:[%s1959_s7 + $0xac] sm:$0xf]  ;;  %v1460_v53 = vld [vmem:[%s1959_s7 + $0xbc] sm:$0xf0] }
  0x43   : > { %1031 = vmatpush.bf16.msrb.mxu3 %v1756_v54  ;;  %1080 = vmatpush.bf16.msrb.mxu0 %v1764_v55  ;;  %v1466_v54 = vld [vmem:[%s1959_s7 + $0xb0] sm:$0xf]  ;;  %v1714_v55 = vld [vmem:[%s1959_s7 + $0xc0] sm:$0xf0] }
  0x45   : > { %983 = vmatpush.bf16.msrb.mxu2 %v1747_v56  ;;  %934 = vmatpush.bf16.msrb.mxu1 %v1739_v57  ;;  %v1455_v56 = vor.u32 %v1710_v48, %v1452_v49  ;;  %v1459_v57 = vor.u32 %v1713_v51, %v1458_v50 }
  0x47   : > { %1032 = vmatpush.bf16.msrb.mxu3 %v1755_v58  ;;  %1081 = vmatpush.bf16.msrb.mxu0 %v1763_v59  ;;  %v1463_v58 = vor.u32 %v1711_v52, %v1460_v53  ;;  %v1467_v59 = vor.u32 %v1714_v55, %v1466_v54 }
  0x49   : > { %984 = vmatpush.bf16.msrb.mxu2 %v1746_v60  ;;  %935 = vmatpush.bf16.msrb.mxu1 %v1738_v61  ;;  %v1715_v60 = vld [vmem:[%s1959_s7 + $0xcc] sm:$0xf]  ;;  %v1472_v61 = vld [vmem:[%s1959_s7 + $0xdc] sm:$0xf0] }
  0x4a   : > { %v1475_v4 = vor.u32 %v1715_v60, %v1472_v61  ;;  %v2167_v60 = vld [vmem:[%s2222_s2] ss:$0 sm:$0xff] }
  0x4b   : > { %1033 = vmatpush.bf16.msrb.mxu3 %v1754_v62  ;;  %1082 = vmatpush.bf16.msrb.mxu0 %v1762_v63  ;;  %v1478_v62 = vld [vmem:[%s1959_s7 + $0xd0] sm:$0xf]  ;;  %v1718_v63 = vld [vmem:[%s1959_s7 + $0xe0] sm:$0xf0] }
  0x4c   : > { %936 = vmatmul.bf16.vlgmr.msrb.gmra.mxu1 %v1375_v8  ;;  %985 = vmatmul.bf16.vlgmr.msrb.gmra.mxu2 %v1379_v9  ;;  %v1479_v5 = vor.u32 %v1718_v63, %v1478_v62  ;;  %v1720_v8 = vld [vmem:[%s1959_s7 + $0xf4] sm:$0xf]  ;;  %v1492_v9 = vld [vmem:[%s1959_s7 + $0x104] sm:$0xf0] }
  0x4d   : > { %v1495_v16 = vor.u32 %v1720_v8, %v1492_v9 }
  0x4e   : > { %1034 = vmatmul.bf16.vlgmr.msrb.gmra.mxu3 %v1383_v10  ;;  %1083 = vmatmul.bf16.vlgmr.msrb.gmra.mxu0 %v1387_v11  ;;  %v1498_v10 = vld [vmem:[%s1959_s7 + $0xf8] sm:$0xf]  ;;  %v1723_v11 = vld [vmem:[%s1959_s7 + $0x108] sm:$0xf0] }
  0x4f   : > { %v1499_v17 = vor.u32 %v1723_v11, %v1498_v10 }
  0x5c   : > { %941 = vmatmul.bf16.gmra.mxu1 %v1395_v20  ;;  %990 = vmatmul.bf16.gmra.mxu2 %v1399_v21  ;;  %v1507_v20 = vor.u32 %v1724_v15, %v1506_v14 }
  0x5e   : > { %1039 = vmatmul.bf16.gmra.mxu3 %v1403_v22  ;;  %1088 = vmatmul.bf16.gmra.mxu0 %v1407_v23 }
  0x6c   : > { %946 = vmatmul.bf16.gmra.mxu1 %v1415_v32  ;;  %995 = vmatmul.bf16.gmra.mxu2 %v1419_v33  ;;  %v1526_v32 = vld [vmem:[%s1959_s7 + $0x128] sm:$0xf]  ;;  %v1729_v33 = vld [vmem:[%s1959_s7 + $0x138] sm:$0xf0] }
  0x6d   : > { %v1527_v40 = vor.u32 %v1729_v33, %v1526_v32 }
  0x6e   : > { %1044 = vmatmul.bf16.gmra.mxu3 %v1423_v34  ;;  %1093 = vmatmul.bf16.gmra.mxu0 %v1427_v35 }
  0x7c   : > { %951 = vmatmul.bf16.gmra.mxu1 %v1435_v44  ;;  %1000 = vmatmul.bf16.gmra.mxu2 %v1439_v45 }
  0x7e   : > { %1049 = vmatmul.bf16.gmra.mxu3 %v1443_v46  ;;  %1098 = vmatmul.bf16.gmra.mxu0 %v1447_v47 }
  0x8c   : > { %956 = vmatmul.bf16.gmra.mxu1 %v1455_v56  ;;  %1005 = vmatmul.bf16.gmra.mxu2 %v1459_v57 }
  0x8e   : > { %1054 = vmatmul.bf16.gmra.mxu3 %v1463_v58  ;;  %1103 = vmatmul.bf16.gmra.mxu0 %v1467_v59 }
  0x9c   : > { %961 = vmatmul.bf16.gmra.mxu1 %v1475_v4  ;;  %1010 = vmatmul.bf16.gmra.mxu2 %v1479_v5 }
  0x9e   : > { %1059 = vmatmul.bf16.gmra.mxu3 %v1483_v6  ;;  %1108 = vmatmul.bf16.gmra.mxu0 %v1487_v7 }
  0xa9   : > { %v2132_v18 = vpop.f32.mrf.mxu1 }
  0xab   : > { %v888_v21 = vpop.f32.mrf.mxu0 }
  0xac   : > { %966 = vmatmul.bf16.gmra.mxu1 %v1495_v16  ;;  %1015 = vmatmul.bf16.gmra.mxu2 %v1499_v17 }
  0xae   : > { %1064 = vmatmul.bf16.gmra.mxu3 %v1503_v19  ;;  %1113 = vmatmul.bf16.gmra.mxu0 %v1507_v20 }
  0xaf   : > { %v2134_v22 = vpop.f32.mrf.mxu2 }
  0xb1   : > { %v2136_v23 = vpop.f32.mrf.mxu3  ;;  %v2138_v24 = vpop.f32.mrf.mxu1 }
  0xb3   : > { %v890_v25 = vpop.f32.mrf.mxu0 }
  0xb7   : > { %v2148_v34 = vpop.f32.mrf.mxu2 }
  0xb9   : > { %v2150_v35 = vpop.f32.mrf.mxu3  ;;  %v2152_v38 = vpop.f32.mrf.mxu1 }
  0xbb   : > { %v893_v41 = vpop.f32.mrf.mxu0 }
  0xbc   : > { %971 = vmatmul.bf16.gmra.mxu1 %v1515_v36  ;;  %1020 = vmatmul.bf16.gmra.mxu2 %v1519_v37 }
  0xbe   : > { %1069 = vmatmul.bf16.gmra.mxu3 %v1523_v39  ;;  %1118 = vmatmul.bf16.gmra.mxu0 %v1527_v40 }
  0xbf   : > { %v2154_v42 = vpop.f32.mrf.mxu2 }
  0xc1   : > { %v2156_v43 = vpop.f32.mrf.mxu3  ;;  %v2158_v44 = vpop.f32.mrf.mxu1 }
  0xc3   : > { %v895_v45 = vpop.f32.mrf.mxu0 }
  0xc7   : > { %v2160_v46 = vpop.f32.mrf.mxu2 }
  0xc9   : > { %v2162_v47 = vpop.f32.mrf.mxu3  ;;  %v937_v48 = vpop.f32.mrf.mxu1 }
  0xca   : > { %v938_v50 = vadd.f32 %v937_v48, %v888_v21 }
  0xcb   : > { %v1084_v49 = vpop.f32.mrf.mxu0 }
  0xcf   : > { %v986_v51 = vpop.f32.mrf.mxu2 }
  0xd0   : > { %v987_v52 = vadd.f32 %v986_v51, %v938_v50 }
  0xd1   : > { %v1035_v53 = vpop.f32.mrf.mxu3  ;;  %v939_v54 = vpop.f32.mrf.mxu1 }
  0xd2   : > { %v1036_v56 = vadd.f32 %v1035_v53, %v987_v52  ;;  %v940_v57 = vadd.f32 %v939_v54, %v890_v25 }
  0xd3   : > { %v1086_v55 = vpop.f32.mrf.mxu0 }
  0xd4   : > { %v1085_v59 = vadd.f32 %v1084_v49, %v1036_v56 }
  0xd6   : > { %v1179_v2 = vadd.f32 %v2167_v60, %v1085_v59 }
  0xd7   : > { %v988_v58 = vpop.f32.mrf.mxu2 }
  0xd8   : > { %v989_v61 = vadd.f32 %v988_v58, %v940_v57  ;;  %v1195_v7 = vmax.f32 %v1179_v2, 0.0 }
  0xd9   : > { %v1037_v62 = vpop.f32.mrf.mxu3  ;;  %v942_v63 = vpop.f32.mrf.mxu1 }
  0xda   : > { %v1038_v0 = vadd.f32 %v1037_v62, %v989_v61  ;;  %v943_v5 = vadd.f32 %v942_v63, %v893_v41 }
  0xdb   : > { %v1089_v1 = vpop.f32.mrf.mxu0 }
  0xdc   : > { %v1087_v3 = vadd.f32 %v1086_v55, %v1038_v0 }
  0xde   : > { %v1180_v4 = vadd.f32 %v2167_v60, %v1087_v3 }
  0xdf   : > { %v991_v6 = vpop.f32.mrf.mxu2 }
  0xe0   : > { %v1196_v8 = vmax.f32 %v1180_v4, 0.0  ;;  %v992_v9 = vadd.f32 %v991_v6, %v943_v5 }
  0xe1   : > { %v1040_v10 = vpop.f32.mrf.mxu3  ;;  %v944_v11 = vpop.f32.mrf.mxu1 }
  0xe2   : > { %v1773_v12 = vpack.c.bf16 %v1196_v8, %v1195_v7  ;;  %v1041_v14 = vadd.f32 %v1040_v10, %v992_v9  ;;  %v945_v15 = vadd.f32 %v944_v11, %v895_v45 }
  0xe3   : > { %v1091_v13 = vpop.f32.mrf.mxu0 }
  0xe4   : > { %1774 = vst [vmem:[%s2175_s12] sm:$0xff] %v1773_v12   ;;  %v1090_v17 = vadd.f32 %v1089_v1, %v1041_v14 }
  0xe6   : > { %v1181_v27 = vadd.f32 %v2167_v60, %v1090_v17 }
  0xe7   : > { %v993_v16 = vpop.f32.mrf.mxu2 }
  0xe8   : > { %v994_v19 = vadd.f32 %v993_v16, %v945_v15  ;;  %v1197_v32 = vmax.f32 %v1181_v27, 0.0 }
  0xe9   : > { %v1042_v20 = vpop.f32.mrf.mxu3  ;;  %v947_v21 = vpop.f32.mrf.mxu1 }
  0xea   : > { %v1043_v25 = vadd.f32 %v1042_v20, %v994_v19  ;;  %v948_v30 = vadd.f32 %v947_v21, %v2132_v18 }
  0xeb   : > { %v1094_v26 = vpop.f32.mrf.mxu0 }
  0xec   : > { %v1092_v28 = vadd.f32 %v1091_v13, %v1043_v25 }
  0xee   : > { %v1182_v29 = vadd.f32 %v2167_v60, %v1092_v28 }
  0xef   : > { %v996_v31 = vpop.f32.mrf.mxu2 }
  0xf0   : > { %v1198_v33 = vmax.f32 %v1182_v29, 0.0  ;;  %v997_v36 = vadd.f32 %v996_v31, %v948_v30 }
  0xf1   : > { %v1045_v37 = vpop.f32.mrf.mxu3  ;;  %v949_v39 = vpop.f32.mrf.mxu1 }
  0xf2   : > { %v1778_v40 = vpack.c.bf16 %v1198_v33, %v1197_v32  ;;  %v1046_v45 = vadd.f32 %v1045_v37, %v997_v36  ;;  %v950_v48 = vadd.f32 %v949_v39, %v2138_v24 }
  0xf3   : > { %v1096_v41 = vpop.f32.mrf.mxu0 }
  0xf4   : > { %1810 = vst [vmem:[%s2175_s12 + $0x8] sm:$0xff] %v1778_v40   ;;  %v1095_v50 = vadd.f32 %v1094_v26, %v1046_v45 }
  0xf6   : > { %v1183_v55 = vadd.f32 %v2167_v60, %v1095_v50 }
  0xf7   : > { %v998_v49 = vpop.f32.mrf.mxu2 }
  0xf8   : > { %v999_v51 = vadd.f32 %v998_v49, %v950_v48  ;;  %v1199_v61 = vmax.f32 %v1183_v55, 0.0 }
  0xf9   : > { %v1047_v52 = vpop.f32.mrf.mxu3  ;;  %v952_v53 = vpop.f32.mrf.mxu1 }
  0xfa   : > { %v1048_v54 = vadd.f32 %v1047_v52, %v999_v51  ;;  %v953_v58 = vadd.f32 %v952_v53, %v2152_v38 }
  0xfb   : > { %v1099_v18 = vpop.f32.mrf.mxu0 }
  0xfc   : > { %v1097_v56 = vadd.f32 %v1096_v41, %v1048_v54 }
  0xfe   : > { %v1184_v57 = vadd.f32 %v2167_v60, %v1097_v56 }
  0xff   : > { %v1001_v59 = vpop.f32.mrf.mxu2 }
 0x100   : > { %v1200_v62 = vmax.f32 %v1184_v57, 0.0  ;;  %v1002_v63 = vadd.f32 %v1001_v59, %v953_v58 }
 0x101   : > { %v1050_v24 = vpop.f32.mrf.mxu3  ;;  %v954_v0 = vpop.f32.mrf.mxu1 }
 0x102   : > { %v1783_v1 = vpack.c.bf16 %v1200_v62, %v1199_v61  ;;  %v1051_v3 = vadd.f32 %v1050_v24, %v1002_v63  ;;  %v955_v4 = vadd.f32 %v954_v0, %v2158_v44 }
 0x103   : > { %v1101_v2 = vpop.f32.mrf.mxu0 }
 0x104   : > { %1811 = vst [vmem:[%s2175_s12 + $0x10] sm:$0xff] %v1783_v1   ;;  %v1100_v6 = vadd.f32 %v1099_v18, %v1051_v3 }
 0x106   : > { %v1185_v11 = vadd.f32 %v2167_v60, %v1100_v6 }
 0x107   : > { %v1003_v5 = vpop.f32.mrf.mxu2 }
 0x108   : > { %v1004_v7 = vadd.f32 %v1003_v5, %v955_v4  ;;  %v1201_v16 = vmax.f32 %v1185_v11, 0.0 }
 0x109   : > { %v1052_v8 = vpop.f32.mrf.mxu3  ;;  %v957_v9 = vpop.f32.mrf.mxu1 }
 0x10a   : > { %v1053_v10 = vadd.f32 %v1052_v8, %v1004_v7  ;;  %v958_v14 = vadd.f32 %v957_v9, %v2134_v22 }
 0x10b   : > { %v1104_v38 = vpop.f32.mrf.mxu0 }
 0x10c   : > { %v1102_v12 = vadd.f32 %v1101_v2, %v1053_v10 }
 0x10e   : > { %v1186_v13 = vadd.f32 %v2167_v60, %v1102_v12 }
 0x10f   : > { %v1006_v15 = vpop.f32.mrf.mxu2 }
 0x110   : > { %v1202_v17 = vmax.f32 %v1186_v13, 0.0  ;;  %v1007_v19 = vadd.f32 %v1006_v15, %v958_v14 }
 0x111   : > { %v1055_v44 = vpop.f32.mrf.mxu3  ;;  %v959_v20 = vpop.f32.mrf.mxu1 }
 0x112   : > { %v1788_v21 = vpack.c.bf16 %v1202_v17, %v1201_v16  ;;  %v1056_v26 = vadd.f32 %v1055_v44, %v1007_v19  ;;  %v960_v27 = vadd.f32 %v959_v20, %v2148_v34 }
 0x113   : > { %v1106_v25 = vpop.f32.mrf.mxu0 }
 0x114   : > { %1812 = vst [vmem:[%s2175_s12 + $0x18] sm:$0xff] %v1788_v21   ;;  %v1105_v29 = vadd.f32 %v1104_v38, %v1056_v26 }
 0x116   : > { %v1187_v36 = vadd.f32 %v2167_v60, %v1105_v29 }
 0x117   : > { %v1008_v28 = vpop.f32.mrf.mxu2 }
 0x118   : > { %v1009_v30 = vadd.f32 %v1008_v28, %v960_v27  ;;  %v1203_v45 = vmax.f32 %v1187_v36, 0.0 }
 0x119   : > { %v1057_v31 = vpop.f32.mrf.mxu3  ;;  %v962_v32 = vpop.f32.mrf.mxu1 }
 0x11a   : > { %v1058_v33 = vadd.f32 %v1057_v31, %v1009_v30  ;;  %v963_v40 = vadd.f32 %v962_v32, %v2154_v42 }
 0x11b   : > { %v1109_v22 = vpop.f32.mrf.mxu0 }
 0x11c   : > { %v1107_v37 = vadd.f32 %v1106_v25, %v1058_v33 }
 0x11e   : > { %v1188_v39 = vadd.f32 %v2167_v60, %v1107_v37 }
 0x11f   : > { %v1011_v41 = vpop.f32.mrf.mxu2 }
 0x120   : > { %v1204_v48 = vmax.f32 %v1188_v39, 0.0  ;;  %v1012_v49 = vadd.f32 %v1011_v41, %v963_v40 }
 0x121   : > { %v1060_v34 = vpop.f32.mrf.mxu3  ;;  %v964_v50 = vpop.f32.mrf.mxu1 }
 0x122   : > { %v1793_v51 = vpack.c.bf16 %v1204_v48, %v1203_v45  ;;  %v1061_v53 = vadd.f32 %v1060_v34, %v1012_v49  ;;  %v965_v54 = vadd.f32 %v964_v50, %v2160_v46 }
 0x123   : > { %v1111_v52 = vpop.f32.mrf.mxu0 }
 0x124   : > { %1813 = vst [vmem:[%s2175_s12 + $0x20] sm:$0xff] %v1793_v51   ;;  %v1110_v55 = vadd.f32 %v1109_v22, %v1061_v53 }
 0x126   : > { %v1189_v42 = vadd.f32 %v2167_v60, %v1110_v55 }
 0x127   : > { %v1013_v18 = vpop.f32.mrf.mxu2 }
 0x128   : > { %v1014_v56 = vadd.f32 %v1013_v18, %v965_v54  ;;  %v1205_v1 = vmax.f32 %v1189_v42, 0.0 }
 0x129   : > { %v1062_v57 = vpop.f32.mrf.mxu3  ;;  %v967_v58 = vpop.f32.mrf.mxu1 }
 0x12a   : > { %v1063_v59 = vadd.f32 %v1062_v57, %v1014_v56  ;;  %v968_v24 = vadd.f32 %v967_v58, %v2136_v23 }
 0x12b   : > { %v1114_v62 = vpop.f32.mrf.mxu0 }
 0x12c   : > { %v1112_v61 = vadd.f32 %v1111_v52, %v1063_v59 }
 0x12e   : > { %v1190_v63 = vadd.f32 %v2167_v60, %v1112_v61 }
 0x12f   : > { %v1016_v0 = vpop.f32.mrf.mxu2 }
 0x130   : > { %v1206_v2 = vmax.f32 %v1190_v63, 0.0  ;;  %v1017_v3 = vadd.f32 %v1016_v0, %v968_v24 }
 0x131   : > { %v1065_v46 = vpop.f32.mrf.mxu3  ;;  %v969_v4 = vpop.f32.mrf.mxu1 }
 0x132   : > { %v1798_v5 = vpack.c.bf16 %v1206_v2, %v1205_v1  ;;  %v1066_v6 = vadd.f32 %v1065_v46, %v1017_v3  ;;  %v970_v7 = vadd.f32 %v969_v4, %v2150_v35 }
 0x133   : > { %v1116_v8 = vpop.f32.mrf.mxu0 }
 0x134   : > { %1814 = vst [vmem:[%s2175_s12 + $0x28] sm:$0xff] %v1798_v5   ;;  %v1115_v10 = vadd.f32 %v1114_v62, %v1066_v6 }
 0x136   : > { %v1191_v23 = vadd.f32 %v2167_v60, %v1115_v10 }
 0x137   : > { %v1018_v9 = vpop.f32.mrf.mxu2 }
 0x138   : > { %v1019_v38 = vadd.f32 %v1018_v9, %v970_v7  ;;  %v1207_v19 = vmax.f32 %v1191_v23, 0.0 }
 0x139   : > { %v1067_v11 = vpop.f32.mrf.mxu3  ;;  %v972_v12 = vpop.f32.mrf.mxu1 }
 0x13a   : > { %v1068_v13 = vadd.f32 %v1067_v11, %v1019_v38  ;;  %v973_v16 = vadd.f32 %v972_v12, %v2156_v43 }
 0x13b   : > { %v1119_v21 = vpop.f32.mrf.mxu0 }
 0x13c   : > { %v1117_v14 = vadd.f32 %v1116_v8, %v1068_v13 }
 0x13e   : > { %v1192_v15 = vadd.f32 %v2167_v60, %v1117_v14 }
 0x13f   : > { %v1021_v17 = vpop.f32.mrf.mxu2 }
 0x140   : > { %v1208_v44 = vmax.f32 %v1192_v15, 0.0  ;;  %v1022_v20 = vadd.f32 %v1021_v17, %v973_v16 }
 0x141   : > { %v1070_v35 = vpop.f32.mrf.mxu3  ;;  %v974_v26 = vpop.f32.mrf.mxu1 }
 0x142   : > { %v1803_v25 = vpack.c.bf16 %v1208_v44, %v1207_v19  ;;  %v1071_v27 = vadd.f32 %v1070_v35, %v1022_v20  ;;  %v975_v28 = vadd.f32 %v974_v26, %v2162_v47 }
 0x143   : > { %v1121_v22 = vpop.f32.mrf.mxu0 }
 0x144   : > { %1815 = vst [vmem:[%s2175_s12 + $0x30] sm:$0xff] %v1803_v25   ;;  %v1120_v30 = vadd.f32 %v1119_v21, %v1071_v27 }
 0x146   : > { %v1193_v43 = vadd.f32 %v2167_v60, %v1120_v30 }
 0x147   : > { %v1023_v29 = vpop.f32.mrf.mxu2 }
 0x148   : > { %v1024_v31 = vadd.f32 %v1023_v29, %v975_v28  ;;  %v1209_v39 = vmax.f32 %v1193_v43, 0.0 }
 0x149   : > { %v1072_v32 = vpop.f32.mrf.mxu3 }
 0x14a   : > { %v1073_v33 = vadd.f32 %v1072_v32, %v1024_v31 }
 0x14c   : > { %v1122_v36 = vadd.f32 %v1121_v22, %v1073_v33 }
 0x14e   : > { %v1194_v37 = vadd.f32 %v2167_v60, %v1122_v36 }
 0x150   : > { %v1210_v40 = vmax.f32 %v1194_v37, 0.0 }
 0x152   : > { %v1808_v41 = vpack.c.bf16 %v1210_v40, %v1209_v39 }
 0x154   : > { %1816 = vst [vmem:[%s2175_s12 + $0x38] sm:$0xff] %v1808_v41  }
 0x155 PF: > { %s13_s14 = sadd.s32 1, %s1889_s14   ;;  %s2224_s12 = smov %s1885_s13 }
 0x156   : > { %p10_p5 = scmp.ge.s32.totalorder %s13_s14, 6   ;;  %s2225_s13 = smov %s2227_s15 }
 0x158   :  { %12 = sbr.rel (!%p10_p5) target bundleno = 2 (0x2), region = 76 }

// kernel: convnet_forward.17
= control target key start
LH: loop header
LB: loop body
LE: loop exit
PB: predicated region body
PF: predicated region fallthrough
CT: control target
= control target key end

     0   :  { %s1618_s12 = smov 0   ;;  %s1620_s13 = smov 0   ;;  %s1921_s0 = inlined_call_operand.vmem [shape: bf16[512,1152], index: 0, kind: input, shape index: {}]   ;;  %s1922_s1 = inlined_call_operand.vmem [shape: bf16[1152,128], index: 1, kind: input, shape index: {}]   ;;  %s1923_s2 = inlined_call_operand.vmem [shape: f32[1,128], index: 2, kind: input, shape index: {}]   ;;  %s1924_s3 = inlined_call_operand.vmem [shape: bf16[512,128], index: 3, kind: output, shape index: {}]  }
   0x1   :  { %s1622_s14 = smov 0   ;;  %s1624_s15 = smov 0  }
   0x2   :  { %s1626_s16 = smov 0   ;;  %s1628_s17 = smov 0  }
   0x3   :  { %s1630_s18 = smov 0  }
   0x4 LB: > { %s25_s19 = sadd.s32 1, %s1587_s16  ;;  %s32_s20 = sadd.s32 1, %s1591_s17  ;;  %s1595_s18 = sphi %s1630_s18, %s13_s18   ;;  %s1591_s17 = sphi %s1628_s17, %s1930_s17   ;;  %s1587_s16 = sphi %s1626_s16, %s1929_s16   ;;  %s1583_s15 = sphi %s1624_s15, %s1928_s15   ;;  %s1579_s14 = sphi %s1622_s14, %s1927_s14   ;;  %s1575_s13 = sphi %s1620_s13, %s1926_s13   ;;  %s1571_s12 = sphi %s1618_s12, %s1925_s12  }
   0x5   : > { %p26_p0 = scmp.ge.s32.totalorder %s25_s19, 3  ;;  %p48_p1 = scmp.ne.s32.totalorder %s1575_s13, %s1571_s12 }
   0x6   : > { %p49_p2 = scmp.eq.s32.totalorder %s1595_s18, 0  ;;  %s41_s24 = sadd.s32 1, %s1575_s13 }
   0x7   : > { %s1932_s19 = smov (%p26_p0, %s25_s19), 0  ;;  %s1934_s20 = smov (!%p26_p0, %s32_s20), %s1591_s17 }
   0x8   : > { %p50_p3 = por %p49_p2, %p48_p1  ;;  %p34_p4 = scmp.ge.s32.totalorder %s1934_s20, 4 }
   0x9   : > { %s37_s21 = ssub.s32 %s1587_s16, %s1932_s19  ;;  %p1125_p6 = scmp.ge.s32.totalorder %s1595_s18, 12 }
   0xa   : > { %s1936_s20 = smov (%p34_p4, %s1934_s20), 0 }
   0xb   : > { %s36_s22 = ssub.s32 %s1591_s17, %s1936_s20  ;;  %162 = sbr.rel (%p1125_p6) target bundleno = 57 (0x39), region = 20 }
   0xc   : > { %s38_s23 = sor.u32 %s37_s21, %s36_s22 }
   0xd   : > { %p39_p5 = scmp.eq.s32.totalorder %s38_s23, 0 }
   0xf   : > { %s1669_s25 = scalar_select %p39_p5, %s1575_s13, %s41_s24  }
  0x10   : > { %165 = sbr.rel (!%p50_p3) target bundleno = 57 (0x39), region = 24  ;;  %s167_s26 = sand.u32 (%p50_p3), 1, %s1575_s13  }
  0x11   : > { %s171_s27 = smul.u32 (%p50_p3), 3, %s1587_s16 }
  0x12   : > { %s1480_s28 = smul.u32 (%p50_p3), 192, %s167_s26 }
  0x13   : > { %s1481_s29 = smul.u32 (%p50_p3), 144, %s1591_s17 }
  0x14   : > { %s1683_s8 = scalar_lea.vmem (%p50_p3), [#allocation3], %s1480_s28 }
  0x15   : > { %s173_s30 = sadd.s32 %s1481_s29, %s171_s27 }
  0x16   : > { %s1128_s4 = sshll.u32 %s173_s30, 2 }
  0x17   : > { %s1678_s7 = scalar_lea.vmem %s1921_s0, %s1128_s4 }
  0x18   : > { %v190_v0 = vld [vmem:[%s1678_s7] sm:$0xff]  ;;  %v194_v2 = vld [vmem:[%s1678_s7 + $0x48] sm:$0xff]  ;;  %v198_v4 = vld [vmem:[%s1678_s7 + $0x90] sm:$0xff] }
  0x19   : > { %v192_v1 = vld [vmem:[%s1678_s7 + $0x24] sm:$0xff]  ;;  %191 = vst [vmem:[%s1683_s8] sm:$0xff] %v190_v0  ;;  %v196_v3 = vld [vmem:[%s1678_s7 + $0x6c] sm:$0xff]  ;;  %v200_v5 = vld [vmem:[%s1678_s7 + $0xb4] sm:$0xff] }
  0x1a   : > { %193 = vst [vmem:[%s1683_s8 + $0xc] sm:$0xff] %v192_v1  ;;  %v202_v6 = vld [vmem:[%s1678_s7 + $0xd8] sm:$0xff]  ;;  %v206_v8 = vld [vmem:[%s1678_s7 + $0x120] sm:$0xff]  ;;  %v210_v10 = vld [vmem:[%s1678_s7 + $0x168] sm:$0xff] }
  0x1b   : > { %195 = vst [vmem:[%s1683_s8 + $0x18] sm:$0xff] %v194_v2  ;;  %v204_v7 = vld [vmem:[%s1678_s7 + $0xfc] sm:$0xff]  ;;  %v208_v9 = vld [vmem:[%s1678_s7 + $0x144] sm:$0xff]  ;;  %v212_v11 = vld [vmem:[%s1678_s7 + $0x18c] sm:$0xff] }
  0x1c   : > { %197 = vst [vmem:[%s1683_s8 + $0x24] sm:$0xff] %v196_v3  ;;  %v214_v12 = vld [vmem:[%s1678_s7 + $0x1b0] sm:$0xff]  ;;  %v218_v14 = vld [vmem:[%s1678_s7 + $0x1f8] sm:$0xff]  ;;  %v1129_v16 = vld [vmem:[%s1678_s7 + $0x8] sm:$0xf] }
  0x1d   : > { %199 = vst [vmem:[%s1683_s8 + $0x30] sm:$0xff] %v198_v4  ;;  %v216_v13 = vld [vmem:[%s1678_s7 + $0x1d4] sm:$0xff]  ;;  %v220_v15 = vld [vmem:[%s1678_s7 + $0x21c] sm:$0xff]  ;;  %v1131_v17 = vld [vmem:[%s1678_s7 + $0x2c] sm:$0xf] }
  0x1e   : > { %201 = vst [vmem:[%s1683_s8 + $0x3c] sm:$0xff] %v200_v5  ;;  %v1133_v18 = vld [vmem:[%s1678_s7 + $0x50] sm:$0xf]  ;;  %v1135_v19 = vld [vmem:[%s1678_s7 + $0x74] sm:$0xf] }
  0x1f   : > { %203 = vst [vmem:[%s1683_s8 + $0x48] sm:$0xff] %v202_v6  ;;  %v1137_v20 = vld [vmem:[%s1678_s7 + $0x98] sm:$0xf]  ;;  %v1139_v21 = vld [vmem:[%s1678_s7 + $0xbc] sm:$0xf] }
  0x20   : > { %205 = vst [vmem:[%s1683_s8 + $0x54] sm:$0xff] %v204_v7  ;;  %v1141_v22 = vld [vmem:[%s1678_s7 + $0xe0] sm:$0xf]  ;;  %v1143_v23 = vld [vmem:[%s1678_s7 + $0x104] sm:$0xf] }
  0x21   : > { %207 = vst [vmem:[%s1683_s8 + $0x60] sm:$0xff] %v206_v8  ;;  %v1145_v24 = vld [vmem:[%s1678_s7 + $0x128] sm:$0xf]  ;;  %v1147_v25 = vld [vmem:[%s1678_s7 + $0x14c] sm:$0xf] }
  0x22   : > { %209 = vst [vmem:[%s1683_s8 + $0x6c] sm:$0xff] %v208_v9  ;;  %v1149_v26 = vld [vmem:[%s1678_s7 + $0x170] sm:$0xf]  ;;  %v1151_v27 = vld [vmem:[%s1678_s7 + $0x194] sm:$0xf] }
  0x23   : > { %211 = vst [vmem:[%s1683_s8 + $0x78] sm:$0xff] %v210_v10  ;;  %v1153_v28 = vld [vmem:[%s1678_s7 + $0x1b8] sm:$0xf]  ;;  %v1155_v29 = vld [vmem:[%s1678_s7 + $0x1dc] sm:$0xf] }
  0x24   : > { %213 = vst [vmem:[%s1683_s8 + $0x84] sm:$0xff] %v212_v11  ;;  %v1157_v30 = vld [vmem:[%s1678_s7 + $0x200] sm:$0xf]  ;;  %v1159_v31 = vld [vmem:[%s1678_s7 + $0x224] sm:$0xf] }
  0x25   : > { %215 = vst [vmem:[%s1683_s8 + $0x90] sm:$0xff] %v214_v12 }
  0x26   : > { %217 = vst [vmem:[%s1683_s8 + $0x9c] sm:$0xff] %v216_v13 }
  0x27   : > { %219 = vst [vmem:[%s1683_s8 + $0xa8] sm:$0xff] %v218_v14 }
  0x28   : > { %221 = vst [vmem:[%s1683_s8 + $0xb4] sm:$0xff] %v220_v15 }
  0x29   : > { %1130 = vst [vmem:[%s1683_s8 + $0x8] sm:$0xf] %v1129_v16 }
  0x2a   : > { %1132 = vst [vmem:[%s1683_s8 + $0x14] sm:$0xf] %v1131_v17 }
  0x2b   : > { %1134 = vst [vmem:[%s1683_s8 + $0x20] sm:$0xf] %v1133_v18 }
  0x2c   : > { %1136 = vst [vmem:[%s1683_s8 + $0x2c] sm:$0xf] %v1135_v19 }
  0x2d   : > { %1138 = vst [vmem:[%s1683_s8 + $0x38] sm:$0xf] %v1137_v20 }
  0x2e   : > { %1140 = vst [vmem:[%s1683_s8 + $0x44] sm:$0xf] %v1139_v21 }
  0x2f   : > { %1142 = vst [vmem:[%s1683_s8 + $0x50] sm:$0xf] %v1141_v22 }
  0x30   : > { %1144 = vst [vmem:[%s1683_s8 + $0x5c] sm:$0xf] %v1143_v23 }
  0x31   : > { %1146 = vst [vmem:[%s1683_s8 + $0x68] sm:$0xf] %v1145_v24 }
  0x32   : > { %1148 = vst [vmem:[%s1683_s8 + $0x74] sm:$0xf] %v1147_v25 }
  0x33   : > { %1150 = vst [vmem:[%s1683_s8 + $0x80] sm:$0xf] %v1149_v26 }
  0x34   : > { %1152 = vst [vmem:[%s1683_s8 + $0x8c] sm:$0xf] %v1151_v27 }
  0x35   : > { %1154 = vst [vmem:[%s1683_s8 + $0x98] sm:$0xf] %v1153_v28 }
  0x36   : > { %1156 = vst [vmem:[%s1683_s8 + $0xa4] sm:$0xf] %v1155_v29 }
  0x37   : > { %1158 = vst [vmem:[%s1683_s8 + $0xb0] sm:$0xf] %v1157_v30 }
  0x38   : > { %1160 = vst [vmem:[%s1683_s8 + $0xbc] sm:$0xf] %v1159_v31 }
  0x39 PF: > { %p1161_p7 = scmp.ge.s32.totalorder %s1595_s18, 1  ;;  %p278_p8 = scmp.lt.s32.totalorder %s1595_s18, 13 }
  0x3b   : > { %p279_p9 = pnand %p1161_p7, %p278_p8 }
  0x3c   : > { %s285_s9 = sand.u32 (!%p279_p9), 1, %s1571_s12   ;;  %s324_s10 = smul.u32 (!%p279_p9), 48, %s1579_s14 }
  0x3d   : > { %282 = sbr.rel (%p279_p9) target bundleno = 366 (0x16e), region = 54  ;;  %s1163_s21 = sshll.u32 (!%p279_p9), %s1583_s15, 4 }
  0x3e   : > { %s1482_s11 = smul.u32 (!%p279_p9), 192, %s285_s9  ;;  %p325_p10 = scmp.lt.s32.totalorder (!%p279_p9), %s324_s10, 143 }
  0x3f   : > { %p337_p11 = scmp.lt.s32.totalorder (!%p279_p9), %s1163_s21, 63  ;;  %p1165_p12 = scmp.ne.s32.totalorder (!%p279_p9), %s1579_s14, 0 }
  0x40   : > { %s1761_s12 = scalar_lea.vmem (!%p279_p9), [#allocation3], %s1482_s11 }
  0x42   : > { %s1938_s10 = smov (!%p325_p10, %s324_s10), 143  ;;  %s1940_s21 = smov (!%p337_p11, %s1163_s21), 63 }
  0x43   : > { %s1162_s22 = sshll.u32 %s1938_s10, 2  ;;  %s1164_s27 = sshll.u32 %s1940_s21, 2 }
  0x44   : > { %s1754_s26 = scalar_lea.vmem %s1922_s1, %s1162_s22  ;;  %s1759_s30 = scalar_lea.vmem %s1924_s3, %s1164_s27 }
  0x45   : > { %348 = sbr.rel (%p1165_p12) target bundleno = 91 (0x5b), region = 62 }
  0x4a   : > { %v1597_v32 = vmov 0.0  }
  0x4b   : > { %349 = vst [vmem:[#allocation2 + $0x30] sm:$0xff] %v1597_v32 }
  0x4c   : > { %350 = vst [vmem:[#allocation2] sm:$0xff] %v1597_v32 }
  0x4d   : > { %351 = vst [vmem:[#allocation2 + $0x58] sm:$0xff] %v1597_v32 }
  0x4e   : > { %352 = vst [vmem:[#allocation2 + $0x18] sm:$0xff] %v1597_v32 }
  0x4f   : > { %353 = vst [vmem:[#allocation2 + $0x50] sm:$0xff] %v1597_v32 }
  0x50   : > { %354 = vst [vmem:[#allocation2 + $0x68] sm:$0xff] %v1597_v32 }
  0x51   : > { %355 = vst [vmem:[#allocation2 + $0x8] sm:$0xff] %v1597_v32 }
  0x52   : > { %356 = vst [vmem:[#allocation2 + $0x48] sm:$0xff] %v1597_v32 }
  0x53   : > { %357 = vst [vmem:[#allocation2 + $0x40] sm:$0xff] %v1597_v32 }
  0x54   : > { %358 = vst [vmem:[#allocation2 + $0x20] sm:$0xff] %v1597_v32 }
  0x55   : > { %359 = vst [vmem:[#allocation2 + $0x10] sm:$0xff] %v1597_v32 }
  0x56   : > { %360 = vst [vmem:[#allocation2 + $0x38] sm:$0xff] %v1597_v32 }
  0x57   : > { %361 = vst [vmem:[#allocation2 + $0x60] sm:$0xff] %v1597_v32 }
  0x58   : > { %362 = vst [vmem:[#allocation2 + $0x70] sm:$0xff] %v1597_v32 }
  0x59   : > { %363 = vst [vmem:[#allocation2 + $0x78] sm:$0xff] %v1597_v32 }
  0x5a   : > { %364 = vst [vmem:[#allocation2 + $0x28] sm:$0xff] %v1597_v32 }
  0x5b PF: > { %v1392_v33 = vld [vmem:[%s1754_s26 + $0x38] sm:$0xff]  ;;  %v1391_v36 = vld [vmem:[%s1754_s26 + $0x30] sm:$0xff]  ;;  %v1390_v39 = vld [vmem:[%s1754_s26 + $0x28] sm:$0xff]  ;;  %p1358_p13 = scmp.ne.s32.totalorder %s1579_s14, 2 }
  0x5c   : > { %v1766_v34 = vld [vmem:[%s1754_s26 + $0x78] sm:$0xff]  ;;  %733 = vmatpush.bf16.msra.mxu0 %v1392_v33  ;;  %1456 = vmatpush.bf16.msra.mxu3 %v1392_v33  ;;  %v1775_v37 = vld [vmem:[%s1754_s26 + $0x70] sm:$0xff]  ;;  %v1398_v40 = vld [vmem:[%s1754_s26 + $0x68] sm:$0xff] }
  0x5d   : > { %v1769_v35 = vld [vmem:[%s1754_s26 + $0xb8] sm:$0xff]  ;;  %782 = vmatpush.bf16.msra.mxu1 %v1766_v34  ;;  %v1778_v38 = vld [vmem:[%s1754_s26 + $0xb0] sm:$0xff]  ;;  %v1785_v41 = vld [vmem:[%s1754_s26 + $0xa8] sm:$0xff] }
  0x5e   : > { %831 = vmatpush.bf16.msra.mxu2 %v1769_v35  ;;  %v1389_v42 = vld [vmem:[%s1754_s26 + $0x20] sm:$0xff]  ;;  %v1388_v45 = vld [vmem:[%s1754_s26 + $0x18] sm:$0xff]  ;;  %v1387_v48 = vld [vmem:[%s1754_s26 + $0x10] sm:$0xff] }
  0x5f   : > { %v1397_v43 = vld [vmem:[%s1754_s26 + $0x60] sm:$0xff]  ;;  %v1396_v46 = vld [vmem:[%s1754_s26 + $0x58] sm:$0xff]  ;;  %v1395_v49 = vld [vmem:[%s1754_s26 + $0x50] sm:$0xff] }
  0x60   : > { %734 = vmatpush.bf16.msra.mxu0 %v1391_v36  ;;  %1457 = vmatpush.bf16.msra.mxu3 %v1391_v36  ;;  %v1791_v44 = vld [vmem:[%s1754_s26 + $0xa0] sm:$0xff]  ;;  %v1797_v47 = vld [vmem:[%s1754_s26 + $0x98] sm:$0xff]  ;;  %v1803_v50 = vld [vmem:[%s1754_s26 + $0x90] sm:$0xff] }
  0x61   : > { %783 = vmatpush.bf16.msra.mxu1 %v1775_v37  ;;  %v1386_v51 = vld [vmem:[%s1754_s26 + $0x8] sm:$0xff]  ;;  %v1385_v54 = vld [vmem:[%s1754_s26] sm:$0xff]  ;;  %v1240_v59 = vld [vmem:[%s1761_s12 + $0x90] sm:$0xf] }
  0x62   : > { %832 = vmatpush.bf16.msra.mxu2 %v1778_v38  ;;  %v1394_v52 = vld [vmem:[%s1754_s26 + $0x48] sm:$0xff]  ;;  %v1393_v55 = vld [vmem:[%s1754_s26 + $0x40] sm:$0xff]  ;;  %v1380_v60 = vld [vmem:[%s1761_s12 + $0x98] sm:$0xf0] }
  0x63   : > { %v1809_v53 = vld [vmem:[%s1754_s26 + $0x88] sm:$0xff]  ;;  %v1814_v56 = vld [vmem:[%s1754_s26 + $0x80] sm:$0xff]  ;;  %v1170_v62 = vld [vmem:[%s1761_s12 + $0xc] sm:$0xf0]  ;;  %v1241_v2 = vor.u32 %v1380_v60, %v1240_v59 }
  0x64   : > { %735 = vmatpush.bf16.msra.mxu0 %v1390_v39  ;;  %1458 = vmatpush.bf16.msra.mxu3 %v1390_v39  ;;  %v1168_v57 = vld [vmem:[%s1761_s12] sm:$0xf]  ;;  %v1362_v58 = vld [vmem:[%s1761_s12 + $0x8] sm:$0xf0]  ;;  %v1361_v61 = vld [vmem:[%s1761_s12 + $0x4] sm:$0xf] }
  0x65   : > { %784 = vmatpush.bf16.msra.mxu1 %v1398_v40  ;;  %v1176_v63 = vld [vmem:[%s1761_s12 + $0x8] sm:$0xf]  ;;  %v1363_v0 = vld [vmem:[%s1761_s12 + $0x10] sm:$0xf0]  ;;  %v1169_v1 = vor.u32 %v1362_v58, %v1168_v57  ;;  %v1173_v3 = vor.u32 %v1361_v61, %v1170_v62  ;;  %v1180_v5 = vld [vmem:[%s1761_s12 + $0x18] sm:$0xf] }
  0x66   : > { %833 = vmatpush.bf16.msra.mxu2 %v1785_v41  ;;  %v1177_v4 = vor.u32 %v1363_v0, %v1176_v63  ;;  %v1365_v6 = vld [vmem:[%s1761_s12 + $0x20] sm:$0xf0]  ;;  %v1252_v7 = vld [vmem:[%s1761_s12 + $0xa8] sm:$0xf]  ;;  %v1383_v8 = vld [vmem:[%s1761_s12 + $0xb0] sm:$0xf0] }
  0x67   : > { %v1364_v9 = vld [vmem:[%s1761_s12 + $0x1c] sm:$0xf]  ;;  %v1182_v10 = vld [vmem:[%s1761_s12 + $0x24] sm:$0xf0]  ;;  %v1188_v11 = vld [vmem:[%s1761_s12 + $0x20] sm:$0xf]  ;;  %v1181_v13 = vor.u32 %v1365_v6, %v1180_v5  ;;  %v1253_v14 = vor.u32 %v1383_v8, %v1252_v7 }
  0x68   : > { %736 = vmatpush.bf16.msra.mxu0 %v1389_v42  ;;  %1459 = vmatpush.bf16.msra.mxu3 %v1389_v42  ;;  %v1366_v12 = vld [vmem:[%s1761_s12 + $0x28] sm:$0xf0]  ;;  %v1185_v15 = vor.u32 %v1364_v9, %v1182_v10  ;;  %v1192_v17 = vld [vmem:[%s1761_s12 + $0x30] sm:$0xf]  ;;  %v1368_v18 = vld [vmem:[%s1761_s12 + $0x38] sm:$0xf0] }
  0x69   : > { %785 = vmatpush.bf16.msra.mxu1 %v1397_v43  ;;  %v1189_v16 = vor.u32 %v1366_v12, %v1188_v11  ;;  %v1367_v19 = vld [vmem:[%s1761_s12 + $0x34] sm:$0xf]  ;;  %v1242_v21 = vld [vmem:[%s1761_s12 + $0x9c] sm:$0xf0]  ;;  %v1200_v23 = vld [vmem:[%s1761_s12 + $0x38] sm:$0xf]  ;;  %v1193_v25 = vor.u32 %v1368_v18, %v1192_v17 }
  0x6a   : > { %834 = vmatpush.bf16.msra.mxu2 %v1791_v44  ;;  %v1379_v20 = vld [vmem:[%s1761_s12 + $0x94] sm:$0xf]  ;;  %v1194_v22 = vld [vmem:[%s1761_s12 + $0x3c] sm:$0xf0]  ;;  %v1369_v24 = vld [vmem:[%s1761_s12 + $0x40] sm:$0xf0] }
  0x6b   : > { %v1245_v26 = vor.u32 %v1379_v20, %v1242_v21  ;;  %v1197_v27 = vor.u32 %v1367_v19, %v1194_v22  ;;  %v1201_v28 = vor.u32 %v1369_v24, %v1200_v23  ;;  %v1204_v29 = vld [vmem:[%s1761_s12 + $0x48] sm:$0xf]  ;;  %v1371_v30 = vld [vmem:[%s1761_s12 + $0x50] sm:$0xf0]  ;;  %v1370_v31 = vld [vmem:[%s1761_s12 + $0x4c] sm:$0xf] }
  0x6c   : > { %737 = vmatpush.bf16.msra.mxu0 %v1388_v45  ;;  %1460 = vmatpush.bf16.msra.mxu3 %v1388_v45  ;;  %v1382_v32 = vld [vmem:[%s1761_s12 + $0xac] sm:$0xf]  ;;  %v1254_v33 = vld [vmem:[%s1761_s12 + $0xb4] sm:$0xf0]  ;;  %v1372_v36 = vld [vmem:[%s1761_s12 + $0x58] sm:$0xf0] }
  0x6d   : > { %786 = vmatpush.bf16.msra.mxu1 %v1396_v46  ;;  %v1257_v39 = vor.u32 %v1382_v32, %v1254_v33  ;;  %v1374_v42 = vld [vmem:[%s1761_s12 + $0x68] sm:$0xf0]  ;;  %v1381_v45 = vld [vmem:[%s1761_s12 + $0xa0] sm:$0xf0]  ;;  %v1260_v57 = vld [vmem:[%s1761_s12 + $0xb0] sm:$0xf] }
  0x6e   : > { %835 = vmatpush.bf16.msra.mxu2 %v1797_v47  ;;  %v1230_v58 = vld [vmem:[%s1761_s12 + $0x84] sm:$0xf0]  ;;  %v1236_v59 = vld [vmem:[%s1761_s12 + $0x80] sm:$0xf]  ;;  %v1378_v60 = vld [vmem:[%s1761_s12 + $0x88] sm:$0xf0] }
  0x6f   : > { %v1237_v0 = vor.u32 %v1378_v60, %v1236_v59  ;;  %v365_v5 = vld [vmem:[#allocation2 + $0x30] sm:$0xff]  ;;  %v367_v21 = vld [vmem:[#allocation2 + $0x58] sm:$0xff] }
  0x70   : > { %738 = vmatpush.bf16.msra.mxu0 %v1387_v48  ;;  %1461 = vmatpush.bf16.msra.mxu3 %v1387_v48  ;;  %v1375_v48 = vld [vmem:[%s1761_s12 + $0x70] sm:$0xf0] }
  0x71   : > { %787 = vmatpush.bf16.msra.mxu1 %v1395_v49 }
  0x72   : > { %836 = vmatpush.bf16.msra.mxu2 %v1803_v50 }
  0x74   : > { %739 = vmatpush.bf16.msra.mxu0 %v1386_v51  ;;  %1462 = vmatpush.bf16.msra.mxu3 %v1386_v51 }
  0x75   : > { %788 = vmatpush.bf16.msra.mxu1 %v1394_v52 }
  0x76   : > { %837 = vmatpush.bf16.msra.mxu2 %v1809_v53 }
  0x78   : > { %740 = vmatpush.bf16.msra.mxu0 %v1385_v54  ;;  %1463 = vmatpush.bf16.msra.mxu3 %v1385_v54  ;;  %v1377_v54 = vld [vmem:[%s1761_s12 + $0x80] sm:$0xf0] }
  0x79   : > { %789 = vmatpush.bf16.msra.mxu1 %v1393_v55 }
  0x7a   : > { %838 = vmatpush.bf16.msra.mxu2 %v1814_v56 }
  0x7b   : > { %741 = vmatmul.bf16.vlgmr.msra.gmra.mxu0 %v1169_v1  ;;  %771 = vmatmul.bf16.vlgmr.msra.gmra.mxu3 %v1241_v2 }
  0x7c   : > { %1464 = vmatpush.bf16.msrb.mxu3 %v1766_v34  ;;  %790 = vmatmul.bf16.vlgmr.msra.gmra.mxu1 %v1173_v3  ;;  %v1206_v34 = vld [vmem:[%s1761_s12 + $0x54] sm:$0xf0] }
  0x7d   : > { %839 = vmatmul.bf16.vlgmr.msra.gmra.mxu2 %v1177_v4 }
  0x80   : > { %1465 = vmatpush.bf16.msrb.mxu3 %v1775_v37  ;;  %v1205_v37 = vor.u32 %v1371_v30, %v1204_v29  ;;  %v368_v29 = vld [vmem:[#allocation2 + $0x18] sm:$0xff] }
  0x84   : > { %1466 = vmatpush.bf16.msrb.mxu3 %v1398_v40 }
  0x88   : > { %1467 = vmatpush.bf16.msrb.mxu3 %v1397_v43  ;;  %v1373_v43 = vld [vmem:[%s1761_s12 + $0x64] sm:$0xf] }
  0x8b   : > { %746 = vmatmul.bf16.gmra.mxu0 %v1181_v13  ;;  %776 = vmatmul.bf16.gmra.mxu3 %v1253_v14  ;;  %v366_v13 = vld [vmem:[#allocation2] sm:$0xff] }
  0x8c   : > { %1468 = vmatpush.bf16.msrb.mxu3 %v1396_v46  ;;  %795 = vmatmul.bf16.gmra.mxu1 %v1185_v15  ;;  %v1218_v46 = vld [vmem:[%s1761_s12 + $0x6c] sm:$0xf0] }
  0x8d   : > { %844 = vmatmul.bf16.gmra.mxu2 %v1189_v16  ;;  %v1221_v51 = vor.u32 %v1373_v43, %v1218_v46 }
  0x90   : > { %1469 = vmatpush.bf16.msrb.mxu3 %v1395_v49 }
  0x94   : > { %1470 = vmatpush.bf16.msrb.mxu3 %v1394_v52 }
  0x98   : > { %1471 = vmatpush.bf16.msrb.mxu3 %v1393_v55  ;;  %v1376_v55 = vld [vmem:[%s1761_s12 + $0x7c] sm:$0xf] }
  0x99   : > { %v1233_v63 = vor.u32 %v1376_v55, %v1230_v58 }
  0x9b   : > { %751 = vmatmul.bf16.gmra.mxu0 %v1193_v25  ;;  %820 = vmatmul.bf16.vlgmr.msrb.gmra.mxu3 %v1245_v26 }
  0x9c   : > { %1472 = vmatpush.bf16.msra.mxu3 %v1769_v35  ;;  %800 = vmatmul.bf16.gmra.mxu1 %v1197_v27  ;;  %v1212_v35 = vld [vmem:[%s1761_s12 + $0x50] sm:$0xf] }
  0x9d   : > { %849 = vmatmul.bf16.gmra.mxu2 %v1201_v28  ;;  %v1213_v40 = vor.u32 %v1372_v36, %v1212_v35 }
  0xa0   : > { %1473 = vmatpush.bf16.msra.mxu3 %v1778_v38  ;;  %v1209_v38 = vor.u32 %v1370_v31, %v1206_v34 }
  0xa4   : > { %1474 = vmatpush.bf16.msra.mxu3 %v1785_v41  ;;  %v1216_v41 = vld [vmem:[%s1761_s12 + $0x60] sm:$0xf] }
  0xa5   : > { %v1217_v49 = vor.u32 %v1374_v42, %v1216_v41 }
  0xa8   : > { %1475 = vmatpush.bf16.msra.mxu3 %v1791_v44  ;;  %v1248_v44 = vld [vmem:[%s1761_s12 + $0x98] sm:$0xf] }
  0xab   : > { %756 = vmatmul.bf16.gmra.mxu0 %v1205_v37  ;;  %825 = vmatmul.bf16.gmra.mxu3 %v1257_v39  ;;  %v369_v37 = vld [vmem:[#allocation2 + $0x50] sm:$0xff] }
  0xac   : > { %1476 = vmatpush.bf16.msra.mxu3 %v1797_v47  ;;  %805 = vmatmul.bf16.gmra.mxu1 %v1209_v38  ;;  %v1224_v47 = vld [vmem:[%s1761_s12 + $0x68] sm:$0xf] }
  0xad   : > { %854 = vmatmul.bf16.gmra.mxu2 %v1213_v40  ;;  %v1225_v52 = vor.u32 %v1375_v48, %v1224_v47 }
  0xb0   : > { %1477 = vmatpush.bf16.msra.mxu3 %v1803_v50  ;;  %v1249_v50 = vor.u32 %v1381_v45, %v1248_v44  ;;  %v370_v45 = vld [vmem:[#allocation2 + $0x68] sm:$0xff] }
  0xb4   : > { %1478 = vmatpush.bf16.msra.mxu3 %v1809_v53  ;;  %v1228_v53 = vld [vmem:[%s1761_s12 + $0x78] sm:$0xf] }
  0xb5   : > { %v1229_v61 = vor.u32 %v1377_v54, %v1228_v53  ;;  %v371_v53 = vld [vmem:[#allocation2 + $0x8] sm:$0xff] }
  0xb8   : > { %1479 = vmatpush.bf16.msra.mxu3 %v1814_v56  ;;  %v1384_v56 = vld [vmem:[%s1761_s12 + $0xb8] sm:$0xf0] }
  0xb9   : > { %v1261_v62 = vor.u32 %v1384_v56, %v1260_v57 }
  0xbb   : > { %761 = vmatmul.bf16.gmra.mxu0 %v1217_v49  ;;  %869 = vmatmul.bf16.vlgmr.msra.gmra.mxu3 %v1249_v50 }
  0xbc   : > { %810 = vmatmul.bf16.gmra.mxu1 %v1221_v51 }
  0xbd   : > { %859 = vmatmul.bf16.gmra.mxu2 %v1225_v52 }
  0xcb   : > { %766 = vmatmul.bf16.gmra.mxu0 %v1229_v61  ;;  %874 = vmatmul.bf16.gmra.mxu3 %v1261_v62  ;;  %v372_v61 = vld [vmem:[#allocation2 + $0x48] sm:$0xff] }
  0xcc   : > { %815 = vmatmul.bf16.gmra.mxu1 %v1233_v63 }
  0xcd   : > { %864 = vmatmul.bf16.gmra.mxu2 %v1237_v0 }
  0xf8   : > { %v742_v1 = vpop.f32.mrf.mxu0 }
  0xf9   : > { %v791_v2 = vpop.f32.mrf.mxu1 }
  0xfa   : > { %v792_v3 = vadd.f32 %v791_v2, %v742_v1 }
  0xfe   : > { %v1876_v4 = vpop.f32.mrf.mxu3 }
 0x100   : > { %v840_v6 = vpop.f32.mrf.mxu2  ;;  %v744_v8 = vpop.f32.mrf.mxu0 }
 0x101   : > { %v841_v7 = vadd.f32 %v840_v6, %v792_v3  ;;  %v793_v9 = vpop.f32.mrf.mxu1  ;;  %v377_v6 = vld [vmem:[#allocation2 + $0x60] sm:$0xff] }
 0x102   : > { %v794_v11 = vadd.f32 %v793_v9, %v744_v8  ;;  %v373_v8 = vld [vmem:[#allocation2 + $0x40] sm:$0xff] }
 0x103   : > { %v880_v10 = vadd.f32 %v841_v7, %v365_v5 }
 0x105   : > { %896 = vst [vmem:[#allocation2 + $0x30] sm:$0xff] %v880_v10 }
 0x106   : > { %v1878_v12 = vpop.f32.mrf.mxu3 }
 0x108   : > { %v842_v14 = vpop.f32.mrf.mxu2  ;;  %v747_v16 = vpop.f32.mrf.mxu0 }
 0x109   : > { %v843_v15 = vadd.f32 %v842_v14, %v794_v11  ;;  %v796_v17 = vpop.f32.mrf.mxu1 }
 0x10a   : > { %v797_v19 = vadd.f32 %v796_v17, %v747_v16 }
 0x10b   : > { %v881_v18 = vadd.f32 %v843_v15, %v366_v13 }
 0x10d   : > { %897 = vst [vmem:[#allocation2] sm:$0xff] %v881_v18 }
 0x10e   : > { %v1880_v20 = vpop.f32.mrf.mxu3 }
 0x110   : > { %v845_v22 = vpop.f32.mrf.mxu2  ;;  %v749_v24 = vpop.f32.mrf.mxu0 }
 0x111   : > { %v846_v23 = vadd.f32 %v845_v22, %v797_v19  ;;  %v798_v25 = vpop.f32.mrf.mxu1  ;;  %v378_v19 = vld [vmem:[#allocation2 + $0x70] sm:$0xff]  ;;  %v374_v22 = vld [vmem:[#allocation2 + $0x20] sm:$0xff] }
 0x112   : > { %v799_v27 = vadd.f32 %v798_v25, %v749_v24 }
 0x113   : > { %v882_v26 = vadd.f32 %v846_v23, %v367_v21 }
 0x115   : > { %898 = vst [vmem:[#allocation2 + $0x58] sm:$0xff] %v882_v26 }
 0x116   : > { %v1882_v28 = vpop.f32.mrf.mxu3 }
 0x118   : > { %v847_v30 = vpop.f32.mrf.mxu2  ;;  %v752_v32 = vpop.f32.mrf.mxu0 }
 0x119   : > { %v848_v31 = vadd.f32 %v847_v30, %v799_v27  ;;  %v801_v33 = vpop.f32.mrf.mxu1 }
 0x11a   : > { %v802_v35 = vadd.f32 %v801_v33, %v752_v32  ;;  %v379_v32 = vld [vmem:[#allocation2 + $0x78] sm:$0xff] }
 0x11b   : > { %v883_v34 = vadd.f32 %v848_v31, %v368_v29 }
 0x11d   : > { %899 = vst [vmem:[#allocation2 + $0x18] sm:$0xff] %v883_v34  ;;  %v375_v34 = vld [vmem:[#allocation2 + $0x10] sm:$0xff] }
 0x11e   : > { %v821_v36 = vpop.f32.mrf.mxu3 }
 0x11f   : > { %v822_v5 = vadd.f32 %v821_v36, %v1876_v4 }
 0x120   : > { %v850_v39 = vpop.f32.mrf.mxu2  ;;  %v754_v40 = vpop.f32.mrf.mxu0 }
 0x121   : > { %v851_v38 = vadd.f32 %v850_v39, %v802_v35  ;;  %v803_v41 = vpop.f32.mrf.mxu1 }
 0x122   : > { %v804_v43 = vadd.f32 %v803_v41, %v754_v40 }
 0x123   : > { %v884_v42 = vadd.f32 %v851_v38, %v369_v37 }
 0x125   : > { %900 = vst [vmem:[#allocation2 + $0x50] sm:$0xff] %v884_v42 }
 0x126   : > { %v823_v44 = vpop.f32.mrf.mxu3 }
 0x127   : > { %v824_v17 = vadd.f32 %v823_v44, %v1878_v12 }
 0x128   : > { %v852_v46 = vpop.f32.mrf.mxu2  ;;  %v757_v48 = vpop.f32.mrf.mxu0 }
 0x129   : > { %v853_v47 = vadd.f32 %v852_v46, %v804_v43  ;;  %v806_v49 = vpop.f32.mrf.mxu1  ;;  %v380_v43 = vld [vmem:[#allocation2 + $0x28] sm:$0xff] }
 0x12a   : > { %v807_v51 = vadd.f32 %v806_v49, %v757_v48 }
 0x12b   : > { %v885_v50 = vadd.f32 %v853_v47, %v370_v45  ;;  %v376_v45 = vld [vmem:[#allocation2 + $0x38] sm:$0xff] }
 0x12d   : > { %901 = vst [vmem:[#allocation2 + $0x68] sm:$0xff] %v885_v50 }
 0x12e   : > { %v826_v52 = vpop.f32.mrf.mxu3 }
 0x12f   : > { %v827_v31 = vadd.f32 %v826_v52, %v1880_v20 }
 0x130   : > { %v855_v54 = vpop.f32.mrf.mxu2  ;;  %v759_v57 = vpop.f32.mrf.mxu0 }
 0x131   : > { %v856_v55 = vadd.f32 %v855_v54, %v807_v51  ;;  %v808_v56 = vpop.f32.mrf.mxu1 }
 0x132   : > { %v809_v59 = vadd.f32 %v808_v56, %v759_v57 }
 0x133   : > { %v886_v58 = vadd.f32 %v856_v55, %v371_v53 }
 0x135   : > { %902 = vst [vmem:[#allocation2 + $0x8] sm:$0xff] %v886_v58 }
 0x136   : > { %v828_v60 = vpop.f32.mrf.mxu3 }
 0x137   : > { %v829_v41 = vadd.f32 %v828_v60, %v1882_v28 }
 0x138   : > { %v857_v62 = vpop.f32.mrf.mxu2  ;;  %v762_v0 = vpop.f32.mrf.mxu0 }
 0x139   : > { %v858_v63 = vadd.f32 %v857_v62, %v809_v59  ;;  %v811_v1 = vpop.f32.mrf.mxu1 }
 0x13a   : > { %v812_v3 = vadd.f32 %v811_v1, %v762_v0 }
 0x13b   : > { %v887_v2 = vadd.f32 %v858_v63, %v372_v61 }
 0x13d   : > { %903 = vst [vmem:[#allocation2 + $0x48] sm:$0xff] %v887_v2 }
 0x13e   : > { %v870_v7 = vpop.f32.mrf.mxu3 }
 0x13f   : > { %v871_v10 = vadd.f32 %v870_v7, %v822_v5 }
 0x140   : > { %v860_v9 = vpop.f32.mrf.mxu2  ;;  %v764_v13 = vpop.f32.mrf.mxu0 }
 0x141   : > { %v861_v11 = vadd.f32 %v860_v9, %v812_v3  ;;  %v892_v14 = vadd.f32 %v871_v10, %v377_v6  ;;  %v813_v15 = vpop.f32.mrf.mxu1 }
 0x142   : > { %v814_v18 = vadd.f32 %v813_v15, %v764_v13 }
 0x143   : > { %v888_v16 = vadd.f32 %v861_v11, %v373_v8  ;;  %908 = vst [vmem:[#allocation2 + $0x60] sm:$0xff] %v892_v14 }
 0x145   : > { %904 = vst [vmem:[#allocation2 + $0x40] sm:$0xff] %v888_v16 }
 0x146   : > { %v872_v21 = vpop.f32.mrf.mxu3 }
 0x147   : > { %v873_v4 = vadd.f32 %v872_v21, %v824_v17 }
 0x148   : > { %v862_v23 = vpop.f32.mrf.mxu2  ;;  %v767_v26 = vpop.f32.mrf.mxu0 }
 0x149   : > { %v863_v24 = vadd.f32 %v862_v23, %v814_v18  ;;  %v893_v25 = vadd.f32 %v873_v4, %v378_v19  ;;  %v816_v27 = vpop.f32.mrf.mxu1 }
 0x14a   : > { %v817_v30 = vadd.f32 %v816_v27, %v767_v26 }
 0x14b   : > { %v889_v29 = vadd.f32 %v863_v24, %v374_v22  ;;  %909 = vst [vmem:[#allocation2 + $0x70] sm:$0xff] %v893_v25 }
 0x14d   : > { %905 = vst [vmem:[#allocation2 + $0x20] sm:$0xff] %v889_v29 }
 0x14e   : > { %v875_v33 = vpop.f32.mrf.mxu3 }
 0x14f   : > { %v876_v35 = vadd.f32 %v875_v33, %v827_v31 }
 0x150   : > { %v865_v12 = vpop.f32.mrf.mxu2  ;;  %v769_v38 = vpop.f32.mrf.mxu0 }
 0x151   : > { %v866_v36 = vadd.f32 %v865_v12, %v817_v30  ;;  %v894_v37 = vadd.f32 %v876_v35, %v379_v32  ;;  %v818_v40 = vpop.f32.mrf.mxu1 }
 0x152   : > { %v819_v42 = vadd.f32 %v818_v40, %v769_v38 }
 0x153   : > { %v890_v39 = vadd.f32 %v866_v36, %v375_v34  ;;  %910 = vst [vmem:[#allocation2 + $0x78] sm:$0xff] %v894_v37 }
 0x155   : > { %906 = vst [vmem:[#allocation2 + $0x10] sm:$0xff] %v890_v39 }
 0x156   : > { %v877_v44 = vpop.f32.mrf.mxu3 }
 0x157   : > { %v878_v20 = vadd.f32 %v877_v44, %v829_v41 }
 0x158   : > { %v867_v46 = vpop.f32.mrf.mxu2 }
 0x159   : > { %v868_v47 = vadd.f32 %v867_v46, %v819_v42  ;;  %v895_v48 = vadd.f32 %v878_v20, %v380_v43  ;;  %915 = sbr.rel (%p1358_p13) target bundleno = 366 (0x16e), region = 66 }
 0x15b   : > { %v891_v49 = vadd.f32 %v868_v47, %v376_v45  ;;  %911 = vst [vmem:[#allocation2 + $0x28] sm:$0xff] %v895_v48 }
 0x15d   : > { %907 = vst [vmem:[#allocation2 + $0x38] sm:$0xff] %v891_v49 }
 0x15e   : > { %v916_v50 = vld [vmem:[#allocation2 + $0x30] sm:$0xff]  ;;  %v917_v51 = vld [vmem:[#allocation2] sm:$0xff]  ;;  %v918_v52 = vld [vmem:[#allocation2 + $0x58] sm:$0xff] }
 0x15f   : > { %v1540_v28 = vld [vmem:[%s1923_s2] ss:$0 sm:$0xff]  ;;  %v919_v53 = vld [vmem:[#allocation2 + $0x18] sm:$0xff]  ;;  %v920_v54 = vld [vmem:[#allocation2 + $0x50] sm:$0xff] }
 0x160   : > { %v921_v55 = vld [vmem:[#allocation2 + $0x68] sm:$0xff]  ;;  %v936_v56 = vadd.f32 %v1540_v28, %v916_v50  ;;  %v937_v58 = vadd.f32 %v1540_v28, %v917_v51  ;;  %v938_v59 = vadd.f32 %v1540_v28, %v918_v52  ;;  %v939_v60 = vadd.f32 %v1540_v28, %v919_v53  ;;  %v924_v2 = vld [vmem:[#allocation2 + $0x40] sm:$0xff]  ;;  %v926_v9 = vld [vmem:[#allocation2 + $0x10] sm:$0xff] }
 0x161   : > { %v922_v57 = vld [vmem:[#allocation2 + $0x8] sm:$0xff]  ;;  %v940_v62 = vadd.f32 %v1540_v28, %v920_v54  ;;  %v941_v63 = vadd.f32 %v1540_v28, %v921_v55  ;;  %v925_v3 = vld [vmem:[#allocation2 + $0x20] sm:$0xff]  ;;  %v929_v17 = vld [vmem:[#allocation2 + $0x70] sm:$0xff]  ;;  %v944_v21 = vadd.f32 %v1540_v28, %v924_v2  ;;  %v946_v26 = vadd.f32 %v1540_v28, %v926_v9 }
 0x162   : > { %v923_v61 = vld [vmem:[#allocation2 + $0x48] sm:$0xff]  ;;  %v942_v0 = vadd.f32 %v1540_v28, %v922_v57  ;;  %v952_v5 = vmax.f32 %v936_v56, 0.0  ;;  %v953_v6 = vmax.f32 %v937_v58, 0.0  ;;  %v954_v7 = vmax.f32 %v938_v59, 0.0  ;;  %v928_v16 = vld [vmem:[#allocation2 + $0x60] sm:$0xff]  ;;  %v930_v23 = vld [vmem:[#allocation2 + $0x78] sm:$0xff] }
 0x163   : > { %v943_v1 = vadd.f32 %v1540_v28, %v923_v61  ;;  %v955_v8 = vmax.f32 %v939_v60, 0.0  ;;  %v956_v11 = vmax.f32 %v940_v62, 0.0  ;;  %v957_v13 = vmax.f32 %v941_v63, 0.0  ;;  %v931_v4 = vld [vmem:[#allocation2 + $0x28] sm:$0xff] }
 0x164   : > { %v927_v10 = vld [vmem:[#allocation2 + $0x38] sm:$0xff]  ;;  %v958_v14 = vmax.f32 %v942_v0, 0.0  ;;  %v1412_v18 = vpack.c.bf16 %v953_v6, %v952_v5  ;;  %v945_v22 = vadd.f32 %v1540_v28, %v925_v3  ;;  %v960_v29 = vmax.f32 %v944_v21, 0.0 }
 0x165   : > { %v959_v15 = vmax.f32 %v943_v1, 0.0  ;;  %v1417_v19 = vpack.c.bf16 %v955_v8, %v954_v7  ;;  %v1422_v24 = vpack.c.bf16 %v957_v13, %v956_v11  ;;  %v947_v27 = vadd.f32 %v1540_v28, %v927_v10 }
 0x166   : > { %1413 = vst [vmem:[%s1759_s30] sm:$0xff] %v1412_v18   ;;  %v961_v30 = vmax.f32 %v945_v22, 0.0  ;;  %v948_v31 = vadd.f32 %v1540_v28, %v928_v16  ;;  %v949_v32 = vadd.f32 %v1540_v28, %v929_v17  ;;  %v962_v33 = vmax.f32 %v946_v26, 0.0 }
 0x167   : > { %v1427_v25 = vpack.c.bf16 %v959_v15, %v958_v14  ;;  %1449 = vst [vmem:[%s1759_s30 + $0x8] sm:$0xff] %v1417_v19   ;;  %v963_v34 = vmax.f32 %v947_v27, 0.0  ;;  %v950_v12 = vadd.f32 %v1540_v28, %v930_v23  ;;  %v951_v35 = vadd.f32 %v1540_v28, %v931_v4 }
 0x168   : > { %1450 = vst [vmem:[%s1759_s30 + $0x10] sm:$0xff] %v1422_v24   ;;  %v1432_v36 = vpack.c.bf16 %v961_v30, %v960_v29  ;;  %v964_v37 = vmax.f32 %v948_v31, 0.0  ;;  %v965_v39 = vmax.f32 %v949_v32, 0.0 }
 0x169   : > { %1451 = vst [vmem:[%s1759_s30 + $0x18] sm:$0xff] %v1427_v25   ;;  %v1437_v38 = vpack.c.bf16 %v963_v34, %v962_v33  ;;  %v966_v40 = vmax.f32 %v950_v12, 0.0  ;;  %v967_v41 = vmax.f32 %v951_v35, 0.0 }
 0x16a   : > { %1452 = vst [vmem:[%s1759_s30 + $0x20] sm:$0xff] %v1432_v36   ;;  %v1442_v42 = vpack.c.bf16 %v965_v39, %v964_v37 }
 0x16b   : > { %1453 = vst [vmem:[%s1759_s30 + $0x28] sm:$0xff] %v1437_v38   ;;  %v1447_v43 = vpack.c.bf16 %v967_v41, %v966_v40 }
 0x16c   : > { %1454 = vst [vmem:[%s1759_s30 + $0x30] sm:$0xff] %v1442_v42  }
 0x16d   : > { %1455 = vst [vmem:[%s1759_s30 + $0x38] sm:$0xff] %v1447_v43  }
 0x16e PF: > { %s13_s18 = sadd.s32 1, %s1595_s18   ;;  %s1925_s12 = smov %s1575_s13 }
 0x16f   : > { %p10_p0 = scmp.ge.s32.totalorder %s13_s18, 14   ;;  %s1926_s13 = smov %s1669_s25 }
 0x170   : > { %s1927_s14 = smov %s1587_s16  ;;  %s1928_s15 = smov %s1591_s17 }
 0x171   : > { %s1929_s16 = smov %s1932_s19  ;;  %s1930_s17 = smov %s1936_s20 }
 0x172   :  { %12 = sbr.rel (!%p10_p0) target bundleno = 4 (0x4), region = 113 }

// kernel: convnet_forward.19
= control target key start
LH: loop header
LB: loop body
LE: loop exit
PB: predicated region body
PF: predicated region fallthrough
CT: control target
= control target key end

     0   :  { %s2492_s0 = inlined_call_operand.vmem [shape: bf16[128,1152], index: 0, kind: input, shape index: {}]   ;;  %s2493_s1 = inlined_call_operand.vmem [shape: bf16[1152,256], index: 1, kind: input, shape index: {}]   ;;  %s2494_s2 = inlined_call_operand.vmem [shape: f32[1,256], index: 2, kind: input, shape index: {}]   ;;  %s2495_s3 = inlined_call_operand.vmem [shape: bf16[128,256], index: 3, kind: output, shape index: {}]  }
   0x1   :  { %2497 = sst [smem:[#allocation7_spill]] %s2492_s0 }
   0x2   :  { %2498 = sst [smem:[#allocation8_spill]] %s2493_s1 }
   0x3   :  { %s1997_s12 = smov 0   ;;  %s1999_s13 = smov 0  }
   0x4   :  { %s2001_s14 = smov 0   ;;  %s2003_s15 = smov 0  }
   0x5   :  { %s2005_s16 = smov 0   ;;  %s2007_s17 = smov 0  }
   0x6   :  { %s2009_s18 = smov 0   ;;  %s2011_s19 = smov 0  }
   0x7   :  { %s2013_s20 = smov 0   ;;  %s2015_s21 = smov 0  }
   0x8   :  { %s2017_s22 = smov 0  }
   0x9 LB: > { %s1434_s23 = sadd.s32 4294967295, %s1974_s22   ;;  %s25_s24 = sadd.s32 1, %s1966_s20  ;;  %s1974_s22 = sphi %s2017_s22, %s13_s22   ;;  %s1970_s21 = sphi %s2015_s21, %s2515_s21   ;;  %s1966_s20 = sphi %s2013_s20, %s2514_s20   ;;  %s1962_s19 = sphi %s2011_s19, %s2513_s19   ;;  %s1958_s18 = sphi %s2009_s18, %s2512_s18   ;;  %s1954_s17 = sphi %s2007_s17, %s2511_s17   ;;  %s1950_s16 = sphi %s2005_s16, %s2510_s16   ;;  %s1946_s15 = sphi %s2003_s15, %s2509_s15   ;;  %s1942_s14 = sphi %s2001_s14, %s2508_s14   ;;  %s1938_s13 = sphi %s1999_s13, %s2507_s13   ;;  %s1934_s12 = sphi %s1997_s12, %s2506_s12  }
   0xa   : > { %p26_p0 = scmp.ge.s32.totalorder %s25_s24, 3  ;;  %s28_s25 = sadd.s32 1, %s1970_s21 }
   0xb   : > { %s41_s26 = sadd.s32 1, %s1954_s17  ;;  %p48_p1 = scmp.ne.s32.totalorder %s1954_s17, %s1950_s16 }
   0xc   : > { %s2517_s24 = smov (%p26_p0, %s25_s24), 0  ;;  %s2519_s25 = smov (!%p26_p0, %s28_s25), %s1970_s21 }
   0xd   : > { %s37_s27 = ssub.s32 %s1966_s20, %s2517_s24  ;;  %p49_p2 = scmp.eq.s32.totalorder %s1974_s22, 0 }
   0xe   : > { %p30_p3 = scmp.ge.s32.totalorder %s2519_s25, 2  ;;  %p39_p4 = scmp.eq.s32.totalorder %s37_s27, 0 }
   0xf   : > { %p2064_p5 = por %p49_p2, %p48_p1  ;;  %s69_s29 = sadd.s32 1, %s1946_s15 }
  0x10   : > { %s2521_s25 = smov (%p30_p3, %s2519_s25), 0  ;;  %p76_p6 = scmp.ne.s32.totalorder %s1946_s15, %s1942_s14 }
  0x11   : > { %2500 = sst [smem:[#allocation6_spill]] %s2521_s25  ;;  %s65_s4 = ssub.s32 %s1970_s21, %s2521_s25 }
  0x12   : > { %s2072_s30 = scalar_select %p39_p4, %s1954_s17, %s41_s26  }
  0x13   : > { %s66_s5 = sor.u32 %s65_s4, %s37_s27  ;;  %p121_p7 = scmp.eq.s32.totalorder %s65_s4, 0 }
  0x14   : > { %p67_p8 = scmp.eq.s32.totalorder %s66_s5, 0  ;;  %p2078_p9 = por %p76_p6, %p49_p2 }
  0x15   : > { %s123_s7 = sadd.s32 1, %s1938_s13  ;;  %p133_p10 = scmp.ne.s32.totalorder %s1938_s13, %s1934_s12 }
  0x16   : > { %s2086_s8 = scalar_select %p67_p8, %s1946_s15, %s69_s29  }
  0x17   : > { %s2089_s9 = scalar_select %p121_p7, %s1938_s13, %s123_s7  }
  0x18   : > { %p134_p11 = scmp.eq.s32.totalorder %s1434_s23, 5  ;;  %p1437_p13 = scmp.ge.s32.totalorder %s1974_s22, 6 }
  0x1a   : > { %p2091_p12 = por %p134_p11, %p133_p10  ;;  %156 = sbr.rel (%p1437_p13) target bundleno = 129 (0x81), region = 16 }
  0x1f   : > { %159 = sbr.rel (!%p2064_p5) target bundleno = 72 (0x48), region = 20  ;;  %s161_s11 = sand.u32 (%p2064_p5), 1, %s1954_s17  }
  0x20   : > { %s1673_s26 = smul.u32 (%p2064_p5), 12, %s1966_s20  ;;  %s2503_s0 = sld [smem:[#allocation7_spill]] (%p2064_p5) }
  0x21   : > { %s1794_s27 = smul.u32 (%p2064_p5), 192, %s161_s11 }
  0x23   : > { %s2108_s23 = scalar_lea.vmem (%p2064_p5), [#allocation3], %s1794_s27 }
  0x26   : > { %s2103_s5 = scalar_lea.vmem %s2503_s0, %s1673_s26 }
  0x27   : > { %v184_v0 = vld [vmem:[%s2103_s5] sm:$0xff]  ;;  %v188_v2 = vld [vmem:[%s2103_s5 + $0x48] sm:$0xff]  ;;  %v192_v4 = vld [vmem:[%s2103_s5 + $0x90] sm:$0xff] }
  0x28   : > { %v186_v1 = vld [vmem:[%s2103_s5 + $0x24] sm:$0xff]  ;;  %185 = vst [vmem:[%s2108_s23] sm:$0xff] %v184_v0  ;;  %v190_v3 = vld [vmem:[%s2103_s5 + $0x6c] sm:$0xff]  ;;  %v194_v5 = vld [vmem:[%s2103_s5 + $0xb4] sm:$0xff] }
  0x29   : > { %187 = vst [vmem:[%s2108_s23 + $0xc] sm:$0xff] %v186_v1  ;;  %v196_v6 = vld [vmem:[%s2103_s5 + $0xd8] sm:$0xff]  ;;  %v200_v8 = vld [vmem:[%s2103_s5 + $0x120] sm:$0xff]  ;;  %v204_v10 = vld [vmem:[%s2103_s5 + $0x168] sm:$0xff] }
  0x2a   : > { %189 = vst [vmem:[%s2108_s23 + $0x18] sm:$0xff] %v188_v2  ;;  %v198_v7 = vld [vmem:[%s2103_s5 + $0xfc] sm:$0xff]  ;;  %v202_v9 = vld [vmem:[%s2103_s5 + $0x144] sm:$0xff]  ;;  %v206_v11 = vld [vmem:[%s2103_s5 + $0x18c] sm:$0xff] }
  0x2b   : > { %191 = vst [vmem:[%s2108_s23 + $0x24] sm:$0xff] %v190_v3  ;;  %v208_v12 = vld [vmem:[%s2103_s5 + $0x1b0] sm:$0xff]  ;;  %v212_v14 = vld [vmem:[%s2103_s5 + $0x1f8] sm:$0xff]  ;;  %v1439_v16 = vld [vmem:[%s2103_s5 + $0x8] sm:$0xf] }
  0x2c   : > { %193 = vst [vmem:[%s2108_s23 + $0x30] sm:$0xff] %v192_v4  ;;  %v210_v13 = vld [vmem:[%s2103_s5 + $0x1d4] sm:$0xff]  ;;  %v214_v15 = vld [vmem:[%s2103_s5 + $0x21c] sm:$0xff]  ;;  %v1441_v17 = vld [vmem:[%s2103_s5 + $0x2c] sm:$0xf] }
  0x2d   : > { %195 = vst [vmem:[%s2108_s23 + $0x3c] sm:$0xff] %v194_v5  ;;  %v1443_v18 = vld [vmem:[%s2103_s5 + $0x50] sm:$0xf]  ;;  %v1445_v19 = vld [vmem:[%s2103_s5 + $0x74] sm:$0xf] }
  0x2e   : > { %197 = vst [vmem:[%s2108_s23 + $0x48] sm:$0xff] %v196_v6  ;;  %v1447_v20 = vld [vmem:[%s2103_s5 + $0x98] sm:$0xf]  ;;  %v1449_v21 = vld [vmem:[%s2103_s5 + $0xbc] sm:$0xf] }
  0x2f   : > { %199 = vst [vmem:[%s2108_s23 + $0x54] sm:$0xff] %v198_v7  ;;  %v1451_v22 = vld [vmem:[%s2103_s5 + $0xe0] sm:$0xf]  ;;  %v1453_v23 = vld [vmem:[%s2103_s5 + $0x104] sm:$0xf] }
  0x30   : > { %201 = vst [vmem:[%s2108_s23 + $0x60] sm:$0xff] %v200_v8  ;;  %v1455_v24 = vld [vmem:[%s2103_s5 + $0x128] sm:$0xf]  ;;  %v1457_v25 = vld [vmem:[%s2103_s5 + $0x14c] sm:$0xf] }
  0x31   : > { %203 = vst [vmem:[%s2108_s23 + $0x6c] sm:$0xff] %v202_v9  ;;  %v1459_v26 = vld [vmem:[%s2103_s5 + $0x170] sm:$0xf]  ;;  %v1461_v27 = vld [vmem:[%s2103_s5 + $0x194] sm:$0xf] }
  0x32   : > { %205 = vst [vmem:[%s2108_s23 + $0x78] sm:$0xff] %v204_v10  ;;  %v1463_v28 = vld [vmem:[%s2103_s5 + $0x1b8] sm:$0xf]  ;;  %v1465_v29 = vld [vmem:[%s2103_s5 + $0x1dc] sm:$0xf] }
  0x33   : > { %207 = vst [vmem:[%s2108_s23 + $0x84] sm:$0xff] %v206_v11  ;;  %v1467_v30 = vld [vmem:[%s2103_s5 + $0x200] sm:$0xf]  ;;  %v1469_v31 = vld [vmem:[%s2103_s5 + $0x224] sm:$0xf] }
  0x34   : > { %209 = vst [vmem:[%s2108_s23 + $0x90] sm:$0xff] %v208_v12 }
  0x35   : > { %211 = vst [vmem:[%s2108_s23 + $0x9c] sm:$0xff] %v210_v13 }
  0x36   : > { %213 = vst [vmem:[%s2108_s23 + $0xa8] sm:$0xff] %v212_v14 }
  0x37   : > { %215 = vst [vmem:[%s2108_s23 + $0xb4] sm:$0xff] %v214_v15 }
  0x38   : > { %1440 = vst [vmem:[%s2108_s23 + $0x8] sm:$0xf] %v1439_v16 }
  0x39   : > { %1442 = vst [vmem:[%s2108_s23 + $0x14] sm:$0xf] %v1441_v17 }
  0x3a   : > { %1444 = vst [vmem:[%s2108_s23 + $0x20] sm:$0xf] %v1443_v18 }
  0x3b   : > { %1446 = vst [vmem:[%s2108_s23 + $0x2c] sm:$0xf] %v1445_v19 }
  0x3c   : > { %1448 = vst [vmem:[%s2108_s23 + $0x38] sm:$0xf] %v1447_v20 }
  0x3d   : > { %1450 = vst [vmem:[%s2108_s23 + $0x44] sm:$0xf] %v1449_v21 }
  0x3e   : > { %1452 = vst [vmem:[%s2108_s23 + $0x50] sm:$0xf] %v1451_v22 }
  0x3f   : > { %1454 = vst [vmem:[%s2108_s23 + $0x5c] sm:$0xf] %v1453_v23 }
  0x40   : > { %1456 = vst [vmem:[%s2108_s23 + $0x68] sm:$0xf] %v1455_v24 }
  0x41   : > { %1458 = vst [vmem:[%s2108_s23 + $0x74] sm:$0xf] %v1457_v25 }
  0x42   : > { %1460 = vst [vmem:[%s2108_s23 + $0x80] sm:$0xf] %v1459_v26 }
  0x43   : > { %1462 = vst [vmem:[%s2108_s23 + $0x8c] sm:$0xf] %v1461_v27 }
  0x44   : > { %1464 = vst [vmem:[%s2108_s23 + $0x98] sm:$0xf] %v1463_v28 }
  0x45   : > { %1466 = vst [vmem:[%s2108_s23 + $0xa4] sm:$0xf] %v1465_v29 }
  0x46   : > { %1468 = vst [vmem:[%s2108_s23 + $0xb0] sm:$0xf] %v1467_v30 }
  0x47   : > { %1470 = vst [vmem:[%s2108_s23 + $0xbc] sm:$0xf] %v1469_v31 }
  0x48 PF: > { %261 = sbr.rel (!%p2078_p9) target bundleno = 129 (0x81), region = 46  ;;  %s263_s28 = sand.u32 (%p2078_p9), 1, %s1946_s15  }
  0x49   : > { %s1674_s7 = smul.u32 (%p2078_p9), 96, %s1966_s20  ;;  %s2504_s1 = sld [smem:[#allocation8_spill]] (%p2078_p9) }
  0x4a   : > { %s1795_s11 = smul.u32 (%p2078_p9), 192, %s263_s28 }
  0x4b   : > { %s268_s26 = sadd.s32 (%p2078_p9), %s1970_s21, %s1674_s7 }
  0x4c   : > { %s1472_s27 = sshll.u32 (%p2078_p9), %s268_s26, 2  ;;  %s2184_s6 = scalar_lea.vmem (%p2078_p9), [#allocation4], %s1795_s11 }
  0x4f   : > { %s2179_s0 = scalar_lea.vmem %s2504_s1, %s1472_s27 }
  0x50   : > { %v287_v32 = vld [vmem:[%s2179_s0] sm:$0xf]  ;;  %v289_v33 = vld [vmem:[%s2179_s0 + $0x8] sm:$0xf]  ;;  %v291_v34 = vld [vmem:[%s2179_s0 + $0x10] sm:$0xf] }
  0x51   : > { %288 = vst [vmem:[%s2184_s6] sm:$0xf] %v287_v32  ;;  %v293_v35 = vld [vmem:[%s2179_s0 + $0x18] sm:$0xf]  ;;  %v295_v36 = vld [vmem:[%s2179_s0 + $0x20] sm:$0xf] }
  0x52   : > { %290 = vst [vmem:[%s2184_s6 + $0x4] sm:$0xf] %v289_v33  ;;  %v297_v37 = vld [vmem:[%s2179_s0 + $0x28] sm:$0xf]  ;;  %v299_v38 = vld [vmem:[%s2179_s0 + $0x30] sm:$0xf] }
  0x53   : > { %292 = vst [vmem:[%s2184_s6 + $0x8] sm:$0xf] %v291_v34  ;;  %v301_v39 = vld [vmem:[%s2179_s0 + $0x38] sm:$0xf]  ;;  %v303_v40 = vld [vmem:[%s2179_s0 + $0x40] sm:$0xf] }
  0x54   : > { %294 = vst [vmem:[%s2184_s6 + $0xc] sm:$0xf] %v293_v35  ;;  %v305_v41 = vld [vmem:[%s2179_s0 + $0x48] sm:$0xf]  ;;  %v307_v42 = vld [vmem:[%s2179_s0 + $0x50] sm:$0xf] }
  0x55   : > { %296 = vst [vmem:[%s2184_s6 + $0x10] sm:$0xf] %v295_v36  ;;  %v309_v43 = vld [vmem:[%s2179_s0 + $0x58] sm:$0xf]  ;;  %v311_v44 = vld [vmem:[%s2179_s0 + $0x60] sm:$0xf] }
  0x56   : > { %298 = vst [vmem:[%s2184_s6 + $0x14] sm:$0xf] %v297_v37  ;;  %v313_v45 = vld [vmem:[%s2179_s0 + $0x68] sm:$0xf]  ;;  %v315_v46 = vld [vmem:[%s2179_s0 + $0x70] sm:$0xf] }
  0x57   : > { %300 = vst [vmem:[%s2184_s6 + $0x18] sm:$0xf] %v299_v38  ;;  %v317_v47 = vld [vmem:[%s2179_s0 + $0x78] sm:$0xf]  ;;  %v319_v48 = vld [vmem:[%s2179_s0 + $0x80] sm:$0xf] }
  0x58   : > { %302 = vst [vmem:[%s2184_s6 + $0x1c] sm:$0xf] %v301_v39  ;;  %v321_v49 = vld [vmem:[%s2179_s0 + $0x88] sm:$0xf]  ;;  %v323_v50 = vld [vmem:[%s2179_s0 + $0x90] sm:$0xf] }
  0x59   : > { %304 = vst [vmem:[%s2184_s6 + $0x20] sm:$0xf] %v303_v40  ;;  %v325_v51 = vld [vmem:[%s2179_s0 + $0x98] sm:$0xf]  ;;  %v327_v52 = vld [vmem:[%s2179_s0 + $0xa0] sm:$0xf] }
  0x5a   : > { %306 = vst [vmem:[%s2184_s6 + $0x24] sm:$0xf] %v305_v41  ;;  %v329_v53 = vld [vmem:[%s2179_s0 + $0xa8] sm:$0xf]  ;;  %v331_v54 = vld [vmem:[%s2179_s0 + $0xb0] sm:$0xf] }
  0x5b   : > { %308 = vst [vmem:[%s2184_s6 + $0x28] sm:$0xf] %v307_v42  ;;  %v333_v55 = vld [vmem:[%s2179_s0 + $0xb8] sm:$0xf]  ;;  %v335_v56 = vld [vmem:[%s2179_s0 + $0xc0] sm:$0xf] }
  0x5c   : > { %310 = vst [vmem:[%s2184_s6 + $0x2c] sm:$0xf] %v309_v43  ;;  %v337_v57 = vld [vmem:[%s2179_s0 + $0xc8] sm:$0xf]  ;;  %v339_v58 = vld [vmem:[%s2179_s0 + $0xd0] sm:$0xf] }
  0x5d   : > { %312 = vst [vmem:[%s2184_s6 + $0x30] sm:$0xf] %v311_v44  ;;  %v341_v59 = vld [vmem:[%s2179_s0 + $0xd8] sm:$0xf]  ;;  %v343_v60 = vld [vmem:[%s2179_s0 + $0xe0] sm:$0xf] }
  0x5e   : > { %314 = vst [vmem:[%s2184_s6 + $0x34] sm:$0xf] %v313_v45  ;;  %v345_v61 = vld [vmem:[%s2179_s0 + $0xe8] sm:$0xf]  ;;  %v347_v62 = vld [vmem:[%s2179_s0 + $0xf0] sm:$0xf] }
  0x5f   : > { %316 = vst [vmem:[%s2184_s6 + $0x38] sm:$0xf] %v315_v46  ;;  %v349_v63 = vld [vmem:[%s2179_s0 + $0xf8] sm:$0xf]  ;;  %v351_v0 = vld [vmem:[%s2179_s0 + $0x100] sm:$0xf] }
  0x60   : > { %318 = vst [vmem:[%s2184_s6 + $0x3c] sm:$0xf] %v317_v47  ;;  %v353_v1 = vld [vmem:[%s2179_s0 + $0x108] sm:$0xf]  ;;  %v355_v2 = vld [vmem:[%s2179_s0 + $0x110] sm:$0xf] }
  0x61   : > { %320 = vst [vmem:[%s2184_s6 + $0x40] sm:$0xf] %v319_v48  ;;  %v357_v3 = vld [vmem:[%s2179_s0 + $0x118] sm:$0xf]  ;;  %v359_v4 = vld [vmem:[%s2179_s0 + $0x120] sm:$0xf] }
  0x62   : > { %322 = vst [vmem:[%s2184_s6 + $0x44] sm:$0xf] %v321_v49  ;;  %v361_v5 = vld [vmem:[%s2179_s0 + $0x128] sm:$0xf]  ;;  %v363_v6 = vld [vmem:[%s2179_s0 + $0x130] sm:$0xf] }
  0x63   : > { %324 = vst [vmem:[%s2184_s6 + $0x48] sm:$0xf] %v323_v50  ;;  %v365_v7 = vld [vmem:[%s2179_s0 + $0x138] sm:$0xf]  ;;  %v367_v8 = vld [vmem:[%s2179_s0 + $0x140] sm:$0xf] }
  0x64   : > { %326 = vst [vmem:[%s2184_s6 + $0x4c] sm:$0xf] %v325_v51  ;;  %v369_v9 = vld [vmem:[%s2179_s0 + $0x148] sm:$0xf]  ;;  %v371_v10 = vld [vmem:[%s2179_s0 + $0x150] sm:$0xf] }
  0x65   : > { %328 = vst [vmem:[%s2184_s6 + $0x50] sm:$0xf] %v327_v52  ;;  %v373_v11 = vld [vmem:[%s2179_s0 + $0x158] sm:$0xf]  ;;  %v375_v12 = vld [vmem:[%s2179_s0 + $0x160] sm:$0xf] }
  0x66   : > { %330 = vst [vmem:[%s2184_s6 + $0x54] sm:$0xf] %v329_v53  ;;  %v377_v13 = vld [vmem:[%s2179_s0 + $0x168] sm:$0xf]  ;;  %v379_v14 = vld [vmem:[%s2179_s0 + $0x170] sm:$0xf] }
  0x67   : > { %332 = vst [vmem:[%s2184_s6 + $0x58] sm:$0xf] %v331_v54  ;;  %v381_v15 = vld [vmem:[%s2179_s0 + $0x178] sm:$0xf] }
  0x68   : > { %334 = vst [vmem:[%s2184_s6 + $0x5c] sm:$0xf] %v333_v55 }
  0x69   : > { %336 = vst [vmem:[%s2184_s6 + $0x60] sm:$0xf] %v335_v56 }
  0x6a   : > { %338 = vst [vmem:[%s2184_s6 + $0x64] sm:$0xf] %v337_v57 }
  0x6b   : > { %340 = vst [vmem:[%s2184_s6 + $0x68] sm:$0xf] %v339_v58 }
  0x6c   : > { %342 = vst [vmem:[%s2184_s6 + $0x6c] sm:$0xf] %v341_v59 }
  0x6d   : > { %344 = vst [vmem:[%s2184_s6 + $0x70] sm:$0xf] %v343_v60 }
  0x6e   : > { %346 = vst [vmem:[%s2184_s6 + $0x74] sm:$0xf] %v345_v61 }
  0x6f   : > { %348 = vst [vmem:[%s2184_s6 + $0x78] sm:$0xf] %v347_v62 }
  0x70   : > { %350 = vst [vmem:[%s2184_s6 + $0x7c] sm:$0xf] %v349_v63 }
  0x71   : > { %352 = vst [vmem:[%s2184_s6 + $0x80] sm:$0xf] %v351_v0 }
  0x72   : > { %354 = vst [vmem:[%s2184_s6 + $0x84] sm:$0xf] %v353_v1 }
  0x73   : > { %356 = vst [vmem:[%s2184_s6 + $0x88] sm:$0xf] %v355_v2 }
  0x74   : > { %358 = vst [vmem:[%s2184_s6 + $0x8c] sm:$0xf] %v357_v3 }
  0x75   : > { %360 = vst [vmem:[%s2184_s6 + $0x90] sm:$0xf] %v359_v4 }
  0x76   : > { %362 = vst [vmem:[%s2184_s6 + $0x94] sm:$0xf] %v361_v5 }
  0x77   : > { %364 = vst [vmem:[%s2184_s6 + $0x98] sm:$0xf] %v363_v6 }
  0x78   : > { %366 = vst [vmem:[%s2184_s6 + $0x9c] sm:$0xf] %v365_v7 }
  0x79   : > { %368 = vst [vmem:[%s2184_s6 + $0xa0] sm:$0xf] %v367_v8 }
  0x7a   : > { %370 = vst [vmem:[%s2184_s6 + $0xa4] sm:$0xf] %v369_v9 }
  0x7b   : > { %372 = vst [vmem:[%s2184_s6 + $0xa8] sm:$0xf] %v371_v10 }
  0x7c   : > { %374 = vst [vmem:[%s2184_s6 + $0xac] sm:$0xf] %v373_v11 }
  0x7d   : > { %376 = vst [vmem:[%s2184_s6 + $0xb0] sm:$0xf] %v375_v12 }
  0x7e   : > { %378 = vst [vmem:[%s2184_s6 + $0xb4] sm:$0xf] %v377_v13 }
  0x7f   : > { %380 = vst [vmem:[%s2184_s6 + $0xb8] sm:$0xf] %v379_v14 }
  0x80   : > { %382 = vst [vmem:[%s2184_s6 + $0xbc] sm:$0xf] %v381_v15 }
  0x81 PF: > { %p1473_p0 = scmp.ge.s32.totalorder %s1974_s22, 1  ;;  %p507_p1 = scmp.lt.s32.totalorder %s1974_s22, 7 }
  0x83   : > { %p508_p2 = pnand %p1473_p0, %p507_p1 }
  0x84   : > { %s514_s5 = sand.u32 (!%p508_p2), 1, %s1950_s16   ;;  %s521_s23 = sand.u32 (!%p508_p2), 1, %s1942_s14  }
  0x85   : > { %511 = sbr.rel (%p508_p2) target bundleno = 454 (0x1c6), region = 91  ;;  %s547_s0 = sand.u32 (!%p508_p2), 1, %s1934_s12  }
  0x86   : > { %s1796_s28 = smul.u32 (!%p508_p2), 192, %s514_s5  ;;  %s1474_s11 = sshll.u32 (!%p508_p2), %s547_s0, 6 }
  0x87   : > { %s1797_s7 = smul.u32 (!%p508_p2), 192, %s521_s23  ;;  %p553_p3 = scmp.lt.s32.totalorder (!%p508_p2), %s1962_s19, 1 }
  0x88   : > { %s2292_s6 = scalar_lea.vmem (!%p508_p2), [#allocation3], %s1796_s28  ;;  %s2296_s25 = scalar_lea.vmem (!%p508_p2), [#allocation5], %s1474_s11 }
  0x89   : > { %s2294_s1 = scalar_lea.vmem (!%p508_p2), [#allocation4], %s1797_s7  ;;  %p1475_p4 = scmp.ne.s32.totalorder (!%p508_p2), %s1958_s18, 0 }
  0x8a   : > { %s2286_s26 = scalar_select %p553_p3, %s1962_s19, 1 }
  0x8b   : > { %560 = sbr.rel (%p1475_p4) target bundleno = 161 (0xa1), region = 103 }
  0x8c   : > { %s555_s4 = scalar_lea.vmem %s2494_s2, %s2286_s26 }
  0x90   : > { %v1976_v16 = vmov 0.0  }
  0x91   : > { %561 = vst [vmem:[#allocation2 + $0x30] sm:$0xff] %v1976_v16 }
  0x92   : > { %562 = vst [vmem:[#allocation2] sm:$0xff] %v1976_v16 }
  0x93   : > { %563 = vst [vmem:[#allocation2 + $0x58] sm:$0xff] %v1976_v16 }
  0x94   : > { %564 = vst [vmem:[#allocation2 + $0x18] sm:$0xff] %v1976_v16 }
  0x95   : > { %565 = vst [vmem:[#allocation2 + $0x50] sm:$0xff] %v1976_v16 }
  0x96   : > { %566 = vst [vmem:[#allocation2 + $0x68] sm:$0xff] %v1976_v16 }
  0x97   : > { %567 = vst [vmem:[#allocation2 + $0x8] sm:$0xff] %v1976_v16 }
  0x98   : > { %568 = vst [vmem:[#allocation2 + $0x48] sm:$0xff] %v1976_v16 }
  0x99   : > { %569 = vst [vmem:[#allocation2 + $0x40] sm:$0xff] %v1976_v16 }
  0x9a   : > { %570 = vst [vmem:[#allocation2 + $0x20] sm:$0xff] %v1976_v16 }
  0x9b   : > { %571 = vst [vmem:[#allocation2 + $0x10] sm:$0xff] %v1976_v16 }
  0x9c   : > { %572 = vst [vmem:[#allocation2 + $0x38] sm:$0xff] %v1976_v16 }
  0x9d   : > { %573 = vst [vmem:[#allocation2 + $0x60] sm:$0xff] %v1976_v16 }
  0x9e   : > { %574 = vst [vmem:[#allocation2 + $0x70] sm:$0xff] %v1976_v16 }
  0x9f   : > { %575 = vst [vmem:[#allocation2 + $0x78] sm:$0xff] %v1976_v16 }
  0xa0   : > { %576 = vst [vmem:[#allocation2 + $0x28] sm:$0xff] %v1976_v16 }
  0xa1 PF: > { %v1706_v17 = vld [vmem:[%s2294_s1 + $0x38] sm:$0xff]  ;;  %v1705_v20 = vld [vmem:[%s2294_s1 + $0x30] sm:$0xff]  ;;  %v1704_v23 = vld [vmem:[%s2294_s1 + $0x28] sm:$0xff]  ;;  %p1668_p5 = scmp.ne.s32.totalorder %s1958_s18, 2 }
  0xa2   : > { %v2301_v18 = vld [vmem:[%s2294_s1 + $0x78] sm:$0xff]  ;;  %945 = vmatpush.bf16.msra.mxu0 %v1706_v17  ;;  %1770 = vmatpush.bf16.msra.mxu3 %v1706_v17  ;;  %v2310_v21 = vld [vmem:[%s2294_s1 + $0x70] sm:$0xff]  ;;  %v1712_v24 = vld [vmem:[%s2294_s1 + $0x68] sm:$0xff] }
  0xa3   : > { %v2304_v19 = vld [vmem:[%s2294_s1 + $0xb8] sm:$0xff]  ;;  %994 = vmatpush.bf16.msra.mxu1 %v2301_v18  ;;  %v2313_v22 = vld [vmem:[%s2294_s1 + $0xb0] sm:$0xff]  ;;  %v2320_v25 = vld [vmem:[%s2294_s1 + $0xa8] sm:$0xff] }
  0xa4   : > { %1043 = vmatpush.bf16.msra.mxu2 %v2304_v19  ;;  %v1703_v26 = vld [vmem:[%s2294_s1 + $0x20] sm:$0xff]  ;;  %v1702_v29 = vld [vmem:[%s2294_s1 + $0x18] sm:$0xff]  ;;  %v1701_v32 = vld [vmem:[%s2294_s1 + $0x10] sm:$0xff] }
  0xa5   : > { %v1711_v27 = vld [vmem:[%s2294_s1 + $0x60] sm:$0xff]  ;;  %v1710_v30 = vld [vmem:[%s2294_s1 + $0x58] sm:$0xff]  ;;  %v1709_v33 = vld [vmem:[%s2294_s1 + $0x50] sm:$0xff] }
  0xa6   : > { %946 = vmatpush.bf16.msra.mxu0 %v1705_v20  ;;  %1771 = vmatpush.bf16.msra.mxu3 %v1705_v20  ;;  %v2326_v28 = vld [vmem:[%s2294_s1 + $0xa0] sm:$0xff]  ;;  %v2332_v31 = vld [vmem:[%s2294_s1 + $0x98] sm:$0xff]  ;;  %v2338_v34 = vld [vmem:[%s2294_s1 + $0x90] sm:$0xff] }
  0xa7   : > { %995 = vmatpush.bf16.msra.mxu1 %v2310_v21  ;;  %v1700_v35 = vld [vmem:[%s2294_s1 + $0x8] sm:$0xff]  ;;  %v1699_v38 = vld [vmem:[%s2294_s1] sm:$0xff]  ;;  %v1550_v43 = vld [vmem:[%s2292_s6 + $0x90] sm:$0xf] }
  0xa8   : > { %1044 = vmatpush.bf16.msra.mxu2 %v2313_v22  ;;  %v1708_v36 = vld [vmem:[%s2294_s1 + $0x48] sm:$0xff]  ;;  %v1707_v39 = vld [vmem:[%s2294_s1 + $0x40] sm:$0xff]  ;;  %v1694_v44 = vld [vmem:[%s2292_s6 + $0x98] sm:$0xf0] }
  0xa9   : > { %v2344_v37 = vld [vmem:[%s2294_s1 + $0x88] sm:$0xff]  ;;  %v2349_v40 = vld [vmem:[%s2294_s1 + $0x80] sm:$0xff]  ;;  %v1480_v46 = vld [vmem:[%s2292_s6 + $0xc] sm:$0xf0]  ;;  %v1551_v50 = vor.u32 %v1694_v44, %v1550_v43 }
  0xaa   : > { %947 = vmatpush.bf16.msra.mxu0 %v1704_v23  ;;  %1772 = vmatpush.bf16.msra.mxu3 %v1704_v23  ;;  %v1478_v41 = vld [vmem:[%s2292_s6] sm:$0xf]  ;;  %v1676_v42 = vld [vmem:[%s2292_s6 + $0x8] sm:$0xf0]  ;;  %v1675_v45 = vld [vmem:[%s2292_s6 + $0x4] sm:$0xf] }
  0xab   : > { %996 = vmatpush.bf16.msra.mxu1 %v1712_v24  ;;  %v1486_v47 = vld [vmem:[%s2292_s6 + $0x8] sm:$0xf]  ;;  %v1677_v48 = vld [vmem:[%s2292_s6 + $0x10] sm:$0xf0]  ;;  %v1479_v49 = vor.u32 %v1676_v42, %v1478_v41  ;;  %v1483_v51 = vor.u32 %v1675_v45, %v1480_v46  ;;  %v1490_v53 = vld [vmem:[%s2292_s6 + $0x18] sm:$0xf] }
  0xac   : > { %1045 = vmatpush.bf16.msra.mxu2 %v2320_v25  ;;  %v1487_v52 = vor.u32 %v1677_v48, %v1486_v47  ;;  %v1679_v54 = vld [vmem:[%s2292_s6 + $0x20] sm:$0xf0]  ;;  %v1562_v55 = vld [vmem:[%s2292_s6 + $0xa8] sm:$0xf]  ;;  %v1697_v56 = vld [vmem:[%s2292_s6 + $0xb0] sm:$0xf0] }
  0xad   : > { %v1678_v57 = vld [vmem:[%s2292_s6 + $0x1c] sm:$0xf]  ;;  %v1492_v58 = vld [vmem:[%s2292_s6 + $0x24] sm:$0xf0]  ;;  %v1498_v59 = vld [vmem:[%s2292_s6 + $0x20] sm:$0xf]  ;;  %v1491_v61 = vor.u32 %v1679_v54, %v1490_v53  ;;  %v1563_v62 = vor.u32 %v1697_v56, %v1562_v55 }
  0xae   : > { %948 = vmatpush.bf16.msra.mxu0 %v1703_v26  ;;  %1773 = vmatpush.bf16.msra.mxu3 %v1703_v26  ;;  %v1680_v60 = vld [vmem:[%s2292_s6 + $0x28] sm:$0xf0]  ;;  %v1495_v63 = vor.u32 %v1678_v57, %v1492_v58  ;;  %v1502_v1 = vld [vmem:[%s2292_s6 + $0x30] sm:$0xf]  ;;  %v1682_v2 = vld [vmem:[%s2292_s6 + $0x38] sm:$0xf0] }
  0xaf   : > { %997 = vmatpush.bf16.msra.mxu1 %v1711_v27  ;;  %v1499_v0 = vor.u32 %v1680_v60, %v1498_v59  ;;  %v1681_v3 = vld [vmem:[%s2292_s6 + $0x34] sm:$0xf]  ;;  %v1552_v5 = vld [vmem:[%s2292_s6 + $0x9c] sm:$0xf0]  ;;  %v1510_v7 = vld [vmem:[%s2292_s6 + $0x38] sm:$0xf]  ;;  %v1503_v9 = vor.u32 %v1682_v2, %v1502_v1 }
  0xb0   : > { %1046 = vmatpush.bf16.msra.mxu2 %v2326_v28  ;;  %v1693_v4 = vld [vmem:[%s2292_s6 + $0x94] sm:$0xf]  ;;  %v1504_v6 = vld [vmem:[%s2292_s6 + $0x3c] sm:$0xf0]  ;;  %v1683_v8 = vld [vmem:[%s2292_s6 + $0x40] sm:$0xf0] }
  0xb1   : > { %v1555_v10 = vor.u32 %v1693_v4, %v1552_v5  ;;  %v1507_v11 = vor.u32 %v1681_v3, %v1504_v6  ;;  %v1511_v12 = vor.u32 %v1683_v8, %v1510_v7  ;;  %v1514_v13 = vld [vmem:[%s2292_s6 + $0x48] sm:$0xf]  ;;  %v1685_v14 = vld [vmem:[%s2292_s6 + $0x50] sm:$0xf0]  ;;  %v1684_v15 = vld [vmem:[%s2292_s6 + $0x4c] sm:$0xf] }
  0xb2   : > { %949 = vmatpush.bf16.msra.mxu0 %v1702_v29  ;;  %1774 = vmatpush.bf16.msra.mxu3 %v1702_v29  ;;  %v1696_v16 = vld [vmem:[%s2292_s6 + $0xac] sm:$0xf]  ;;  %v1564_v17 = vld [vmem:[%s2292_s6 + $0xb4] sm:$0xf0]  ;;  %v1686_v20 = vld [vmem:[%s2292_s6 + $0x58] sm:$0xf0] }
  0xb3   : > { %998 = vmatpush.bf16.msra.mxu1 %v1710_v30  ;;  %v1567_v23 = vor.u32 %v1696_v16, %v1564_v17  ;;  %v1688_v26 = vld [vmem:[%s2292_s6 + $0x68] sm:$0xf0]  ;;  %v1695_v29 = vld [vmem:[%s2292_s6 + $0xa0] sm:$0xf0]  ;;  %v1570_v41 = vld [vmem:[%s2292_s6 + $0xb0] sm:$0xf] }
  0xb4   : > { %1047 = vmatpush.bf16.msra.mxu2 %v2332_v31  ;;  %v1540_v42 = vld [vmem:[%s2292_s6 + $0x84] sm:$0xf0]  ;;  %v1546_v43 = vld [vmem:[%s2292_s6 + $0x80] sm:$0xf]  ;;  %v1692_v44 = vld [vmem:[%s2292_s6 + $0x88] sm:$0xf0] }
  0xb5   : > { %v1547_v48 = vor.u32 %v1692_v44, %v1546_v43  ;;  %v577_v53 = vld [vmem:[#allocation2 + $0x30] sm:$0xff]  ;;  %v579_v5 = vld [vmem:[#allocation2 + $0x58] sm:$0xff] }
  0xb6   : > { %950 = vmatpush.bf16.msra.mxu0 %v1701_v32  ;;  %1775 = vmatpush.bf16.msra.mxu3 %v1701_v32  ;;  %v1689_v32 = vld [vmem:[%s2292_s6 + $0x70] sm:$0xf0] }
  0xb7   : > { %999 = vmatpush.bf16.msra.mxu1 %v1709_v33 }
  0xb8   : > { %1048 = vmatpush.bf16.msra.mxu2 %v2338_v34 }
  0xba   : > { %951 = vmatpush.bf16.msra.mxu0 %v1700_v35  ;;  %1776 = vmatpush.bf16.msra.mxu3 %v1700_v35 }
  0xbb   : > { %1000 = vmatpush.bf16.msra.mxu1 %v1708_v36 }
  0xbc   : > { %1049 = vmatpush.bf16.msra.mxu2 %v2344_v37 }
  0xbe   : > { %952 = vmatpush.bf16.msra.mxu0 %v1699_v38  ;;  %1777 = vmatpush.bf16.msra.mxu3 %v1699_v38  ;;  %v1691_v38 = vld [vmem:[%s2292_s6 + $0x80] sm:$0xf0] }
  0xbf   : > { %1001 = vmatpush.bf16.msra.mxu1 %v1707_v39 }
  0xc0   : > { %1050 = vmatpush.bf16.msra.mxu2 %v2349_v40 }
  0xc1   : > { %953 = vmatmul.bf16.vlgmr.msra.gmra.mxu0 %v1479_v49  ;;  %983 = vmatmul.bf16.vlgmr.msra.gmra.mxu3 %v1551_v50 }
  0xc2   : > { %1778 = vmatpush.bf16.msrb.mxu3 %v2301_v18  ;;  %1002 = vmatmul.bf16.vlgmr.msra.gmra.mxu1 %v1483_v51  ;;  %v1516_v18 = vld [vmem:[%s2292_s6 + $0x54] sm:$0xf0] }
  0xc3   : > { %1051 = vmatmul.bf16.vlgmr.msra.gmra.mxu2 %v1487_v52 }
  0xc6   : > { %1779 = vmatpush.bf16.msrb.mxu3 %v2310_v21  ;;  %v1515_v21 = vor.u32 %v1685_v14, %v1514_v13  ;;  %v580_v13 = vld [vmem:[#allocation2 + $0x18] sm:$0xff] }
  0xca   : > { %1780 = vmatpush.bf16.msrb.mxu3 %v1712_v24 }
  0xce   : > { %1781 = vmatpush.bf16.msrb.mxu3 %v1711_v27  ;;  %v1687_v27 = vld [vmem:[%s2292_s6 + $0x64] sm:$0xf] }
  0xd1   : > { %958 = vmatmul.bf16.gmra.mxu0 %v1491_v61  ;;  %988 = vmatmul.bf16.gmra.mxu3 %v1563_v62  ;;  %v578_v61 = vld [vmem:[#allocation2] sm:$0xff] }
  0xd2   : > { %1782 = vmatpush.bf16.msrb.mxu3 %v1710_v30  ;;  %1007 = vmatmul.bf16.gmra.mxu1 %v1495_v63  ;;  %v1528_v30 = vld [vmem:[%s2292_s6 + $0x6c] sm:$0xf0] }
  0xd3   : > { %1056 = vmatmul.bf16.gmra.mxu2 %v1499_v0  ;;  %v1531_v35 = vor.u32 %v1687_v27, %v1528_v30 }
  0xd6   : > { %1783 = vmatpush.bf16.msrb.mxu3 %v1709_v33 }
  0xda   : > { %1784 = vmatpush.bf16.msrb.mxu3 %v1708_v36 }
  0xde   : > { %1785 = vmatpush.bf16.msrb.mxu3 %v1707_v39  ;;  %v1690_v39 = vld [vmem:[%s2292_s6 + $0x7c] sm:$0xf] }
  0xdf   : > { %v1543_v47 = vor.u32 %v1690_v39, %v1540_v42 }
  0xe1   : > { %963 = vmatmul.bf16.gmra.mxu0 %v1503_v9  ;;  %1032 = vmatmul.bf16.vlgmr.msrb.gmra.mxu3 %v1555_v10 }
  0xe2   : > { %1786 = vmatpush.bf16.msra.mxu3 %v2304_v19  ;;  %1012 = vmatmul.bf16.gmra.mxu1 %v1507_v11  ;;  %v1522_v19 = vld [vmem:[%s2292_s6 + $0x50] sm:$0xf] }
  0xe3   : > { %1061 = vmatmul.bf16.gmra.mxu2 %v1511_v12  ;;  %v1523_v24 = vor.u32 %v1686_v20, %v1522_v19 }
  0xe6   : > { %1787 = vmatpush.bf16.msra.mxu3 %v2313_v22  ;;  %v1519_v22 = vor.u32 %v1684_v15, %v1516_v18 }
  0xea   : > { %1788 = vmatpush.bf16.msra.mxu3 %v2320_v25  ;;  %v1526_v25 = vld [vmem:[%s2292_s6 + $0x60] sm:$0xf] }
  0xeb   : > { %v1527_v33 = vor.u32 %v1688_v26, %v1526_v25 }
  0xee   : > { %1789 = vmatpush.bf16.msra.mxu3 %v2326_v28  ;;  %v1558_v28 = vld [vmem:[%s2292_s6 + $0x98] sm:$0xf] }
  0xf1   : > { %968 = vmatmul.bf16.gmra.mxu0 %v1515_v21  ;;  %1037 = vmatmul.bf16.gmra.mxu3 %v1567_v23  ;;  %v581_v21 = vld [vmem:[#allocation2 + $0x50] sm:$0xff] }
  0xf2   : > { %1790 = vmatpush.bf16.msra.mxu3 %v2332_v31  ;;  %1017 = vmatmul.bf16.gmra.mxu1 %v1519_v22  ;;  %v1534_v31 = vld [vmem:[%s2292_s6 + $0x68] sm:$0xf] }
  0xf3   : > { %1066 = vmatmul.bf16.gmra.mxu2 %v1523_v24  ;;  %v1535_v36 = vor.u32 %v1689_v32, %v1534_v31 }
  0xf6   : > { %1791 = vmatpush.bf16.msra.mxu3 %v2338_v34  ;;  %v1559_v34 = vor.u32 %v1695_v29, %v1558_v28  ;;  %v582_v29 = vld [vmem:[#allocation2 + $0x68] sm:$0xff] }
  0xfa   : > { %1792 = vmatpush.bf16.msra.mxu3 %v2344_v37  ;;  %v1538_v37 = vld [vmem:[%s2292_s6 + $0x78] sm:$0xf] }
  0xfb   : > { %v1539_v45 = vor.u32 %v1691_v38, %v1538_v37  ;;  %v583_v37 = vld [vmem:[#allocation2 + $0x8] sm:$0xff] }
  0xfe   : > { %1793 = vmatpush.bf16.msra.mxu3 %v2349_v40  ;;  %v1698_v40 = vld [vmem:[%s2292_s6 + $0xb8] sm:$0xf0] }
  0xff   : > { %v1571_v46 = vor.u32 %v1698_v40, %v1570_v41 }
 0x101   : > { %973 = vmatmul.bf16.gmra.mxu0 %v1527_v33  ;;  %1081 = vmatmul.bf16.vlgmr.msra.gmra.mxu3 %v1559_v34 }
 0x102   : > { %1022 = vmatmul.bf16.gmra.mxu1 %v1531_v35 }
 0x103   : > { %1071 = vmatmul.bf16.gmra.mxu2 %v1535_v36 }
 0x111   : > { %978 = vmatmul.bf16.gmra.mxu0 %v1539_v45  ;;  %1086 = vmatmul.bf16.gmra.mxu3 %v1571_v46  ;;  %v584_v45 = vld [vmem:[#allocation2 + $0x48] sm:$0xff] }
 0x112   : > { %1027 = vmatmul.bf16.gmra.mxu1 %v1543_v47 }
 0x113   : > { %1076 = vmatmul.bf16.gmra.mxu2 %v1547_v48 }
 0x13e   : > { %v954_v49 = vpop.f32.mrf.mxu0 }
 0x13f   : > { %v1003_v50 = vpop.f32.mrf.mxu1 }
 0x140   : > { %v1004_v51 = vadd.f32 %v1003_v50, %v954_v49 }
 0x144   : > { %v2411_v52 = vpop.f32.mrf.mxu3 }
 0x146   : > { %v1052_v54 = vpop.f32.mrf.mxu2  ;;  %v956_v56 = vpop.f32.mrf.mxu0 }
 0x147   : > { %v1053_v55 = vadd.f32 %v1052_v54, %v1004_v51  ;;  %v1005_v57 = vpop.f32.mrf.mxu1  ;;  %v589_v54 = vld [vmem:[#allocation2 + $0x60] sm:$0xff] }
 0x148   : > { %v1006_v59 = vadd.f32 %v1005_v57, %v956_v56  ;;  %v585_v56 = vld [vmem:[#allocation2 + $0x40] sm:$0xff] }
 0x149   : > { %v1092_v58 = vadd.f32 %v1053_v55, %v577_v53 }
 0x14b   : > { %1108 = vst [vmem:[#allocation2 + $0x30] sm:$0xff] %v1092_v58 }
 0x14c   : > { %v2413_v60 = vpop.f32.mrf.mxu3 }
 0x14e   : > { %v1054_v62 = vpop.f32.mrf.mxu2  ;;  %v959_v0 = vpop.f32.mrf.mxu0 }
 0x14f   : > { %v1055_v63 = vadd.f32 %v1054_v62, %v1006_v59  ;;  %v1008_v1 = vpop.f32.mrf.mxu1 }
 0x150   : > { %v1009_v3 = vadd.f32 %v1008_v1, %v959_v0 }
 0x151   : > { %v1093_v2 = vadd.f32 %v1055_v63, %v578_v61 }
 0x153   : > { %1109 = vst [vmem:[#allocation2] sm:$0xff] %v1093_v2 }
 0x154   : > { %v2415_v4 = vpop.f32.mrf.mxu3 }
 0x156   : > { %v1057_v6 = vpop.f32.mrf.mxu2  ;;  %v961_v8 = vpop.f32.mrf.mxu0 }
 0x157   : > { %v1058_v7 = vadd.f32 %v1057_v6, %v1009_v3  ;;  %v1010_v9 = vpop.f32.mrf.mxu1  ;;  %v590_v3 = vld [vmem:[#allocation2 + $0x70] sm:$0xff]  ;;  %v586_v6 = vld [vmem:[#allocation2 + $0x20] sm:$0xff] }
 0x158   : > { %v1011_v11 = vadd.f32 %v1010_v9, %v961_v8 }
 0x159   : > { %v1094_v10 = vadd.f32 %v1058_v7, %v579_v5 }
 0x15b   : > { %1110 = vst [vmem:[#allocation2 + $0x58] sm:$0xff] %v1094_v10 }
 0x15c   : > { %v2417_v12 = vpop.f32.mrf.mxu3 }
 0x15e   : > { %v1059_v14 = vpop.f32.mrf.mxu2  ;;  %v964_v16 = vpop.f32.mrf.mxu0 }
 0x15f   : > { %v1060_v15 = vadd.f32 %v1059_v14, %v1011_v11  ;;  %v1013_v17 = vpop.f32.mrf.mxu1 }
 0x160   : > { %v1014_v19 = vadd.f32 %v1013_v17, %v964_v16  ;;  %v591_v16 = vld [vmem:[#allocation2 + $0x78] sm:$0xff] }
 0x161   : > { %v1095_v18 = vadd.f32 %v1060_v15, %v580_v13 }
 0x163   : > { %1111 = vst [vmem:[#allocation2 + $0x18] sm:$0xff] %v1095_v18  ;;  %v587_v18 = vld [vmem:[#allocation2 + $0x10] sm:$0xff] }
 0x164   : > { %v1033_v20 = vpop.f32.mrf.mxu3 }
 0x165   : > { %v1034_v53 = vadd.f32 %v1033_v20, %v2411_v52 }
 0x166   : > { %v1062_v23 = vpop.f32.mrf.mxu2  ;;  %v966_v24 = vpop.f32.mrf.mxu0 }
 0x167   : > { %v1063_v22 = vadd.f32 %v1062_v23, %v1014_v19  ;;  %v1015_v25 = vpop.f32.mrf.mxu1 }
 0x168   : > { %v1016_v27 = vadd.f32 %v1015_v25, %v966_v24 }
 0x169   : > { %v1096_v26 = vadd.f32 %v1063_v22, %v581_v21 }
 0x16b   : > { %1112 = vst [vmem:[#allocation2 + $0x50] sm:$0xff] %v1096_v26 }
 0x16c   : > { %v1035_v28 = vpop.f32.mrf.mxu3 }
 0x16d   : > { %v1036_v1 = vadd.f32 %v1035_v28, %v2413_v60 }
 0x16e   : > { %v1064_v30 = vpop.f32.mrf.mxu2  ;;  %v969_v32 = vpop.f32.mrf.mxu0 }
 0x16f   : > { %v1065_v31 = vadd.f32 %v1064_v30, %v1016_v27  ;;  %v1018_v33 = vpop.f32.mrf.mxu1  ;;  %v592_v27 = vld [vmem:[#allocation2 + $0x28] sm:$0xff] }
 0x170   : > { %v1019_v35 = vadd.f32 %v1018_v33, %v969_v32 }
 0x171   : > { %v1097_v34 = vadd.f32 %v1065_v31, %v582_v29  ;;  %v588_v29 = vld [vmem:[#allocation2 + $0x38] sm:$0xff] }
 0x173   : > { %1113 = vst [vmem:[#allocation2 + $0x68] sm:$0xff] %v1097_v34 }
 0x174   : > { %v1038_v36 = vpop.f32.mrf.mxu3 }
 0x175   : > { %v1039_v15 = vadd.f32 %v1038_v36, %v2415_v4 }
 0x176   : > { %v1067_v38 = vpop.f32.mrf.mxu2  ;;  %v971_v41 = vpop.f32.mrf.mxu0 }
 0x177   : > { %v1068_v39 = vadd.f32 %v1067_v38, %v1019_v35  ;;  %v1020_v40 = vpop.f32.mrf.mxu1 }
 0x178   : > { %v1021_v43 = vadd.f32 %v1020_v40, %v971_v41 }
 0x179   : > { %v1098_v42 = vadd.f32 %v1068_v39, %v583_v37 }
 0x17b   : > { %1114 = vst [vmem:[#allocation2 + $0x8] sm:$0xff] %v1098_v42 }
 0x17c   : > { %v1040_v44 = vpop.f32.mrf.mxu3 }
 0x17d   : > { %v1041_v25 = vadd.f32 %v1040_v44, %v2417_v12 }
 0x17e   : > { %v1069_v46 = vpop.f32.mrf.mxu2  ;;  %v974_v48 = vpop.f32.mrf.mxu0 }
 0x17f   : > { %v1070_v47 = vadd.f32 %v1069_v46, %v1021_v43  ;;  %v1023_v49 = vpop.f32.mrf.mxu1 }
 0x180   : > { %v1024_v51 = vadd.f32 %v1023_v49, %v974_v48 }
 0x181   : > { %v1099_v50 = vadd.f32 %v1070_v47, %v584_v45 }
 0x183   : > { %1115 = vst [vmem:[#allocation2 + $0x48] sm:$0xff] %v1099_v50 }
 0x184   : > { %v1082_v55 = vpop.f32.mrf.mxu3 }
 0x185   : > { %v1083_v58 = vadd.f32 %v1082_v55, %v1034_v53 }
 0x186   : > { %v1072_v57 = vpop.f32.mrf.mxu2  ;;  %v976_v61 = vpop.f32.mrf.mxu0 }
 0x187   : > { %v1073_v59 = vadd.f32 %v1072_v57, %v1024_v51  ;;  %v1104_v62 = vadd.f32 %v1083_v58, %v589_v54  ;;  %v1025_v63 = vpop.f32.mrf.mxu1 }
 0x188   : > { %v1026_v2 = vadd.f32 %v1025_v63, %v976_v61 }
 0x189   : > { %v1100_v0 = vadd.f32 %v1073_v59, %v585_v56  ;;  %1120 = vst [vmem:[#allocation2 + $0x60] sm:$0xff] %v1104_v62 }
 0x18b   : > { %1116 = vst [vmem:[#allocation2 + $0x40] sm:$0xff] %v1100_v0 }
 0x18c   : > { %v1084_v5 = vpop.f32.mrf.mxu3 }
 0x18d   : > { %v1085_v52 = vadd.f32 %v1084_v5, %v1036_v1 }
 0x18e   : > { %v1074_v7 = vpop.f32.mrf.mxu2  ;;  %v979_v10 = vpop.f32.mrf.mxu0 }
 0x18f   : > { %v1075_v8 = vadd.f32 %v1074_v7, %v1026_v2  ;;  %v1105_v9 = vadd.f32 %v1085_v52, %v590_v3  ;;  %v1028_v11 = vpop.f32.mrf.mxu1 }
 0x190   : > { %v1029_v14 = vadd.f32 %v1028_v11, %v979_v10 }
 0x191   : > { %v1101_v13 = vadd.f32 %v1075_v8, %v586_v6  ;;  %1121 = vst [vmem:[#allocation2 + $0x70] sm:$0xff] %v1105_v9 }
 0x193   : > { %1117 = vst [vmem:[#allocation2 + $0x20] sm:$0xff] %v1101_v13 }
 0x194   : > { %v1087_v17 = vpop.f32.mrf.mxu3 }
 0x195   : > { %v1088_v19 = vadd.f32 %v1087_v17, %v1039_v15 }
 0x196   : > { %v1077_v60 = vpop.f32.mrf.mxu2  ;;  %v981_v22 = vpop.f32.mrf.mxu0 }
 0x197   : > { %v1078_v20 = vadd.f32 %v1077_v60, %v1029_v14  ;;  %v1106_v21 = vadd.f32 %v1088_v19, %v591_v16  ;;  %v1030_v24 = vpop.f32.mrf.mxu1 }
 0x198   : > { %v1031_v26 = vadd.f32 %v1030_v24, %v981_v22 }
 0x199   : > { %v1102_v23 = vadd.f32 %v1078_v20, %v587_v18  ;;  %1122 = vst [vmem:[#allocation2 + $0x78] sm:$0xff] %v1106_v21 }
 0x19b   : > { %1118 = vst [vmem:[#allocation2 + $0x10] sm:$0xff] %v1102_v23 }
 0x19c   : > { %v1089_v28 = vpop.f32.mrf.mxu3 }
 0x19d   : > { %v1090_v4 = vadd.f32 %v1089_v28, %v1041_v25 }
 0x19e   : > { %v1079_v30 = vpop.f32.mrf.mxu2 }
 0x19f   : > { %v1080_v31 = vadd.f32 %v1079_v30, %v1031_v26  ;;  %v1107_v32 = vadd.f32 %v1090_v4, %v592_v27  ;;  %1127 = sbr.rel (%p1668_p5) target bundleno = 436 (0x1b4), region = 107 }
 0x1a1   : > { %v1103_v33 = vadd.f32 %v1080_v31, %v588_v29  ;;  %1123 = vst [vmem:[#allocation2 + $0x28] sm:$0xff] %v1107_v32 }
 0x1a3   : > { %1119 = vst [vmem:[#allocation2 + $0x38] sm:$0xff] %v1103_v33 }
 0x1a4   : > { %v1128_v34 = vld [vmem:[#allocation2 + $0x30] sm:$0xff]  ;;  %v1129_v35 = vld [vmem:[#allocation2] sm:$0xff]  ;;  %v1130_v36 = vld [vmem:[#allocation2 + $0x58] sm:$0xff] }
 0x1a5   : > { %v1887_v12 = vld [vmem:[%s555_s4] ss:$0 sm:$0xff]  ;;  %v1131_v37 = vld [vmem:[#allocation2 + $0x18] sm:$0xff]  ;;  %v1132_v38 = vld [vmem:[#allocation2 + $0x50] sm:$0xff] }
 0x1a6   : > { %v1133_v39 = vld [vmem:[#allocation2 + $0x68] sm:$0xff]  ;;  %v1148_v40 = vadd.f32 %v1887_v12, %v1128_v34  ;;  %v1149_v42 = vadd.f32 %v1887_v12, %v1129_v35  ;;  %v1150_v43 = vadd.f32 %v1887_v12, %v1130_v36  ;;  %v1151_v44 = vadd.f32 %v1887_v12, %v1131_v37  ;;  %v1136_v50 = vld [vmem:[#allocation2 + $0x40] sm:$0xff]  ;;  %v1138_v57 = vld [vmem:[#allocation2 + $0x10] sm:$0xff] }
 0x1a7   : > { %v1134_v41 = vld [vmem:[#allocation2 + $0x8] sm:$0xff]  ;;  %v1152_v46 = vadd.f32 %v1887_v12, %v1132_v38  ;;  %v1153_v47 = vadd.f32 %v1887_v12, %v1133_v39  ;;  %v1137_v51 = vld [vmem:[#allocation2 + $0x20] sm:$0xff]  ;;  %v1141_v1 = vld [vmem:[#allocation2 + $0x70] sm:$0xff]  ;;  %v1156_v5 = vadd.f32 %v1887_v12, %v1136_v50  ;;  %v1158_v10 = vadd.f32 %v1887_v12, %v1138_v57 }
 0x1a8   : > { %v1135_v45 = vld [vmem:[#allocation2 + $0x48] sm:$0xff]  ;;  %v1154_v48 = vadd.f32 %v1887_v12, %v1134_v41  ;;  %v1164_v53 = vmax.f32 %v1148_v40, 0.0  ;;  %v1165_v54 = vmax.f32 %v1149_v42, 0.0  ;;  %v1166_v55 = vmax.f32 %v1150_v43, 0.0  ;;  %v1140_v0 = vld [vmem:[#allocation2 + $0x60] sm:$0xff]  ;;  %v1142_v7 = vld [vmem:[#allocation2 + $0x78] sm:$0xff] }
 0x1a9   : > { %v1155_v49 = vadd.f32 %v1887_v12, %v1135_v45  ;;  %v1167_v56 = vmax.f32 %v1151_v44, 0.0  ;;  %v1168_v59 = vmax.f32 %v1152_v46, 0.0  ;;  %v1169_v61 = vmax.f32 %v1153_v47, 0.0  ;;  %v1143_v52 = vld [vmem:[#allocation2 + $0x28] sm:$0xff] }
 0x1aa   : > { %v1139_v58 = vld [vmem:[#allocation2 + $0x38] sm:$0xff]  ;;  %v1170_v62 = vmax.f32 %v1154_v48, 0.0  ;;  %v1726_v2 = vpack.c.bf16 %v1165_v54, %v1164_v53  ;;  %v1157_v6 = vadd.f32 %v1887_v12, %v1137_v51  ;;  %v1172_v13 = vmax.f32 %v1156_v5, 0.0 }
 0x1ab   : > { %v1171_v63 = vmax.f32 %v1155_v49, 0.0  ;;  %v1731_v3 = vpack.c.bf16 %v1167_v56, %v1166_v55  ;;  %v1736_v8 = vpack.c.bf16 %v1169_v61, %v1168_v59  ;;  %v1159_v11 = vadd.f32 %v1887_v12, %v1139_v58 }
 0x1ac   : > { %1727 = vst [vmem:[%s2296_s25] sm:$0xff] %v1726_v2   ;;  %v1173_v14 = vmax.f32 %v1157_v6, 0.0  ;;  %v1160_v15 = vadd.f32 %v1887_v12, %v1140_v0  ;;  %v1161_v16 = vadd.f32 %v1887_v12, %v1141_v1  ;;  %v1174_v17 = vmax.f32 %v1158_v10, 0.0 }
 0x1ad   : > { %v1741_v9 = vpack.c.bf16 %v1171_v63, %v1170_v62  ;;  %1763 = vst [vmem:[%s2296_s25 + $0x8] sm:$0xff] %v1731_v3   ;;  %v1175_v18 = vmax.f32 %v1159_v11, 0.0  ;;  %v1162_v60 = vadd.f32 %v1887_v12, %v1142_v7  ;;  %v1163_v19 = vadd.f32 %v1887_v12, %v1143_v52 }
 0x1ae   : > { %1764 = vst [vmem:[%s2296_s25 + $0x10] sm:$0xff] %v1736_v8   ;;  %v1746_v20 = vpack.c.bf16 %v1173_v14, %v1172_v13  ;;  %v1176_v21 = vmax.f32 %v1160_v15, 0.0  ;;  %v1177_v23 = vmax.f32 %v1161_v16, 0.0 }
 0x1af   : > { %1765 = vst [vmem:[%s2296_s25 + $0x18] sm:$0xff] %v1741_v9   ;;  %v1751_v22 = vpack.c.bf16 %v1175_v18, %v1174_v17  ;;  %v1178_v24 = vmax.f32 %v1162_v60, 0.0  ;;  %v1179_v25 = vmax.f32 %v1163_v19, 0.0 }
 0x1b0   : > { %1766 = vst [vmem:[%s2296_s25 + $0x20] sm:$0xff] %v1746_v20   ;;  %v1756_v26 = vpack.c.bf16 %v1177_v23, %v1176_v21 }
 0x1b1   : > { %1767 = vst [vmem:[%s2296_s25 + $0x28] sm:$0xff] %v1751_v22   ;;  %v1761_v27 = vpack.c.bf16 %v1179_v25, %v1178_v24 }
 0x1b2   : > { %1768 = vst [vmem:[%s2296_s25 + $0x30] sm:$0xff] %v1756_v26  }
 0x1b3   : > { %1769 = vst [vmem:[%s2296_s25 + $0x38] sm:$0xff] %v1761_v27  }
 0x1b4 PF: > { %1218 = sbr.rel (!%p2091_p12) target bundleno = 454 (0x1c6), region = 111  ;;  %s1670_s14 = sshll.u32 (%p2091_p12), %s1962_s19, 2  ;;  %v1240_v28 = vld [vmem:[%s2296_s25] sm:$0xf] (%p2091_p12)  ;;  %v1242_v29 = vld [vmem:[%s2296_s25 + $0x4] sm:$0xf] (%p2091_p12) }
 0x1b5   : > { %s1223_s5 = scalar_lea.vmem (%p2091_p12), %s2495_s3, %s1670_s14  ;;  %v1244_v30 = vld [vmem:[%s2296_s25 + $0x8] sm:$0xf] (%p2091_p12)  ;;  %v1246_v4 = vld [vmem:[%s2296_s25 + $0xc] sm:$0xf] (%p2091_p12)  ;;  %v1248_v31 = vld [vmem:[%s2296_s25 + $0x10] sm:$0xf] (%p2091_p12) }
 0x1b6   : > { %1241 = vst [vmem:[%s1223_s5] sm:$0xf] (%p2091_p12), %v1240_v28  ;;  %v1250_v32 = vld [vmem:[%s2296_s25 + $0x14] sm:$0xf] (%p2091_p12)  ;;  %v1252_v33 = vld [vmem:[%s2296_s25 + $0x18] sm:$0xf] (%p2091_p12) }
 0x1b7   : > { %1243 = vst [vmem:[%s1223_s5 + $0x8] sm:$0xf] (%p2091_p12), %v1242_v29  ;;  %v1254_v34 = vld [vmem:[%s2296_s25 + $0x1c] sm:$0xf] (%p2091_p12)  ;;  %v1256_v35 = vld [vmem:[%s2296_s25 + $0x20] sm:$0xf] (%p2091_p12) }
 0x1b8   : > { %1245 = vst [vmem:[%s1223_s5 + $0x10] sm:$0xf] (%p2091_p12), %v1244_v30  ;;  %v1258_v12 = vld [vmem:[%s2296_s25 + $0x24] sm:$0xf] (%p2091_p12)  ;;  %v1260_v36 = vld [vmem:[%s2296_s25 + $0x28] sm:$0xf] (%p2091_p12) }
 0x1b9   : > { %1247 = vst [vmem:[%s1223_s5 + $0x18] sm:$0xf] %v1246_v4  ;;  %v1262_v37 = vld [vmem:[%s2296_s25 + $0x2c] sm:$0xf]  ;;  %v1264_v38 = vld [vmem:[%s2296_s25 + $0x30] sm:$0xf] }
 0x1ba   : > { %1249 = vst [vmem:[%s1223_s5 + $0x20] sm:$0xf] %v1248_v31  ;;  %v1266_v39 = vld [vmem:[%s2296_s25 + $0x34] sm:$0xf]  ;;  %v1268_v41 = vld [vmem:[%s2296_s25 + $0x38] sm:$0xf] }
 0x1bb   : > { %1251 = vst [vmem:[%s1223_s5 + $0x28] sm:$0xf] %v1250_v32  ;;  %v1270_v40 = vld [vmem:[%s2296_s25 + $0x3c] sm:$0xf] }
 0x1bc   : > { %1253 = vst [vmem:[%s1223_s5 + $0x30] sm:$0xf] %v1252_v33 }
 0x1bd   : > { %1255 = vst [vmem:[%s1223_s5 + $0x38] sm:$0xf] %v1254_v34 }
 0x1be   : > { %1257 = vst [vmem:[%s1223_s5 + $0x40] sm:$0xf] %v1256_v35 }
 0x1bf   : > { %1259 = vst [vmem:[%s1223_s5 + $0x48] sm:$0xf] %v1258_v12 }
 0x1c0   : > { %1261 = vst [vmem:[%s1223_s5 + $0x50] sm:$0xf] %v1260_v36 }
 0x1c1   : > { %1263 = vst [vmem:[%s1223_s5 + $0x58] sm:$0xf] %v1262_v37 }
 0x1c2   : > { %1265 = vst [vmem:[%s1223_s5 + $0x60] sm:$0xf] %v1264_v38 }
 0x1c3   : > { %1267 = vst [vmem:[%s1223_s5 + $0x68] sm:$0xf] %v1266_v39 }
 0x1c4   : > { %1269 = vst [vmem:[%s1223_s5 + $0x70] sm:$0xf] %v1268_v41 }
 0x1c5   : > { %1271 = vst [vmem:[%s1223_s5 + $0x78] sm:$0xf] %v1270_v40 }
 0x1c6 PF: > { %s13_s22 = sadd.s32 1, %s1974_s22   ;;  %s2505_s10 = sld [smem:[#allocation6_spill]] }
 0x1c7   : > { %p10_p6 = scmp.ge.s32.totalorder %s13_s22, 8   ;;  %s2506_s12 = smov %s1938_s13 }
 0x1c8   : > { %s2507_s13 = smov %s2089_s9  ;;  %s2508_s14 = smov %s1946_s15 }
 0x1c9   : > { %s2509_s15 = smov %s2086_s8  ;;  %s2510_s16 = smov %s1954_s17 }
 0x1ca   : > { %s2511_s17 = smov %s2072_s30  ;;  %s2512_s18 = smov %s1966_s20 }
 0x1cb   : > { %s2513_s19 = smov %s1970_s21  ;;  %s2514_s20 = smov %s2517_s24 }
 0x1cc   : > { %s2515_s21 = smov %s2505_s10  ;;  %12 = sbr.rel (!%p10_p6) target bundleno = 9 (0x9), region = 200 }

// kernel: convnet_forward.20
= control target key start
LH: loop header
LB: loop body
LE: loop exit
PB: predicated region body
PF: predicated region fallthrough
CT: control target
= control target key end

     0   :  { %s2492_s0 = inlined_call_operand.vmem [shape: bf16[128,2304], index: 0, kind: input, shape index: {}]   ;;  %s2493_s1 = inlined_call_operand.vmem [shape: bf16[2304,256], index: 1, kind: input, shape index: {}]   ;;  %s2494_s2 = inlined_call_operand.vmem [shape: f32[1,256], index: 2, kind: input, shape index: {}]   ;;  %s2495_s3 = inlined_call_operand.vmem [shape: bf16[128,256], index: 3, kind: output, shape index: {}]  }
   0x1   :  { %2497 = sst [smem:[#allocation7_spill]] %s2492_s0 }
   0x2   :  { %2498 = sst [smem:[#allocation8_spill]] %s2493_s1 }
   0x3   :  { %s1997_s12 = smov 0   ;;  %s1999_s13 = smov 0  }
   0x4   :  { %s2001_s14 = smov 0   ;;  %s2003_s15 = smov 0  }
   0x5   :  { %s2005_s16 = smov 0   ;;  %s2007_s17 = smov 0  }
   0x6   :  { %s2009_s18 = smov 0   ;;  %s2011_s19 = smov 0  }
   0x7   :  { %s2013_s20 = smov 0   ;;  %s2015_s21 = smov 0  }
   0x8   :  { %s2017_s22 = smov 0  }
   0x9 LB: > { %s1434_s23 = sadd.s32 4294967295, %s1974_s22   ;;  %s25_s24 = sadd.s32 1, %s1966_s20  ;;  %s1974_s22 = sphi %s2017_s22, %s13_s22   ;;  %s1970_s21 = sphi %s2015_s21, %s2515_s21   ;;  %s1966_s20 = sphi %s2013_s20, %s2514_s20   ;;  %s1962_s19 = sphi %s2011_s19, %s2513_s19   ;;  %s1958_s18 = sphi %s2009_s18, %s2512_s18   ;;  %s1954_s17 = sphi %s2007_s17, %s2511_s17   ;;  %s1950_s16 = sphi %s2005_s16, %s2510_s16   ;;  %s1946_s15 = sphi %s2003_s15, %s2509_s15   ;;  %s1942_s14 = sphi %s2001_s14, %s2508_s14   ;;  %s1938_s13 = sphi %s1999_s13, %s2507_s13   ;;  %s1934_s12 = sphi %s1997_s12, %s2506_s12  }
   0xa   : > { %p26_p0 = scmp.ge.s32.totalorder %s25_s24, 6  ;;  %s28_s25 = sadd.s32 1, %s1970_s21 }
   0xb   : > { %s41_s26 = sadd.s32 1, %s1954_s17  ;;  %p48_p1 = scmp.ne.s32.totalorder %s1954_s17, %s1950_s16 }
   0xc   : > { %s2517_s24 = smov (%p26_p0, %s25_s24), 0  ;;  %s2519_s25 = smov (!%p26_p0, %s28_s25), %s1970_s21 }
   0xd   : > { %s37_s27 = ssub.s32 %s1966_s20, %s2517_s24  ;;  %p49_p2 = scmp.eq.s32.totalorder %s1974_s22, 0 }
   0xe   : > { %p30_p3 = scmp.ge.s32.totalorder %s2519_s25, 2  ;;  %p39_p4 = scmp.eq.s32.totalorder %s37_s27, 0 }
   0xf   : > { %p2064_p5 = por %p49_p2, %p48_p1  ;;  %s69_s29 = sadd.s32 1, %s1946_s15 }
  0x10   : > { %s2521_s25 = smov (%p30_p3, %s2519_s25), 0  ;;  %p76_p6 = scmp.ne.s32.totalorder %s1946_s15, %s1942_s14 }
  0x11   : > { %2500 = sst [smem:[#allocation6_spill]] %s2521_s25  ;;  %s65_s4 = ssub.s32 %s1970_s21, %s2521_s25 }
  0x12   : > { %s2072_s30 = scalar_select %p39_p4, %s1954_s17, %s41_s26  }
  0x13   : > { %s66_s5 = sor.u32 %s65_s4, %s37_s27  ;;  %p121_p7 = scmp.eq.s32.totalorder %s65_s4, 0 }
  0x14   : > { %p67_p8 = scmp.eq.s32.totalorder %s66_s5, 0  ;;  %p2078_p9 = por %p76_p6, %p49_p2 }
  0x15   : > { %s123_s7 = sadd.s32 1, %s1938_s13  ;;  %p133_p10 = scmp.ne.s32.totalorder %s1938_s13, %s1934_s12 }
  0x16   : > { %s2086_s8 = scalar_select %p67_p8, %s1946_s15, %s69_s29  }
  0x17   : > { %s2089_s9 = scalar_select %p121_p7, %s1938_s13, %s123_s7  }
  0x18   : > { %p134_p11 = scmp.eq.s32.totalorder %s1434_s23, 11  ;;  %p1437_p13 = scmp.ge.s32.totalorder %s1974_s22, 12 }
  0x1a   : > { %p2091_p12 = por %p134_p11, %p133_p10  ;;  %156 = sbr.rel (%p1437_p13) target bundleno = 129 (0x81), region = 16 }
  0x1f   : > { %159 = sbr.rel (!%p2064_p5) target bundleno = 72 (0x48), region = 20  ;;  %s161_s11 = sand.u32 (%p2064_p5), 1, %s1954_s17  }
  0x20   : > { %s1673_s26 = smul.u32 (%p2064_p5), 12, %s1966_s20  ;;  %s2503_s0 = sld [smem:[#allocation7_spill]] (%p2064_p5) }
  0x21   : > { %s1794_s27 = smul.u32 (%p2064_p5), 192, %s161_s11 }
  0x23   : > { %s2108_s23 = scalar_lea.vmem (%p2064_p5), [#allocation3], %s1794_s27 }
  0x26   : > { %s2103_s5 = scalar_lea.vmem %s2503_s0, %s1673_s26 }
  0x27   : > { %v184_v0 = vld [vmem:[%s2103_s5] sm:$0xff]  ;;  %v186_v1 = vld [vmem:[%s2103_s5 + $0x48] sm:$0xff]  ;;  %v188_v2 = vld [vmem:[%s2103_s5 + $0x90] sm:$0xff] }
  0x28   : > { %185 = vst [vmem:[%s2108_s23] sm:$0xff] %v184_v0  ;;  %v190_v3 = vld [vmem:[%s2103_s5 + $0xd8] sm:$0xff]  ;;  %v192_v4 = vld [vmem:[%s2103_s5 + $0x120] sm:$0xff]  ;;  %v194_v5 = vld [vmem:[%s2103_s5 + $0x168] sm:$0xff] }
  0x29   : > { %187 = vst [vmem:[%s2108_s23 + $0xc] sm:$0xff] %v186_v1  ;;  %v196_v6 = vld [vmem:[%s2103_s5 + $0x1b0] sm:$0xff]  ;;  %v198_v7 = vld [vmem:[%s2103_s5 + $0x1f8] sm:$0xff]  ;;  %v200_v8 = vld [vmem:[%s2103_s5 + $0x240] sm:$0xff] }
  0x2a   : > { %189 = vst [vmem:[%s2108_s23 + $0x18] sm:$0xff] %v188_v2  ;;  %v202_v9 = vld [vmem:[%s2103_s5 + $0x288] sm:$0xff]  ;;  %v204_v10 = vld [vmem:[%s2103_s5 + $0x2d0] sm:$0xff]  ;;  %v206_v11 = vld [vmem:[%s2103_s5 + $0x318] sm:$0xff] }
  0x2b   : > { %191 = vst [vmem:[%s2108_s23 + $0x24] sm:$0xff] %v190_v3  ;;  %v208_v12 = vld [vmem:[%s2103_s5 + $0x360] sm:$0xff]  ;;  %v210_v13 = vld [vmem:[%s2103_s5 + $0x3a8] sm:$0xff]  ;;  %v212_v14 = vld [vmem:[%s2103_s5 + $0x3f0] sm:$0xff] }
  0x2c   : > { %193 = vst [vmem:[%s2108_s23 + $0x30] sm:$0xff] %v192_v4  ;;  %v214_v15 = vld [vmem:[%s2103_s5 + $0x438] sm:$0xff]  ;;  %v1439_v16 = vld [vmem:[%s2103_s5 + $0x8] sm:$0xf]  ;;  %v1441_v17 = vld [vmem:[%s2103_s5 + $0x50] sm:$0xf] }
  0x2d   : > { %195 = vst [vmem:[%s2108_s23 + $0x3c] sm:$0xff] %v194_v5  ;;  %v1443_v18 = vld [vmem:[%s2103_s5 + $0x98] sm:$0xf]  ;;  %v1445_v19 = vld [vmem:[%s2103_s5 + $0xe0] sm:$0xf] }
  0x2e   : > { %197 = vst [vmem:[%s2108_s23 + $0x48] sm:$0xff] %v196_v6  ;;  %v1447_v20 = vld [vmem:[%s2103_s5 + $0x128] sm:$0xf]  ;;  %v1449_v21 = vld [vmem:[%s2103_s5 + $0x170] sm:$0xf] }
  0x2f   : > { %199 = vst [vmem:[%s2108_s23 + $0x54] sm:$0xff] %v198_v7  ;;  %v1451_v22 = vld [vmem:[%s2103_s5 + $0x1b8] sm:$0xf]  ;;  %v1453_v23 = vld [vmem:[%s2103_s5 + $0x200] sm:$0xf] }
  0x30   : > { %201 = vst [vmem:[%s2108_s23 + $0x60] sm:$0xff] %v200_v8  ;;  %v1455_v24 = vld [vmem:[%s2103_s5 + $0x248] sm:$0xf]  ;;  %v1457_v25 = vld [vmem:[%s2103_s5 + $0x290] sm:$0xf] }
  0x31   : > { %203 = vst [vmem:[%s2108_s23 + $0x6c] sm:$0xff] %v202_v9  ;;  %v1459_v26 = vld [vmem:[%s2103_s5 + $0x2d8] sm:$0xf]  ;;  %v1461_v27 = vld [vmem:[%s2103_s5 + $0x320] sm:$0xf] }
  0x32   : > { %205 = vst [vmem:[%s2108_s23 + $0x78] sm:$0xff] %v204_v10  ;;  %v1463_v28 = vld [vmem:[%s2103_s5 + $0x368] sm:$0xf]  ;;  %v1465_v29 = vld [vmem:[%s2103_s5 + $0x3b0] sm:$0xf] }
  0x33   : > { %207 = vst [vmem:[%s2108_s23 + $0x84] sm:$0xff] %v206_v11  ;;  %v1467_v30 = vld [vmem:[%s2103_s5 + $0x3f8] sm:$0xf]  ;;  %v1469_v31 = vld [vmem:[%s2103_s5 + $0x440] sm:$0xf] }
  0x34   : > { %209 = vst [vmem:[%s2108_s23 + $0x90] sm:$0xff] %v208_v12 }
  0x35   : > { %211 = vst [vmem:[%s2108_s23 + $0x9c] sm:$0xff] %v210_v13 }
  0x36   : > { %213 = vst [vmem:[%s2108_s23 + $0xa8] sm:$0xff] %v212_v14 }
  0x37   : > { %215 = vst [vmem:[%s2108_s23 + $0xb4] sm:$0xff] %v214_v15 }
  0x38   : > { %1440 = vst [vmem:[%s2108_s23 + $0x8] sm:$0xf] %v1439_v16 }
  0x39   : > { %1442 = vst [vmem:[%s2108_s23 + $0x14] sm:$0xf] %v1441_v17 }
  0x3a   : > { %1444 = vst [vmem:[%s2108_s23 + $0x20] sm:$0xf] %v1443_v18 }
  0x3b   : > { %1446 = vst [vmem:[%s2108_s23 + $0x2c] sm:$0xf] %v1445_v19 }
  0x3c   : > { %1448 = vst [vmem:[%s2108_s23 + $0x38] sm:$0xf] %v1447_v20 }
  0x3d   : > { %1450 = vst [vmem:[%s2108_s23 + $0x44] sm:$0xf] %v1449_v21 }
  0x3e   : > { %1452 = vst [vmem:[%s2108_s23 + $0x50] sm:$0xf] %v1451_v22 }
  0x3f   : > { %1454 = vst [vmem:[%s2108_s23 + $0x5c] sm:$0xf] %v1453_v23 }
  0x40   : > { %1456 = vst [vmem:[%s2108_s23 + $0x68] sm:$0xf] %v1455_v24 }
  0x41   : > { %1458 = vst [vmem:[%s2108_s23 + $0x74] sm:$0xf] %v1457_v25 }
  0x42   : > { %1460 = vst [vmem:[%s2108_s23 + $0x80] sm:$0xf] %v1459_v26 }
  0x43   : > { %1462 = vst [vmem:[%s2108_s23 + $0x8c] sm:$0xf] %v1461_v27 }
  0x44   : > { %1464 = vst [vmem:[%s2108_s23 + $0x98] sm:$0xf] %v1463_v28 }
  0x45   : > { %1466 = vst [vmem:[%s2108_s23 + $0xa4] sm:$0xf] %v1465_v29 }
  0x46   : > { %1468 = vst [vmem:[%s2108_s23 + $0xb0] sm:$0xf] %v1467_v30 }
  0x47   : > { %1470 = vst [vmem:[%s2108_s23 + $0xbc] sm:$0xf] %v1469_v31 }
  0x48 PF: > { %261 = sbr.rel (!%p2078_p9) target bundleno = 129 (0x81), region = 46  ;;  %s263_s28 = sand.u32 (%p2078_p9), 1, %s1946_s15  }
  0x49   : > { %s1674_s7 = smul.u32 (%p2078_p9), 96, %s1966_s20  ;;  %s2504_s1 = sld [smem:[#allocation8_spill]] (%p2078_p9) }
  0x4a   : > { %s1795_s11 = smul.u32 (%p2078_p9), 192, %s263_s28 }
  0x4b   : > { %s268_s26 = sadd.s32 (%p2078_p9), %s1970_s21, %s1674_s7 }
  0x4c   : > { %s1472_s27 = sshll.u32 (%p2078_p9), %s268_s26, 2  ;;  %s2184_s6 = scalar_lea.vmem (%p2078_p9), [#allocation4], %s1795_s11 }
  0x4f   : > { %s2179_s0 = scalar_lea.vmem %s2504_s1, %s1472_s27 }
  0x50   : > { %v287_v32 = vld [vmem:[%s2179_s0] sm:$0xf]  ;;  %v289_v33 = vld [vmem:[%s2179_s0 + $0x8] sm:$0xf]  ;;  %v291_v34 = vld [vmem:[%s2179_s0 + $0x10] sm:$0xf] }
  0x51   : > { %288 = vst [vmem:[%s2184_s6] sm:$0xf] %v287_v32  ;;  %v293_v35 = vld [vmem:[%s2179_s0 + $0x18] sm:$0xf]  ;;  %v295_v36 = vld [vmem:[%s2179_s0 + $0x20] sm:$0xf] }
  0x52   : > { %290 = vst [vmem:[%s2184_s6 + $0x4] sm:$0xf] %v289_v33  ;;  %v297_v37 = vld [vmem:[%s2179_s0 + $0x28] sm:$0xf]  ;;  %v299_v38 = vld [vmem:[%s2179_s0 + $0x30] sm:$0xf] }
  0x53   : > { %292 = vst [vmem:[%s2184_s6 + $0x8] sm:$0xf] %v291_v34  ;;  %v301_v39 = vld [vmem:[%s2179_s0 + $0x38] sm:$0xf]  ;;  %v303_v40 = vld [vmem:[%s2179_s0 + $0x40] sm:$0xf] }
  0x54   : > { %294 = vst [vmem:[%s2184_s6 + $0xc] sm:$0xf] %v293_v35  ;;  %v305_v41 = vld [vmem:[%s2179_s0 + $0x48] sm:$0xf]  ;;  %v307_v42 = vld [vmem:[%s2179_s0 + $0x50] sm:$0xf] }
  0x55   : > { %296 = vst [vmem:[%s2184_s6 + $0x10] sm:$0xf] %v295_v36  ;;  %v309_v43 = vld [vmem:[%s2179_s0 + $0x58] sm:$0xf]  ;;  %v311_v44 = vld [vmem:[%s2179_s0 + $0x60] sm:$0xf] }
  0x56   : > { %298 = vst [vmem:[%s2184_s6 + $0x14] sm:$0xf] %v297_v37  ;;  %v313_v45 = vld [vmem:[%s2179_s0 + $0x68] sm:$0xf]  ;;  %v315_v46 = vld [vmem:[%s2179_s0 + $0x70] sm:$0xf] }
  0x57   : > { %300 = vst [vmem:[%s2184_s6 + $0x18] sm:$0xf] %v299_v38  ;;  %v317_v47 = vld [vmem:[%s2179_s0 + $0x78] sm:$0xf]  ;;  %v319_v48 = vld [vmem:[%s2179_s0 + $0x80] sm:$0xf] }
  0x58   : > { %302 = vst [vmem:[%s2184_s6 + $0x1c] sm:$0xf] %v301_v39  ;;  %v321_v49 = vld [vmem:[%s2179_s0 + $0x88] sm:$0xf]  ;;  %v323_v50 = vld [vmem:[%s2179_s0 + $0x90] sm:$0xf] }
  0x59   : > { %304 = vst [vmem:[%s2184_s6 + $0x20] sm:$0xf] %v303_v40  ;;  %v325_v51 = vld [vmem:[%s2179_s0 + $0x98] sm:$0xf]  ;;  %v327_v52 = vld [vmem:[%s2179_s0 + $0xa0] sm:$0xf] }
  0x5a   : > { %306 = vst [vmem:[%s2184_s6 + $0x24] sm:$0xf] %v305_v41  ;;  %v329_v53 = vld [vmem:[%s2179_s0 + $0xa8] sm:$0xf]  ;;  %v331_v54 = vld [vmem:[%s2179_s0 + $0xb0] sm:$0xf] }
  0x5b   : > { %308 = vst [vmem:[%s2184_s6 + $0x28] sm:$0xf] %v307_v42  ;;  %v333_v55 = vld [vmem:[%s2179_s0 + $0xb8] sm:$0xf]  ;;  %v335_v56 = vld [vmem:[%s2179_s0 + $0xc0] sm:$0xf] }
  0x5c   : > { %310 = vst [vmem:[%s2184_s6 + $0x2c] sm:$0xf] %v309_v43  ;;  %v337_v57 = vld [vmem:[%s2179_s0 + $0xc8] sm:$0xf]  ;;  %v339_v58 = vld [vmem:[%s2179_s0 + $0xd0] sm:$0xf] }
  0x5d   : > { %312 = vst [vmem:[%s2184_s6 + $0x30] sm:$0xf] %v311_v44  ;;  %v341_v59 = vld [vmem:[%s2179_s0 + $0xd8] sm:$0xf]  ;;  %v343_v60 = vld [vmem:[%s2179_s0 + $0xe0] sm:$0xf] }
  0x5e   : > { %314 = vst [vmem:[%s2184_s6 + $0x34] sm:$0xf] %v313_v45  ;;  %v345_v61 = vld [vmem:[%s2179_s0 + $0xe8] sm:$0xf]  ;;  %v347_v62 = vld [vmem:[%s2179_s0 + $0xf0] sm:$0xf] }
  0x5f   : > { %316 = vst [vmem:[%s2184_s6 + $0x38] sm:$0xf] %v315_v46  ;;  %v349_v63 = vld [vmem:[%s2179_s0 + $0xf8] sm:$0xf]  ;;  %v351_v0 = vld [vmem:[%s2179_s0 + $0x100] sm:$0xf] }
  0x60   : > { %318 = vst [vmem:[%s2184_s6 + $0x3c] sm:$0xf] %v317_v47  ;;  %v353_v1 = vld [vmem:[%s2179_s0 + $0x108] sm:$0xf]  ;;  %v355_v2 = vld [vmem:[%s2179_s0 + $0x110] sm:$0xf] }
  0x61   : > { %320 = vst [vmem:[%s2184_s6 + $0x40] sm:$0xf] %v319_v48  ;;  %v357_v3 = vld [vmem:[%s2179_s0 + $0x118] sm:$0xf]  ;;  %v359_v4 = vld [vmem:[%s2179_s0 + $0x120] sm:$0xf] }
  0x62   : > { %322 = vst [vmem:[%s2184_s6 + $0x44] sm:$0xf] %v321_v49  ;;  %v361_v5 = vld [vmem:[%s2179_s0 + $0x128] sm:$0xf]  ;;  %v363_v6 = vld [vmem:[%s2179_s0 + $0x130] sm:$0xf] }
  0x63   : > { %324 = vst [vmem:[%s2184_s6 + $0x48] sm:$0xf] %v323_v50  ;;  %v365_v7 = vld [vmem:[%s2179_s0 + $0x138] sm:$0xf]  ;;  %v367_v8 = vld [vmem:[%s2179_s0 + $0x140] sm:$0xf] }
  0x64   : > { %326 = vst [vmem:[%s2184_s6 + $0x4c] sm:$0xf] %v325_v51  ;;  %v369_v9 = vld [vmem:[%s2179_s0 + $0x148] sm:$0xf]  ;;  %v371_v10 = vld [vmem:[%s2179_s0 + $0x150] sm:$0xf] }
  0x65   : > { %328 = vst [vmem:[%s2184_s6 + $0x50] sm:$0xf] %v327_v52  ;;  %v373_v11 = vld [vmem:[%s2179_s0 + $0x158] sm:$0xf]  ;;  %v375_v12 = vld [vmem:[%s2179_s0 + $0x160] sm:$0xf] }
  0x66   : > { %330 = vst [vmem:[%s2184_s6 + $0x54] sm:$0xf] %v329_v53  ;;  %v377_v13 = vld [vmem:[%s2179_s0 + $0x168] sm:$0xf]  ;;  %v379_v14 = vld [vmem:[%s2179_s0 + $0x170] sm:$0xf] }
  0x67   : > { %332 = vst [vmem:[%s2184_s6 + $0x58] sm:$0xf] %v331_v54  ;;  %v381_v15 = vld [vmem:[%s2179_s0 + $0x178] sm:$0xf] }
  0x68   : > { %334 = vst [vmem:[%s2184_s6 + $0x5c] sm:$0xf] %v333_v55 }
  0x69   : > { %336 = vst [vmem:[%s2184_s6 + $0x60] sm:$0xf] %v335_v56 }
  0x6a   : > { %338 = vst [vmem:[%s2184_s6 + $0x64] sm:$0xf] %v337_v57 }
  0x6b   : > { %340 = vst [vmem:[%s2184_s6 + $0x68] sm:$0xf] %v339_v58 }
  0x6c   : > { %342 = vst [vmem:[%s2184_s6 + $0x6c] sm:$0xf] %v341_v59 }
  0x6d   : > { %344 = vst [vmem:[%s2184_s6 + $0x70] sm:$0xf] %v343_v60 }
  0x6e   : > { %346 = vst [vmem:[%s2184_s6 + $0x74] sm:$0xf] %v345_v61 }
  0x6f   : > { %348 = vst [vmem:[%s2184_s6 + $0x78] sm:$0xf] %v347_v62 }
  0x70   : > { %350 = vst [vmem:[%s2184_s6 + $0x7c] sm:$0xf] %v349_v63 }
  0x71   : > { %352 = vst [vmem:[%s2184_s6 + $0x80] sm:$0xf] %v351_v0 }
  0x72   : > { %354 = vst [vmem:[%s2184_s6 + $0x84] sm:$0xf] %v353_v1 }
  0x73   : > { %356 = vst [vmem:[%s2184_s6 + $0x88] sm:$0xf] %v355_v2 }
  0x74   : > { %358 = vst [vmem:[%s2184_s6 + $0x8c] sm:$0xf] %v357_v3 }
  0x75   : > { %360 = vst [vmem:[%s2184_s6 + $0x90] sm:$0xf] %v359_v4 }
  0x76   : > { %362 = vst [vmem:[%s2184_s6 + $0x94] sm:$0xf] %v361_v5 }
  0x77   : > { %364 = vst [vmem:[%s2184_s6 + $0x98] sm:$0xf] %v363_v6 }
  0x78   : > { %366 = vst [vmem:[%s2184_s6 + $0x9c] sm:$0xf] %v365_v7 }
  0x79   : > { %368 = vst [vmem:[%s2184_s6 + $0xa0] sm:$0xf] %v367_v8 }
  0x7a   : > { %370 = vst [vmem:[%s2184_s6 + $0xa4] sm:$0xf] %v369_v9 }
  0x7b   : > { %372 = vst [vmem:[%s2184_s6 + $0xa8] sm:$0xf] %v371_v10 }
  0x7c   : > { %374 = vst [vmem:[%s2184_s6 + $0xac] sm:$0xf] %v373_v11 }
  0x7d   : > { %376 = vst [vmem:[%s2184_s6 + $0xb0] sm:$0xf] %v375_v12 }
  0x7e   : > { %378 = vst [vmem:[%s2184_s6 + $0xb4] sm:$0xf] %v377_v13 }
  0x7f   : > { %380 = vst [vmem:[%s2184_s6 + $0xb8] sm:$0xf] %v379_v14 }
  0x80   : > { %382 = vst [vmem:[%s2184_s6 + $0xbc] sm:$0xf] %v381_v15 }
  0x81 PF: > { %p1473_p0 = scmp.ge.s32.totalorder %s1974_s22, 1  ;;  %p507_p1 = scmp.lt.s32.totalorder %s1974_s22, 13 }
  0x83   : > { %p508_p2 = pnand %p1473_p0, %p507_p1 }
  0x84   : > { %s514_s5 = sand.u32 (!%p508_p2), 1, %s1950_s16   ;;  %s521_s23 = sand.u32 (!%p508_p2), 1, %s1942_s14  }
  0x85   : > { %511 = sbr.rel (%p508_p2) target bundleno = 454 (0x1c6), region = 91  ;;  %s547_s0 = sand.u32 (!%p508_p2), 1, %s1934_s12  }
  0x86   : > { %s1796_s28 = smul.u32 (!%p508_p2), 192, %s514_s5  ;;  %s1474_s11 = sshll.u32 (!%p508_p2), %s547_s0, 6 }
  0x87   : > { %s1797_s7 = smul.u32 (!%p508_p2), 192, %s521_s23  ;;  %p553_p3 = scmp.lt.s32.totalorder (!%p508_p2), %s1962_s19, 1 }
  0x88   : > { %s2292_s6 = scalar_lea.vmem (!%p508_p2), [#allocation3], %s1796_s28  ;;  %s2296_s25 = scalar_lea.vmem (!%p508_p2), [#allocation5], %s1474_s11 }
  0x89   : > { %s2294_s1 = scalar_lea.vmem (!%p508_p2), [#allocation4], %s1797_s7  ;;  %p1475_p4 = scmp.ne.s32.totalorder (!%p508_p2), %s1958_s18, 0 }
  0x8a   : > { %s2286_s26 = scalar_select %p553_p3, %s1962_s19, 1 }
  0x8b   : > { %560 = sbr.rel (%p1475_p4) target bundleno = 161 (0xa1), region = 103 }
  0x8c   : > { %s555_s4 = scalar_lea.vmem %s2494_s2, %s2286_s26 }
  0x90   : > { %v1976_v16 = vmov 0.0  }
  0x91   : > { %561 = vst [vmem:[#allocation2 + $0x30] sm:$0xff] %v1976_v16 }
  0x92   : > { %562 = vst [vmem:[#allocation2] sm:$0xff] %v1976_v16 }
  0x93   : > { %563 = vst [vmem:[#allocation2 + $0x58] sm:$0xff] %v1976_v16 }
  0x94   : > { %564 = vst [vmem:[#allocation2 + $0x18] sm:$0xff] %v1976_v16 }
  0x95   : > { %565 = vst [vmem:[#allocation2 + $0x50] sm:$0xff] %v1976_v16 }
  0x96   : > { %566 = vst [vmem:[#allocation2 + $0x68] sm:$0xff] %v1976_v16 }
  0x97   : > { %567 = vst [vmem:[#allocation2 + $0x8] sm:$0xff] %v1976_v16 }
  0x98   : > { %568 = vst [vmem:[#allocation2 + $0x48] sm:$0xff] %v1976_v16 }
  0x99   : > { %569 = vst [vmem:[#allocation2 + $0x40] sm:$0xff] %v1976_v16 }
  0x9a   : > { %570 = vst [vmem:[#allocation2 + $0x20] sm:$0xff] %v1976_v16 }
  0x9b   : > { %571 = vst [vmem:[#allocation2 + $0x10] sm:$0xff] %v1976_v16 }
  0x9c   : > { %572 = vst [vmem:[#allocation2 + $0x38] sm:$0xff] %v1976_v16 }
  0x9d   : > { %573 = vst [vmem:[#allocation2 + $0x60] sm:$0xff] %v1976_v16 }
  0x9e   : > { %574 = vst [vmem:[#allocation2 + $0x70] sm:$0xff] %v1976_v16 }
  0x9f   : > { %575 = vst [vmem:[#allocation2 + $0x78] sm:$0xff] %v1976_v16 }
  0xa0   : > { %576 = vst [vmem:[#allocation2 + $0x28] sm:$0xff] %v1976_v16 }
  0xa1 PF: > { %v1706_v17 = vld [vmem:[%s2294_s1 + $0x38] sm:$0xff]  ;;  %v1705_v20 = vld [vmem:[%s2294_s1 + $0x30] sm:$0xff]  ;;  %v1704_v23 = vld [vmem:[%s2294_s1 + $0x28] sm:$0xff]  ;;  %p1668_p5 = scmp.ne.s32.totalorder %s1958_s18, 5 }
  0xa2   : > { %v2301_v18 = vld [vmem:[%s2294_s1 + $0x78] sm:$0xff]  ;;  %945 = vmatpush.bf16.msra.mxu0 %v1706_v17  ;;  %1770 = vmatpush.bf16.msra.mxu3 %v1706_v17  ;;  %v2310_v21 = vld [vmem:[%s2294_s1 + $0x70] sm:$0xff]  ;;  %v1712_v24 = vld [vmem:[%s2294_s1 + $0x68] sm:$0xff] }
  0xa3   : > { %v2304_v19 = vld [vmem:[%s2294_s1 + $0xb8] sm:$0xff]  ;;  %994 = vmatpush.bf16.msra.mxu1 %v2301_v18  ;;  %v2313_v22 = vld [vmem:[%s2294_s1 + $0xb0] sm:$0xff]  ;;  %v2320_v25 = vld [vmem:[%s2294_s1 + $0xa8] sm:$0xff] }
  0xa4   : > { %1043 = vmatpush.bf16.msra.mxu2 %v2304_v19  ;;  %v1703_v26 = vld [vmem:[%s2294_s1 + $0x20] sm:$0xff]  ;;  %v1702_v29 = vld [vmem:[%s2294_s1 + $0x18] sm:$0xff]  ;;  %v1701_v32 = vld [vmem:[%s2294_s1 + $0x10] sm:$0xff] }
  0xa5   : > { %v1711_v27 = vld [vmem:[%s2294_s1 + $0x60] sm:$0xff]  ;;  %v1710_v30 = vld [vmem:[%s2294_s1 + $0x58] sm:$0xff]  ;;  %v1709_v33 = vld [vmem:[%s2294_s1 + $0x50] sm:$0xff] }
  0xa6   : > { %946 = vmatpush.bf16.msra.mxu0 %v1705_v20  ;;  %1771 = vmatpush.bf16.msra.mxu3 %v1705_v20  ;;  %v2326_v28 = vld [vmem:[%s2294_s1 + $0xa0] sm:$0xff]  ;;  %v2332_v31 = vld [vmem:[%s2294_s1 + $0x98] sm:$0xff]  ;;  %v2338_v34 = vld [vmem:[%s2294_s1 + $0x90] sm:$0xff] }
  0xa7   : > { %995 = vmatpush.bf16.msra.mxu1 %v2310_v21  ;;  %v1700_v35 = vld [vmem:[%s2294_s1 + $0x8] sm:$0xff]  ;;  %v1699_v38 = vld [vmem:[%s2294_s1] sm:$0xff]  ;;  %v1550_v43 = vld [vmem:[%s2292_s6 + $0x90] sm:$0xf] }
  0xa8   : > { %1044 = vmatpush.bf16.msra.mxu2 %v2313_v22  ;;  %v1708_v36 = vld [vmem:[%s2294_s1 + $0x48] sm:$0xff]  ;;  %v1707_v39 = vld [vmem:[%s2294_s1 + $0x40] sm:$0xff]  ;;  %v1694_v44 = vld [vmem:[%s2292_s6 + $0x98] sm:$0xf0] }
  0xa9   : > { %v2344_v37 = vld [vmem:[%s2294_s1 + $0x88] sm:$0xff]  ;;  %v2349_v40 = vld [vmem:[%s2294_s1 + $0x80] sm:$0xff]  ;;  %v1480_v46 = vld [vmem:[%s2292_s6 + $0xc] sm:$0xf0]  ;;  %v1551_v50 = vor.u32 %v1694_v44, %v1550_v43 }
  0xaa   : > { %947 = vmatpush.bf16.msra.mxu0 %v1704_v23  ;;  %1772 = vmatpush.bf16.msra.mxu3 %v1704_v23  ;;  %v1478_v41 = vld [vmem:[%s2292_s6] sm:$0xf]  ;;  %v1676_v42 = vld [vmem:[%s2292_s6 + $0x8] sm:$0xf0]  ;;  %v1675_v45 = vld [vmem:[%s2292_s6 + $0x4] sm:$0xf] }
  0xab   : > { %996 = vmatpush.bf16.msra.mxu1 %v1712_v24  ;;  %v1486_v47 = vld [vmem:[%s2292_s6 + $0x8] sm:$0xf]  ;;  %v1677_v48 = vld [vmem:[%s2292_s6 + $0x10] sm:$0xf0]  ;;  %v1479_v49 = vor.u32 %v1676_v42, %v1478_v41  ;;  %v1483_v51 = vor.u32 %v1675_v45, %v1480_v46  ;;  %v1490_v53 = vld [vmem:[%s2292_s6 + $0x18] sm:$0xf] }
  0xac   : > { %1045 = vmatpush.bf16.msra.mxu2 %v2320_v25  ;;  %v1487_v52 = vor.u32 %v1677_v48, %v1486_v47  ;;  %v1679_v54 = vld [vmem:[%s2292_s6 + $0x20] sm:$0xf0]  ;;  %v1562_v55 = vld [vmem:[%s2292_s6 + $0xa8] sm:$0xf]  ;;  %v1697_v56 = vld [vmem:[%s2292_s6 + $0xb0] sm:$0xf0] }
  0xad   : > { %v1678_v57 = vld [vmem:[%s2292_s6 + $0x1c] sm:$0xf]  ;;  %v1492_v58 = vld [vmem:[%s2292_s6 + $0x24] sm:$0xf0]  ;;  %v1498_v59 = vld [vmem:[%s2292_s6 + $0x20] sm:$0xf]  ;;  %v1491_v61 = vor.u32 %v1679_v54, %v1490_v53  ;;  %v1563_v62 = vor.u32 %v1697_v56, %v1562_v55 }
  0xae   : > { %948 = vmatpush.bf16.msra.mxu0 %v1703_v26  ;;  %1773 = vmatpush.bf16.msra.mxu3 %v1703_v26  ;;  %v1680_v60 = vld [vmem:[%s2292_s6 + $0x28] sm:$0xf0]  ;;  %v1495_v63 = vor.u32 %v1678_v57, %v1492_v58  ;;  %v1502_v1 = vld [vmem:[%s2292_s6 + $0x30] sm:$0xf]  ;;  %v1682_v2 = vld [vmem:[%s2292_s6 + $0x38] sm:$0xf0] }
  0xaf   : > { %997 = vmatpush.bf16.msra.mxu1 %v1711_v27  ;;  %v1499_v0 = vor.u32 %v1680_v60, %v1498_v59  ;;  %v1681_v3 = vld [vmem:[%s2292_s6 + $0x34] sm:$0xf]  ;;  %v1552_v5 = vld [vmem:[%s2292_s6 + $0x9c] sm:$0xf0]  ;;  %v1510_v7 = vld [vmem:[%s2292_s6 + $0x38] sm:$0xf]  ;;  %v1503_v9 = vor.u32 %v1682_v2, %v1502_v1 }
  0xb0   : > { %1046 = vmatpush.bf16.msra.mxu2 %v2326_v28  ;;  %v1693_v4 = vld [vmem:[%s2292_s6 + $0x94] sm:$0xf]  ;;  %v1504_v6 = vld [vmem:[%s2292_s6 + $0x3c] sm:$0xf0]  ;;  %v1683_v8 = vld [vmem:[%s2292_s6 + $0x40] sm:$0xf0] }
  0xb1   : > { %v1555_v10 = vor.u32 %v1693_v4, %v1552_v5  ;;  %v1507_v11 = vor.u32 %v1681_v3, %v1504_v6  ;;  %v1511_v12 = vor.u32 %v1683_v8, %v1510_v7  ;;  %v1514_v13 = vld [vmem:[%s2292_s6 + $0x48] sm:$0xf]  ;;  %v1685_v14 = vld [vmem:[%s2292_s6 + $0x50] sm:$0xf0]  ;;  %v1684_v15 = vld [vmem:[%s2292_s6 + $0x4c] sm:$0xf] }
  0xb2   : > { %949 = vmatpush.bf16.msra.mxu0 %v1702_v29  ;;  %1774 = vmatpush.bf16.msra.mxu3 %v1702_v29  ;;  %v1696_v16 = vld [vmem:[%s2292_s6 + $0xac] sm:$0xf]  ;;  %v1564_v17 = vld [vmem:[%s2292_s6 + $0xb4] sm:$0xf0]  ;;  %v1686_v20 = vld [vmem:[%s2292_s6 + $0x58] sm:$0xf0] }
  0xb3   : > { %998 = vmatpush.bf16.msra.mxu1 %v1710_v30  ;;  %v1567_v23 = vor.u32 %v1696_v16, %v1564_v17  ;;  %v1688_v26 = vld [vmem:[%s2292_s6 + $0x68] sm:$0xf0]  ;;  %v1695_v29 = vld [vmem:[%s2292_s6 + $0xa0] sm:$0xf0]  ;;  %v1570_v41 = vld [vmem:[%s2292_s6 + $0xb0] sm:$0xf] }
  0xb4   : > { %1047 = vmatpush.bf16.msra.mxu2 %v2332_v31  ;;  %v1540_v42 = vld [vmem:[%s2292_s6 + $0x84] sm:$0xf0]  ;;  %v1546_v43 = vld [vmem:[%s2292_s6 + $0x80] sm:$0xf]  ;;  %v1692_v44 = vld [vmem:[%s2292_s6 + $0x88] sm:$0xf0] }
  0xb5   : > { %v1547_v48 = vor.u32 %v1692_v44, %v1546_v43  ;;  %v577_v53 = vld [vmem:[#allocation2 + $0x30] sm:$0xff]  ;;  %v579_v5 = vld [vmem:[#allocation2 + $0x58] sm:$0xff] }
  0xb6   : > { %950 = vmatpush.bf16.msra.mxu0 %v1701_v32  ;;  %1775 = vmatpush.bf16.msra.mxu3 %v1701_v32  ;;  %v1689_v32 = vld [vmem:[%s2292_s6 + $0x70] sm:$0xf0] }
  0xb7   : > { %999 = vmatpush.bf16.msra.mxu1 %v1709_v33 }
  0xb8   : > { %1048 = vmatpush.bf16.msra.mxu2 %v2338_v34 }
  0xba   : > { %951 = vmatpush.bf16.msra.mxu0 %v1700_v35  ;;  %1776 = vmatpush.bf16.msra.mxu3 %v1700_v35 }
  0xbb   : > { %1000 = vmatpush.bf16.msra.mxu1 %v1708_v36 }
  0xbc   : > { %1049 = vmatpush.bf16.msra.mxu2 %v2344_v37 }
  0xbe   : > { %952 = vmatpush.bf16.msra.mxu0 %v1699_v38  ;;  %1777 = vmatpush.bf16.msra.mxu3 %v1699_v38  ;;  %v1691_v38 = vld [vmem:[%s2292_s6 + $0x80] sm:$0xf0] }
  0xbf   : > { %1001 = vmatpush.bf16.msra.mxu1 %v1707_v39 }
  0xc0   : > { %1050 = vmatpush.bf16.msra.mxu2 %v2349_v40 }
  0xc1   : > { %953 = vmatmul.bf16.vlgmr.msra.gmra.mxu0 %v1479_v49  ;;  %983 = vmatmul.bf16.vlgmr.msra.gmra.mxu3 %v1551_v50 }
  0xc2   : > { %1778 = vmatpush.bf16.msrb.mxu3 %v2301_v18  ;;  %1002 = vmatmul.bf16.vlgmr.msra.gmra.mxu1 %v1483_v51  ;;  %v1516_v18 = vld [vmem:[%s2292_s6 + $0x54] sm:$0xf0] }
  0xc3   : > { %1051 = vmatmul.bf16.vlgmr.msra.gmra.mxu2 %v1487_v52 }
  0xc6   : > { %1779 = vmatpush.bf16.msrb.mxu3 %v2310_v21  ;;  %v1515_v21 = vor.u32 %v1685_v14, %v1514_v13  ;;  %v580_v13 = vld [vmem:[#allocation2 + $0x18] sm:$0xff] }
  0xca   : > { %1780 = vmatpush.bf16.msrb.mxu3 %v1712_v24 }
  0xce   : > { %1781 = vmatpush.bf16.msrb.mxu3 %v1711_v27  ;;  %v1687_v27 = vld [vmem:[%s2292_s6 + $0x64] sm:$0xf] }
  0xd1   : > { %958 = vmatmul.bf16.gmra.mxu0 %v1491_v61  ;;  %988 = vmatmul.bf16.gmra.mxu3 %v1563_v62  ;;  %v578_v61 = vld [vmem:[#allocation2] sm:$0xff] }
  0xd2   : > { %1782 = vmatpush.bf16.msrb.mxu3 %v1710_v30  ;;  %1007 = vmatmul.bf16.gmra.mxu1 %v1495_v63  ;;  %v1528_v30 = vld [vmem:[%s2292_s6 + $0x6c] sm:$0xf0] }
  0xd3   : > { %1056 = vmatmul.bf16.gmra.mxu2 %v1499_v0  ;;  %v1531_v35 = vor.u32 %v1687_v27, %v1528_v30 }
  0xd6   : > { %1783 = vmatpush.bf16.msrb.mxu3 %v1709_v33 }
  0xda   : > { %1784 = vmatpush.bf16.msrb.mxu3 %v1708_v36 }
  0xde   : > { %1785 = vmatpush.bf16.msrb.mxu3 %v1707_v39  ;;  %v1690_v39 = vld [vmem:[%s2292_s6 + $0x7c] sm:$0xf] }
  0xdf   : > { %v1543_v47 = vor.u32 %v1690_v39, %v1540_v42 }
  0xe1   : > { %963 = vmatmul.bf16.gmra.mxu0 %v1503_v9  ;;  %1032 = vmatmul.bf16.vlgmr.msrb.gmra.mxu3 %v1555_v10 }
  0xe2   : > { %1786 = vmatpush.bf16.msra.mxu3 %v2304_v19  ;;  %1012 = vmatmul.bf16.gmra.mxu1 %v1507_v11  ;;  %v1522_v19 = vld [vmem:[%s2292_s6 + $0x50] sm:$0xf] }
  0xe3   : > { %1061 = vmatmul.bf16.gmra.mxu2 %v1511_v12  ;;  %v1523_v24 = vor.u32 %v1686_v20, %v1522_v19 }
  0xe6   : > { %1787 = vmatpush.bf16.msra.mxu3 %v2313_v22  ;;  %v1519_v22 = vor.u32 %v1684_v15, %v1516_v18 }
  0xea   : > { %1788 = vmatpush.bf16.msra.mxu3 %v2320_v25  ;;  %v1526_v25 = vld [vmem:[%s2292_s6 + $0x60] sm:$0xf] }
  0xeb   : > { %v1527_v33 = vor.u32 %v1688_v26, %v1526_v25 }
  0xee   : > { %1789 = vmatpush.bf16.msra.mxu3 %v2326_v28  ;;  %v1558_v28 = vld [vmem:[%s2292_s6 + $0x98] sm:$0xf] }
  0xf1   : > { %968 = vmatmul.bf16.gmra.mxu0 %v1515_v21  ;;  %1037 = vmatmul.bf16.gmra.mxu3 %v1567_v23  ;;  %v581_v21 = vld [vmem:[#allocation2 + $0x50] sm:$0xff] }
  0xf2   : > { %1790 = vmatpush.bf16.msra.mxu3 %v2332_v31  ;;  %1017 = vmatmul.bf16.gmra.mxu1 %v1519_v22  ;;  %v1534_v31 = vld [vmem:[%s2292_s6 + $0x68] sm:$0xf] }
  0xf3   : > { %1066 = vmatmul.bf16.gmra.mxu2 %v1523_v24  ;;  %v1535_v36 = vor.u32 %v1689_v32, %v1534_v31 }
  0xf6   : > { %1791 = vmatpush.bf16.msra.mxu3 %v2338_v34  ;;  %v1559_v34 = vor.u32 %v1695_v29, %v1558_v28  ;;  %v582_v29 = vld [vmem:[#allocation2 + $0x68] sm:$0xff] }
  0xfa   : > { %1792 = vmatpush.bf16.msra.mxu3 %v2344_v37  ;;  %v1538_v37 = vld [vmem:[%s2292_s6 + $0x78] sm:$0xf] }
  0xfb   : > { %v1539_v45 = vor.u32 %v1691_v38, %v1538_v37  ;;  %v583_v37 = vld [vmem:[#allocation2 + $0x8] sm:$0xff] }
  0xfe   : > { %1793 = vmatpush.bf16.msra.mxu3 %v2349_v40  ;;  %v1698_v40 = vld [vmem:[%s2292_s6 + $0xb8] sm:$0xf0] }
  0xff   : > { %v1571_v46 = vor.u32 %v1698_v40, %v1570_v41 }
 0x101   : > { %973 = vmatmul.bf16.gmra.mxu0 %v1527_v33  ;;  %1081 = vmatmul.bf16.vlgmr.msra.gmra.mxu3 %v1559_v34 }
 0x102   : > { %1022 = vmatmul.bf16.gmra.mxu1 %v1531_v35 }
 0x103   : > { %1071 = vmatmul.bf16.gmra.mxu2 %v1535_v36 }
 0x111   : > { %978 = vmatmul.bf16.gmra.mxu0 %v1539_v45  ;;  %1086 = vmatmul.bf16.gmra.mxu3 %v1571_v46  ;;  %v584_v45 = vld [vmem:[#allocation2 + $0x48] sm:$0xff] }
 0x112   : > { %1027 = vmatmul.bf16.gmra.mxu1 %v1543_v47 }
 0x113   : > { %1076 = vmatmul.bf16.gmra.mxu2 %v1547_v48 }
 0x13e   : > { %v954_v49 = vpop.f32.mrf.mxu0 }
 0x13f   : > { %v1003_v50 = vpop.f32.mrf.mxu1 }
 0x140   : > { %v1004_v51 = vadd.f32 %v1003_v50, %v954_v49 }
 0x144   : > { %v2411_v52 = vpop.f32.mrf.mxu3 }
 0x146   : > { %v1052_v54 = vpop.f32.mrf.mxu2  ;;  %v956_v56 = vpop.f32.mrf.mxu0 }
 0x147   : > { %v1053_v55 = vadd.f32 %v1052_v54, %v1004_v51  ;;  %v1005_v57 = vpop.f32.mrf.mxu1  ;;  %v589_v54 = vld [vmem:[#allocation2 + $0x60] sm:$0xff] }
 0x148   : > { %v1006_v59 = vadd.f32 %v1005_v57, %v956_v56  ;;  %v585_v56 = vld [vmem:[#allocation2 + $0x40] sm:$0xff] }
 0x149   : > { %v1092_v58 = vadd.f32 %v1053_v55, %v577_v53 }
 0x14b   : > { %1108 = vst [vmem:[#allocation2 + $0x30] sm:$0xff] %v1092_v58 }
 0x14c   : > { %v2413_v60 = vpop.f32.mrf.mxu3 }
 0x14e   : > { %v1054_v62 = vpop.f32.mrf.mxu2  ;;  %v959_v0 = vpop.f32.mrf.mxu0 }
 0x14f   : > { %v1055_v63 = vadd.f32 %v1054_v62, %v1006_v59  ;;  %v1008_v1 = vpop.f32.mrf.mxu1 }
 0x150   : > { %v1009_v3 = vadd.f32 %v1008_v1, %v959_v0 }
 0x151   : > { %v1093_v2 = vadd.f32 %v1055_v63, %v578_v61 }
 0x153   : > { %1109 = vst [vmem:[#allocation2] sm:$0xff] %v1093_v2 }
 0x154   : > { %v2415_v4 = vpop.f32.mrf.mxu3 }
 0x156   : > { %v1057_v6 = vpop.f32.mrf.mxu2  ;;  %v961_v8 = vpop.f32.mrf.mxu0 }
 0x157   : > { %v1058_v7 = vadd.f32 %v1057_v6, %v1009_v3  ;;  %v1010_v9 = vpop.f32.mrf.mxu1  ;;  %v590_v3 = vld [vmem:[#allocation2 + $0x70] sm:$0xff]  ;;  %v586_v6 = vld [vmem:[#allocation2 + $0x20] sm:$0xff] }
 0x158   : > { %v1011_v11 = vadd.f32 %v1010_v9, %v961_v8 }
 0x159   : > { %v1094_v10 = vadd.f32 %v1058_v7, %v579_v5 }
 0x15b   : > { %1110 = vst [vmem:[#allocation2 + $0x58] sm:$0xff] %v1094_v10 }
 0x15c   : > { %v2417_v12 = vpop.f32.mrf.mxu3 }
 0x15e   : > { %v1059_v14 = vpop.f32.mrf.mxu2  ;;  %v964_v16 = vpop.f32.mrf.mxu0 }
 0x15f   : > { %v1060_v15 = vadd.f32 %v1059_v14, %v1011_v11  ;;  %v1013_v17 = vpop.f32.mrf.mxu1 }
 0x160   : > { %v1014_v19 = vadd.f32 %v1013_v17, %v964_v16  ;;  %v591_v16 = vld [vmem:[#allocation2 + $0x78] sm:$0xff] }
 0x161   : > { %v1095_v18 = vadd.f32 %v1060_v15, %v580_v13 }
 0x163   : > { %1111 = vst [vmem:[#allocation2 + $0x18] sm:$0xff] %v1095_v18  ;;  %v587_v18 = vld [vmem:[#allocation2 + $0x10] sm:$0xff] }
 0x164   : > { %v1033_v20 = vpop.f32.mrf.mxu3 }
 0x165   : > { %v1034_v53 = vadd.f32 %v1033_v20, %v2411_v52 }
 0x166   : > { %v1062_v23 = vpop.f32.mrf.mxu2  ;;  %v966_v24 = vpop.f32.mrf.mxu0 }
 0x167   : > { %v1063_v22 = vadd.f32 %v1062_v23, %v1014_v19  ;;  %v1015_v25 = vpop.f32.mrf.mxu1 }
 0x168   : > { %v1016_v27 = vadd.f32 %v1015_v25, %v966_v24 }
 0x169   : > { %v1096_v26 = vadd.f32 %v1063_v22, %v581_v21 }
 0x16b   : > { %1112 = vst [vmem:[#allocation2 + $0x50] sm:$0xff] %v1096_v26 }
 0x16c   : > { %v1035_v28 = vpop.f32.mrf.mxu3 }
 0x16d   : > { %v1036_v1 = vadd.f32 %v1035_v28, %v2413_v60 }
 0x16e   : > { %v1064_v30 = vpop.f32.mrf.mxu2  ;;  %v969_v32 = vpop.f32.mrf.mxu0 }
 0x16f   : > { %v1065_v31 = vadd.f32 %v1064_v30, %v1016_v27  ;;  %v1018_v33 = vpop.f32.mrf.mxu1  ;;  %v592_v27 = vld [vmem:[#allocation2 + $0x28] sm:$0xff] }
 0x170   : > { %v1019_v35 = vadd.f32 %v1018_v33, %v969_v32 }
 0x171   : > { %v1097_v34 = vadd.f32 %v1065_v31, %v582_v29  ;;  %v588_v29 = vld [vmem:[#allocation2 + $0x38] sm:$0xff] }
 0x173   : > { %1113 = vst [vmem:[#allocation2 + $0x68] sm:$0xff] %v1097_v34 }
 0x174   : > { %v1038_v36 = vpop.f32.mrf.mxu3 }
 0x175   : > { %v1039_v15 = vadd.f32 %v1038_v36, %v2415_v4 }
 0x176   : > { %v1067_v38 = vpop.f32.mrf.mxu2  ;;  %v971_v41 = vpop.f32.mrf.mxu0 }
 0x177   : > { %v1068_v39 = vadd.f32 %v1067_v38, %v1019_v35  ;;  %v1020_v40 = vpop.f32.mrf.mxu1 }
 0x178   : > { %v1021_v43 = vadd.f32 %v1020_v40, %v971_v41 }
 0x179   : > { %v1098_v42 = vadd.f32 %v1068_v39, %v583_v37 }
 0x17b   : > { %1114 = vst [vmem:[#allocation2 + $0x8] sm:$0xff] %v1098_v42 }
 0x17c   : > { %v1040_v44 = vpop.f32.mrf.mxu3 }
 0x17d   : > { %v1041_v25 = vadd.f32 %v1040_v44, %v2417_v12 }
 0x17e   : > { %v1069_v46 = vpop.f32.mrf.mxu2  ;;  %v974_v48 = vpop.f32.mrf.mxu0 }
 0x17f   : > { %v1070_v47 = vadd.f32 %v1069_v46, %v1021_v43  ;;  %v1023_v49 = vpop.f32.mrf.mxu1 }
 0x180   : > { %v1024_v51 = vadd.f32 %v1023_v49, %v974_v48 }
 0x181   : > { %v1099_v50 = vadd.f32 %v1070_v47, %v584_v45 }
 0x183   : > { %1115 = vst [vmem:[#allocation2 + $0x48] sm:$0xff] %v1099_v50 }
 0x184   : > { %v1082_v55 = vpop.f32.mrf.mxu3 }
 0x185   : > { %v1083_v58 = vadd.f32 %v1082_v55, %v1034_v53 }
 0x186   : > { %v1072_v57 = vpop.f32.mrf.mxu2  ;;  %v976_v61 = vpop.f32.mrf.mxu0 }
 0x187   : > { %v1073_v59 = vadd.f32 %v1072_v57, %v1024_v51  ;;  %v1104_v62 = vadd.f32 %v1083_v58, %v589_v54  ;;  %v1025_v63 = vpop.f32.mrf.mxu1 }
 0x188   : > { %v1026_v2 = vadd.f32 %v1025_v63, %v976_v61 }
 0x189   : > { %v1100_v0 = vadd.f32 %v1073_v59, %v585_v56  ;;  %1120 = vst [vmem:[#allocation2 + $0x60] sm:$0xff] %v1104_v62 }
 0x18b   : > { %1116 = vst [vmem:[#allocation2 + $0x40] sm:$0xff] %v1100_v0 }
 0x18c   : > { %v1084_v5 = vpop.f32.mrf.mxu3 }
 0x18d   : > { %v1085_v52 = vadd.f32 %v1084_v5, %v1036_v1 }
 0x18e   : > { %v1074_v7 = vpop.f32.mrf.mxu2  ;;  %v979_v10 = vpop.f32.mrf.mxu0 }
 0x18f   : > { %v1075_v8 = vadd.f32 %v1074_v7, %v1026_v2  ;;  %v1105_v9 = vadd.f32 %v1085_v52, %v590_v3  ;;  %v1028_v11 = vpop.f32.mrf.mxu1 }
 0x190   : > { %v1029_v14 = vadd.f32 %v1028_v11, %v979_v10 }
 0x191   : > { %v1101_v13 = vadd.f32 %v1075_v8, %v586_v6  ;;  %1121 = vst [vmem:[#allocation2 + $0x70] sm:$0xff] %v1105_v9 }
 0x193   : > { %1117 = vst [vmem:[#allocation2 + $0x20] sm:$0xff] %v1101_v13 }
 0x194   : > { %v1087_v17 = vpop.f32.mrf.mxu3 }
 0x195   : > { %v1088_v19 = vadd.f32 %v1087_v17, %v1039_v15 }
 0x196   : > { %v1077_v60 = vpop.f32.mrf.mxu2  ;;  %v981_v22 = vpop.f32.mrf.mxu0 }
 0x197   : > { %v1078_v20 = vadd.f32 %v1077_v60, %v1029_v14  ;;  %v1106_v21 = vadd.f32 %v1088_v19, %v591_v16  ;;  %v1030_v24 = vpop.f32.mrf.mxu1 }
 0x198   : > { %v1031_v26 = vadd.f32 %v1030_v24, %v981_v22 }
 0x199   : > { %v1102_v23 = vadd.f32 %v1078_v20, %v587_v18  ;;  %1122 = vst [vmem:[#allocation2 + $0x78] sm:$0xff] %v1106_v21 }
 0x19b   : > { %1118 = vst [vmem:[#allocation2 + $0x10] sm:$0xff] %v1102_v23 }
 0x19c   : > { %v1089_v28 = vpop.f32.mrf.mxu3 }
 0x19d   : > { %v1090_v4 = vadd.f32 %v1089_v28, %v1041_v25 }
 0x19e   : > { %v1079_v30 = vpop.f32.mrf.mxu2 }
 0x19f   : > { %v1080_v31 = vadd.f32 %v1079_v30, %v1031_v26  ;;  %v1107_v32 = vadd.f32 %v1090_v4, %v592_v27  ;;  %1127 = sbr.rel (%p1668_p5) target bundleno = 436 (0x1b4), region = 107 }
 0x1a1   : > { %v1103_v33 = vadd.f32 %v1080_v31, %v588_v29  ;;  %1123 = vst [vmem:[#allocation2 + $0x28] sm:$0xff] %v1107_v32 }
 0x1a3   : > { %1119 = vst [vmem:[#allocation2 + $0x38] sm:$0xff] %v1103_v33 }
 0x1a4   : > { %v1128_v34 = vld [vmem:[#allocation2 + $0x30] sm:$0xff]  ;;  %v1129_v35 = vld [vmem:[#allocation2] sm:$0xff]  ;;  %v1130_v36 = vld [vmem:[#allocation2 + $0x58] sm:$0xff] }
 0x1a5   : > { %v1887_v12 = vld [vmem:[%s555_s4] ss:$0 sm:$0xff]  ;;  %v1131_v37 = vld [vmem:[#allocation2 + $0x18] sm:$0xff]  ;;  %v1132_v38 = vld [vmem:[#allocation2 + $0x50] sm:$0xff] }
 0x1a6   : > { %v1133_v39 = vld [vmem:[#allocation2 + $0x68] sm:$0xff]  ;;  %v1148_v40 = vadd.f32 %v1887_v12, %v1128_v34  ;;  %v1149_v42 = vadd.f32 %v1887_v12, %v1129_v35  ;;  %v1150_v43 = vadd.f32 %v1887_v12, %v1130_v36  ;;  %v1151_v44 = vadd.f32 %v1887_v12, %v1131_v37  ;;  %v1136_v50 = vld [vmem:[#allocation2 + $0x40] sm:$0xff]  ;;  %v1138_v57 = vld [vmem:[#allocation2 + $0x10] sm:$0xff] }
 0x1a7   : > { %v1134_v41 = vld [vmem:[#allocation2 + $0x8] sm:$0xff]  ;;  %v1152_v46 = vadd.f32 %v1887_v12, %v1132_v38  ;;  %v1153_v47 = vadd.f32 %v1887_v12, %v1133_v39  ;;  %v1137_v51 = vld [vmem:[#allocation2 + $0x20] sm:$0xff]  ;;  %v1141_v1 = vld [vmem:[#allocation2 + $0x70] sm:$0xff]  ;;  %v1156_v5 = vadd.f32 %v1887_v12, %v1136_v50  ;;  %v1158_v10 = vadd.f32 %v1887_v12, %v1138_v57 }
 0x1a8   : > { %v1135_v45 = vld [vmem:[#allocation2 + $0x48] sm:$0xff]  ;;  %v1154_v48 = vadd.f32 %v1887_v12, %v1134_v41  ;;  %v1164_v53 = vmax.f32 %v1148_v40, 0.0  ;;  %v1165_v54 = vmax.f32 %v1149_v42, 0.0  ;;  %v1166_v55 = vmax.f32 %v1150_v43, 0.0  ;;  %v1140_v0 = vld [vmem:[#allocation2 + $0x60] sm:$0xff]  ;;  %v1142_v7 = vld [vmem:[#allocation2 + $0x78] sm:$0xff] }
 0x1a9   : > { %v1155_v49 = vadd.f32 %v1887_v12, %v1135_v45  ;;  %v1167_v56 = vmax.f32 %v1151_v44, 0.0  ;;  %v1168_v59 = vmax.f32 %v1152_v46, 0.0  ;;  %v1169_v61 = vmax.f32 %v1153_v47, 0.0  ;;  %v1143_v52 = vld [vmem:[#allocation2 + $0x28] sm:$0xff] }
 0x1aa   : > { %v1139_v58 = vld [vmem:[#allocation2 + $0x38] sm:$0xff]  ;;  %v1170_v62 = vmax.f32 %v1154_v48, 0.0  ;;  %v1726_v2 = vpack.c.bf16 %v1165_v54, %v1164_v53  ;;  %v1157_v6 = vadd.f32 %v1887_v12, %v1137_v51  ;;  %v1172_v13 = vmax.f32 %v1156_v5, 0.0 }
 0x1ab   : > { %v1171_v63 = vmax.f32 %v1155_v49, 0.0  ;;  %v1731_v3 = vpack.c.bf16 %v1167_v56, %v1166_v55  ;;  %v1736_v8 = vpack.c.bf16 %v1169_v61, %v1168_v59  ;;  %v1159_v11 = vadd.f32 %v1887_v12, %v1139_v58 }
 0x1ac   : > { %1727 = vst [vmem:[%s2296_s25] sm:$0xff] %v1726_v2   ;;  %v1173_v14 = vmax.f32 %v1157_v6, 0.0  ;;  %v1160_v15 = vadd.f32 %v1887_v12, %v1140_v0  ;;  %v1161_v16 = vadd.f32 %v1887_v12, %v1141_v1  ;;  %v1174_v17 = vmax.f32 %v1158_v10, 0.0 }
 0x1ad   : > { %v1741_v9 = vpack.c.bf16 %v1171_v63, %v1170_v62  ;;  %1763 = vst [vmem:[%s2296_s25 + $0x8] sm:$0xff] %v1731_v3   ;;  %v1175_v18 = vmax.f32 %v1159_v11, 0.0  ;;  %v1162_v60 = vadd.f32 %v1887_v12, %v1142_v7  ;;  %v1163_v19 = vadd.f32 %v1887_v12, %v1143_v52 }
 0x1ae   : > { %1764 = vst [vmem:[%s2296_s25 + $0x10] sm:$0xff] %v1736_v8   ;;  %v1746_v20 = vpack.c.bf16 %v1173_v14, %v1172_v13  ;;  %v1176_v21 = vmax.f32 %v1160_v15, 0.0  ;;  %v1177_v23 = vmax.f32 %v1161_v16, 0.0 }
 0x1af   : > { %1765 = vst [vmem:[%s2296_s25 + $0x18] sm:$0xff] %v1741_v9   ;;  %v1751_v22 = vpack.c.bf16 %v1175_v18, %v1174_v17  ;;  %v1178_v24 = vmax.f32 %v1162_v60, 0.0  ;;  %v1179_v25 = vmax.f32 %v1163_v19, 0.0 }
 0x1b0   : > { %1766 = vst [vmem:[%s2296_s25 + $0x20] sm:$0xff] %v1746_v20   ;;  %v1756_v26 = vpack.c.bf16 %v1177_v23, %v1176_v21 }
 0x1b1   : > { %1767 = vst [vmem:[%s2296_s25 + $0x28] sm:$0xff] %v1751_v22   ;;  %v1761_v27 = vpack.c.bf16 %v1179_v25, %v1178_v24 }
 0x1b2   : > { %1768 = vst [vmem:[%s2296_s25 + $0x30] sm:$0xff] %v1756_v26  }
 0x1b3   : > { %1769 = vst [vmem:[%s2296_s25 + $0x38] sm:$0xff] %v1761_v27  }
 0x1b4 PF: > { %1218 = sbr.rel (!%p2091_p12) target bundleno = 454 (0x1c6), region = 111  ;;  %s1670_s14 = sshll.u32 (%p2091_p12), %s1962_s19, 2  ;;  %v1240_v28 = vld [vmem:[%s2296_s25] sm:$0xf] (%p2091_p12)  ;;  %v1242_v29 = vld [vmem:[%s2296_s25 + $0x4] sm:$0xf] (%p2091_p12) }
 0x1b5   : > { %s1223_s5 = scalar_lea.vmem (%p2091_p12), %s2495_s3, %s1670_s14  ;;  %v1244_v30 = vld [vmem:[%s2296_s25 + $0x8] sm:$0xf] (%p2091_p12)  ;;  %v1246_v4 = vld [vmem:[%s2296_s25 + $0xc] sm:$0xf] (%p2091_p12)  ;;  %v1248_v31 = vld [vmem:[%s2296_s25 + $0x10] sm:$0xf] (%p2091_p12) }
 0x1b6   : > { %1241 = vst [vmem:[%s1223_s5] sm:$0xf] (%p2091_p12), %v1240_v28  ;;  %v1250_v32 = vld [vmem:[%s2296_s25 + $0x14] sm:$0xf] (%p2091_p12)  ;;  %v1252_v33 = vld [vmem:[%s2296_s25 + $0x18] sm:$0xf] (%p2091_p12) }
 0x1b7   : > { %1243 = vst [vmem:[%s1223_s5 + $0x8] sm:$0xf] (%p2091_p12), %v1242_v29  ;;  %v1254_v34 = vld [vmem:[%s2296_s25 + $0x1c] sm:$0xf] (%p2091_p12)  ;;  %v1256_v35 = vld [vmem:[%s2296_s25 + $0x20] sm:$0xf] (%p2091_p12) }
 0x1b8   : > { %1245 = vst [vmem:[%s1223_s5 + $0x10] sm:$0xf] (%p2091_p12), %v1244_v30  ;;  %v1258_v12 = vld [vmem:[%s2296_s25 + $0x24] sm:$0xf] (%p2091_p12)  ;;  %v1260_v36 = vld [vmem:[%s2296_s25 + $0x28] sm:$0xf] (%p2091_p12) }
 0x1b9   : > { %1247 = vst [vmem:[%s1223_s5 + $0x18] sm:$0xf] %v1246_v4  ;;  %v1262_v37 = vld [vmem:[%s2296_s25 + $0x2c] sm:$0xf]  ;;  %v1264_v38 = vld [vmem:[%s2296_s25 + $0x30] sm:$0xf] }
 0x1ba   : > { %1249 = vst [vmem:[%s1223_s5 + $0x20] sm:$0xf] %v1248_v31  ;;  %v1266_v39 = vld [vmem:[%s2296_s25 + $0x34] sm:$0xf]  ;;  %v1268_v41 = vld [vmem:[%s2296_s25 + $0x38] sm:$0xf] }
 0x1bb   : > { %1251 = vst [vmem:[%s1223_s5 + $0x28] sm:$0xf] %v1250_v32  ;;  %v1270_v40 = vld [vmem:[%s2296_s25 + $0x3c] sm:$0xf] }
 0x1bc   : > { %1253 = vst [vmem:[%s1223_s5 + $0x30] sm:$0xf] %v1252_v33 }
 0x1bd   : > { %1255 = vst [vmem:[%s1223_s5 + $0x38] sm:$0xf] %v1254_v34 }
 0x1be   : > { %1257 = vst [vmem:[%s1223_s5 + $0x40] sm:$0xf] %v1256_v35 }
 0x1bf   : > { %1259 = vst [vmem:[%s1223_s5 + $0x48] sm:$0xf] %v1258_v12 }
 0x1c0   : > { %1261 = vst [vmem:[%s1223_s5 + $0x50] sm:$0xf] %v1260_v36 }
 0x1c1   : > { %1263 = vst [vmem:[%s1223_s5 + $0x58] sm:$0xf] %v1262_v37 }
 0x1c2   : > { %1265 = vst [vmem:[%s1223_s5 + $0x60] sm:$0xf] %v1264_v38 }
 0x1c3   : > { %1267 = vst [vmem:[%s1223_s5 + $0x68] sm:$0xf] %v1266_v39 }
 0x1c4   : > { %1269 = vst [vmem:[%s1223_s5 + $0x70] sm:$0xf] %v1268_v41 }
 0x1c5   : > { %1271 = vst [vmem:[%s1223_s5 + $0x78] sm:$0xf] %v1270_v40 }
 0x1c6 PF: > { %s13_s22 = sadd.s32 1, %s1974_s22   ;;  %s2505_s10 = sld [smem:[#allocation6_spill]] }
 0x1c7   : > { %p10_p6 = scmp.ge.s32.totalorder %s13_s22, 14   ;;  %s2506_s12 = smov %s1938_s13 }
 0x1c8   : > { %s2507_s13 = smov %s2089_s9  ;;  %s2508_s14 = smov %s1946_s15 }
 0x1c9   : > { %s2509_s15 = smov %s2086_s8  ;;  %s2510_s16 = smov %s1954_s17 }
 0x1ca   : > { %s2511_s17 = smov %s2072_s30  ;;  %s2512_s18 = smov %s1966_s20 }
 0x1cb   : > { %s2513_s19 = smov %s1970_s21  ;;  %s2514_s20 = smov %s2517_s24 }
 0x1cc   : > { %s2515_s21 = smov %s2505_s10  ;;  %12 = sbr.rel (!%p10_p6) target bundleno = 9 (0x9), region = 200 }

// kernel: convnet_forward.22
= control target key start
LH: loop header
LB: loop body
LE: loop exit
PB: predicated region body
PF: predicated region fallthrough
CT: control target
= control target key end

     0   :  { %s2117_s0 = inlined_call_operand.vmem [shape: bf16[32,2304], index: 0, kind: input, shape index: {}]   ;;  %s2118_s1 = inlined_call_operand.vmem [shape: bf16[2304,512], index: 1, kind: input, shape index: {}]   ;;  %s2119_s2 = inlined_call_operand.vmem [shape: f32[1,512], index: 2, kind: input, shape index: {}]   ;;  %s2120_s3 = inlined_call_operand.vmem [shape: bf16[32,512], index: 3, kind: output, shape index: {}]  }
   0x1   :  { %2122 = sst [smem:[#allocation7_spill]] %s2117_s0 }
   0x2   :  { %2123 = sst [smem:[#allocation8_spill]] %s2118_s1 }
   0x3   :  { %s1715_s12 = smov 0   ;;  %s1717_s13 = smov 0  }
   0x4   :  { %s1719_s14 = smov 0   ;;  %s1721_s15 = smov 0  }
   0x5   :  { %s1723_s16 = smov 0   ;;  %s1725_s17 = smov 0  }
   0x6   :  { %s1727_s18 = smov 0   ;;  %s1729_s19 = smov 0  }
   0x7   :  { %s1731_s20 = smov 0   ;;  %s1733_s21 = smov 0  }
   0x8   :  { %s1735_s22 = smov 0  }
   0x9 LB: > { %s1198_s23 = sadd.s32 4294967295, %s1692_s22   ;;  %s25_s24 = sadd.s32 1, %s1684_s20  ;;  %s1692_s22 = sphi %s1735_s22, %s13_s22   ;;  %s1688_s21 = sphi %s1733_s21, %s2140_s21   ;;  %s1684_s20 = sphi %s1731_s20, %s2139_s20   ;;  %s1680_s19 = sphi %s1729_s19, %s2138_s19   ;;  %s1676_s18 = sphi %s1727_s18, %s2137_s18   ;;  %s1672_s17 = sphi %s1725_s17, %s2136_s17   ;;  %s1668_s16 = sphi %s1723_s16, %s2135_s16   ;;  %s1664_s15 = sphi %s1721_s15, %s2134_s15   ;;  %s1660_s14 = sphi %s1719_s14, %s2133_s14   ;;  %s1656_s13 = sphi %s1717_s13, %s2132_s13   ;;  %s1652_s12 = sphi %s1715_s12, %s2131_s12  }
   0xa   : > { %p26_p0 = scmp.ge.s32.totalorder %s25_s24, 6  ;;  %s28_s25 = sadd.s32 1, %s1688_s21 }
   0xb   : > { %s41_s26 = sadd.s32 1, %s1672_s17  ;;  %p48_p1 = scmp.ne.s32.totalorder %s1672_s17, %s1668_s16 }
   0xc   : > { %s2142_s24 = smov (%p26_p0, %s25_s24), 0  ;;  %s2144_s25 = smov (!%p26_p0, %s28_s25), %s1688_s21 }
   0xd   : > { %s37_s27 = ssub.s32 %s1684_s20, %s2142_s24  ;;  %p49_p2 = scmp.eq.s32.totalorder %s1692_s22, 0 }
   0xe   : > { %p30_p3 = scmp.ge.s32.totalorder %s2144_s25, 2  ;;  %p39_p4 = scmp.eq.s32.totalorder %s37_s27, 0 }
   0xf   : > { %p1782_p5 = por %p49_p2, %p48_p1  ;;  %s69_s29 = sadd.s32 1, %s1664_s15 }
  0x10   : > { %s2146_s25 = smov (%p30_p3, %s2144_s25), 0  ;;  %p76_p6 = scmp.ne.s32.totalorder %s1664_s15, %s1660_s14 }
  0x11   : > { %2125 = sst [smem:[#allocation6_spill]] %s2146_s25  ;;  %s65_s4 = ssub.s32 %s1688_s21, %s2146_s25 }
  0x12   : > { %s1790_s30 = scalar_select %p39_p4, %s1672_s17, %s41_s26  }
  0x13   : > { %s66_s5 = sor.u32 %s65_s4, %s37_s27  ;;  %p121_p7 = scmp.eq.s32.totalorder %s65_s4, 0 }
  0x14   : > { %p67_p8 = scmp.eq.s32.totalorder %s66_s5, 0  ;;  %p1796_p9 = por %p76_p6, %p49_p2 }
  0x15   : > { %s123_s7 = sadd.s32 1, %s1656_s13  ;;  %p133_p10 = scmp.ne.s32.totalorder %s1656_s13, %s1652_s12 }
  0x16   : > { %s1804_s8 = scalar_select %p67_p8, %s1664_s15, %s69_s29  }
  0x17   : > { %s1807_s9 = scalar_select %p121_p7, %s1656_s13, %s123_s7  }
  0x18   : > { %p134_p11 = scmp.eq.s32.totalorder %s1198_s23, 11  ;;  %p1201_p13 = scmp.ge.s32.totalorder %s1692_s22, 12 }
  0x1a   : > { %p1809_p12 = por %p134_p11, %p133_p10  ;;  %156 = sbr.rel (%p1201_p13) target bundleno = 106 (0x6a), region = 16 }
  0x1f   : > { %159 = sbr.rel (!%p1782_p5) target bundleno = 48 (0x30), region = 20  ;;  %s161_s11 = sand.u32 (%p1782_p5), 1, %s1672_s17  }
  0x20   : > { %s1440_s26 = smul.u32 (%p1782_p5), 12, %s1684_s20  ;;  %s2128_s0 = sld [smem:[#allocation7_spill]] (%p1782_p5) }
  0x21   : > { %s1513_s27 = smul.u32 (%p1782_p5), 48, %s161_s11 }
  0x23   : > { %s163_s23 = scalar_lea.vmem (%p1782_p5), [#allocation3], %s1513_s27 }
  0x26   : > { %s169_s5 = scalar_lea.vmem %s2128_s0, %s1440_s26 }
  0x27   : > { %v184_v0 = vld [vmem:[%s169_s5] sm:$0xff]  ;;  %v186_v1 = vld [vmem:[%s169_s5 + $0x48] sm:$0xff]  ;;  %v188_v2 = vld [vmem:[%s169_s5 + $0x90] sm:$0xff] }
  0x28   : > { %185 = vst [vmem:[%s163_s23] sm:$0xff] %v184_v0  ;;  %v190_v3 = vld [vmem:[%s169_s5 + $0xd8] sm:$0xff]  ;;  %v1203_v4 = vld [vmem:[%s169_s5 + $0x8] sm:$0xf]  ;;  %v1205_v5 = vld [vmem:[%s169_s5 + $0x50] sm:$0xf] }
  0x29   : > { %187 = vst [vmem:[%s163_s23 + $0xc] sm:$0xff] %v186_v1  ;;  %v1207_v6 = vld [vmem:[%s169_s5 + $0x98] sm:$0xf]  ;;  %v1209_v7 = vld [vmem:[%s169_s5 + $0xe0] sm:$0xf] }
  0x2a   : > { %189 = vst [vmem:[%s163_s23 + $0x18] sm:$0xff] %v188_v2 }
  0x2b   : > { %191 = vst [vmem:[%s163_s23 + $0x24] sm:$0xff] %v190_v3 }
  0x2c   : > { %1204 = vst [vmem:[%s163_s23 + $0x8] sm:$0xf] %v1203_v4 }
  0x2d   : > { %1206 = vst [vmem:[%s163_s23 + $0x14] sm:$0xf] %v1205_v5 }
  0x2e   : > { %1208 = vst [vmem:[%s163_s23 + $0x20] sm:$0xf] %v1207_v6 }
  0x2f   : > { %1210 = vst [vmem:[%s163_s23 + $0x2c] sm:$0xf] %v1209_v7 }
  0x30 PF: > { %213 = sbr.rel (!%p1796_p9) target bundleno = 106 (0x6a), region = 46  ;;  %s215_s28 = sand.u32 (%p1796_p9), 1, %s1664_s15  }
  0x31   : > { %s1514_s7 = smul.u32 (%p1796_p9), 384, %s215_s28  ;;  %s1211_s11 = sshll.u32 (%p1796_p9), %s1688_s21, 1 }
  0x32   : > { %s1441_s26 = smul.u32 (%p1796_p9), 192, %s1684_s20  ;;  %s2129_s1 = sld [smem:[#allocation8_spill]] (%p1796_p9) }
  0x33   : > { %s1834_s6 = scalar_lea.vmem (%p1796_p9), [#allocation4], %s1514_s7 }
  0x34   : > { %s221_s27 = sadd.s32 (%p1796_p9), %s1441_s26, %s1211_s11 }
  0x35   : > { %s1213_s29 = sshll.u32 %s221_s27, 2 }
  0x38   : > { %s1829_s5 = scalar_lea.vmem %s2129_s1, %s1213_s29 }
  0x39   : > { %v346_v8 = vld [vmem:[%s1829_s5] sm:$0xff]  ;;  %v348_v9 = vld [vmem:[%s1829_s5 + $0x10] sm:$0xff] }
  0x3a   : > { %v350_v10 = vld [vmem:[%s1829_s5 + $0x20] sm:$0xff]  ;;  %347 = vst [vmem:[%s1834_s6] sm:$0xff] %v346_v8  ;;  %v352_v11 = vld [vmem:[%s1829_s5 + $0x30] sm:$0xff] }
  0x3b   : > { %349 = vst [vmem:[%s1834_s6 + $0x8] sm:$0xff] %v348_v9  ;;  %v354_v12 = vld [vmem:[%s1829_s5 + $0x40] sm:$0xff]  ;;  %v356_v13 = vld [vmem:[%s1829_s5 + $0x50] sm:$0xff] }
  0x3c   : > { %351 = vst [vmem:[%s1834_s6 + $0x10] sm:$0xff] %v350_v10  ;;  %v358_v14 = vld [vmem:[%s1829_s5 + $0x60] sm:$0xff]  ;;  %v360_v15 = vld [vmem:[%s1829_s5 + $0x70] sm:$0xff] }
  0x3d   : > { %353 = vst [vmem:[%s1834_s6 + $0x18] sm:$0xff] %v352_v11  ;;  %v362_v16 = vld [vmem:[%s1829_s5 + $0x80] sm:$0xff]  ;;  %v364_v17 = vld [vmem:[%s1829_s5 + $0x90] sm:$0xff] }
  0x3e   : > { %355 = vst [vmem:[%s1834_s6 + $0x20] sm:$0xff] %v354_v12  ;;  %v366_v18 = vld [vmem:[%s1829_s5 + $0xa0] sm:$0xff]  ;;  %v368_v19 = vld [vmem:[%s1829_s5 + $0xb0] sm:$0xff] }
  0x3f   : > { %357 = vst [vmem:[%s1834_s6 + $0x28] sm:$0xff] %v356_v13  ;;  %v370_v20 = vld [vmem:[%s1829_s5 + $0xc0] sm:$0xff]  ;;  %v372_v21 = vld [vmem:[%s1829_s5 + $0xd0] sm:$0xff] }
  0x40   : > { %359 = vst [vmem:[%s1834_s6 + $0x30] sm:$0xff] %v358_v14  ;;  %v374_v22 = vld [vmem:[%s1829_s5 + $0xe0] sm:$0xff]  ;;  %v376_v23 = vld [vmem:[%s1829_s5 + $0xf0] sm:$0xff] }
  0x41   : > { %361 = vst [vmem:[%s1834_s6 + $0x38] sm:$0xff] %v360_v15  ;;  %v378_v24 = vld [vmem:[%s1829_s5 + $0x100] sm:$0xff]  ;;  %v380_v25 = vld [vmem:[%s1829_s5 + $0x110] sm:$0xff] }
  0x42   : > { %363 = vst [vmem:[%s1834_s6 + $0x40] sm:$0xff] %v362_v16  ;;  %v382_v26 = vld [vmem:[%s1829_s5 + $0x120] sm:$0xff]  ;;  %v384_v27 = vld [vmem:[%s1829_s5 + $0x130] sm:$0xff] }
  0x43   : > { %365 = vst [vmem:[%s1834_s6 + $0x48] sm:$0xff] %v364_v17  ;;  %v386_v28 = vld [vmem:[%s1829_s5 + $0x140] sm:$0xff]  ;;  %v388_v29 = vld [vmem:[%s1829_s5 + $0x150] sm:$0xff] }
  0x44   : > { %367 = vst [vmem:[%s1834_s6 + $0x50] sm:$0xff] %v366_v18  ;;  %v390_v30 = vld [vmem:[%s1829_s5 + $0x160] sm:$0xff]  ;;  %v392_v31 = vld [vmem:[%s1829_s5 + $0x170] sm:$0xff] }
  0x45   : > { %369 = vst [vmem:[%s1834_s6 + $0x58] sm:$0xff] %v368_v19  ;;  %v394_v32 = vld [vmem:[%s1829_s5 + $0x180] sm:$0xff]  ;;  %v396_v33 = vld [vmem:[%s1829_s5 + $0x190] sm:$0xff] }
  0x46   : > { %371 = vst [vmem:[%s1834_s6 + $0x60] sm:$0xff] %v370_v20  ;;  %v398_v34 = vld [vmem:[%s1829_s5 + $0x1a0] sm:$0xff]  ;;  %v400_v35 = vld [vmem:[%s1829_s5 + $0x1b0] sm:$0xff] }
  0x47   : > { %373 = vst [vmem:[%s1834_s6 + $0x68] sm:$0xff] %v372_v21  ;;  %v402_v36 = vld [vmem:[%s1829_s5 + $0x1c0] sm:$0xff]  ;;  %v404_v37 = vld [vmem:[%s1829_s5 + $0x1d0] sm:$0xff] }
  0x48   : > { %375 = vst [vmem:[%s1834_s6 + $0x70] sm:$0xff] %v374_v22  ;;  %v406_v38 = vld [vmem:[%s1829_s5 + $0x1e0] sm:$0xff]  ;;  %v408_v39 = vld [vmem:[%s1829_s5 + $0x1f0] sm:$0xff] }
  0x49   : > { %377 = vst [vmem:[%s1834_s6 + $0x78] sm:$0xff] %v376_v23  ;;  %v410_v40 = vld [vmem:[%s1829_s5 + $0x200] sm:$0xff]  ;;  %v412_v41 = vld [vmem:[%s1829_s5 + $0x210] sm:$0xff] }
  0x4a   : > { %379 = vst [vmem:[%s1834_s6 + $0x80] sm:$0xff] %v378_v24  ;;  %v414_v42 = vld [vmem:[%s1829_s5 + $0x220] sm:$0xff]  ;;  %v416_v43 = vld [vmem:[%s1829_s5 + $0x230] sm:$0xff] }
  0x4b   : > { %381 = vst [vmem:[%s1834_s6 + $0x88] sm:$0xff] %v380_v25  ;;  %v418_v44 = vld [vmem:[%s1829_s5 + $0x240] sm:$0xff]  ;;  %v420_v45 = vld [vmem:[%s1829_s5 + $0x250] sm:$0xff] }
  0x4c   : > { %383 = vst [vmem:[%s1834_s6 + $0x90] sm:$0xff] %v382_v26  ;;  %v422_v46 = vld [vmem:[%s1829_s5 + $0x260] sm:$0xff]  ;;  %v424_v47 = vld [vmem:[%s1829_s5 + $0x270] sm:$0xff] }
  0x4d   : > { %385 = vst [vmem:[%s1834_s6 + $0x98] sm:$0xff] %v384_v27  ;;  %v426_v48 = vld [vmem:[%s1829_s5 + $0x280] sm:$0xff]  ;;  %v428_v49 = vld [vmem:[%s1829_s5 + $0x290] sm:$0xff] }
  0x4e   : > { %387 = vst [vmem:[%s1834_s6 + $0xa0] sm:$0xff] %v386_v28  ;;  %v430_v50 = vld [vmem:[%s1829_s5 + $0x2a0] sm:$0xff]  ;;  %v432_v51 = vld [vmem:[%s1829_s5 + $0x2b0] sm:$0xff] }
  0x4f   : > { %389 = vst [vmem:[%s1834_s6 + $0xa8] sm:$0xff] %v388_v29  ;;  %v434_v52 = vld [vmem:[%s1829_s5 + $0x2c0] sm:$0xff]  ;;  %v436_v53 = vld [vmem:[%s1829_s5 + $0x2d0] sm:$0xff] }
  0x50   : > { %391 = vst [vmem:[%s1834_s6 + $0xb0] sm:$0xff] %v390_v30  ;;  %v438_v54 = vld [vmem:[%s1829_s5 + $0x2e0] sm:$0xff]  ;;  %v440_v55 = vld [vmem:[%s1829_s5 + $0x2f0] sm:$0xff] }
  0x51   : > { %393 = vst [vmem:[%s1834_s6 + $0xb8] sm:$0xff] %v392_v31 }
  0x52   : > { %395 = vst [vmem:[%s1834_s6 + $0xc0] sm:$0xff] %v394_v32 }
  0x53   : > { %397 = vst [vmem:[%s1834_s6 + $0xc8] sm:$0xff] %v396_v33 }
  0x54   : > { %399 = vst [vmem:[%s1834_s6 + $0xd0] sm:$0xff] %v398_v34 }
  0x55   : > { %401 = vst [vmem:[%s1834_s6 + $0xd8] sm:$0xff] %v400_v35 }
  0x56   : > { %403 = vst [vmem:[%s1834_s6 + $0xe0] sm:$0xff] %v402_v36 }
  0x57   : > { %405 = vst [vmem:[%s1834_s6 + $0xe8] sm:$0xff] %v404_v37 }
  0x58   : > { %407 = vst [vmem:[%s1834_s6 + $0xf0] sm:$0xff] %v406_v38 }
  0x59   : > { %409 = vst [vmem:[%s1834_s6 + $0xf8] sm:$0xff] %v408_v39 }
  0x5a   : > { %411 = vst [vmem:[%s1834_s6 + $0x100] sm:$0xff] %v410_v40 }
  0x5b   : > { %413 = vst [vmem:[%s1834_s6 + $0x108] sm:$0xff] %v412_v41 }
  0x5c   : > { %415 = vst [vmem:[%s1834_s6 + $0x110] sm:$0xff] %v414_v42 }
  0x5d   : > { %417 = vst [vmem:[%s1834_s6 + $0x118] sm:$0xff] %v416_v43 }
  0x5e   : > { %419 = vst [vmem:[%s1834_s6 + $0x120] sm:$0xff] %v418_v44 }
  0x5f   : > { %421 = vst [vmem:[%s1834_s6 + $0x128] sm:$0xff] %v420_v45 }
  0x60   : > { %423 = vst [vmem:[%s1834_s6 + $0x130] sm:$0xff] %v422_v46 }
  0x61   : > { %425 = vst [vmem:[%s1834_s6 + $0x138] sm:$0xff] %v424_v47 }
  0x62   : > { %427 = vst [vmem:[%s1834_s6 + $0x140] sm:$0xff] %v426_v48 }
  0x63   : > { %429 = vst [vmem:[%s1834_s6 + $0x148] sm:$0xff] %v428_v49 }
  0x64   : > { %431 = vst [vmem:[%s1834_s6 + $0x150] sm:$0xff] %v430_v50 }
  0x65   : > { %433 = vst [vmem:[%s1834_s6 + $0x158] sm:$0xff] %v432_v51 }
  0x66   : > { %435 = vst [vmem:[%s1834_s6 + $0x160] sm:$0xff] %v434_v52 }
  0x67   : > { %437 = vst [vmem:[%s1834_s6 + $0x168] sm:$0xff] %v436_v53 }
  0x68   : > { %439 = vst [vmem:[%s1834_s6 + $0x170] sm:$0xff] %v438_v54 }
  0x69   : > { %441 = vst [vmem:[%s1834_s6 + $0x178] sm:$0xff] %v440_v55 }
  0x6a PF: > { %p1214_p0 = scmp.ge.s32.totalorder %s1692_s22, 1  ;;  %p454_p1 = scmp.lt.s32.totalorder %s1692_s22, 13 }
  0x6c   : > { %p455_p2 = pnand %p1214_p0, %p454_p1 }
  0x6d   : > { %s461_s0 = sand.u32 (!%p455_p2), 1, %s1668_s16   ;;  %s468_s23 = sand.u32 (!%p455_p2), 1, %s1660_s14  }
  0x6e   : > { %458 = sbr.rel (%p455_p2) target bundleno = 368 (0x170), region = 88  ;;  %s495_s7 = sand.u32 (!%p455_p2), 1, %s1652_s12  }
  0x6f   : > { %s1515_s28 = smul.u32 (!%p455_p2), 48, %s461_s0  ;;  %s1215_s26 = sshll.u32 (!%p455_p2), %s495_s7, 5 }
  0x70   : > { %s1516_s11 = smul.u32 (!%p455_p2), 384, %s468_s23  ;;  %s1216_s27 = sshll.u32 (!%p455_p2), %s1680_s19, 1 }
  0x71   : > { %p503_p3 = scmp.lt.s32.totalorder (!%p455_p2), %s1216_s27, 3  ;;  %s1941_s6 = scalar_lea.vmem (!%p455_p2), [#allocation3], %s1515_s28 }
  0x72   : > { %s1943_s1 = scalar_lea.vmem (!%p455_p2), [#allocation4], %s1516_s11  ;;  %s1945_s25 = scalar_lea.vmem (!%p455_p2), [#allocation5], %s1215_s26 }
  0x73   : > { %s2148_s27 = smov (!%p503_p3, %s1216_s27), 3  ;;  %p1217_p4 = scmp.ne.s32.totalorder %s1676_s18, 0 }
  0x74   : > { %s505_s5 = scalar_lea.vmem %s2119_s2, %s2148_s27 }
  0x75   : > { %512 = sbr.rel (%p1217_p4) target bundleno = 131 (0x83), region = 100 }
  0x7a   : > { %v1694_v56 = vmov 0.0  }
  0x7b   : > { %513 = vst [vmem:[#allocation2 + $0x30] sm:$0xff] %v1694_v56 }
  0x7c   : > { %514 = vst [vmem:[#allocation2] sm:$0xff] %v1694_v56 }
  0x7d   : > { %515 = vst [vmem:[#allocation2 + $0x18] sm:$0xff] %v1694_v56 }
  0x7e   : > { %516 = vst [vmem:[#allocation2 + $0x10] sm:$0xff] %v1694_v56 }
  0x7f   : > { %517 = vst [vmem:[#allocation2 + $0x8] sm:$0xff] %v1694_v56 }
  0x80   : > { %518 = vst [vmem:[#allocation2 + $0x20] sm:$0xff] %v1694_v56 }
  0x81   : > { %519 = vst [vmem:[#allocation2 + $0x28] sm:$0xff] %v1694_v56 }
  0x82   : > { %520 = vst [vmem:[#allocation2 + $0x38] sm:$0xff] %v1694_v56 }
  0x83 PF: > { %v1300_v57 = vld [vmem:[%s1943_s1 + $0x70] sm:$0xf]  ;;  %v1463_v58 = vld [vmem:[%s1943_s1 + $0x74] sm:$0xf0]  ;;  %v1462_v2 = vld [vmem:[%s1943_s1 + $0x74] sm:$0xf] }
  0x84   : > { %v1364_v59 = vld [vmem:[%s1943_s1 + $0xf0] sm:$0xf]  ;;  %v1301_v60 = vor.u32 %v1463_v58, %v1300_v57  ;;  %v1479_v61 = vld [vmem:[%s1943_s1 + $0xf4] sm:$0xf0]  ;;  %v1302_v3 = vld [vmem:[%s1943_s1 + $0x78] sm:$0xf0] }
  0x85   : > { %v1428_v62 = vld [vmem:[%s1943_s1 + $0x170] sm:$0xf]  ;;  %v1495_v63 = vld [vmem:[%s1943_s1 + $0x174] sm:$0xf0]  ;;  %v1365_v0 = vor.u32 %v1479_v61, %v1364_v59  ;;  %v1292_v4 = vld [vmem:[%s1943_s1 + $0x60] sm:$0xf]  ;;  %v1305_v5 = vor.u32 %v1462_v2, %v1302_v3 }
  0x86   : > { %v1429_v1 = vor.u32 %v1495_v63, %v1428_v62  ;;  %857 = vmatpush.bf16.msra.mxu0 %v1301_v60  ;;  %v1461_v6 = vld [vmem:[%s1943_s1 + $0x64] sm:$0xf0]  ;;  %v1356_v7 = vld [vmem:[%s1943_s1 + $0xe0] sm:$0xf]  ;;  %v1460_v13 = vld [vmem:[%s1943_s1 + $0x64] sm:$0xf] }
  0x87   : > { %v1477_v8 = vld [vmem:[%s1943_s1 + $0xe4] sm:$0xf0]  ;;  %876 = vmatpush.bf16.msra.mxu1 %v1365_v0  ;;  %v1293_v9 = vor.u32 %v1461_v6, %v1292_v4  ;;  %v1420_v11 = vld [vmem:[%s1943_s1 + $0x160] sm:$0xf]  ;;  %914 = vmatpush.bf16.msra.mxu3 %v1305_v5  ;;  %v1294_v15 = vld [vmem:[%s1943_s1 + $0x68] sm:$0xf0] }
  0x88   : > { %895 = vmatpush.bf16.msra.mxu2 %v1429_v1  ;;  %v1357_v10 = vor.u32 %v1477_v8, %v1356_v7  ;;  %v1493_v12 = vld [vmem:[%s1943_s1 + $0x164] sm:$0xf0]  ;;  %v1284_v16 = vld [vmem:[%s1943_s1 + $0x50] sm:$0xf]  ;;  %v1459_v17 = vld [vmem:[%s1943_s1 + $0x54] sm:$0xf0]  ;;  %v1297_v18 = vor.u32 %v1460_v13, %v1294_v15 }
  0x89   : > { %v1421_v14 = vor.u32 %v1493_v12, %v1420_v11  ;;  %v1348_v19 = vld [vmem:[%s1943_s1 + $0xd0] sm:$0xf]  ;;  %v1475_v20 = vld [vmem:[%s1943_s1 + $0xd4] sm:$0xf0]  ;;  %v1285_v22 = vor.u32 %v1459_v17, %v1284_v16  ;;  %v1458_v24 = vld [vmem:[%s1943_s1 + $0x54] sm:$0xf] }
  0x8a   : > { %v1412_v21 = vld [vmem:[%s1943_s1 + $0x150] sm:$0xf]  ;;  %858 = vmatpush.bf16.msra.mxu0 %v1293_v9  ;;  %v1491_v23 = vld [vmem:[%s1943_s1 + $0x154] sm:$0xf0]  ;;  %v1286_v25 = vld [vmem:[%s1943_s1 + $0x58] sm:$0xf0]  ;;  %v1349_v26 = vor.u32 %v1475_v20, %v1348_v19 }
  0x8b   : > { %877 = vmatpush.bf16.msra.mxu1 %v1357_v10  ;;  %v1413_v27 = vor.u32 %v1491_v23, %v1412_v21  ;;  %v1276_v28 = vld [vmem:[%s1943_s1 + $0x40] sm:$0xf]  ;;  %v1457_v29 = vld [vmem:[%s1943_s1 + $0x44] sm:$0xf0]  ;;  %915 = vmatpush.bf16.msra.mxu3 %v1297_v18  ;;  %v1289_v31 = vor.u32 %v1458_v24, %v1286_v25  ;;  %v1456_v35 = vld [vmem:[%s1943_s1 + $0x44] sm:$0xf] }
  0x8c   : > { %896 = vmatpush.bf16.msra.mxu2 %v1421_v14  ;;  %v1340_v30 = vld [vmem:[%s1943_s1 + $0xc0] sm:$0xf]  ;;  %v1473_v32 = vld [vmem:[%s1943_s1 + $0xc4] sm:$0xf0]  ;;  %v1278_v36 = vld [vmem:[%s1943_s1 + $0x48] sm:$0xf0]  ;;  %v1277_v37 = vor.u32 %v1457_v29, %v1276_v28 }
  0x8d   : > { %v1404_v33 = vld [vmem:[%s1943_s1 + $0x140] sm:$0xf]  ;;  %v1489_v34 = vld [vmem:[%s1943_s1 + $0x144] sm:$0xf0]  ;;  %v1341_v38 = vor.u32 %v1473_v32, %v1340_v30  ;;  %v1268_v40 = vld [vmem:[%s1943_s1 + $0x30] sm:$0xf]  ;;  %v1281_v43 = vor.u32 %v1456_v35, %v1278_v36 }
  0x8e   : > { %859 = vmatpush.bf16.msra.mxu0 %v1285_v22  ;;  %v1405_v39 = vor.u32 %v1489_v34, %v1404_v33  ;;  %v1455_v41 = vld [vmem:[%s1943_s1 + $0x34] sm:$0xf0]  ;;  %v1332_v42 = vld [vmem:[%s1943_s1 + $0xb0] sm:$0xf]  ;;  %v1454_v47 = vld [vmem:[%s1943_s1 + $0x34] sm:$0xf] }
  0x8f   : > { %878 = vmatpush.bf16.msra.mxu1 %v1349_v26  ;;  %916 = vmatpush.bf16.msra.mxu3 %v1289_v31  ;;  %v1471_v44 = vld [vmem:[%s1943_s1 + $0xb4] sm:$0xf0]  ;;  %v1396_v45 = vld [vmem:[%s1943_s1 + $0x130] sm:$0xf]  ;;  %v1270_v48 = vld [vmem:[%s1943_s1 + $0x38] sm:$0xf0]  ;;  %v1269_v49 = vor.u32 %v1455_v41, %v1268_v40 }
  0x90   : > { %897 = vmatpush.bf16.msra.mxu2 %v1413_v27  ;;  %v1487_v46 = vld [vmem:[%s1943_s1 + $0x134] sm:$0xf0]  ;;  %v1333_v50 = vor.u32 %v1471_v44, %v1332_v42  ;;  %v1260_v52 = vld [vmem:[%s1943_s1 + $0x20] sm:$0xf]  ;;  %v1453_v53 = vld [vmem:[%s1943_s1 + $0x24] sm:$0xf0]  ;;  %v1273_v55 = vor.u32 %v1454_v47, %v1270_v48 }
  0x91   : > { %v1397_v51 = vor.u32 %v1487_v46, %v1396_v45  ;;  %v1324_v54 = vld [vmem:[%s1943_s1 + $0xa0] sm:$0xf]  ;;  %v1469_v56 = vld [vmem:[%s1943_s1 + $0xa4] sm:$0xf0]  ;;  %v1452_v59 = vld [vmem:[%s1943_s1 + $0x24] sm:$0xf]  ;;  %v1261_v61 = vor.u32 %v1453_v53, %v1260_v52 }
  0x92   : > { %860 = vmatpush.bf16.msra.mxu0 %v1277_v37  ;;  %v1388_v57 = vld [vmem:[%s1943_s1 + $0x120] sm:$0xf]  ;;  %v1485_v58 = vld [vmem:[%s1943_s1 + $0x124] sm:$0xf0]  ;;  %v1262_v60 = vld [vmem:[%s1943_s1 + $0x28] sm:$0xf0]  ;;  %v1325_v62 = vor.u32 %v1469_v56, %v1324_v54 }
  0x93   : > { %879 = vmatpush.bf16.msra.mxu1 %v1341_v38  ;;  %917 = vmatpush.bf16.msra.mxu3 %v1281_v43  ;;  %v1389_v63 = vor.u32 %v1485_v58, %v1388_v57  ;;  %v1252_v0 = vld [vmem:[%s1943_s1 + $0x10] sm:$0xf]  ;;  %v1451_v1 = vld [vmem:[%s1943_s1 + $0x14] sm:$0xf0]  ;;  %v1265_v3 = vor.u32 %v1452_v59, %v1262_v60  ;;  %v1450_v7 = vld [vmem:[%s1943_s1 + $0x14] sm:$0xf] }
  0x94   : > { %898 = vmatpush.bf16.msra.mxu2 %v1405_v39  ;;  %v1316_v2 = vld [vmem:[%s1943_s1 + $0x90] sm:$0xf]  ;;  %v1467_v4 = vld [vmem:[%s1943_s1 + $0x94] sm:$0xf0]  ;;  %v1254_v8 = vld [vmem:[%s1943_s1 + $0x18] sm:$0xf0]  ;;  %v1253_v9 = vor.u32 %v1451_v1, %v1252_v0 }
  0x95   : > { %v1380_v5 = vld [vmem:[%s1943_s1 + $0x110] sm:$0xf]  ;;  %v1483_v6 = vld [vmem:[%s1943_s1 + $0x114] sm:$0xf0]  ;;  %v1244_v10 = vld [vmem:[%s1943_s1] sm:$0xf]  ;;  %v1317_v13 = vor.u32 %v1467_v4, %v1316_v2  ;;  %v1257_v18 = vor.u32 %v1450_v7, %v1254_v8 }
  0x96   : > { %861 = vmatpush.bf16.msra.mxu0 %v1269_v49  ;;  %v1449_v11 = vld [vmem:[%s1943_s1 + $0x4] sm:$0xf0]  ;;  %v1308_v12 = vld [vmem:[%s1943_s1 + $0x80] sm:$0xf]  ;;  %v1381_v14 = vor.u32 %v1483_v6, %v1380_v5  ;;  %v1448_v19 = vld [vmem:[%s1943_s1 + $0x4] sm:$0xf] }
  0x97   : > { %880 = vmatpush.bf16.msra.mxu1 %v1333_v50  ;;  %918 = vmatpush.bf16.msra.mxu3 %v1273_v55  ;;  %v1465_v15 = vld [vmem:[%s1943_s1 + $0x84] sm:$0xf0]  ;;  %v1372_v16 = vld [vmem:[%s1943_s1 + $0x100] sm:$0xf]  ;;  %v1246_v20 = vld [vmem:[%s1943_s1 + $0x8] sm:$0xf0]  ;;  %v1245_v25 = vor.u32 %v1449_v11, %v1244_v10 }
  0x98   : > { %899 = vmatpush.bf16.msra.mxu2 %v1397_v51  ;;  %v1481_v17 = vld [vmem:[%s1943_s1 + $0x104] sm:$0xf0]  ;;  %v1220_v21 = vld [vmem:[%s1941_s6] sm:$0xf]  ;;  %v1443_v22 = vld [vmem:[%s1941_s6 + $0x8] sm:$0xf0]  ;;  %v1309_v29 = vor.u32 %v1465_v15, %v1308_v12  ;;  %v1249_v34 = vor.u32 %v1448_v19, %v1246_v20 }
  0x99   : > { %v1478_v23 = vld [vmem:[%s1943_s1 + $0xf4] sm:$0xf]  ;;  %v1366_v24 = vld [vmem:[%s1943_s1 + $0xf8] sm:$0xf0]  ;;  %v1373_v30 = vor.u32 %v1481_v17, %v1372_v16  ;;  %v1222_v31 = vld [vmem:[%s1941_s6 + $0xc] sm:$0xf0]  ;;  %v1221_v36 = vor.u32 %v1443_v22, %v1220_v21 }
  0x9a   : > { %862 = vmatpush.bf16.msra.mxu0 %v1261_v61  ;;  %v1442_v26 = vld [vmem:[%s1941_s6 + $0x4] sm:$0xf]  ;;  %v1430_v28 = vld [vmem:[%s1943_s1 + $0x178] sm:$0xf0]  ;;  %v1228_v32 = vld [vmem:[%s1941_s6 + $0x8] sm:$0xf]  ;;  %v1369_v35 = vor.u32 %v1478_v23, %v1366_v24 }
  0x9b   : > { %881 = vmatpush.bf16.msra.mxu1 %v1325_v62  ;;  %919 = vmatpush.bf16.msra.mxu3 %v1265_v3  ;;  %v1494_v27 = vld [vmem:[%s1943_s1 + $0x174] sm:$0xf]  ;;  %v1476_v38 = vld [vmem:[%s1943_s1 + $0xe4] sm:$0xf]  ;;  %v1358_v39 = vld [vmem:[%s1943_s1 + $0xe8] sm:$0xf0]  ;;  %v2024_v40 = vor.u32 %v1442_v26, %v1222_v31 }
  0x9c   : > { %900 = vmatpush.bf16.msra.mxu2 %v1389_v63  ;;  %v1444_v33 = vld [vmem:[%s1941_s6 + $0x10] sm:$0xf0]  ;;  %v1433_v37 = vor.u32 %v1494_v27, %v1430_v28  ;;  %v1422_v43 = vld [vmem:[%s1943_s1 + $0x168] sm:$0xf0]  ;;  %v1361_v44 = vor.u32 %v1476_v38, %v1358_v39  ;;  %v1350_v47 = vld [vmem:[%s1943_s1 + $0xd8] sm:$0xf0] }
  0x9d   : > { %v2026_v41 = vor.u32 %v1444_v33, %v1228_v32  ;;  %v1492_v42 = vld [vmem:[%s1943_s1 + $0x164] sm:$0xf]  ;;  %v1474_v46 = vld [vmem:[%s1943_s1 + $0xd4] sm:$0xf]  ;;  %v1414_v49 = vld [vmem:[%s1943_s1 + $0x158] sm:$0xf0] }
  0x9e   : > { %863 = vmatpush.bf16.msra.mxu0 %v1253_v9  ;;  %v1425_v45 = vor.u32 %v1492_v42, %v1422_v43  ;;  %v1490_v48 = vld [vmem:[%s1943_s1 + $0x154] sm:$0xf]  ;;  %v1353_v50 = vor.u32 %v1474_v46, %v1350_v47  ;;  %v1472_v52 = vld [vmem:[%s1943_s1 + $0xc4] sm:$0xf]  ;;  %v1342_v53 = vld [vmem:[%s1943_s1 + $0xc8] sm:$0xf0] }
  0x9f   : > { %882 = vmatpush.bf16.msra.mxu1 %v1317_v13  ;;  %920 = vmatpush.bf16.msra.mxu3 %v1257_v18  ;;  %v1417_v51 = vor.u32 %v1490_v48, %v1414_v49  ;;  %v1488_v54 = vld [vmem:[%s1943_s1 + $0x144] sm:$0xf]  ;;  %v1406_v55 = vld [vmem:[%s1943_s1 + $0x148] sm:$0xf0]  ;;  %v1345_v56 = vor.u32 %v1472_v52, %v1342_v53  ;;  %v1232_v57 = vld [vmem:[%s1941_s6 + $0x18] sm:$0xf] }
  0xa0   : > { %901 = vmatpush.bf16.msra.mxu2 %v1381_v14  ;;  %v1409_v58 = vor.u32 %v1488_v54, %v1406_v55  ;;  %v1446_v59 = vld [vmem:[%s1941_s6 + $0x20] sm:$0xf0]  ;;  %v1334_v61 = vld [vmem:[%s1943_s1 + $0xb8] sm:$0xf0]  ;;  %v1234_v1 = vld [vmem:[%s1941_s6 + $0x24] sm:$0xf0] }
  0xa1   : > { %v1470_v60 = vld [vmem:[%s1943_s1 + $0xb4] sm:$0xf]  ;;  %v1445_v62 = vld [vmem:[%s1941_s6 + $0x1c] sm:$0xf]  ;;  %v1240_v2 = vld [vmem:[%s1941_s6 + $0x20] sm:$0xf]  ;;  %v1233_v5 = vor.u32 %v1446_v59, %v1232_v57 }
  0xa2   : > { %864 = vmatpush.bf16.msra.mxu0 %v1245_v25  ;;  %v1486_v63 = vld [vmem:[%s1943_s1 + $0x134] sm:$0xf]  ;;  %v1398_v0 = vld [vmem:[%s1943_s1 + $0x138] sm:$0xf0]  ;;  %v1337_v4 = vor.u32 %v1470_v60, %v1334_v61  ;;  %v1468_v7 = vld [vmem:[%s1943_s1 + $0xa4] sm:$0xf]  ;;  %v1237_v9 = vor.u32 %v1445_v62, %v1234_v1 }
  0xa3   : > { %883 = vmatpush.bf16.msra.mxu1 %v1309_v29  ;;  %921 = vmatpush.bf16.msra.mxu3 %v1249_v34  ;;  %v1447_v3 = vld [vmem:[%s1941_s6 + $0x28] sm:$0xf0]  ;;  %v1401_v6 = vor.u32 %v1486_v63, %v1398_v0  ;;  %v1484_v11 = vld [vmem:[%s1943_s1 + $0x124] sm:$0xf]  ;;  %v1466_v15 = vld [vmem:[%s1943_s1 + $0x94] sm:$0xf] }
  0xa4   : > { %902 = vmatpush.bf16.msra.mxu2 %v1373_v30  ;;  %v1326_v8 = vld [vmem:[%s1943_s1 + $0xa8] sm:$0xf0]  ;;  %v1241_v10 = vor.u32 %v1447_v3, %v1240_v2  ;;  %v1318_v16 = vld [vmem:[%s1943_s1 + $0x98] sm:$0xf0]  ;;  %v1482_v17 = vld [vmem:[%s1943_s1 + $0x114] sm:$0xf] }
  0xa5   : > { %865 = vmatmul.bf16.vlgmr.msra.gmra.mxu0 %v1221_v36  ;;  %v1390_v12 = vld [vmem:[%s1943_s1 + $0x128] sm:$0xf0]  ;;  %v1329_v13 = vor.u32 %v1468_v7, %v1326_v8  ;;  %v1382_v18 = vld [vmem:[%s1943_s1 + $0x118] sm:$0xf0]  ;;  %v1321_v19 = vor.u32 %v1466_v15, %v1318_v16  ;;  %v1464_v21 = vld [vmem:[%s1943_s1 + $0x84] sm:$0xf] }
  0xa6   : > { %884 = vmatmul.bf16.vlgmr.msra.gmra.mxu1 %v2024_v40  ;;  %922 = vmatmul.bf16.vlgmr.msra.gmra.mxu3 %v1221_v36  ;;  %v1393_v14 = vor.u32 %v1484_v11, %v1390_v12  ;;  %v1385_v20 = vor.u32 %v1482_v17, %v1382_v18  ;;  %v1310_v22 = vld [vmem:[%s1943_s1 + $0x88] sm:$0xf0]  ;;  %v1480_v23 = vld [vmem:[%s1943_s1 + $0x104] sm:$0xf]  ;;  %v521_v30 = vld [vmem:[#allocation2 + $0x30] sm:$0xff]  ;;  %p1434_p5 = scmp.ne.s32.totalorder %s1676_s18, 5 }
  0xa7   : > { %952 = vmatpush.bf16.msrb.mxu1 %v1433_v37  ;;  %903 = vmatmul.bf16.vlgmr.msra.gmra.mxu2 %v2026_v41  ;;  %v1374_v24 = vld [vmem:[%s1943_s1 + $0x108] sm:$0xf0]  ;;  %v1313_v25 = vor.u32 %v1464_v21, %v1310_v22  ;;  %v523_v38 = vld [vmem:[#allocation2 + $0x18] sm:$0xff]  ;;  %v522_v62 = vld [vmem:[#allocation2] sm:$0xff] }
  0xa8   : > { %1497 = vmatpush.bf16.msrb.mxu2 %v1369_v35  ;;  %933 = vmatpush.bf16.msrb.mxu0 %v1369_v35  ;;  %v1377_v26 = vor.u32 %v1480_v23, %v1374_v24  ;;  %v525_v46 = vld [vmem:[#allocation2 + $0x8] sm:$0xff]  ;;  %v524_v8 = vld [vmem:[#allocation2 + $0x10] sm:$0xff]  ;;  %v528_v15 = vld [vmem:[#allocation2 + $0x38] sm:$0xff] }
  0xa9   : > { %1505 = vmatpush.bf16.msrb.mxu3 %v1433_v37  ;;  %v527_v54 = vld [vmem:[#allocation2 + $0x28] sm:$0xff] }
  0xab   : > { %953 = vmatpush.bf16.msrb.mxu1 %v1425_v45 }
  0xac   : > { %1498 = vmatpush.bf16.msrb.mxu2 %v1361_v44  ;;  %934 = vmatpush.bf16.msrb.mxu0 %v1361_v44 }
  0xad   : > { %1506 = vmatpush.bf16.msrb.mxu3 %v1425_v45 }
  0xaf   : > { %954 = vmatpush.bf16.msrb.mxu1 %v1417_v51 }
  0xb0   : > { %1499 = vmatpush.bf16.msrb.mxu2 %v1353_v50  ;;  %935 = vmatpush.bf16.msrb.mxu0 %v1353_v50 }
  0xb1   : > { %1507 = vmatpush.bf16.msrb.mxu3 %v1417_v51 }
  0xb3   : > { %955 = vmatpush.bf16.msrb.mxu1 %v1409_v58 }
  0xb4   : > { %1500 = vmatpush.bf16.msrb.mxu2 %v1345_v56  ;;  %936 = vmatpush.bf16.msrb.mxu0 %v1345_v56 }
  0xb5   : > { %1508 = vmatpush.bf16.msrb.mxu3 %v1409_v58  ;;  %870 = vmatmul.bf16.gmra.mxu0 %v1233_v5 }
  0xb6   : > { %889 = vmatmul.bf16.gmra.mxu1 %v1237_v9  ;;  %927 = vmatmul.bf16.gmra.mxu3 %v1233_v5 }
  0xb7   : > { %956 = vmatpush.bf16.msrb.mxu1 %v1401_v6  ;;  %908 = vmatmul.bf16.gmra.mxu2 %v1241_v10 }
  0xb8   : > { %1501 = vmatpush.bf16.msrb.mxu2 %v1337_v4  ;;  %937 = vmatpush.bf16.msrb.mxu0 %v1337_v4  ;;  %v526_v4 = vld [vmem:[#allocation2 + $0x20] sm:$0xff] }
  0xb9   : > { %1509 = vmatpush.bf16.msrb.mxu3 %v1401_v6 }
  0xbb   : > { %957 = vmatpush.bf16.msrb.mxu1 %v1393_v14 }
  0xbc   : > { %1502 = vmatpush.bf16.msrb.mxu2 %v1329_v13  ;;  %938 = vmatpush.bf16.msrb.mxu0 %v1329_v13 }
  0xbd   : > { %1510 = vmatpush.bf16.msrb.mxu3 %v1393_v14 }
  0xbf   : > { %958 = vmatpush.bf16.msrb.mxu1 %v1385_v20 }
  0xc0   : > { %1503 = vmatpush.bf16.msrb.mxu2 %v1321_v19  ;;  %939 = vmatpush.bf16.msrb.mxu0 %v1321_v19 }
  0xc1   : > { %1511 = vmatpush.bf16.msrb.mxu3 %v1385_v20 }
  0xc3   : > { %959 = vmatpush.bf16.msrb.mxu1 %v1377_v26 }
  0xc4   : > { %1504 = vmatpush.bf16.msrb.mxu2 %v1313_v25  ;;  %940 = vmatpush.bf16.msrb.mxu0 %v1313_v25 }
  0xc5   : > { %1512 = vmatpush.bf16.msrb.mxu3 %v1377_v26 }
  0xc6   : > { %960 = vmatmul.bf16.vlgmr.msrb.gmra.mxu1 %v2026_v41 }
  0xc7   : > { %941 = vmatmul.bf16.vlgmr.msrb.gmra.mxu0 %v2024_v40  ;;  %946 = vmatmul.bf16.vlgmr.msrb.gmra.mxu2 %v1237_v9 }
  0xc8   : > { %965 = vmatmul.bf16.vlgmr.msrb.gmra.mxu3 %v1241_v10 }
 0x122   : > { %v866_v27 = vpop.f32.mrf.mxu0 }
 0x123   : > { %v885_v28 = vpop.f32.mrf.mxu1 }
 0x124   : > { %v886_v29 = vadd.f32 %v885_v28, %v866_v27 }
 0x129   : > { %v923_v33 = vpop.f32.mrf.mxu3 }
 0x12a   : > { %v904_v31 = vpop.f32.mrf.mxu2  ;;  %v868_v34 = vpop.f32.mrf.mxu0 }
 0x12b   : > { %v905_v32 = vadd.f32 %v904_v31, %v886_v29  ;;  %v887_v35 = vpop.f32.mrf.mxu1 }
 0x12c   : > { %v888_v37 = vadd.f32 %v887_v35, %v868_v34 }
 0x12d   : > { %v971_v36 = vadd.f32 %v905_v32, %v521_v30 }
 0x12f   : > { %979 = vst [vmem:[#allocation2 + $0x30] sm:$0xff] %v971_v36 }
 0x131   : > { %v925_v40 = vpop.f32.mrf.mxu3 }
 0x132   : > { %v906_v39 = vpop.f32.mrf.mxu2  ;;  %v871_v43 = vpop.f32.mrf.mxu0 }
 0x133   : > { %v907_v42 = vadd.f32 %v906_v39, %v888_v37  ;;  %v890_v44 = vpop.f32.mrf.mxu1 }
 0x134   : > { %v891_v45 = vadd.f32 %v890_v44, %v871_v43 }
 0x135   : > { %v973_v41 = vadd.f32 %v907_v42, %v523_v38 }
 0x137   : > { %981 = vst [vmem:[#allocation2 + $0x18] sm:$0xff] %v973_v41 }
 0x139   : > { %v928_v49 = vpop.f32.mrf.mxu3 }
 0x13a   : > { %v909_v47 = vpop.f32.mrf.mxu2  ;;  %v873_v50 = vpop.f32.mrf.mxu0 }
 0x13b   : > { %v910_v48 = vadd.f32 %v909_v47, %v891_v45  ;;  %v892_v51 = vpop.f32.mrf.mxu1 }
 0x13c   : > { %v893_v53 = vadd.f32 %v892_v51, %v873_v50 }
 0x13d   : > { %v975_v52 = vadd.f32 %v910_v48, %v525_v46 }
 0x13f   : > { %983 = vst [vmem:[#allocation2 + $0x8] sm:$0xff] %v975_v52 }
 0x141   : > { %v930_v57 = vpop.f32.mrf.mxu3 }
 0x142   : > { %v911_v55 = vpop.f32.mrf.mxu2 }
 0x143   : > { %v912_v56 = vadd.f32 %v911_v55, %v893_v53  ;;  %v961_v61 = vpop.f32.mrf.mxu1 }
 0x144   : > { %v942_v58 = vpop.f32.mrf.mxu0 }
 0x145   : > { %v977_v59 = vadd.f32 %v912_v56, %v527_v54  ;;  %v943_v60 = vadd.f32 %v942_v58, %v923_v33 }
 0x147   : > { %985 = vst [vmem:[#allocation2 + $0x28] sm:$0xff] %v977_v59  ;;  %v962_v63 = vadd.f32 %v961_v61, %v943_v60 }
 0x149   : > { %v972_v0 = vadd.f32 %v962_v63, %v522_v62 }
 0x14a   : > { %v947_v1 = vpop.f32.mrf.mxu2 }
 0x14b   : > { %980 = vst [vmem:[#allocation2] sm:$0xff] %v972_v0  ;;  %v948_v2 = vadd.f32 %v947_v1, %v928_v49  ;;  %v966_v3 = vpop.f32.mrf.mxu3  ;;  %v963_v9 = vpop.f32.mrf.mxu1 }
 0x14c   : > { %v944_v5 = vpop.f32.mrf.mxu0 }
 0x14d   : > { %v967_v6 = vadd.f32 %v966_v3, %v948_v2  ;;  %v945_v7 = vadd.f32 %v944_v5, %v925_v40 }
 0x14f   : > { %v976_v10 = vadd.f32 %v967_v6, %v526_v4  ;;  %v964_v11 = vadd.f32 %v963_v9, %v945_v7 }
 0x151   : > { %984 = vst [vmem:[#allocation2 + $0x20] sm:$0xff] %v976_v10  ;;  %v974_v12 = vadd.f32 %v964_v11, %v524_v8 }
 0x152   : > { %v949_v13 = vpop.f32.mrf.mxu2 }
 0x153   : > { %982 = vst [vmem:[#allocation2 + $0x10] sm:$0xff] %v974_v12  ;;  %v950_v14 = vadd.f32 %v949_v13, %v930_v57  ;;  %v968_v16 = vpop.f32.mrf.mxu3 }
 0x155   : > { %v969_v17 = vadd.f32 %v968_v16, %v950_v14  ;;  %990 = sbr.rel (%p1434_p5) target bundleno = 360 (0x168), region = 104 }
 0x157   : > { %v978_v18 = vadd.f32 %v969_v17, %v528_v15 }
 0x159   : > { %986 = vst [vmem:[#allocation2 + $0x38] sm:$0xff] %v978_v18 }
 0x15a   : > { %v991_v19 = vld [vmem:[#allocation2 + $0x30] sm:$0xff]  ;;  %v992_v20 = vld [vmem:[#allocation2] sm:$0xff]  ;;  %v993_v24 = vld [vmem:[#allocation2 + $0x18] sm:$0xff] }
 0x15b   : > { %v999_v21 = vld [vmem:[%s505_s5] sm:$0x3]  ;;  %v994_v25 = vld [vmem:[#allocation2 + $0x10] sm:$0xff]  ;;  %v995_v26 = vld [vmem:[#allocation2 + $0x8] sm:$0xff] }
 0x15c   : > { %v1001_v22 = vperm.slane %v999_v21, 0  ;;  %v1002_v23 = vperm.slane %v999_v21, 1  ;;  %v996_v27 = vld [vmem:[#allocation2 + $0x20] sm:$0xff]  ;;  %v997_v28 = vld [vmem:[#allocation2 + $0x28] sm:$0xff] }
 0x15e   : > { %v1005_v30 = vadd.f32 %v1001_v22, %v991_v19  ;;  %v1006_v31 = vadd.f32 %v1002_v23, %v992_v20  ;;  %v1007_v32 = vadd.f32 %v1001_v22, %v993_v24  ;;  %v1008_v33 = vadd.f32 %v1002_v23, %v994_v25 }
 0x15f   : > { %v1009_v34 = vadd.f32 %v1001_v22, %v995_v26  ;;  %v1010_v35 = vadd.f32 %v1002_v23, %v996_v27  ;;  %v1011_v36 = vadd.f32 %v1001_v22, %v997_v28 }
 0x160   : > { %v998_v29 = vld [vmem:[#allocation2 + $0x38] sm:$0xff]  ;;  %v1013_v38 = vmax.f32 %v1005_v30, 0.0  ;;  %v1014_v39 = vmax.f32 %v1006_v31, 0.0  ;;  %v1015_v42 = vmax.f32 %v1007_v32, 0.0  ;;  %v1016_v40 = vmax.f32 %v1008_v33, 0.0 }
 0x161   : > { %v1012_v37 = vadd.f32 %v1002_v23, %v998_v29  ;;  %v1017_v43 = vmax.f32 %v1009_v34, 0.0  ;;  %v1018_v44 = vmax.f32 %v1010_v35, 0.0  ;;  %v1019_v41 = vmax.f32 %v1011_v36, 0.0 }
 0x162   : > { %v1021_v46 = vpack.c.bf16 %v1014_v39, %v1013_v38  ;;  %v1022_v47 = vpack.c.bf16 %v1016_v40, %v1015_v42 }
 0x163   : > { %v1020_v45 = vmax.f32 %v1012_v37, 0.0  ;;  %v1023_v48 = vpack.c.bf16 %v1018_v44, %v1017_v43 }
 0x164   : > { %1025 = vst [vmem:[%s1945_s25] sm:$0xff] %v1021_v46 }
 0x165   : > { %v1024_v49 = vpack.c.bf16 %v1020_v45, %v1019_v41  ;;  %1026 = vst [vmem:[%s1945_s25 + $0x8] sm:$0xff] %v1022_v47 }
 0x166   : > { %1027 = vst [vmem:[%s1945_s25 + $0x10] sm:$0xff] %v1023_v48 }
 0x167   : > { %1028 = vst [vmem:[%s1945_s25 + $0x18] sm:$0xff] %v1024_v49 }
 0x168 PF: > { %1035 = sbr.rel (!%p1809_p12) target bundleno = 368 (0x170), region = 108  ;;  %s1496_s14 = sshll.u32 (%p1809_p12), %s1680_s19, 3 }
 0x169   : > { %s1041_s0 = scalar_lea.vmem (%p1809_p12), %s2120_s3, %s1496_s14 }
 0x16b   : > { %v1076_v50 = vld [vmem:[%s1945_s25] sm:$0xff] (%p1809_p12) }
 0x16c   : > { %v1078_v51 = vld [vmem:[%s1945_s25 + $0x8] sm:$0xff] (%p1809_p12)  ;;  %1077 = vst [vmem:[%s1041_s0] sm:$0xff] (%p1809_p12), %v1076_v50 }
 0x16d   : > { %v1080_v52 = vld [vmem:[%s1945_s25 + $0x10] sm:$0xff]  ;;  %1079 = vst [vmem:[%s1041_s0 + $0x10] sm:$0xff] %v1078_v51 }
 0x16e   : > { %v1082_v53 = vld [vmem:[%s1945_s25 + $0x18] sm:$0xff]  ;;  %1081 = vst [vmem:[%s1041_s0 + $0x20] sm:$0xff] %v1080_v52 }
 0x16f   : > { %1083 = vst [vmem:[%s1041_s0 + $0x30] sm:$0xff] %v1082_v53 }
 0x170 PF: > { %s13_s22 = sadd.s32 1, %s1692_s22   ;;  %s2130_s10 = sld [smem:[#allocation6_spill]] }
 0x171   : > { %p10_p6 = scmp.ge.s32.totalorder %s13_s22, 14   ;;  %s2131_s12 = smov %s1656_s13 }
 0x172   : > { %s2132_s13 = smov %s1807_s9  ;;  %s2133_s14 = smov %s1664_s15 }
 0x173   : > { %s2134_s15 = smov %s1804_s8  ;;  %s2135_s16 = smov %s1672_s17 }
 0x174   : > { %s2136_s17 = smov %s1790_s30  ;;  %s2137_s18 = smov %s1684_s20 }
 0x175   : > { %s2138_s19 = smov %s1688_s21  ;;  %s2139_s20 = smov %s2142_s24 }
 0x176   : > { %s2140_s21 = smov %s2130_s10  ;;  %12 = sbr.rel (!%p10_p6) target bundleno = 9 (0x9), region = 194 }

// kernel: convnet_forward.23
= control target key start
LH: loop header
LB: loop body
LE: loop exit
PB: predicated region body
PF: predicated region fallthrough
CT: control target
= control target key end

     0   :  { %s2465_s0 = inlined_call_operand.vmem [shape: bf16[32,4608], index: 0, kind: input, shape index: {}]   ;;  %s2466_s1 = inlined_call_operand.vmem [shape: bf16[4608,512], index: 1, kind: input, shape index: {}]   ;;  %s2467_s2 = inlined_call_operand.vmem [shape: f32[1,512], index: 2, kind: input, shape index: {}]   ;;  %s2468_s3 = inlined_call_operand.vmem [shape: bf16[32,512], index: 3, kind: output, shape index: {}]  }
   0x1   :  { %2470 = sst [smem:[#allocation7_spill]] %s2465_s0 }
   0x2   :  { %2471 = sst [smem:[#allocation8_spill]] %s2466_s1 }
   0x3   :  { %s1975_s12 = smov 0   ;;  %s1977_s13 = smov 0  }
   0x4   :  { %s1979_s14 = smov 0   ;;  %s1981_s15 = smov 0  }
   0x5   :  { %s1983_s16 = smov 0   ;;  %s1985_s17 = smov 0  }
   0x6   :  { %s1987_s18 = smov 0   ;;  %s1989_s19 = smov 0  }
   0x7   :  { %s1991_s20 = smov 0   ;;  %s1993_s21 = smov 0  }
   0x8   :  { %s1995_s22 = smov 0  }
   0x9 LB: > { %s1390_s23 = sadd.s32 4294967295, %s1952_s22   ;;  %s25_s24 = sadd.s32 1, %s1944_s20  ;;  %s1952_s22 = sphi %s1995_s22, %s13_s22   ;;  %s1948_s21 = sphi %s1993_s21, %s2488_s21   ;;  %s1944_s20 = sphi %s1991_s20, %s2487_s20   ;;  %s1940_s19 = sphi %s1989_s19, %s2486_s19   ;;  %s1936_s18 = sphi %s1987_s18, %s2485_s18   ;;  %s1932_s17 = sphi %s1985_s17, %s2484_s17   ;;  %s1928_s16 = sphi %s1983_s16, %s2483_s16   ;;  %s1924_s15 = sphi %s1981_s15, %s2482_s15   ;;  %s1920_s14 = sphi %s1979_s14, %s2481_s14   ;;  %s1916_s13 = sphi %s1977_s13, %s2480_s13   ;;  %s1912_s12 = sphi %s1975_s12, %s2479_s12  }
   0xa   : > { %p26_p0 = scmp.ge.s32.totalorder %s25_s24, 9  ;;  %s28_s25 = sadd.s32 1, %s1948_s21 }
   0xb   : > { %s41_s26 = sadd.s32 1, %s1932_s17  ;;  %p48_p1 = scmp.ne.s32.totalorder %s1932_s17, %s1928_s16 }
   0xc   : > { %s2490_s24 = smov (%p26_p0, %s25_s24), 0  ;;  %s2492_s25 = smov (!%p26_p0, %s28_s25), %s1948_s21 }
   0xd   : > { %s37_s27 = ssub.s32 %s1944_s20, %s2490_s24  ;;  %p49_p2 = scmp.eq.s32.totalorder %s1952_s22, 0 }
   0xe   : > { %p30_p3 = scmp.ge.s32.totalorder %s2492_s25, 2  ;;  %p39_p4 = scmp.eq.s32.totalorder %s37_s27, 0 }
   0xf   : > { %p2042_p5 = por %p49_p2, %p48_p1  ;;  %s69_s29 = sadd.s32 1, %s1924_s15 }
  0x10   : > { %s2494_s25 = smov (%p30_p3, %s2492_s25), 0  ;;  %p76_p6 = scmp.ne.s32.totalorder %s1924_s15, %s1920_s14 }
  0x11   : > { %2473 = sst [smem:[#allocation6_spill]] %s2494_s25  ;;  %s65_s4 = ssub.s32 %s1948_s21, %s2494_s25 }
  0x12   : > { %s2050_s30 = scalar_select %p39_p4, %s1932_s17, %s41_s26  }
  0x13   : > { %s66_s5 = sor.u32 %s65_s4, %s37_s27  ;;  %p121_p7 = scmp.eq.s32.totalorder %s65_s4, 0 }
  0x14   : > { %p67_p8 = scmp.eq.s32.totalorder %s66_s5, 0  ;;  %p2056_p9 = por %p76_p6, %p49_p2 }
  0x15   : > { %s123_s7 = sadd.s32 1, %s1916_s13  ;;  %p133_p10 = scmp.ne.s32.totalorder %s1916_s13, %s1912_s12 }
  0x16   : > { %s2064_s8 = scalar_select %p67_p8, %s1924_s15, %s69_s29  }
  0x17   : > { %s2067_s9 = scalar_select %p121_p7, %s1916_s13, %s123_s7  }
  0x18   : > { %p134_p11 = scmp.eq.s32.totalorder %s1390_s23, 17  ;;  %p1393_p13 = scmp.ge.s32.totalorder %s1952_s22, 18 }
  0x1a   : > { %p2069_p12 = por %p134_p11, %p133_p10  ;;  %156 = sbr.rel (%p1393_p13) target bundleno = 123 (0x7b), region = 16 }
  0x1f   : > { %159 = sbr.rel (!%p2042_p5) target bundleno = 49 (0x31), region = 20  ;;  %s161_s11 = sand.u32 (%p2042_p5), 1, %s1932_s17  }
  0x20   : > { %s1702_s26 = sshll.u32 (%p2042_p5), %s1944_s20, 4  ;;  %s1394_s27 = sshll.u32 (%p2042_p5), %s161_s11, 6 }
  0x21   : > { %s2476_s0 = sld [smem:[#allocation7_spill]] (%p2042_p5)  ;;  %s163_s23 = scalar_lea.vmem (%p2042_p5), [#allocation3], %s1394_s27 }
  0x27   : > { %s169_s5 = scalar_lea.vmem %s2476_s0, %s1702_s26 }
  0x28   : > { %v182_v0 = vld [vmem:[%s169_s5] sm:$0xff]  ;;  %v184_v1 = vld [vmem:[%s169_s5 + $0x8] sm:$0xff]  ;;  %v186_v2 = vld [vmem:[%s169_s5 + $0x90] sm:$0xff] }
  0x29   : > { %183 = vst [vmem:[%s163_s23] sm:$0xff] %v182_v0  ;;  %v188_v3 = vld [vmem:[%s169_s5 + $0x98] sm:$0xff]  ;;  %v190_v4 = vld [vmem:[%s169_s5 + $0x120] sm:$0xff]  ;;  %v192_v5 = vld [vmem:[%s169_s5 + $0x128] sm:$0xff] }
  0x2a   : > { %185 = vst [vmem:[%s163_s23 + $0x8] sm:$0xff] %v184_v1  ;;  %v194_v6 = vld [vmem:[%s169_s5 + $0x1b0] sm:$0xff]  ;;  %v196_v7 = vld [vmem:[%s169_s5 + $0x1b8] sm:$0xff] }
  0x2b   : > { %187 = vst [vmem:[%s163_s23 + $0x10] sm:$0xff] %v186_v2 }
  0x2c   : > { %189 = vst [vmem:[%s163_s23 + $0x18] sm:$0xff] %v188_v3 }
  0x2d   : > { %191 = vst [vmem:[%s163_s23 + $0x20] sm:$0xff] %v190_v4 }
  0x2e   : > { %193 = vst [vmem:[%s163_s23 + $0x28] sm:$0xff] %v192_v5 }
  0x2f   : > { %195 = vst [vmem:[%s163_s23 + $0x30] sm:$0xff] %v194_v6 }
  0x30   : > { %197 = vst [vmem:[%s163_s23 + $0x38] sm:$0xff] %v196_v7 }
  0x31 PF: > { %203 = sbr.rel (!%p2056_p9) target bundleno = 123 (0x7b), region = 43  ;;  %s205_s28 = sand.u32 (%p2056_p9), 1, %s1924_s15  }
  0x32   : > { %s1399_s7 = sshll.u32 (%p2056_p9), %s1948_s21, 1  ;;  %s1397_s11 = sshll.u32 (%p2056_p9), %s205_s28, 9 }
  0x33   : > { %s1703_s26 = sshll.u32 (%p2056_p9), %s1944_s20, 8  ;;  %s2477_s1 = sld [smem:[#allocation8_spill]] (%p2056_p9) }
  0x34   : > { %s211_s27 = sadd.s32 (%p2056_p9), %s1703_s26, %s1399_s7  ;;  %s2094_s6 = scalar_lea.vmem (%p2056_p9), [#allocation4], %s1397_s11 }
  0x35   : > { %s1401_s29 = sshll.u32 (%p2056_p9), %s211_s27, 2 }
  0x39   : > { %s2089_s5 = scalar_lea.vmem %s2477_s1, %s1401_s29 }
  0x3a   : > { %v368_v8 = vld [vmem:[%s2089_s5] sm:$0xff]  ;;  %v370_v9 = vld [vmem:[%s2089_s5 + $0x10] sm:$0xff] }
  0x3b   : > { %v372_v10 = vld [vmem:[%s2089_s5 + $0x20] sm:$0xff]  ;;  %369 = vst [vmem:[%s2094_s6] sm:$0xff] %v368_v8  ;;  %v374_v11 = vld [vmem:[%s2089_s5 + $0x30] sm:$0xff] }
  0x3c   : > { %371 = vst [vmem:[%s2094_s6 + $0x8] sm:$0xff] %v370_v9  ;;  %v376_v12 = vld [vmem:[%s2089_s5 + $0x40] sm:$0xff]  ;;  %v378_v13 = vld [vmem:[%s2089_s5 + $0x50] sm:$0xff] }
  0x3d   : > { %373 = vst [vmem:[%s2094_s6 + $0x10] sm:$0xff] %v372_v10  ;;  %v380_v14 = vld [vmem:[%s2089_s5 + $0x60] sm:$0xff]  ;;  %v382_v15 = vld [vmem:[%s2089_s5 + $0x70] sm:$0xff] }
  0x3e   : > { %375 = vst [vmem:[%s2094_s6 + $0x18] sm:$0xff] %v374_v11  ;;  %v384_v16 = vld [vmem:[%s2089_s5 + $0x80] sm:$0xff]  ;;  %v386_v17 = vld [vmem:[%s2089_s5 + $0x90] sm:$0xff] }
  0x3f   : > { %377 = vst [vmem:[%s2094_s6 + $0x20] sm:$0xff] %v376_v12  ;;  %v388_v18 = vld [vmem:[%s2089_s5 + $0xa0] sm:$0xff]  ;;  %v390_v19 = vld [vmem:[%s2089_s5 + $0xb0] sm:$0xff] }
  0x40   : > { %379 = vst [vmem:[%s2094_s6 + $0x28] sm:$0xff] %v378_v13  ;;  %v392_v20 = vld [vmem:[%s2089_s5 + $0xc0] sm:$0xff]  ;;  %v394_v21 = vld [vmem:[%s2089_s5 + $0xd0] sm:$0xff] }
  0x41   : > { %381 = vst [vmem:[%s2094_s6 + $0x30] sm:$0xff] %v380_v14  ;;  %v396_v22 = vld [vmem:[%s2089_s5 + $0xe0] sm:$0xff]  ;;  %v398_v23 = vld [vmem:[%s2089_s5 + $0xf0] sm:$0xff] }
  0x42   : > { %383 = vst [vmem:[%s2094_s6 + $0x38] sm:$0xff] %v382_v15  ;;  %v400_v24 = vld [vmem:[%s2089_s5 + $0x100] sm:$0xff]  ;;  %v402_v25 = vld [vmem:[%s2089_s5 + $0x110] sm:$0xff] }
  0x43   : > { %385 = vst [vmem:[%s2094_s6 + $0x40] sm:$0xff] %v384_v16  ;;  %v404_v26 = vld [vmem:[%s2089_s5 + $0x120] sm:$0xff]  ;;  %v406_v27 = vld [vmem:[%s2089_s5 + $0x130] sm:$0xff] }
  0x44   : > { %387 = vst [vmem:[%s2094_s6 + $0x48] sm:$0xff] %v386_v17  ;;  %v408_v28 = vld [vmem:[%s2089_s5 + $0x140] sm:$0xff]  ;;  %v410_v29 = vld [vmem:[%s2089_s5 + $0x150] sm:$0xff] }
  0x45   : > { %389 = vst [vmem:[%s2094_s6 + $0x50] sm:$0xff] %v388_v18  ;;  %v412_v30 = vld [vmem:[%s2089_s5 + $0x160] sm:$0xff]  ;;  %v414_v31 = vld [vmem:[%s2089_s5 + $0x170] sm:$0xff] }
  0x46   : > { %391 = vst [vmem:[%s2094_s6 + $0x58] sm:$0xff] %v390_v19  ;;  %v416_v32 = vld [vmem:[%s2089_s5 + $0x180] sm:$0xff]  ;;  %v418_v33 = vld [vmem:[%s2089_s5 + $0x190] sm:$0xff] }
  0x47   : > { %393 = vst [vmem:[%s2094_s6 + $0x60] sm:$0xff] %v392_v20  ;;  %v420_v34 = vld [vmem:[%s2089_s5 + $0x1a0] sm:$0xff]  ;;  %v422_v35 = vld [vmem:[%s2089_s5 + $0x1b0] sm:$0xff] }
  0x48   : > { %395 = vst [vmem:[%s2094_s6 + $0x68] sm:$0xff] %v394_v21  ;;  %v424_v36 = vld [vmem:[%s2089_s5 + $0x1c0] sm:$0xff]  ;;  %v426_v37 = vld [vmem:[%s2089_s5 + $0x1d0] sm:$0xff] }
  0x49   : > { %397 = vst [vmem:[%s2094_s6 + $0x70] sm:$0xff] %v396_v22  ;;  %v428_v38 = vld [vmem:[%s2089_s5 + $0x1e0] sm:$0xff]  ;;  %v430_v39 = vld [vmem:[%s2089_s5 + $0x1f0] sm:$0xff] }
  0x4a   : > { %399 = vst [vmem:[%s2094_s6 + $0x78] sm:$0xff] %v398_v23  ;;  %v432_v40 = vld [vmem:[%s2089_s5 + $0x200] sm:$0xff]  ;;  %v434_v41 = vld [vmem:[%s2089_s5 + $0x210] sm:$0xff] }
  0x4b   : > { %401 = vst [vmem:[%s2094_s6 + $0x80] sm:$0xff] %v400_v24  ;;  %v436_v42 = vld [vmem:[%s2089_s5 + $0x220] sm:$0xff]  ;;  %v438_v43 = vld [vmem:[%s2089_s5 + $0x230] sm:$0xff] }
  0x4c   : > { %403 = vst [vmem:[%s2094_s6 + $0x88] sm:$0xff] %v402_v25  ;;  %v440_v44 = vld [vmem:[%s2089_s5 + $0x240] sm:$0xff]  ;;  %v442_v45 = vld [vmem:[%s2089_s5 + $0x250] sm:$0xff] }
  0x4d   : > { %405 = vst [vmem:[%s2094_s6 + $0x90] sm:$0xff] %v404_v26  ;;  %v444_v46 = vld [vmem:[%s2089_s5 + $0x260] sm:$0xff]  ;;  %v446_v47 = vld [vmem:[%s2089_s5 + $0x270] sm:$0xff] }
  0x4e   : > { %407 = vst [vmem:[%s2094_s6 + $0x98] sm:$0xff] %v406_v27  ;;  %v448_v48 = vld [vmem:[%s2089_s5 + $0x280] sm:$0xff]  ;;  %v450_v49 = vld [vmem:[%s2089_s5 + $0x290] sm:$0xff] }
  0x4f   : > { %409 = vst [vmem:[%s2094_s6 + $0xa0] sm:$0xff] %v408_v28  ;;  %v452_v50 = vld [vmem:[%s2089_s5 + $0x2a0] sm:$0xff]  ;;  %v454_v51 = vld [vmem:[%s2089_s5 + $0x2b0] sm:$0xff] }
  0x50   : > { %411 = vst [vmem:[%s2094_s6 + $0xa8] sm:$0xff] %v410_v29  ;;  %v456_v52 = vld [vmem:[%s2089_s5 + $0x2c0] sm:$0xff]  ;;  %v458_v53 = vld [vmem:[%s2089_s5 + $0x2d0] sm:$0xff] }
  0x51   : > { %413 = vst [vmem:[%s2094_s6 + $0xb0] sm:$0xff] %v412_v30  ;;  %v460_v54 = vld [vmem:[%s2089_s5 + $0x2e0] sm:$0xff]  ;;  %v462_v55 = vld [vmem:[%s2089_s5 + $0x2f0] sm:$0xff] }
  0x52   : > { %415 = vst [vmem:[%s2094_s6 + $0xb8] sm:$0xff] %v414_v31  ;;  %v464_v56 = vld [vmem:[%s2089_s5 + $0x300] sm:$0xff]  ;;  %v466_v57 = vld [vmem:[%s2089_s5 + $0x310] sm:$0xff] }
  0x53   : > { %417 = vst [vmem:[%s2094_s6 + $0xc0] sm:$0xff] %v416_v32  ;;  %v468_v58 = vld [vmem:[%s2089_s5 + $0x320] sm:$0xff]  ;;  %v470_v59 = vld [vmem:[%s2089_s5 + $0x330] sm:$0xff] }
  0x54   : > { %419 = vst [vmem:[%s2094_s6 + $0xc8] sm:$0xff] %v418_v33  ;;  %v472_v60 = vld [vmem:[%s2089_s5 + $0x340] sm:$0xff]  ;;  %v474_v61 = vld [vmem:[%s2089_s5 + $0x350] sm:$0xff] }
  0x55   : > { %421 = vst [vmem:[%s2094_s6 + $0xd0] sm:$0xff] %v420_v34  ;;  %v476_v62 = vld [vmem:[%s2089_s5 + $0x360] sm:$0xff]  ;;  %v478_v63 = vld [vmem:[%s2089_s5 + $0x370] sm:$0xff] }
  0x56   : > { %423 = vst [vmem:[%s2094_s6 + $0xd8] sm:$0xff] %v422_v35  ;;  %v480_v0 = vld [vmem:[%s2089_s5 + $0x380] sm:$0xff]  ;;  %v482_v1 = vld [vmem:[%s2089_s5 + $0x390] sm:$0xff] }
  0x57   : > { %425 = vst [vmem:[%s2094_s6 + $0xe0] sm:$0xff] %v424_v36  ;;  %v484_v2 = vld [vmem:[%s2089_s5 + $0x3a0] sm:$0xff]  ;;  %v486_v3 = vld [vmem:[%s2089_s5 + $0x3b0] sm:$0xff] }
  0x58   : > { %427 = vst [vmem:[%s2094_s6 + $0xe8] sm:$0xff] %v426_v37  ;;  %v488_v4 = vld [vmem:[%s2089_s5 + $0x3c0] sm:$0xff]  ;;  %v490_v5 = vld [vmem:[%s2089_s5 + $0x3d0] sm:$0xff] }
  0x59   : > { %429 = vst [vmem:[%s2094_s6 + $0xf0] sm:$0xff] %v428_v38  ;;  %v492_v6 = vld [vmem:[%s2089_s5 + $0x3e0] sm:$0xff]  ;;  %v494_v7 = vld [vmem:[%s2089_s5 + $0x3f0] sm:$0xff] }
  0x5a   : > { %431 = vst [vmem:[%s2094_s6 + $0xf8] sm:$0xff] %v430_v39 }
  0x5b   : > { %433 = vst [vmem:[%s2094_s6 + $0x100] sm:$0xff] %v432_v40 }
  0x5c   : > { %435 = vst [vmem:[%s2094_s6 + $0x108] sm:$0xff] %v434_v41 }
  0x5d   : > { %437 = vst [vmem:[%s2094_s6 + $0x110] sm:$0xff] %v436_v42 }
  0x5e   : > { %439 = vst [vmem:[%s2094_s6 + $0x118] sm:$0xff] %v438_v43 }
  0x5f   : > { %441 = vst [vmem:[%s2094_s6 + $0x120] sm:$0xff] %v440_v44 }
  0x60   : > { %443 = vst [vmem:[%s2094_s6 + $0x128] sm:$0xff] %v442_v45 }
  0x61   : > { %445 = vst [vmem:[%s2094_s6 + $0x130] sm:$0xff] %v444_v46 }
  0x62   : > { %447 = vst [vmem:[%s2094_s6 + $0x138] sm:$0xff] %v446_v47 }
  0x63   : > { %449 = vst [vmem:[%s2094_s6 + $0x140] sm:$0xff] %v448_v48 }
  0x64   : > { %451 = vst [vmem:[%s2094_s6 + $0x148] sm:$0xff] %v450_v49 }
  0x65   : > { %453 = vst [vmem:[%s2094_s6 + $0x150] sm:$0xff] %v452_v50 }
  0x66   : > { %455 = vst [vmem:[%s2094_s6 + $0x158] sm:$0xff] %v454_v51 }
  0x67   : > { %457 = vst [vmem:[%s2094_s6 + $0x160] sm:$0xff] %v456_v52 }
  0x68   : > { %459 = vst [vmem:[%s2094_s6 + $0x168] sm:$0xff] %v458_v53 }
  0x69   : > { %461 = vst [vmem:[%s2094_s6 + $0x170] sm:$0xff] %v460_v54 }
  0x6a   : > { %463 = vst [vmem:[%s2094_s6 + $0x178] sm:$0xff] %v462_v55 }
  0x6b   : > { %465 = vst [vmem:[%s2094_s6 + $0x180] sm:$0xff] %v464_v56 }
  0x6c   : > { %467 = vst [vmem:[%s2094_s6 + $0x188] sm:$0xff] %v466_v57 }
  0x6d   : > { %469 = vst [vmem:[%s2094_s6 + $0x190] sm:$0xff] %v468_v58 }
  0x6e   : > { %471 = vst [vmem:[%s2094_s6 + $0x198] sm:$0xff] %v470_v59 }
  0x6f   : > { %473 = vst [vmem:[%s2094_s6 + $0x1a0] sm:$0xff] %v472_v60 }
  0x70   : > { %475 = vst [vmem:[%s2094_s6 + $0x1a8] sm:$0xff] %v474_v61 }
  0x71   : > { %477 = vst [vmem:[%s2094_s6 + $0x1b0] sm:$0xff] %v476_v62 }
  0x72   : > { %479 = vst [vmem:[%s2094_s6 + $0x1b8] sm:$0xff] %v478_v63 }
  0x73   : > { %481 = vst [vmem:[%s2094_s6 + $0x1c0] sm:$0xff] %v480_v0 }
  0x74   : > { %483 = vst [vmem:[%s2094_s6 + $0x1c8] sm:$0xff] %v482_v1 }
  0x75   : > { %485 = vst [vmem:[%s2094_s6 + $0x1d0] sm:$0xff] %v484_v2 }
  0x76   : > { %487 = vst [vmem:[%s2094_s6 + $0x1d8] sm:$0xff] %v486_v3 }
  0x77   : > { %489 = vst [vmem:[%s2094_s6 + $0x1e0] sm:$0xff] %v488_v4 }
  0x78   : > { %491 = vst [vmem:[%s2094_s6 + $0x1e8] sm:$0xff] %v490_v5 }
  0x79   : > { %493 = vst [vmem:[%s2094_s6 + $0x1f0] sm:$0xff] %v492_v6 }
  0x7a   : > { %495 = vst [vmem:[%s2094_s6 + $0x1f8] sm:$0xff] %v494_v7 }
  0x7b PF: > { %p1402_p0 = scmp.ge.s32.totalorder %s1952_s22, 1  ;;  %p508_p1 = scmp.lt.s32.totalorder %s1952_s22, 19 }
  0x7d   : > { %p509_p2 = pnand %p1402_p0, %p508_p1 }
  0x7e   : > { %s515_s0 = sand.u32 (!%p509_p2), 1, %s1928_s16   ;;  %s522_s23 = sand.u32 (!%p509_p2), 1, %s1920_s14  }
  0x7f   : > { %512 = sbr.rel (%p509_p2) target bundleno = 401 (0x191), region = 85  ;;  %s1403_s28 = sshll.u32 (!%p509_p2), %s515_s0, 6 }
  0x80   : > { %s1404_s7 = sshll.u32 (!%p509_p2), %s522_s23, 9  ;;  %s549_s11 = sand.u32 (!%p509_p2), 1, %s1912_s12  }
  0x81   : > { %s1406_s26 = sshll.u32 (!%p509_p2), %s1940_s19, 1  ;;  %s1405_s27 = sshll.u32 (!%p509_p2), %s549_s11, 5 }
  0x82   : > { %p557_p3 = scmp.lt.s32.totalorder (!%p509_p2), %s1406_s26, 3  ;;  %s2233_s6 = scalar_lea.vmem (!%p509_p2), [#allocation3], %s1403_s28 }
  0x83   : > { %s2235_s1 = scalar_lea.vmem (!%p509_p2), [#allocation4], %s1404_s7  ;;  %s2237_s25 = scalar_lea.vmem (!%p509_p2), [#allocation5], %s1405_s27 }
  0x84   : > { %s2496_s26 = smov (!%p557_p3, %s1406_s26), 3  ;;  %p1407_p4 = scmp.ne.s32.totalorder %s1936_s18, 0 }
  0x85   : > { %s559_s5 = scalar_lea.vmem %s2467_s2, %s2496_s26 }
  0x86   : > { %566 = sbr.rel (%p1407_p4) target bundleno = 148 (0x94), region = 97 }
  0x8b   : > { %v1954_v8 = vmov 0.0  }
  0x8c   : > { %567 = vst [vmem:[#allocation2 + $0x30] sm:$0xff] %v1954_v8 }
  0x8d   : > { %568 = vst [vmem:[#allocation2] sm:$0xff] %v1954_v8 }
  0x8e   : > { %569 = vst [vmem:[#allocation2 + $0x18] sm:$0xff] %v1954_v8 }
  0x8f   : > { %570 = vst [vmem:[#allocation2 + $0x10] sm:$0xff] %v1954_v8 }
  0x90   : > { %571 = vst [vmem:[#allocation2 + $0x8] sm:$0xff] %v1954_v8 }
  0x91   : > { %572 = vst [vmem:[#allocation2 + $0x20] sm:$0xff] %v1954_v8 }
  0x92   : > { %573 = vst [vmem:[#allocation2 + $0x28] sm:$0xff] %v1954_v8 }
  0x93   : > { %574 = vst [vmem:[#allocation2 + $0x38] sm:$0xff] %v1954_v8 }
  0x94 PF: > { %v1498_v9 = vld [vmem:[%s2235_s1 + $0x70] sm:$0xf]  ;;  %v1727_v10 = vld [vmem:[%s2235_s1 + $0x74] sm:$0xf0]  ;;  %v1490_v20 = vld [vmem:[%s2235_s1 + $0x60] sm:$0xf] }
  0x95   : > { %v1562_v11 = vld [vmem:[%s2235_s1 + $0xf0] sm:$0xf]  ;;  %v1499_v12 = vor.u32 %v1727_v10, %v1498_v9  ;;  %v1743_v13 = vld [vmem:[%s2235_s1 + $0xf4] sm:$0xf0]  ;;  %v1725_v22 = vld [vmem:[%s2235_s1 + $0x64] sm:$0xf0] }
  0x96   : > { %v1626_v14 = vld [vmem:[%s2235_s1 + $0x170] sm:$0xf]  ;;  %v1759_v15 = vld [vmem:[%s2235_s1 + $0x174] sm:$0xf0]  ;;  %v1563_v16 = vor.u32 %v1743_v13, %v1562_v11  ;;  %v1554_v23 = vld [vmem:[%s2235_s1 + $0xe0] sm:$0xf]  ;;  %v1491_v25 = vor.u32 %v1725_v22, %v1490_v20 }
  0x97   : > { %v1627_v17 = vor.u32 %v1759_v15, %v1626_v14  ;;  %v1690_v18 = vld [vmem:[%s2235_s1 + $0x1f0] sm:$0xf]  ;;  %v1775_v19 = vld [vmem:[%s2235_s1 + $0x1f4] sm:$0xf0]  ;;  %1015 = vmatpush.bf16.msra.mxu0 %v1499_v12  ;;  %v1741_v24 = vld [vmem:[%s2235_s1 + $0xe4] sm:$0xf0] }
  0x98   : > { %v1691_v21 = vor.u32 %v1775_v19, %v1690_v18  ;;  %1034 = vmatpush.bf16.msra.mxu1 %v1563_v16  ;;  %v1555_v26 = vor.u32 %v1741_v24, %v1554_v23  ;;  %v1618_v27 = vld [vmem:[%s2235_s1 + $0x160] sm:$0xf]  ;;  %v1757_v28 = vld [vmem:[%s2235_s1 + $0x164] sm:$0xf0]  ;;  %v1482_v32 = vld [vmem:[%s2235_s1 + $0x50] sm:$0xf] }
  0x99   : > { %1053 = vmatpush.bf16.msra.mxu2 %v1627_v17  ;;  %v1682_v29 = vld [vmem:[%s2235_s1 + $0x1e0] sm:$0xf]  ;;  %v1619_v30 = vor.u32 %v1757_v28, %v1618_v27  ;;  %v1773_v31 = vld [vmem:[%s2235_s1 + $0x1e4] sm:$0xf0]  ;;  %v1723_v33 = vld [vmem:[%s2235_s1 + $0x54] sm:$0xf0] }
  0x9a   : > { %1072 = vmatpush.bf16.msra.mxu3 %v1691_v21  ;;  %v1683_v34 = vor.u32 %v1773_v31, %v1682_v29  ;;  %v1546_v35 = vld [vmem:[%s2235_s1 + $0xd0] sm:$0xf]  ;;  %v1739_v36 = vld [vmem:[%s2235_s1 + $0xd4] sm:$0xf0]  ;;  %v1483_v38 = vor.u32 %v1723_v33, %v1482_v32  ;;  %v1474_v44 = vld [vmem:[%s2235_s1 + $0x40] sm:$0xf] }
  0x9b   : > { %v1610_v37 = vld [vmem:[%s2235_s1 + $0x150] sm:$0xf]  ;;  %1016 = vmatpush.bf16.msra.mxu0 %v1491_v25  ;;  %v1755_v39 = vld [vmem:[%s2235_s1 + $0x154] sm:$0xf0]  ;;  %v1547_v42 = vor.u32 %v1739_v36, %v1546_v35  ;;  %v1721_v45 = vld [vmem:[%s2235_s1 + $0x44] sm:$0xf0] }
  0x9c   : > { %v1674_v40 = vld [vmem:[%s2235_s1 + $0x1d0] sm:$0xf]  ;;  %v1771_v41 = vld [vmem:[%s2235_s1 + $0x1d4] sm:$0xf0]  ;;  %1035 = vmatpush.bf16.msra.mxu1 %v1555_v26  ;;  %v1611_v43 = vor.u32 %v1755_v39, %v1610_v37  ;;  %v1538_v46 = vld [vmem:[%s2235_s1 + $0xc0] sm:$0xf]  ;;  %v1475_v53 = vor.u32 %v1721_v45, %v1474_v44 }
  0x9d   : > { %1054 = vmatpush.bf16.msra.mxu2 %v1619_v30  ;;  %v1675_v47 = vor.u32 %v1771_v41, %v1674_v40  ;;  %v1737_v48 = vld [vmem:[%s2235_s1 + $0xc4] sm:$0xf0]  ;;  %v1602_v49 = vld [vmem:[%s2235_s1 + $0x140] sm:$0xf]  ;;  %v1466_v56 = vld [vmem:[%s2235_s1 + $0x30] sm:$0xf] }
  0x9e   : > { %1073 = vmatpush.bf16.msra.mxu3 %v1683_v34  ;;  %v1753_v50 = vld [vmem:[%s2235_s1 + $0x144] sm:$0xf0]  ;;  %v1666_v51 = vld [vmem:[%s2235_s1 + $0x1c0] sm:$0xf]  ;;  %v1539_v54 = vor.u32 %v1737_v48, %v1538_v46  ;;  %v1719_v57 = vld [vmem:[%s2235_s1 + $0x34] sm:$0xf0] }
  0x9f   : > { %v1769_v52 = vld [vmem:[%s2235_s1 + $0x1c4] sm:$0xf0]  ;;  %1017 = vmatpush.bf16.msra.mxu0 %v1483_v38  ;;  %v1603_v55 = vor.u32 %v1753_v50, %v1602_v49  ;;  %v1530_v58 = vld [vmem:[%s2235_s1 + $0xb0] sm:$0xf]  ;;  %v1735_v60 = vld [vmem:[%s2235_s1 + $0xb4] sm:$0xf0]  ;;  %v1467_v1 = vor.u32 %v1719_v57, %v1466_v56 }
  0xa0   : > { %1036 = vmatpush.bf16.msra.mxu1 %v1547_v42  ;;  %v1667_v59 = vor.u32 %v1769_v52, %v1666_v51  ;;  %v1594_v61 = vld [vmem:[%s2235_s1 + $0x130] sm:$0xf]  ;;  %v1751_v62 = vld [vmem:[%s2235_s1 + $0x134] sm:$0xf0]  ;;  %v1531_v2 = vor.u32 %v1735_v60, %v1530_v58  ;;  %v1458_v4 = vld [vmem:[%s2235_s1 + $0x20] sm:$0xf] }
  0xa1   : > { %1055 = vmatpush.bf16.msra.mxu2 %v1611_v43  ;;  %v1658_v63 = vld [vmem:[%s2235_s1 + $0x1b0] sm:$0xf]  ;;  %v1767_v0 = vld [vmem:[%s2235_s1 + $0x1b4] sm:$0xf0]  ;;  %v1595_v3 = vor.u32 %v1751_v62, %v1594_v61  ;;  %v1717_v5 = vld [vmem:[%s2235_s1 + $0x24] sm:$0xf0] }
  0xa2   : > { %1074 = vmatpush.bf16.msra.mxu3 %v1675_v47  ;;  %v1522_v6 = vld [vmem:[%s2235_s1 + $0xa0] sm:$0xf]  ;;  %v1659_v7 = vor.u32 %v1767_v0, %v1658_v63  ;;  %v1733_v8 = vld [vmem:[%s2235_s1 + $0xa4] sm:$0xf0]  ;;  %v1459_v13 = vor.u32 %v1717_v5, %v1458_v4  ;;  %v1450_v16 = vld [vmem:[%s2235_s1 + $0x10] sm:$0xf] }
  0xa3   : > { %1018 = vmatpush.bf16.msra.mxu0 %v1475_v53  ;;  %v1586_v9 = vld [vmem:[%s2235_s1 + $0x120] sm:$0xf]  ;;  %v1749_v10 = vld [vmem:[%s2235_s1 + $0x124] sm:$0xf0]  ;;  %v1523_v14 = vor.u32 %v1733_v8, %v1522_v6  ;;  %v1715_v17 = vld [vmem:[%s2235_s1 + $0x14] sm:$0xf0] }
  0xa4   : > { %1037 = vmatpush.bf16.msra.mxu1 %v1539_v54  ;;  %v1650_v11 = vld [vmem:[%s2235_s1 + $0x1a0] sm:$0xf]  ;;  %v1765_v12 = vld [vmem:[%s2235_s1 + $0x1a4] sm:$0xf0]  ;;  %v1587_v15 = vor.u32 %v1749_v10, %v1586_v9  ;;  %v1514_v18 = vld [vmem:[%s2235_s1 + $0x90] sm:$0xf]  ;;  %v1451_v26 = vor.u32 %v1715_v17, %v1450_v16 }
  0xa5   : > { %1056 = vmatpush.bf16.msra.mxu2 %v1603_v55  ;;  %v1651_v19 = vor.u32 %v1765_v12, %v1650_v11  ;;  %v1731_v20 = vld [vmem:[%s2235_s1 + $0x94] sm:$0xf0]  ;;  %v1578_v21 = vld [vmem:[%s2235_s1 + $0x110] sm:$0xf]  ;;  %v1442_v25 = vld [vmem:[%s2235_s1] sm:$0xf] }
  0xa6   : > { %1075 = vmatpush.bf16.msra.mxu3 %v1667_v59  ;;  %v1747_v22 = vld [vmem:[%s2235_s1 + $0x114] sm:$0xf0]  ;;  %v1642_v23 = vld [vmem:[%s2235_s1 + $0x190] sm:$0xf]  ;;  %v1713_v27 = vld [vmem:[%s2235_s1 + $0x4] sm:$0xf0]  ;;  %v1515_v30 = vor.u32 %v1731_v20, %v1514_v18 }
  0xa7   : > { %1019 = vmatpush.bf16.msra.mxu0 %v1467_v1  ;;  %v1763_v24 = vld [vmem:[%s2235_s1 + $0x194] sm:$0xf0]  ;;  %v1506_v28 = vld [vmem:[%s2235_s1 + $0x80] sm:$0xf]  ;;  %v1729_v29 = vld [vmem:[%s2235_s1 + $0x84] sm:$0xf0]  ;;  %v1579_v31 = vor.u32 %v1747_v22, %v1578_v21  ;;  %v1443_v43 = vor.u32 %v1713_v27, %v1442_v25 }
  0xa8   : > { %1038 = vmatpush.bf16.msra.mxu1 %v1531_v2  ;;  %v1570_v32 = vld [vmem:[%s2235_s1 + $0x100] sm:$0xf]  ;;  %v1745_v33 = vld [vmem:[%s2235_s1 + $0x104] sm:$0xf0]  ;;  %v1643_v35 = vor.u32 %v1763_v24, %v1642_v23  ;;  %v1706_v38 = vld [vmem:[%s2233_s6 + $0xc] sm:$0xf0]  ;;  %v1507_v47 = vor.u32 %v1729_v29, %v1506_v28 }
  0xa9   : > { %1057 = vmatpush.bf16.msra.mxu2 %v1595_v3  ;;  %v1634_v34 = vld [vmem:[%s2235_s1 + $0x180] sm:$0xf]  ;;  %v1761_v36 = vld [vmem:[%s2235_s1 + $0x184] sm:$0xf0]  ;;  %v1704_v39 = vld [vmem:[%s2233_s6 + $0x4] sm:$0xf]  ;;  %v1571_v48 = vor.u32 %v1745_v33, %v1570_v32 }
  0xaa   : > { %1076 = vmatpush.bf16.msra.mxu3 %v1659_v7  ;;  %v1410_v37 = vld [vmem:[%s2233_s6] sm:$0xf]  ;;  %v1412_v40 = vld [vmem:[%s2233_s6 + $0x10] sm:$0xf0]  ;;  %v1628_v42 = vld [vmem:[%s2235_s1 + $0x178] sm:$0xf0]  ;;  %v1635_v52 = vor.u32 %v1761_v36, %v1634_v34 }
  0xab   : > { %1020 = vmatpush.bf16.msra.mxu0 %v1459_v13  ;;  %v1758_v41 = vld [vmem:[%s2235_s1 + $0x174] sm:$0xf]  ;;  %v1418_v44 = vld [vmem:[%s2233_s6 + $0x8] sm:$0xf]  ;;  %v1564_v46 = vld [vmem:[%s2235_s1 + $0xf8] sm:$0xf0]  ;;  %v2319_v57 = vor.u32 %v1706_v38, %v1410_v37  ;;  %v2324_v62 = vor.u32 %v1704_v39, %v1412_v40 }
  0xac   : > { %1039 = vmatpush.bf16.msra.mxu1 %v1523_v14  ;;  %v1742_v45 = vld [vmem:[%s2235_s1 + $0xf4] sm:$0xf]  ;;  %v1707_v49 = vld [vmem:[%s2233_s6 + $0x14] sm:$0xf0]  ;;  %v1705_v50 = vld [vmem:[%s2233_s6 + $0xc] sm:$0xf]  ;;  %v1631_v53 = vor.u32 %v1758_v41, %v1628_v42 }
  0xad   : > { %1058 = vmatpush.bf16.msra.mxu2 %v1587_v15  ;;  %v1420_v51 = vld [vmem:[%s2233_s6 + $0x18] sm:$0xf0]  ;;  %v1726_v54 = vld [vmem:[%s2235_s1 + $0x74] sm:$0xf]  ;;  %v1567_v58 = vor.u32 %v1742_v45, %v1564_v46  ;;  %v1756_v60 = vld [vmem:[%s2235_s1 + $0x164] sm:$0xf]  ;;  %v2326_v63 = vor.u32 %v1707_v49, %v1418_v44 }
  0xae   : > { %1077 = vmatpush.bf16.msra.mxu3 %v1651_v19  ;;  %v1500_v55 = vld [vmem:[%s2235_s1 + $0x78] sm:$0xf0]  ;;  %v1774_v56 = vld [vmem:[%s2235_s1 + $0x1f4] sm:$0xf]  ;;  %v1620_v61 = vld [vmem:[%s2235_s1 + $0x168] sm:$0xf0]  ;;  %v2330_v2 = vor.u32 %v1705_v50, %v1420_v51 }
  0xaf   : > { %1021 = vmatpush.bf16.msra.mxu0 %v1451_v26  ;;  %v1692_v59 = vld [vmem:[%s2235_s1 + $0x1f8] sm:$0xf0]  ;;  %v1740_v0 = vld [vmem:[%s2235_s1 + $0xe4] sm:$0xf]  ;;  %v1556_v1 = vld [vmem:[%s2235_s1 + $0xe8] sm:$0xf0]  ;;  %v1503_v3 = vor.u32 %v1726_v54, %v1500_v55  ;;  %v1623_v5 = vor.u32 %v1756_v60, %v1620_v61 }
  0xb0   : > { %1040 = vmatpush.bf16.msra.mxu1 %v1515_v30  ;;  %v1695_v4 = vor.u32 %v1774_v56, %v1692_v59  ;;  %v1724_v6 = vld [vmem:[%s2235_s1 + $0x64] sm:$0xf]  ;;  %v1492_v7 = vld [vmem:[%s2235_s1 + $0x68] sm:$0xf0]  ;;  %v1559_v9 = vor.u32 %v1740_v0, %v1556_v1  ;;  %v1754_v11 = vld [vmem:[%s2235_s1 + $0x154] sm:$0xf] }
  0xb1   : > { %1059 = vmatpush.bf16.msra.mxu2 %v1579_v31  ;;  %v1772_v8 = vld [vmem:[%s2235_s1 + $0x1e4] sm:$0xf]  ;;  %v1684_v10 = vld [vmem:[%s2235_s1 + $0x1e8] sm:$0xf0]  ;;  %v1612_v12 = vld [vmem:[%s2235_s1 + $0x158] sm:$0xf0]  ;;  %v1495_v15 = vor.u32 %v1724_v6, %v1492_v7 }
  0xb2   : > { %1078 = vmatpush.bf16.msra.mxu3 %v1643_v35  ;;  %v1738_v13 = vld [vmem:[%s2235_s1 + $0xd4] sm:$0xf]  ;;  %v1548_v14 = vld [vmem:[%s2235_s1 + $0xd8] sm:$0xf0]  ;;  %v1687_v16 = vor.u32 %v1772_v8, %v1684_v10  ;;  %v1615_v17 = vor.u32 %v1754_v11, %v1612_v12  ;;  %v1752_v23 = vld [vmem:[%s2235_s1 + $0x144] sm:$0xf] }
  0xb3   : > { %1022 = vmatpush.bf16.msra.mxu0 %v1443_v43  ;;  %v1722_v18 = vld [vmem:[%s2235_s1 + $0x54] sm:$0xf]  ;;  %v1484_v19 = vld [vmem:[%s2235_s1 + $0x58] sm:$0xf0]  ;;  %v1551_v21 = vor.u32 %v1738_v13, %v1548_v14  ;;  %v1604_v24 = vld [vmem:[%s2235_s1 + $0x148] sm:$0xf0] }
  0xb4   : > { %1041 = vmatpush.bf16.msra.mxu1 %v1507_v47  ;;  %v1770_v20 = vld [vmem:[%s2235_s1 + $0x1d4] sm:$0xf]  ;;  %v1676_v22 = vld [vmem:[%s2235_s1 + $0x1d8] sm:$0xf0]  ;;  %v1736_v25 = vld [vmem:[%s2235_s1 + $0xc4] sm:$0xf]  ;;  %v1487_v27 = vor.u32 %v1722_v18, %v1484_v19  ;;  %v1607_v32 = vor.u32 %v1752_v23, %v1604_v24 }
  0xb5   : > { %1060 = vmatpush.bf16.msra.mxu2 %v1571_v48  ;;  %v1540_v26 = vld [vmem:[%s2235_s1 + $0xc8] sm:$0xf0]  ;;  %v1720_v28 = vld [vmem:[%s2235_s1 + $0x44] sm:$0xf]  ;;  %v1679_v31 = vor.u32 %v1770_v20, %v1676_v22  ;;  %v1426_v34 = vld [vmem:[%s2233_s6 + $0x20] sm:$0xf] }
  0xb6   : > { %1079 = vmatpush.bf16.msra.mxu3 %v1635_v52  ;;  %1023 = vmatmul.bf16.vlgmr.msra.gmra.mxu0 %v2319_v57  ;;  %v1476_v29 = vld [vmem:[%s2235_s1 + $0x48] sm:$0xf0]  ;;  %v1768_v30 = vld [vmem:[%s2235_s1 + $0x1c4] sm:$0xf]  ;;  %v1710_v35 = vld [vmem:[%s2233_s6 + $0x2c] sm:$0xf0]  ;;  %v1543_v36 = vor.u32 %v1736_v25, %v1540_v26 }
  0xb7   : > { %1042 = vmatmul.bf16.vlgmr.msra.gmra.mxu1 %v2324_v62  ;;  %1091 = vmatpush.bf16.msrb.mxu0 %v1503_v3  ;;  %v1668_v33 = vld [vmem:[%s2235_s1 + $0x1c8] sm:$0xf0]  ;;  %v1708_v37 = vld [vmem:[%s2233_s6 + $0x24] sm:$0xf]  ;;  %v1428_v38 = vld [vmem:[%s2233_s6 + $0x30] sm:$0xf0]  ;;  %v1479_v44 = vor.u32 %v1720_v28, %v1476_v29 }
  0xb8   : > { %1110 = vmatpush.bf16.msrb.mxu1 %v1567_v58  ;;  %1061 = vmatmul.bf16.vlgmr.msra.gmra.mxu2 %v2326_v63  ;;  %v1750_v39 = vld [vmem:[%s2235_s1 + $0x134] sm:$0xf]  ;;  %v1596_v40 = vld [vmem:[%s2235_s1 + $0x138] sm:$0xf0]  ;;  %v1434_v41 = vld [vmem:[%s2233_s6 + $0x28] sm:$0xf]  ;;  %v1671_v48 = vor.u32 %v1768_v30, %v1668_v33  ;;  %v2376_v59 = vor.u32 %v1708_v37, %v1428_v38 }
  0xb9   : > { %1129 = vmatpush.bf16.msrb.mxu2 %v1631_v53  ;;  %1080 = vmatmul.bf16.vlgmr.msra.gmra.mxu3 %v2330_v2  ;;  %v1734_v42 = vld [vmem:[%s2235_s1 + $0xb4] sm:$0xf]  ;;  %v1532_v43 = vld [vmem:[%s2235_s1 + $0xb8] sm:$0xf0]  ;;  %v1711_v45 = vld [vmem:[%s2233_s6 + $0x34] sm:$0xf0]  ;;  %v1599_v49 = vor.u32 %v1750_v39, %v1596_v40  ;;  %v2371_v53 = vor.u32 %v1710_v35, %v1426_v34 }
  0xba   : > { %1148 = vmatpush.bf16.msrb.mxu3 %v1695_v4  ;;  %v1709_v46 = vld [vmem:[%s2233_s6 + $0x2c] sm:$0xf]  ;;  %v1436_v47 = vld [vmem:[%s2233_s6 + $0x38] sm:$0xf0]  ;;  %v1718_v50 = vld [vmem:[%s2235_s1 + $0x34] sm:$0xf]  ;;  %v1535_v54 = vor.u32 %v1734_v42, %v1532_v43  ;;  %v2378_v60 = vor.u32 %v1711_v45, %v1434_v41 }
  0xbb   : > { %1092 = vmatpush.bf16.msrb.mxu0 %v1495_v15  ;;  %v1468_v51 = vld [vmem:[%s2235_s1 + $0x38] sm:$0xf0]  ;;  %v1766_v52 = vld [vmem:[%s2235_s1 + $0x1b4] sm:$0xf]  ;;  %v1748_v56 = vld [vmem:[%s2235_s1 + $0x124] sm:$0xf]  ;;  %v1439_v1 = vor.u32 %v1709_v46, %v1436_v47 }
  0xbc   : > { %1111 = vmatpush.bf16.msrb.mxu1 %v1559_v9  ;;  %v1660_v55 = vld [vmem:[%s2235_s1 + $0x1b8] sm:$0xf0]  ;;  %v1588_v58 = vld [vmem:[%s2235_s1 + $0x128] sm:$0xf0]  ;;  %v1732_v61 = vld [vmem:[%s2235_s1 + $0xa4] sm:$0xf]  ;;  %v1471_v3 = vor.u32 %v1718_v50, %v1468_v51 }
  0xbd   : > { %1130 = vmatpush.bf16.msrb.mxu2 %v1623_v5  ;;  %v1524_v0 = vld [vmem:[%s2235_s1 + $0xa8] sm:$0xf0]  ;;  %v1663_v4 = vor.u32 %v1766_v52, %v1660_v55  ;;  %v1591_v5 = vor.u32 %v1748_v56, %v1588_v58  ;;  %v1716_v6 = vld [vmem:[%s2235_s1 + $0x24] sm:$0xf]  ;;  %v1746_v11 = vld [vmem:[%s2235_s1 + $0x114] sm:$0xf] }
  0xbe   : > { %1149 = vmatpush.bf16.msrb.mxu3 %v1687_v16  ;;  %v1460_v7 = vld [vmem:[%s2235_s1 + $0x28] sm:$0xf0]  ;;  %v1764_v8 = vld [vmem:[%s2235_s1 + $0x1a4] sm:$0xf]  ;;  %v1527_v9 = vor.u32 %v1732_v61, %v1524_v0  ;;  %v1580_v12 = vld [vmem:[%s2235_s1 + $0x118] sm:$0xf0] }
  0xbf   : > { %1093 = vmatpush.bf16.msrb.mxu0 %v1487_v27  ;;  %v1652_v10 = vld [vmem:[%s2235_s1 + $0x1a8] sm:$0xf0]  ;;  %v1730_v13 = vld [vmem:[%s2235_s1 + $0x94] sm:$0xf]  ;;  %v1516_v14 = vld [vmem:[%s2235_s1 + $0x98] sm:$0xf0]  ;;  %v1463_v15 = vor.u32 %v1716_v6, %v1460_v7 }
  0xc0   : > { %1112 = vmatpush.bf16.msrb.mxu1 %v1551_v21  ;;  %v1655_v16 = vor.u32 %v1764_v8, %v1652_v10  ;;  %v1714_v18 = vld [vmem:[%s2235_s1 + $0x14] sm:$0xf]  ;;  %v1452_v19 = vld [vmem:[%s2235_s1 + $0x18] sm:$0xf0]  ;;  %v1519_v21 = vor.u32 %v1730_v13, %v1516_v14  ;;  %v1744_v23 = vld [vmem:[%s2235_s1 + $0x104] sm:$0xf] }
  0xc1   : > { %1131 = vmatpush.bf16.msrb.mxu2 %v1615_v17  ;;  %v1583_v17 = vor.u32 %v1746_v11, %v1580_v12  ;;  %v1762_v20 = vld [vmem:[%s2235_s1 + $0x194] sm:$0xf]  ;;  %v1644_v22 = vld [vmem:[%s2235_s1 + $0x198] sm:$0xf0]  ;;  %v1572_v24 = vld [vmem:[%s2235_s1 + $0x108] sm:$0xf0]  ;;  %v1455_v27 = vor.u32 %v1714_v18, %v1452_v19 }
  0xc2   : > { %1150 = vmatpush.bf16.msrb.mxu3 %v1679_v31  ;;  %v1728_v25 = vld [vmem:[%s2235_s1 + $0x84] sm:$0xf]  ;;  %v1508_v26 = vld [vmem:[%s2235_s1 + $0x88] sm:$0xf0]  ;;  %v1647_v28 = vor.u32 %v1762_v20, %v1644_v22  ;;  %v1575_v29 = vor.u32 %v1744_v23, %v1572_v24  ;;  %v575_v43 = vld [vmem:[#allocation2 + $0x30] sm:$0xff]  ;;  %p1696_p5 = scmp.ne.s32.totalorder %s1936_s18, 8 }
  0xc3   : > { %1094 = vmatpush.bf16.msrb.mxu0 %v1479_v44  ;;  %v1712_v30 = vld [vmem:[%s2235_s1 + $0x4] sm:$0xf]  ;;  %v1444_v31 = vld [vmem:[%s2235_s1 + $0x8] sm:$0xf0]  ;;  %v578_v24 = vld [vmem:[#allocation2 + $0x10] sm:$0xff] }
  0xc4   : > { %1113 = vmatpush.bf16.msrb.mxu1 %v1543_v36  ;;  %v1760_v33 = vld [vmem:[%s2235_s1 + $0x184] sm:$0xf]  ;;  %v1636_v34 = vld [vmem:[%s2235_s1 + $0x188] sm:$0xf0]  ;;  %v1447_v35 = vor.u32 %v1712_v30, %v1444_v31 }
  0xc5   : > { %1132 = vmatpush.bf16.msrb.mxu2 %v1607_v32  ;;  %v1511_v32 = vor.u32 %v1728_v25, %v1508_v26  ;;  %v1639_v36 = vor.u32 %v1760_v33, %v1636_v34  ;;  %v581_v6 = vld [vmem:[#allocation2 + $0x28] sm:$0xff]  ;;  %v580_v33 = vld [vmem:[#allocation2 + $0x20] sm:$0xff] }
  0xc6   : > { %1151 = vmatpush.bf16.msrb.mxu3 %v1671_v48  ;;  %1028 = vmatmul.bf16.gmra.mxu0 %v2371_v53 }
  0xc7   : > { %1047 = vmatmul.bf16.gmra.mxu1 %v2376_v59  ;;  %1095 = vmatpush.bf16.msrb.mxu0 %v1471_v3 }
  0xc8   : > { %1114 = vmatpush.bf16.msrb.mxu1 %v1535_v54  ;;  %1066 = vmatmul.bf16.gmra.mxu2 %v2378_v60 }
  0xc9   : > { %1133 = vmatpush.bf16.msrb.mxu2 %v1599_v49  ;;  %1085 = vmatmul.bf16.gmra.mxu3 %v1439_v1  ;;  %v577_v49 = vld [vmem:[#allocation2 + $0x18] sm:$0xff] }
  0xca   : > { %1152 = vmatpush.bf16.msrb.mxu3 %v1663_v4 }
  0xcb   : > { %1096 = vmatpush.bf16.msrb.mxu0 %v1463_v15 }
  0xcc   : > { %1115 = vmatpush.bf16.msrb.mxu1 %v1527_v9 }
  0xcd   : > { %1134 = vmatpush.bf16.msrb.mxu2 %v1591_v5 }
  0xce   : > { %1153 = vmatpush.bf16.msrb.mxu3 %v1655_v16 }
  0xcf   : > { %1097 = vmatpush.bf16.msrb.mxu0 %v1455_v27 }
  0xd0   : > { %1116 = vmatpush.bf16.msrb.mxu1 %v1519_v21 }
  0xd1   : > { %1135 = vmatpush.bf16.msrb.mxu2 %v1583_v17  ;;  %v576_v17 = vld [vmem:[#allocation2] sm:$0xff] }
  0xd2   : > { %1154 = vmatpush.bf16.msrb.mxu3 %v1647_v28 }
  0xd3   : > { %1098 = vmatpush.bf16.msrb.mxu0 %v1447_v35 }
  0xd4   : > { %1117 = vmatpush.bf16.msrb.mxu1 %v1511_v32 }
  0xd5   : > { %1136 = vmatpush.bf16.msrb.mxu2 %v1575_v29 }
  0xd6   : > { %1155 = vmatpush.bf16.msrb.mxu3 %v1639_v36  ;;  %1099 = vmatmul.bf16.vlgmr.msrb.gmra.mxu0 %v2319_v57 }
  0xd7   : > { %1118 = vmatmul.bf16.vlgmr.msrb.gmra.mxu1 %v2324_v62 }
  0xd8   : > { %1137 = vmatmul.bf16.vlgmr.msrb.gmra.mxu2 %v2326_v63 }
  0xd9   : > { %1156 = vmatmul.bf16.vlgmr.msrb.gmra.mxu3 %v2330_v2 }
  0xe6   : > { %1104 = vmatmul.bf16.gmra.mxu0 %v2371_v53 }
  0xe7   : > { %1123 = vmatmul.bf16.gmra.mxu1 %v2376_v59  ;;  %v579_v59 = vld [vmem:[#allocation2 + $0x8] sm:$0xff] }
  0xe8   : > { %1142 = vmatmul.bf16.gmra.mxu2 %v2378_v60 }
  0xe9   : > { %1161 = vmatmul.bf16.gmra.mxu3 %v1439_v1 }
 0x133   : > { %v1024_v37 = vpop.f32.mrf.mxu0 }
 0x134   : > { %v1043_v38 = vpop.f32.mrf.mxu1 }
 0x135   : > { %v1044_v39 = vadd.f32 %v1043_v38, %v1024_v37 }
 0x13b   : > { %v1062_v40 = vpop.f32.mrf.mxu2  ;;  %v1026_v57 = vpop.f32.mrf.mxu0 }
 0x13c   : > { %v1063_v41 = vadd.f32 %v1062_v40, %v1044_v39  ;;  %v1081_v42 = vpop.f32.mrf.mxu3  ;;  %v1045_v62 = vpop.f32.mrf.mxu1 }
 0x13d   : > { %v1046_v2 = vadd.f32 %v1045_v62, %v1026_v57 }
 0x13e   : > { %v1082_v44 = vadd.f32 %v1081_v42, %v1063_v41  ;;  %v582_v41 = vld [vmem:[#allocation2 + $0x38] sm:$0xff] }
 0x140   : > { %v1167_v63 = vadd.f32 %v1082_v44, %v575_v43 }
 0x142   : > { %1175 = vst [vmem:[#allocation2 + $0x30] sm:$0xff] %v1167_v63 }
 0x143   : > { %v1064_v45 = vpop.f32.mrf.mxu2  ;;  %v1029_v48 = vpop.f32.mrf.mxu0 }
 0x144   : > { %v1065_v46 = vadd.f32 %v1064_v45, %v1046_v2  ;;  %v1083_v47 = vpop.f32.mrf.mxu3  ;;  %v1048_v50 = vpop.f32.mrf.mxu1 }
 0x145   : > { %v1049_v53 = vadd.f32 %v1048_v50, %v1029_v48 }
 0x146   : > { %v1084_v51 = vadd.f32 %v1083_v47, %v1065_v46 }
 0x148   : > { %v1169_v52 = vadd.f32 %v1084_v51, %v577_v49 }
 0x14a   : > { %1177 = vst [vmem:[#allocation2 + $0x18] sm:$0xff] %v1169_v52 }
 0x14b   : > { %v1067_v54 = vpop.f32.mrf.mxu2  ;;  %v1031_v58 = vpop.f32.mrf.mxu0 }
 0x14c   : > { %v1068_v55 = vadd.f32 %v1067_v54, %v1049_v53  ;;  %v1086_v56 = vpop.f32.mrf.mxu3  ;;  %v1050_v60 = vpop.f32.mrf.mxu1 }
 0x14d   : > { %v1051_v1 = vadd.f32 %v1050_v60, %v1031_v58 }
 0x14e   : > { %v1087_v61 = vadd.f32 %v1086_v56, %v1068_v55 }
 0x150   : > { %v1171_v0 = vadd.f32 %v1087_v61, %v579_v59 }
 0x152   : > { %1179 = vst [vmem:[#allocation2 + $0x8] sm:$0xff] %v1171_v0 }
 0x153   : > { %v1069_v3 = vpop.f32.mrf.mxu2  ;;  %v1100_v7 = vpop.f32.mrf.mxu0 }
 0x154   : > { %v1070_v4 = vadd.f32 %v1069_v3, %v1051_v1  ;;  %v1088_v5 = vpop.f32.mrf.mxu3  ;;  %v1119_v8 = vpop.f32.mrf.mxu1 }
 0x155   : > { %v1120_v11 = vadd.f32 %v1119_v8, %v1100_v7 }
 0x156   : > { %v1089_v9 = vadd.f32 %v1088_v5, %v1070_v4 }
 0x158   : > { %v1173_v10 = vadd.f32 %v1089_v9, %v581_v6 }
 0x15a   : > { %1181 = vst [vmem:[#allocation2 + $0x28] sm:$0xff] %v1173_v10 }
 0x15b   : > { %v1138_v12 = vpop.f32.mrf.mxu2  ;;  %v1102_v15 = vpop.f32.mrf.mxu0 }
 0x15c   : > { %v1157_v13 = vpop.f32.mrf.mxu3  ;;  %v1139_v14 = vadd.f32 %v1138_v12, %v1120_v11  ;;  %v1121_v16 = vpop.f32.mrf.mxu1 }
 0x15d   : > { %v1122_v20 = vadd.f32 %v1121_v16, %v1102_v15 }
 0x15e   : > { %v1158_v18 = vadd.f32 %v1157_v13, %v1139_v14 }
 0x160   : > { %v1168_v19 = vadd.f32 %v1158_v18, %v576_v17 }
 0x162   : > { %1176 = vst [vmem:[#allocation2] sm:$0xff] %v1168_v19 }
 0x163   : > { %v1140_v21 = vpop.f32.mrf.mxu2  ;;  %v1105_v25 = vpop.f32.mrf.mxu0 }
 0x164   : > { %v1159_v22 = vpop.f32.mrf.mxu3  ;;  %v1141_v23 = vadd.f32 %v1140_v21, %v1122_v20  ;;  %v1124_v26 = vpop.f32.mrf.mxu1 }
 0x165   : > { %v1125_v29 = vadd.f32 %v1124_v26, %v1105_v25 }
 0x166   : > { %v1160_v27 = vadd.f32 %v1159_v22, %v1141_v23 }
 0x168   : > { %v1170_v28 = vadd.f32 %v1160_v27, %v578_v24 }
 0x16a   : > { %1178 = vst [vmem:[#allocation2 + $0x10] sm:$0xff] %v1170_v28 }
 0x16b   : > { %v1143_v30 = vpop.f32.mrf.mxu2  ;;  %v1107_v35 = vpop.f32.mrf.mxu0 }
 0x16c   : > { %v1162_v31 = vpop.f32.mrf.mxu3  ;;  %v1144_v32 = vadd.f32 %v1143_v30, %v1125_v29  ;;  %v1126_v36 = vpop.f32.mrf.mxu1 }
 0x16d   : > { %v1127_v38 = vadd.f32 %v1126_v36, %v1107_v35 }
 0x16e   : > { %v1163_v34 = vadd.f32 %v1162_v31, %v1144_v32 }
 0x170   : > { %v1172_v37 = vadd.f32 %v1163_v34, %v580_v33 }
 0x172   : > { %1180 = vst [vmem:[#allocation2 + $0x20] sm:$0xff] %v1172_v37 }
 0x173   : > { %v1145_v39 = vpop.f32.mrf.mxu2 }
 0x174   : > { %v1146_v40 = vadd.f32 %v1145_v39, %v1127_v38  ;;  %v1164_v42 = vpop.f32.mrf.mxu3 }
 0x176   : > { %v1165_v57 = vadd.f32 %v1164_v42, %v1146_v40  ;;  %1186 = sbr.rel (%p1696_p5) target bundleno = 393 (0x189), region = 101 }
 0x178   : > { %v1174_v43 = vadd.f32 %v1165_v57, %v582_v41 }
 0x17a   : > { %1182 = vst [vmem:[#allocation2 + $0x38] sm:$0xff] %v1174_v43 }
 0x17b   : > { %v1187_v62 = vld [vmem:[#allocation2 + $0x30] sm:$0xff]  ;;  %v1188_v44 = vld [vmem:[#allocation2] sm:$0xff]  ;;  %v1189_v46 = vld [vmem:[#allocation2 + $0x18] sm:$0xff] }
 0x17c   : > { %v1195_v63 = vld [vmem:[%s559_s5] sm:$0x3]  ;;  %v1190_v47 = vld [vmem:[#allocation2 + $0x10] sm:$0xff]  ;;  %v1191_v48 = vld [vmem:[#allocation2 + $0x8] sm:$0xff] }
 0x17d   : > { %v1197_v2 = vperm.slane %v1195_v63, 0  ;;  %v1198_v45 = vperm.slane %v1195_v63, 1  ;;  %v1192_v49 = vld [vmem:[#allocation2 + $0x20] sm:$0xff]  ;;  %v1193_v50 = vld [vmem:[#allocation2 + $0x28] sm:$0xff] }
 0x17f   : > { %v1201_v52 = vadd.f32 %v1197_v2, %v1187_v62  ;;  %v1202_v53 = vadd.f32 %v1198_v45, %v1188_v44  ;;  %v1203_v54 = vadd.f32 %v1197_v2, %v1189_v46  ;;  %v1204_v55 = vadd.f32 %v1198_v45, %v1190_v47 }
 0x180   : > { %v1205_v56 = vadd.f32 %v1197_v2, %v1191_v48  ;;  %v1206_v58 = vadd.f32 %v1198_v45, %v1192_v49  ;;  %v1207_v59 = vadd.f32 %v1197_v2, %v1193_v50 }
 0x181   : > { %v1194_v51 = vld [vmem:[#allocation2 + $0x38] sm:$0xff]  ;;  %v1209_v61 = vmax.f32 %v1201_v52, 0.0  ;;  %v1210_v0 = vmax.f32 %v1202_v53, 0.0  ;;  %v1211_v1 = vmax.f32 %v1203_v54, 0.0  ;;  %v1212_v3 = vmax.f32 %v1204_v55, 0.0 }
 0x182   : > { %v1208_v60 = vadd.f32 %v1198_v45, %v1194_v51  ;;  %v1213_v4 = vmax.f32 %v1205_v56, 0.0  ;;  %v1214_v5 = vmax.f32 %v1206_v58, 0.0  ;;  %v1215_v6 = vmax.f32 %v1207_v59, 0.0 }
 0x183   : > { %v1217_v8 = vpack.c.bf16 %v1210_v0, %v1209_v61  ;;  %v1218_v9 = vpack.c.bf16 %v1212_v3, %v1211_v1 }
 0x184   : > { %v1216_v7 = vmax.f32 %v1208_v60, 0.0  ;;  %v1219_v10 = vpack.c.bf16 %v1214_v5, %v1213_v4 }
 0x185   : > { %1221 = vst [vmem:[%s2237_s25] sm:$0xff] %v1217_v8 }
 0x186   : > { %v1220_v11 = vpack.c.bf16 %v1216_v7, %v1215_v6  ;;  %1222 = vst [vmem:[%s2237_s25 + $0x8] sm:$0xff] %v1218_v9 }
 0x187   : > { %1223 = vst [vmem:[%s2237_s25 + $0x10] sm:$0xff] %v1219_v10 }
 0x188   : > { %1224 = vst [vmem:[%s2237_s25 + $0x18] sm:$0xff] %v1220_v11 }
 0x189 PF: > { %1231 = sbr.rel (!%p2069_p12) target bundleno = 401 (0x191), region = 105  ;;  %s1776_s14 = sshll.u32 (%p2069_p12), %s1940_s19, 3 }
 0x18a   : > { %s1237_s0 = scalar_lea.vmem (%p2069_p12), %s2468_s3, %s1776_s14 }
 0x18c   : > { %v1272_v12 = vld [vmem:[%s2237_s25] sm:$0xff] (%p2069_p12) }
 0x18d   : > { %v1274_v13 = vld [vmem:[%s2237_s25 + $0x8] sm:$0xff] (%p2069_p12)  ;;  %1273 = vst [vmem:[%s1237_s0] sm:$0xff] (%p2069_p12), %v1272_v12 }
 0x18e   : > { %v1276_v14 = vld [vmem:[%s2237_s25 + $0x10] sm:$0xff]  ;;  %1275 = vst [vmem:[%s1237_s0 + $0x10] sm:$0xff] %v1274_v13 }
 0x18f   : > { %v1278_v15 = vld [vmem:[%s2237_s25 + $0x18] sm:$0xff]  ;;  %1277 = vst [vmem:[%s1237_s0 + $0x20] sm:$0xff] %v1276_v14 }
 0x190   : > { %1279 = vst [vmem:[%s1237_s0 + $0x30] sm:$0xff] %v1278_v15 }
 0x191 PF: > { %s13_s22 = sadd.s32 1, %s1952_s22   ;;  %s2478_s10 = sld [smem:[#allocation6_spill]] }
 0x192   : > { %p10_p6 = scmp.ge.s32.totalorder %s13_s22, 20   ;;  %s2479_s12 = smov %s1916_s13 }
 0x193   : > { %s2480_s13 = smov %s2067_s9  ;;  %s2481_s14 = smov %s1924_s15 }
 0x194   : > { %s2482_s15 = smov %s2064_s8  ;;  %s2483_s16 = smov %s1932_s17 }
 0x195   : > { %s2484_s17 = smov %s2050_s30  ;;  %s2485_s18 = smov %s1944_s20 }
 0x196   : > { %s2486_s19 = smov %s1948_s21  ;;  %s2487_s20 = smov %s2490_s24 }
 0x197   : > { %s2488_s21 = smov %s2478_s10  ;;  %12 = sbr.rel (!%p10_p6) target bundleno = 9 (0x9), region = 185 }

// kernel: convnet_forward.25
= control target key start
LH: loop header
LB: loop body
LE: loop exit
PB: predicated region body
PF: predicated region fallthrough
CT: control target
= control target key end

     0   :  { %s3401_s0 = inlined_call_operand.vmem [shape: bf16[16,8192], index: 0, kind: input, shape index: {}]   ;;  %s3402_s1 = inlined_call_operand.vmem [shape: bf16[8192,2048], index: 1, kind: input, shape index: {}]   ;;  %s3403_s2 = inlined_call_operand.vmem [shape: f32[1,2048], index: 2, kind: input, shape index: {}]   ;;  %s3404_s3 = inlined_call_operand.vmem [shape: bf16[16,2048], index: 3, kind: output, shape index: {}]  }
   0x1   :  { %3406 = sst [smem:[#allocation7_spill]] %s3401_s0 }
   0x2   :  { %3407 = sst [smem:[#allocation8_spill]] %s3402_s1 }
   0x3   :  { %s2667_s12 = smov 0   ;;  %s2669_s13 = smov 0  }
   0x4   :  { %s2671_s14 = smov 0   ;;  %s2673_s15 = smov 0  }
   0x5   :  { %s2675_s16 = smov 0   ;;  %s2677_s17 = smov 0  }
   0x6   :  { %s2679_s18 = smov 0   ;;  %s2681_s19 = smov 0  }
   0x7   :  { %s2683_s20 = smov 0   ;;  %s2685_s21 = smov 0  }
   0x8   :  { %s2687_s22 = smov 0  }
   0x9 LB: > { %s1782_s23 = sadd.s32 4294967295, %s2644_s22   ;;  %s25_s24 = sadd.s32 1, %s2636_s20  ;;  %s2644_s22 = sphi %s2687_s22, %s13_s22   ;;  %s2640_s21 = sphi %s2685_s21, %s3424_s21   ;;  %s2636_s20 = sphi %s2683_s20, %s3423_s20   ;;  %s2632_s19 = sphi %s2681_s19, %s3422_s19   ;;  %s2628_s18 = sphi %s2679_s18, %s3421_s18   ;;  %s2624_s17 = sphi %s2677_s17, %s3420_s17   ;;  %s2620_s16 = sphi %s2675_s16, %s3419_s16   ;;  %s2616_s15 = sphi %s2673_s15, %s3418_s15   ;;  %s2612_s14 = sphi %s2671_s14, %s3417_s14   ;;  %s2608_s13 = sphi %s2669_s13, %s3416_s13   ;;  %s2604_s12 = sphi %s2667_s12, %s3415_s12  }
   0xa   : > { %p26_p0 = scmp.ge.s32.totalorder %s25_s24, 16  ;;  %s28_s25 = sadd.s32 1, %s2640_s21 }
   0xb   : > { %s41_s26 = sadd.s32 1, %s2624_s17  ;;  %p48_p1 = scmp.ne.s32.totalorder %s2624_s17, %s2620_s16 }
   0xc   : > { %s3426_s24 = smov (%p26_p0, %s25_s24), 0  ;;  %s3428_s25 = smov (!%p26_p0, %s28_s25), %s2640_s21 }
   0xd   : > { %s37_s27 = ssub.s32 %s2636_s20, %s3426_s24  ;;  %p49_p2 = scmp.eq.s32.totalorder %s2644_s22, 0 }
   0xe   : > { %p30_p3 = scmp.ge.s32.totalorder %s3428_s25, 4  ;;  %p39_p4 = scmp.eq.s32.totalorder %s37_s27, 0 }
   0xf   : > { %p2734_p5 = por %p49_p2, %p48_p1  ;;  %s69_s29 = sadd.s32 1, %s2616_s15 }
  0x10   : > { %s3430_s25 = smov (%p30_p3, %s3428_s25), 0  ;;  %p76_p6 = scmp.ne.s32.totalorder %s2616_s15, %s2612_s14 }
  0x11   : > { %3409 = sst [smem:[#allocation6_spill]] %s3430_s25  ;;  %s65_s4 = ssub.s32 %s2640_s21, %s3430_s25 }
  0x12   : > { %s2742_s30 = scalar_select %p39_p4, %s2624_s17, %s41_s26  }
  0x13   : > { %s66_s5 = sor.u32 %s65_s4, %s37_s27  ;;  %p121_p7 = scmp.eq.s32.totalorder %s65_s4, 0 }
  0x14   : > { %p67_p8 = scmp.eq.s32.totalorder %s66_s5, 0  ;;  %p2748_p9 = por %p76_p6, %p49_p2 }
  0x15   : > { %s123_s7 = sadd.s32 1, %s2608_s13  ;;  %p133_p10 = scmp.ne.s32.totalorder %s2608_s13, %s2604_s12 }
  0x16   : > { %s2756_s8 = scalar_select %p67_p8, %s2616_s15, %s69_s29  }
  0x17   : > { %s2759_s9 = scalar_select %p121_p7, %s2608_s13, %s123_s7  }
  0x18   : > { %p134_p11 = scmp.eq.s32.totalorder %s1782_s23, 63  ;;  %p1785_p13 = scmp.ge.s32.totalorder %s2644_s22, 64 }
  0x1a   : > { %p2761_p12 = por %p134_p11, %p133_p10  ;;  %156 = sbr.rel (%p1785_p13) target bundleno = 183 (0xb7), region = 16 }
  0x1f   : > { %159 = sbr.rel (!%p2734_p5) target bundleno = 45 (0x2d), region = 20  ;;  %s161_s11 = sand.u32 (%p2734_p5), 1, %s2624_s17  }
  0x20   : > { %s2334_s26 = sshll.u32 (%p2734_p5), %s2636_s20, 4  ;;  %s1786_s27 = sshll.u32 (%p2734_p5), %s161_s11, 5 }
  0x21   : > { %s3412_s0 = sld [smem:[#allocation7_spill]] (%p2734_p5)  ;;  %s163_s23 = scalar_lea.vmem (%p2734_p5), [#allocation3], %s1786_s27 }
  0x27   : > { %s169_s5 = scalar_lea.vmem %s3412_s0, %s2334_s26 }
  0x28   : > { %v182_v0 = vld [vmem:[%s169_s5] sm:$0xff]  ;;  %v184_v1 = vld [vmem:[%s169_s5 + $0x8] sm:$0xff] }
  0x29   : > { %v186_v2 = vld [vmem:[%s169_s5 + $0x100] sm:$0xff]  ;;  %183 = vst [vmem:[%s163_s23] sm:$0xff] %v182_v0  ;;  %v188_v3 = vld [vmem:[%s169_s5 + $0x108] sm:$0xff] }
  0x2a   : > { %185 = vst [vmem:[%s163_s23 + $0x8] sm:$0xff] %v184_v1 }
  0x2b   : > { %187 = vst [vmem:[%s163_s23 + $0x10] sm:$0xff] %v186_v2 }
  0x2c   : > { %189 = vst [vmem:[%s163_s23 + $0x18] sm:$0xff] %v188_v3 }
  0x2d PF: > { %195 = sbr.rel (!%p2748_p9) target bundleno = 183 (0xb7), region = 43  ;;  %s197_s28 = sand.u32 (%p2748_p9), 1, %s2616_s15  }
  0x2e   : > { %s1791_s7 = sshll.u32 (%p2748_p9), %s2640_s21, 2  ;;  %s1789_s11 = sshll.u32 (%p2748_p9), %s197_s28, 10 }
  0x2f   : > { %s2335_s26 = sshll.u32 (%p2748_p9), %s2636_s20, 10  ;;  %s3413_s1 = sld [smem:[#allocation8_spill]] (%p2748_p9) }
  0x30   : > { %s203_s29 = sadd.s32 (%p2748_p9), %s2335_s26, %s1791_s7  ;;  %s2786_s6 = scalar_lea.vmem (%p2748_p9), [#allocation4], %s1789_s11 }
  0x31   : > { %s1793_s4 = sshll.u32 (%p2748_p9), %s203_s29, 2 }
  0x35   : > { %s2781_s5 = scalar_lea.vmem %s3413_s1, %s1793_s4 }
  0x36   : > { %v218_v4 = vld [vmem:[%s2781_s5] sm:$0xff]  ;;  %v220_v5 = vld [vmem:[%s2781_s5 + $0x8] sm:$0xff] }
  0x37   : > { %v222_v6 = vld [vmem:[%s2781_s5 + $0x40] sm:$0xff]  ;;  %219 = vst [vmem:[%s2786_s6] sm:$0xff] %v218_v4  ;;  %v224_v7 = vld [vmem:[%s2781_s5 + $0x48] sm:$0xff] }
  0x38   : > { %221 = vst [vmem:[%s2786_s6 + $0x8] sm:$0xff] %v220_v5  ;;  %v226_v8 = vld [vmem:[%s2781_s5 + $0x80] sm:$0xff]  ;;  %v228_v9 = vld [vmem:[%s2781_s5 + $0x88] sm:$0xff] }
  0x39   : > { %223 = vst [vmem:[%s2786_s6 + $0x10] sm:$0xff] %v222_v6  ;;  %v230_v10 = vld [vmem:[%s2781_s5 + $0xc0] sm:$0xff]  ;;  %v232_v11 = vld [vmem:[%s2781_s5 + $0xc8] sm:$0xff] }
  0x3a   : > { %225 = vst [vmem:[%s2786_s6 + $0x18] sm:$0xff] %v224_v7  ;;  %v234_v12 = vld [vmem:[%s2781_s5 + $0x100] sm:$0xff]  ;;  %v236_v13 = vld [vmem:[%s2781_s5 + $0x108] sm:$0xff] }
  0x3b   : > { %227 = vst [vmem:[%s2786_s6 + $0x20] sm:$0xff] %v226_v8  ;;  %v238_v14 = vld [vmem:[%s2781_s5 + $0x140] sm:$0xff]  ;;  %v240_v15 = vld [vmem:[%s2781_s5 + $0x148] sm:$0xff] }
  0x3c   : > { %229 = vst [vmem:[%s2786_s6 + $0x28] sm:$0xff] %v228_v9  ;;  %v242_v16 = vld [vmem:[%s2781_s5 + $0x180] sm:$0xff]  ;;  %v244_v17 = vld [vmem:[%s2781_s5 + $0x188] sm:$0xff] }
  0x3d   : > { %231 = vst [vmem:[%s2786_s6 + $0x30] sm:$0xff] %v230_v10  ;;  %v246_v18 = vld [vmem:[%s2781_s5 + $0x1c0] sm:$0xff]  ;;  %v248_v19 = vld [vmem:[%s2781_s5 + $0x1c8] sm:$0xff] }
  0x3e   : > { %233 = vst [vmem:[%s2786_s6 + $0x38] sm:$0xff] %v232_v11  ;;  %v250_v20 = vld [vmem:[%s2781_s5 + $0x200] sm:$0xff]  ;;  %v252_v21 = vld [vmem:[%s2781_s5 + $0x208] sm:$0xff] }
  0x3f   : > { %235 = vst [vmem:[%s2786_s6 + $0x40] sm:$0xff] %v234_v12  ;;  %v254_v22 = vld [vmem:[%s2781_s5 + $0x240] sm:$0xff]  ;;  %v256_v23 = vld [vmem:[%s2781_s5 + $0x248] sm:$0xff] }
  0x40   : > { %237 = vst [vmem:[%s2786_s6 + $0x48] sm:$0xff] %v236_v13  ;;  %v258_v24 = vld [vmem:[%s2781_s5 + $0x280] sm:$0xff]  ;;  %v260_v25 = vld [vmem:[%s2781_s5 + $0x288] sm:$0xff] }
  0x41   : > { %239 = vst [vmem:[%s2786_s6 + $0x50] sm:$0xff] %v238_v14  ;;  %v262_v26 = vld [vmem:[%s2781_s5 + $0x2c0] sm:$0xff]  ;;  %v264_v27 = vld [vmem:[%s2781_s5 + $0x2c8] sm:$0xff] }
  0x42   : > { %241 = vst [vmem:[%s2786_s6 + $0x58] sm:$0xff] %v240_v15  ;;  %v266_v28 = vld [vmem:[%s2781_s5 + $0x300] sm:$0xff]  ;;  %v268_v29 = vld [vmem:[%s2781_s5 + $0x308] sm:$0xff] }
  0x43   : > { %243 = vst [vmem:[%s2786_s6 + $0x60] sm:$0xff] %v242_v16  ;;  %v270_v30 = vld [vmem:[%s2781_s5 + $0x340] sm:$0xff]  ;;  %v272_v31 = vld [vmem:[%s2781_s5 + $0x348] sm:$0xff] }
  0x44   : > { %245 = vst [vmem:[%s2786_s6 + $0x68] sm:$0xff] %v244_v17  ;;  %v274_v32 = vld [vmem:[%s2781_s5 + $0x380] sm:$0xff]  ;;  %v276_v33 = vld [vmem:[%s2781_s5 + $0x388] sm:$0xff] }
  0x45   : > { %247 = vst [vmem:[%s2786_s6 + $0x70] sm:$0xff] %v246_v18  ;;  %v278_v34 = vld [vmem:[%s2781_s5 + $0x3c0] sm:$0xff]  ;;  %v280_v35 = vld [vmem:[%s2781_s5 + $0x3c8] sm:$0xff] }
  0x46   : > { %249 = vst [vmem:[%s2786_s6 + $0x78] sm:$0xff] %v248_v19  ;;  %v282_v36 = vld [vmem:[%s2781_s5 + $0x400] sm:$0xff]  ;;  %v284_v37 = vld [vmem:[%s2781_s5 + $0x408] sm:$0xff] }
  0x47   : > { %251 = vst [vmem:[%s2786_s6 + $0x80] sm:$0xff] %v250_v20  ;;  %v286_v38 = vld [vmem:[%s2781_s5 + $0x440] sm:$0xff]  ;;  %v288_v39 = vld [vmem:[%s2781_s5 + $0x448] sm:$0xff] }
  0x48   : > { %253 = vst [vmem:[%s2786_s6 + $0x88] sm:$0xff] %v252_v21  ;;  %v290_v40 = vld [vmem:[%s2781_s5 + $0x480] sm:$0xff]  ;;  %v292_v41 = vld [vmem:[%s2781_s5 + $0x488] sm:$0xff] }
  0x49   : > { %255 = vst [vmem:[%s2786_s6 + $0x90] sm:$0xff] %v254_v22  ;;  %v294_v42 = vld [vmem:[%s2781_s5 + $0x4c0] sm:$0xff]  ;;  %v296_v43 = vld [vmem:[%s2781_s5 + $0x4c8] sm:$0xff] }
  0x4a   : > { %257 = vst [vmem:[%s2786_s6 + $0x98] sm:$0xff] %v256_v23  ;;  %v298_v44 = vld [vmem:[%s2781_s5 + $0x500] sm:$0xff]  ;;  %v300_v45 = vld [vmem:[%s2781_s5 + $0x508] sm:$0xff] }
  0x4b   : > { %259 = vst [vmem:[%s2786_s6 + $0xa0] sm:$0xff] %v258_v24  ;;  %v302_v46 = vld [vmem:[%s2781_s5 + $0x540] sm:$0xff]  ;;  %v304_v47 = vld [vmem:[%s2781_s5 + $0x548] sm:$0xff] }
  0x4c   : > { %261 = vst [vmem:[%s2786_s6 + $0xa8] sm:$0xff] %v260_v25  ;;  %v306_v48 = vld [vmem:[%s2781_s5 + $0x580] sm:$0xff]  ;;  %v308_v49 = vld [vmem:[%s2781_s5 + $0x588] sm:$0xff] }
  0x4d   : > { %263 = vst [vmem:[%s2786_s6 + $0xb0] sm:$0xff] %v262_v26  ;;  %v310_v50 = vld [vmem:[%s2781_s5 + $0x5c0] sm:$0xff]  ;;  %v312_v51 = vld [vmem:[%s2781_s5 + $0x5c8] sm:$0xff] }
  0x4e   : > { %265 = vst [vmem:[%s2786_s6 + $0xb8] sm:$0xff] %v264_v27  ;;  %v314_v52 = vld [vmem:[%s2781_s5 + $0x600] sm:$0xff]  ;;  %v316_v53 = vld [vmem:[%s2781_s5 + $0x608] sm:$0xff] }
  0x4f   : > { %267 = vst [vmem:[%s2786_s6 + $0xc0] sm:$0xff] %v266_v28  ;;  %v318_v54 = vld [vmem:[%s2781_s5 + $0x640] sm:$0xff]  ;;  %v320_v55 = vld [vmem:[%s2781_s5 + $0x648] sm:$0xff] }
  0x50   : > { %269 = vst [vmem:[%s2786_s6 + $0xc8] sm:$0xff] %v268_v29  ;;  %v322_v56 = vld [vmem:[%s2781_s5 + $0x680] sm:$0xff]  ;;  %v324_v57 = vld [vmem:[%s2781_s5 + $0x688] sm:$0xff] }
  0x51   : > { %271 = vst [vmem:[%s2786_s6 + $0xd0] sm:$0xff] %v270_v30  ;;  %v326_v58 = vld [vmem:[%s2781_s5 + $0x6c0] sm:$0xff]  ;;  %v328_v59 = vld [vmem:[%s2781_s5 + $0x6c8] sm:$0xff] }
  0x52   : > { %273 = vst [vmem:[%s2786_s6 + $0xd8] sm:$0xff] %v272_v31  ;;  %v330_v60 = vld [vmem:[%s2781_s5 + $0x700] sm:$0xff]  ;;  %v332_v61 = vld [vmem:[%s2781_s5 + $0x708] sm:$0xff] }
  0x53   : > { %275 = vst [vmem:[%s2786_s6 + $0xe0] sm:$0xff] %v274_v32  ;;  %v334_v62 = vld [vmem:[%s2781_s5 + $0x740] sm:$0xff]  ;;  %v336_v63 = vld [vmem:[%s2781_s5 + $0x748] sm:$0xff] }
  0x54   : > { %277 = vst [vmem:[%s2786_s6 + $0xe8] sm:$0xff] %v276_v33  ;;  %v338_v0 = vld [vmem:[%s2781_s5 + $0x780] sm:$0xff]  ;;  %v340_v1 = vld [vmem:[%s2781_s5 + $0x788] sm:$0xff] }
  0x55   : > { %279 = vst [vmem:[%s2786_s6 + $0xf0] sm:$0xff] %v278_v34  ;;  %v342_v2 = vld [vmem:[%s2781_s5 + $0x7c0] sm:$0xff]  ;;  %v344_v3 = vld [vmem:[%s2781_s5 + $0x7c8] sm:$0xff] }
  0x56   : > { %281 = vst [vmem:[%s2786_s6 + $0xf8] sm:$0xff] %v280_v35  ;;  %v346_v4 = vld [vmem:[%s2781_s5 + $0x800] sm:$0xff]  ;;  %v348_v5 = vld [vmem:[%s2781_s5 + $0x808] sm:$0xff] }
  0x57   : > { %283 = vst [vmem:[%s2786_s6 + $0x100] sm:$0xff] %v282_v36  ;;  %v350_v6 = vld [vmem:[%s2781_s5 + $0x840] sm:$0xff]  ;;  %v352_v7 = vld [vmem:[%s2781_s5 + $0x848] sm:$0xff] }
  0x58   : > { %285 = vst [vmem:[%s2786_s6 + $0x108] sm:$0xff] %v284_v37  ;;  %v354_v8 = vld [vmem:[%s2781_s5 + $0x880] sm:$0xff]  ;;  %v356_v9 = vld [vmem:[%s2781_s5 + $0x888] sm:$0xff] }
  0x59   : > { %287 = vst [vmem:[%s2786_s6 + $0x110] sm:$0xff] %v286_v38  ;;  %v358_v10 = vld [vmem:[%s2781_s5 + $0x8c0] sm:$0xff]  ;;  %v360_v11 = vld [vmem:[%s2781_s5 + $0x8c8] sm:$0xff] }
  0x5a   : > { %289 = vst [vmem:[%s2786_s6 + $0x118] sm:$0xff] %v288_v39  ;;  %v362_v12 = vld [vmem:[%s2781_s5 + $0x900] sm:$0xff]  ;;  %v364_v13 = vld [vmem:[%s2781_s5 + $0x908] sm:$0xff] }
  0x5b   : > { %291 = vst [vmem:[%s2786_s6 + $0x120] sm:$0xff] %v290_v40  ;;  %v366_v14 = vld [vmem:[%s2781_s5 + $0x940] sm:$0xff]  ;;  %v368_v15 = vld [vmem:[%s2781_s5 + $0x948] sm:$0xff] }
  0x5c   : > { %293 = vst [vmem:[%s2786_s6 + $0x128] sm:$0xff] %v292_v41  ;;  %v370_v16 = vld [vmem:[%s2781_s5 + $0x980] sm:$0xff]  ;;  %v372_v17 = vld [vmem:[%s2781_s5 + $0x988] sm:$0xff] }
  0x5d   : > { %295 = vst [vmem:[%s2786_s6 + $0x130] sm:$0xff] %v294_v42  ;;  %v374_v18 = vld [vmem:[%s2781_s5 + $0x9c0] sm:$0xff]  ;;  %v376_v19 = vld [vmem:[%s2781_s5 + $0x9c8] sm:$0xff] }
  0x5e   : > { %297 = vst [vmem:[%s2786_s6 + $0x138] sm:$0xff] %v296_v43  ;;  %v378_v20 = vld [vmem:[%s2781_s5 + $0xa00] sm:$0xff]  ;;  %v380_v21 = vld [vmem:[%s2781_s5 + $0xa08] sm:$0xff] }
  0x5f   : > { %299 = vst [vmem:[%s2786_s6 + $0x140] sm:$0xff] %v298_v44  ;;  %v382_v22 = vld [vmem:[%s2781_s5 + $0xa40] sm:$0xff]  ;;  %v384_v23 = vld [vmem:[%s2781_s5 + $0xa48] sm:$0xff] }
  0x60   : > { %301 = vst [vmem:[%s2786_s6 + $0x148] sm:$0xff] %v300_v45  ;;  %v386_v24 = vld [vmem:[%s2781_s5 + $0xa80] sm:$0xff]  ;;  %v388_v25 = vld [vmem:[%s2781_s5 + $0xa88] sm:$0xff] }
  0x61   : > { %303 = vst [vmem:[%s2786_s6 + $0x150] sm:$0xff] %v302_v46  ;;  %v390_v26 = vld [vmem:[%s2781_s5 + $0xac0] sm:$0xff]  ;;  %v392_v27 = vld [vmem:[%s2781_s5 + $0xac8] sm:$0xff] }
  0x62   : > { %305 = vst [vmem:[%s2786_s6 + $0x158] sm:$0xff] %v304_v47  ;;  %v394_v28 = vld [vmem:[%s2781_s5 + $0xb00] sm:$0xff]  ;;  %v396_v29 = vld [vmem:[%s2781_s5 + $0xb08] sm:$0xff] }
  0x63   : > { %307 = vst [vmem:[%s2786_s6 + $0x160] sm:$0xff] %v306_v48  ;;  %v398_v30 = vld [vmem:[%s2781_s5 + $0xb40] sm:$0xff]  ;;  %v400_v31 = vld [vmem:[%s2781_s5 + $0xb48] sm:$0xff] }
  0x64   : > { %309 = vst [vmem:[%s2786_s6 + $0x168] sm:$0xff] %v308_v49  ;;  %v402_v32 = vld [vmem:[%s2781_s5 + $0xb80] sm:$0xff]  ;;  %v404_v33 = vld [vmem:[%s2781_s5 + $0xb88] sm:$0xff] }
  0x65   : > { %311 = vst [vmem:[%s2786_s6 + $0x170] sm:$0xff] %v310_v50  ;;  %v406_v34 = vld [vmem:[%s2781_s5 + $0xbc0] sm:$0xff]  ;;  %v408_v35 = vld [vmem:[%s2781_s5 + $0xbc8] sm:$0xff] }
  0x66   : > { %313 = vst [vmem:[%s2786_s6 + $0x178] sm:$0xff] %v312_v51  ;;  %v410_v36 = vld [vmem:[%s2781_s5 + $0xc00] sm:$0xff]  ;;  %v412_v37 = vld [vmem:[%s2781_s5 + $0xc08] sm:$0xff] }
  0x67   : > { %315 = vst [vmem:[%s2786_s6 + $0x180] sm:$0xff] %v314_v52  ;;  %v414_v38 = vld [vmem:[%s2781_s5 + $0xc40] sm:$0xff]  ;;  %v416_v39 = vld [vmem:[%s2781_s5 + $0xc48] sm:$0xff] }
  0x68   : > { %317 = vst [vmem:[%s2786_s6 + $0x188] sm:$0xff] %v316_v53  ;;  %v418_v40 = vld [vmem:[%s2781_s5 + $0xc80] sm:$0xff]  ;;  %v420_v41 = vld [vmem:[%s2781_s5 + $0xc88] sm:$0xff] }
  0x69   : > { %319 = vst [vmem:[%s2786_s6 + $0x190] sm:$0xff] %v318_v54  ;;  %v422_v42 = vld [vmem:[%s2781_s5 + $0xcc0] sm:$0xff]  ;;  %v424_v43 = vld [vmem:[%s2781_s5 + $0xcc8] sm:$0xff] }
  0x6a   : > { %321 = vst [vmem:[%s2786_s6 + $0x198] sm:$0xff] %v320_v55  ;;  %v426_v44 = vld [vmem:[%s2781_s5 + $0xd00] sm:$0xff]  ;;  %v428_v45 = vld [vmem:[%s2781_s5 + $0xd08] sm:$0xff] }
  0x6b   : > { %323 = vst [vmem:[%s2786_s6 + $0x1a0] sm:$0xff] %v322_v56  ;;  %v430_v46 = vld [vmem:[%s2781_s5 + $0xd40] sm:$0xff]  ;;  %v432_v47 = vld [vmem:[%s2781_s5 + $0xd48] sm:$0xff] }
  0x6c   : > { %325 = vst [vmem:[%s2786_s6 + $0x1a8] sm:$0xff] %v324_v57  ;;  %v434_v48 = vld [vmem:[%s2781_s5 + $0xd80] sm:$0xff]  ;;  %v436_v49 = vld [vmem:[%s2781_s5 + $0xd88] sm:$0xff] }
  0x6d   : > { %327 = vst [vmem:[%s2786_s6 + $0x1b0] sm:$0xff] %v326_v58  ;;  %v438_v50 = vld [vmem:[%s2781_s5 + $0xdc0] sm:$0xff]  ;;  %v440_v51 = vld [vmem:[%s2781_s5 + $0xdc8] sm:$0xff] }
  0x6e   : > { %329 = vst [vmem:[%s2786_s6 + $0x1b8] sm:$0xff] %v328_v59  ;;  %v442_v52 = vld [vmem:[%s2781_s5 + $0xe00] sm:$0xff]  ;;  %v444_v53 = vld [vmem:[%s2781_s5 + $0xe08] sm:$0xff] }
  0x6f   : > { %331 = vst [vmem:[%s2786_s6 + $0x1c0] sm:$0xff] %v330_v60  ;;  %v446_v54 = vld [vmem:[%s2781_s5 + $0xe40] sm:$0xff]  ;;  %v448_v55 = vld [vmem:[%s2781_s5 + $0xe48] sm:$0xff] }
  0x70   : > { %333 = vst [vmem:[%s2786_s6 + $0x1c8] sm:$0xff] %v332_v61  ;;  %v450_v56 = vld [vmem:[%s2781_s5 + $0xe80] sm:$0xff]  ;;  %v452_v57 = vld [vmem:[%s2781_s5 + $0xe88] sm:$0xff] }
  0x71   : > { %335 = vst [vmem:[%s2786_s6 + $0x1d0] sm:$0xff] %v334_v62  ;;  %v454_v58 = vld [vmem:[%s2781_s5 + $0xec0] sm:$0xff]  ;;  %v456_v59 = vld [vmem:[%s2781_s5 + $0xec8] sm:$0xff] }
  0x72   : > { %337 = vst [vmem:[%s2786_s6 + $0x1d8] sm:$0xff] %v336_v63  ;;  %v458_v60 = vld [vmem:[%s2781_s5 + $0xf00] sm:$0xff]  ;;  %v460_v61 = vld [vmem:[%s2781_s5 + $0xf08] sm:$0xff] }
  0x73   : > { %339 = vst [vmem:[%s2786_s6 + $0x1e0] sm:$0xff] %v338_v0  ;;  %v462_v62 = vld [vmem:[%s2781_s5 + $0xf40] sm:$0xff]  ;;  %v464_v63 = vld [vmem:[%s2781_s5 + $0xf48] sm:$0xff] }
  0x74   : > { %341 = vst [vmem:[%s2786_s6 + $0x1e8] sm:$0xff] %v340_v1  ;;  %v466_v0 = vld [vmem:[%s2781_s5 + $0xf80] sm:$0xff]  ;;  %v468_v1 = vld [vmem:[%s2781_s5 + $0xf88] sm:$0xff] }
  0x75   : > { %343 = vst [vmem:[%s2786_s6 + $0x1f0] sm:$0xff] %v342_v2  ;;  %v470_v2 = vld [vmem:[%s2781_s5 + $0xfc0] sm:$0xff] }
  0x76   : > { %345 = vst [vmem:[%s2786_s6 + $0x1f8] sm:$0xff] %v344_v3  ;;  %v472_v3 = vld [vmem:[%s2781_s5 + $0xfc8] sm:$0xff] }
  0x77   : > { %347 = vst [vmem:[%s2786_s6 + $0x200] sm:$0xff] %v346_v4 }
  0x78   : > { %349 = vst [vmem:[%s2786_s6 + $0x208] sm:$0xff] %v348_v5 }
  0x79   : > { %351 = vst [vmem:[%s2786_s6 + $0x210] sm:$0xff] %v350_v6 }
  0x7a   : > { %353 = vst [vmem:[%s2786_s6 + $0x218] sm:$0xff] %v352_v7 }
  0x7b   : > { %355 = vst [vmem:[%s2786_s6 + $0x220] sm:$0xff] %v354_v8 }
  0x7c   : > { %357 = vst [vmem:[%s2786_s6 + $0x228] sm:$0xff] %v356_v9 }
  0x7d   : > { %359 = vst [vmem:[%s2786_s6 + $0x230] sm:$0xff] %v358_v10 }
  0x7e   : > { %361 = vst [vmem:[%s2786_s6 + $0x238] sm:$0xff] %v360_v11 }
  0x7f   : > { %363 = vst [vmem:[%s2786_s6 + $0x240] sm:$0xff] %v362_v12 }
  0x80   : > { %365 = vst [vmem:[%s2786_s6 + $0x248] sm:$0xff] %v364_v13 }
  0x81   : > { %367 = vst [vmem:[%s2786_s6 + $0x250] sm:$0xff] %v366_v14 }
  0x82   : > { %369 = vst [vmem:[%s2786_s6 + $0x258] sm:$0xff] %v368_v15 }
  0x83   : > { %371 = vst [vmem:[%s2786_s6 + $0x260] sm:$0xff] %v370_v16 }
  0x84   : > { %373 = vst [vmem:[%s2786_s6 + $0x268] sm:$0xff] %v372_v17 }
  0x85   : > { %375 = vst [vmem:[%s2786_s6 + $0x270] sm:$0xff] %v374_v18 }
  0x86   : > { %377 = vst [vmem:[%s2786_s6 + $0x278] sm:$0xff] %v376_v19 }
  0x87   : > { %379 = vst [vmem:[%s2786_s6 + $0x280] sm:$0xff] %v378_v20 }
  0x88   : > { %381 = vst [vmem:[%s2786_s6 + $0x288] sm:$0xff] %v380_v21 }
  0x89   : > { %383 = vst [vmem:[%s2786_s6 + $0x290] sm:$0xff] %v382_v22 }
  0x8a   : > { %385 = vst [vmem:[%s2786_s6 + $0x298] sm:$0xff] %v384_v23 }
  0x8b   : > { %387 = vst [vmem:[%s2786_s6 + $0x2a0] sm:$0xff] %v386_v24 }
  0x8c   : > { %389 = vst [vmem:[%s2786_s6 + $0x2a8] sm:$0xff] %v388_v25 }
  0x8d   : > { %391 = vst [vmem:[%s2786_s6 + $0x2b0] sm:$0xff] %v390_v26 }
  0x8e   : > { %393 = vst [vmem:[%s2786_s6 + $0x2b8] sm:$0xff] %v392_v27 }
  0x8f   : > { %395 = vst [vmem:[%s2786_s6 + $0x2c0] sm:$0xff] %v394_v28 }
  0x90   : > { %397 = vst [vmem:[%s2786_s6 + $0x2c8] sm:$0xff] %v396_v29 }
  0x91   : > { %399 = vst [vmem:[%s2786_s6 + $0x2d0] sm:$0xff] %v398_v30 }
  0x92   : > { %401 = vst [vmem:[%s2786_s6 + $0x2d8] sm:$0xff] %v400_v31 }
  0x93   : > { %403 = vst [vmem:[%s2786_s6 + $0x2e0] sm:$0xff] %v402_v32 }
  0x94   : > { %405 = vst [vmem:[%s2786_s6 + $0x2e8] sm:$0xff] %v404_v33 }
  0x95   : > { %407 = vst [vmem:[%s2786_s6 + $0x2f0] sm:$0xff] %v406_v34 }
  0x96   : > { %409 = vst [vmem:[%s2786_s6 + $0x2f8] sm:$0xff] %v408_v35 }
  0x97   : > { %411 = vst [vmem:[%s2786_s6 + $0x300] sm:$0xff] %v410_v36 }
  0x98   : > { %413 = vst [vmem:[%s2786_s6 + $0x308] sm:$0xff] %v412_v37 }
  0x99   : > { %415 = vst [vmem:[%s2786_s6 + $0x310] sm:$0xff] %v414_v38 }
  0x9a   : > { %417 = vst [vmem:[%s2786_s6 + $0x318] sm:$0xff] %v416_v39 }
  0x9b   : > { %419 = vst [vmem:[%s2786_s6 + $0x320] sm:$0xff] %v418_v40 }
  0x9c   : > { %421 = vst [vmem:[%s2786_s6 + $0x328] sm:$0xff] %v420_v41 }
  0x9d   : > { %423 = vst [vmem:[%s2786_s6 + $0x330] sm:$0xff] %v422_v42 }
  0x9e   : > { %425 = vst [vmem:[%s2786_s6 + $0x338] sm:$0xff] %v424_v43 }
  0x9f   : > { %427 = vst [vmem:[%s2786_s6 + $0x340] sm:$0xff] %v426_v44 }
  0xa0   : > { %429 = vst [vmem:[%s2786_s6 + $0x348] sm:$0xff] %v428_v45 }
  0xa1   : > { %431 = vst [vmem:[%s2786_s6 + $0x350] sm:$0xff] %v430_v46 }
  0xa2   : > { %433 = vst [vmem:[%s2786_s6 + $0x358] sm:$0xff] %v432_v47 }
  0xa3   : > { %435 = vst [vmem:[%s2786_s6 + $0x360] sm:$0xff] %v434_v48 }
  0xa4   : > { %437 = vst [vmem:[%s2786_s6 + $0x368] sm:$0xff] %v436_v49 }
  0xa5   : > { %439 = vst [vmem:[%s2786_s6 + $0x370] sm:$0xff] %v438_v50 }
  0xa6   : > { %441 = vst [vmem:[%s2786_s6 + $0x378] sm:$0xff] %v440_v51 }
  0xa7   : > { %443 = vst [vmem:[%s2786_s6 + $0x380] sm:$0xff] %v442_v52 }
  0xa8   : > { %445 = vst [vmem:[%s2786_s6 + $0x388] sm:$0xff] %v444_v53 }
  0xa9   : > { %447 = vst [vmem:[%s2786_s6 + $0x390] sm:$0xff] %v446_v54 }
  0xaa   : > { %449 = vst [vmem:[%s2786_s6 + $0x398] sm:$0xff] %v448_v55 }
  0xab   : > { %451 = vst [vmem:[%s2786_s6 + $0x3a0] sm:$0xff] %v450_v56 }
  0xac   : > { %453 = vst [vmem:[%s2786_s6 + $0x3a8] sm:$0xff] %v452_v57 }
  0xad   : > { %455 = vst [vmem:[%s2786_s6 + $0x3b0] sm:$0xff] %v454_v58 }
  0xae   : > { %457 = vst [vmem:[%s2786_s6 + $0x3b8] sm:$0xff] %v456_v59 }
  0xaf   : > { %459 = vst [vmem:[%s2786_s6 + $0x3c0] sm:$0xff] %v458_v60 }
  0xb0   : > { %461 = vst [vmem:[%s2786_s6 + $0x3c8] sm:$0xff] %v460_v61 }
  0xb1   : > { %463 = vst [vmem:[%s2786_s6 + $0x3d0] sm:$0xff] %v462_v62 }
  0xb2   : > { %465 = vst [vmem:[%s2786_s6 + $0x3d8] sm:$0xff] %v464_v63 }
  0xb3   : > { %467 = vst [vmem:[%s2786_s6 + $0x3e0] sm:$0xff] %v466_v0 }
  0xb4   : > { %469 = vst [vmem:[%s2786_s6 + $0x3e8] sm:$0xff] %v468_v1 }
  0xb5   : > { %471 = vst [vmem:[%s2786_s6 + $0x3f0] sm:$0xff] %v470_v2 }
  0xb6   : > { %473 = vst [vmem:[%s2786_s6 + $0x3f8] sm:$0xff] %v472_v3 }
  0xb7 PF: > { %p1794_p0 = scmp.ge.s32.totalorder %s2644_s22, 1  ;;  %p486_p1 = scmp.lt.s32.totalorder %s2644_s22, 65 }
  0xb9   : > { %p487_p2 = pnand %p1794_p0, %p486_p1 }
  0xba   : > { %s493_s0 = sand.u32 (!%p487_p2), 1, %s2620_s16   ;;  %s500_s23 = sand.u32 (!%p487_p2), 1, %s2612_s14  }
  0xbb   : > { %490 = sbr.rel (%p487_p2) target bundleno = 509 (0x1fd), region = 70  ;;  %s1795_s28 = sshll.u32 (!%p487_p2), %s493_s0, 5 }
  0xbc   : > { %s1796_s7 = sshll.u32 (!%p487_p2), %s500_s23, 10  ;;  %s527_s11 = sand.u32 (!%p487_p2), 1, %s2604_s12  }
  0xbd   : > { %s1798_s26 = sshll.u32 (!%p487_p2), %s2632_s19, 2  ;;  %s1797_s29 = sshll.u32 (!%p487_p2), %s527_s11, 5 }
  0xbe   : > { %p535_p3 = scmp.lt.s32.totalorder (!%p487_p2), %s1798_s26, 15  ;;  %s3053_s6 = scalar_lea.vmem (!%p487_p2), [#allocation3], %s1795_s28 }
  0xbf   : > { %s3055_s1 = scalar_lea.vmem (!%p487_p2), [#allocation4], %s1796_s7  ;;  %s3057_s25 = scalar_lea.vmem (!%p487_p2), [#allocation5], %s1797_s29 }
  0xc0   : > { %s3432_s26 = smov (!%p535_p3, %s1798_s26), 15  ;;  %p1799_p4 = scmp.ne.s32.totalorder %s2628_s18, 0 }
  0xc1   : > { %s537_s5 = scalar_lea.vmem %s3403_s2, %s3432_s26 }
  0xc2   : > { %544 = sbr.rel (%p1799_p4) target bundleno = 208 (0xd0), region = 82 }
  0xc7   : > { %v2646_v4 = vmov 0.0  }
  0xc8   : > { %545 = vst [vmem:[#allocation2 + $0x30] sm:$0xff] %v2646_v4 }
  0xc9   : > { %546 = vst [vmem:[#allocation2] sm:$0xff] %v2646_v4 }
  0xca   : > { %547 = vst [vmem:[#allocation2 + $0x18] sm:$0xff] %v2646_v4 }
  0xcb   : > { %548 = vst [vmem:[#allocation2 + $0x10] sm:$0xff] %v2646_v4 }
  0xcc   : > { %549 = vst [vmem:[#allocation2 + $0x8] sm:$0xff] %v2646_v4 }
  0xcd   : > { %550 = vst [vmem:[#allocation2 + $0x20] sm:$0xff] %v2646_v4 }
  0xce   : > { %551 = vst [vmem:[#allocation2 + $0x28] sm:$0xff] %v2646_v4 }
  0xcf   : > { %552 = vst [vmem:[#allocation2 + $0x38] sm:$0xff] %v2646_v4 }
  0xd0 PF: > { %v1930_v5 = vld [vmem:[%s3055_s1 + $0xe0] sm:$0xf]  ;;  %v2370_v6 = vld [vmem:[%s3055_s1 + $0xec] sm:$0xf0]  ;;  %p2328_p5 = scmp.ne.s32.totalorder %s2628_s18, 15 }
  0xd1   : > { %v2058_v7 = vld [vmem:[%s3055_s1 + $0x1e0] sm:$0xf]  ;;  %v1931_v8 = vor.u32 %v2370_v6, %v1930_v5  ;;  %v2402_v9 = vld [vmem:[%s3055_s1 + $0x1ec] sm:$0xf0] }
  0xd2   : > { %v2186_v10 = vld [vmem:[%s3055_s1 + $0x2e0] sm:$0xf]  ;;  %v2434_v11 = vld [vmem:[%s3055_s1 + $0x2ec] sm:$0xf0]  ;;  %v2059_v12 = vor.u32 %v2402_v9, %v2058_v7 }
  0xd3   : > { %v2187_v13 = vor.u32 %v2434_v11, %v2186_v10  ;;  %v2314_v14 = vld [vmem:[%s3055_s1 + $0x3e0] sm:$0xf]  ;;  %v2466_v15 = vld [vmem:[%s3055_s1 + $0x3ec] sm:$0xf0]  ;;  %1353 = vmatpush.bf16.msra.mxu0 %v1931_v8 }
  0xd4   : > { %v1914_v16 = vld [vmem:[%s3055_s1 + $0xc0] sm:$0xf]  ;;  %v2315_v17 = vor.u32 %v2466_v15, %v2314_v14  ;;  %v2366_v18 = vld [vmem:[%s3055_s1 + $0xcc] sm:$0xf0]  ;;  %1367 = vmatpush.bf16.msra.mxu1 %v2059_v12 }
  0xd5   : > { %v2042_v19 = vld [vmem:[%s3055_s1 + $0x1c0] sm:$0xf]  ;;  %v2398_v20 = vld [vmem:[%s3055_s1 + $0x1cc] sm:$0xf0]  ;;  %1381 = vmatpush.bf16.msra.mxu2 %v2187_v13  ;;  %v1915_v21 = vor.u32 %v2366_v18, %v1914_v16 }
  0xd6   : > { %v2043_v22 = vor.u32 %v2398_v20, %v2042_v19  ;;  %v2170_v23 = vld [vmem:[%s3055_s1 + $0x2c0] sm:$0xf]  ;;  %v2430_v24 = vld [vmem:[%s3055_s1 + $0x2cc] sm:$0xf0]  ;;  %1395 = vmatpush.bf16.msra.mxu3 %v2315_v17 }
  0xd7   : > { %v2298_v25 = vld [vmem:[%s3055_s1 + $0x3c0] sm:$0xf]  ;;  %v2171_v26 = vor.u32 %v2430_v24, %v2170_v23  ;;  %v2462_v27 = vld [vmem:[%s3055_s1 + $0x3cc] sm:$0xf0]  ;;  %1354 = vmatpush.bf16.msra.mxu0 %v1915_v21 }
  0xd8   : > { %v1898_v28 = vld [vmem:[%s3055_s1 + $0xa0] sm:$0xf]  ;;  %v2362_v29 = vld [vmem:[%s3055_s1 + $0xac] sm:$0xf0]  ;;  %v2299_v30 = vor.u32 %v2462_v27, %v2298_v25  ;;  %1368 = vmatpush.bf16.msra.mxu1 %v2043_v22 }
  0xd9   : > { %v2026_v31 = vld [vmem:[%s3055_s1 + $0x1a0] sm:$0xf]  ;;  %v2394_v32 = vld [vmem:[%s3055_s1 + $0x1ac] sm:$0xf0]  ;;  %v1899_v34 = vor.u32 %v2362_v29, %v1898_v28  ;;  %1382 = vmatpush.bf16.msra.mxu2 %v2171_v26 }
  0xda   : > { %v2154_v33 = vld [vmem:[%s3055_s1 + $0x2a0] sm:$0xf]  ;;  %v2426_v35 = vld [vmem:[%s3055_s1 + $0x2ac] sm:$0xf0]  ;;  %v2027_v38 = vor.u32 %v2394_v32, %v2026_v31  ;;  %1396 = vmatpush.bf16.msra.mxu3 %v2299_v30 }
  0xdb   : > { %v2282_v36 = vld [vmem:[%s3055_s1 + $0x3a0] sm:$0xf]  ;;  %v2458_v37 = vld [vmem:[%s3055_s1 + $0x3ac] sm:$0xf0]  ;;  %v2155_v39 = vor.u32 %v2426_v35, %v2154_v33  ;;  %1355 = vmatpush.bf16.msra.mxu0 %v1899_v34  ;;  %v2368_v33 = vld [vmem:[%s3055_s1 + $0xe4] sm:$0xf] }
  0xdc   : > { %v1882_v40 = vld [vmem:[%s3055_s1 + $0x80] sm:$0xf]  ;;  %v2358_v41 = vld [vmem:[%s3055_s1 + $0x8c] sm:$0xf0]  ;;  %v2283_v43 = vor.u32 %v2458_v37, %v2282_v36  ;;  %1369 = vmatpush.bf16.msra.mxu1 %v2027_v38  ;;  %v1932_v34 = vld [vmem:[%s3055_s1 + $0xf0] sm:$0xf0] }
  0xdd   : > { %v2010_v42 = vld [vmem:[%s3055_s1 + $0x180] sm:$0xf]  ;;  %v2390_v44 = vld [vmem:[%s3055_s1 + $0x18c] sm:$0xf0]  ;;  %v1883_v49 = vor.u32 %v2358_v41, %v1882_v40  ;;  %1383 = vmatpush.bf16.msra.mxu2 %v2155_v39  ;;  %v2400_v35 = vld [vmem:[%s3055_s1 + $0x1e4] sm:$0xf] }
  0xde   : > { %v2138_v45 = vld [vmem:[%s3055_s1 + $0x280] sm:$0xf]  ;;  %v2422_v46 = vld [vmem:[%s3055_s1 + $0x28c] sm:$0xf0]  ;;  %v2011_v50 = vor.u32 %v2390_v44, %v2010_v42  ;;  %1397 = vmatpush.bf16.msra.mxu3 %v2283_v43  ;;  %v2060_v37 = vld [vmem:[%s3055_s1 + $0x1f0] sm:$0xf0] }
  0xdf   : > { %v2266_v47 = vld [vmem:[%s3055_s1 + $0x380] sm:$0xf]  ;;  %v2454_v48 = vld [vmem:[%s3055_s1 + $0x38c] sm:$0xf0]  ;;  %v2139_v51 = vor.u32 %v2422_v46, %v2138_v45  ;;  %1356 = vmatpush.bf16.msra.mxu0 %v1883_v49  ;;  %v2432_v38 = vld [vmem:[%s3055_s1 + $0x2e4] sm:$0xf]  ;;  %v1935_v45 = vor.u32 %v2368_v33, %v1932_v34  ;;  %v2063_v46 = vor.u32 %v2400_v35, %v2060_v37 }
  0xe0   : > { %v1866_v52 = vld [vmem:[%s3055_s1 + $0x60] sm:$0xf]  ;;  %v2354_v53 = vld [vmem:[%s3055_s1 + $0x6c] sm:$0xf0]  ;;  %v2267_v55 = vor.u32 %v2454_v48, %v2266_v47  ;;  %1370 = vmatpush.bf16.msra.mxu1 %v2011_v50  ;;  %v2188_v39 = vld [vmem:[%s3055_s1 + $0x2f0] sm:$0xf0] }
  0xe1   : > { %v1994_v54 = vld [vmem:[%s3055_s1 + $0x160] sm:$0xf]  ;;  %v2386_v56 = vld [vmem:[%s3055_s1 + $0x16c] sm:$0xf0]  ;;  %v1867_v61 = vor.u32 %v2354_v53, %v1866_v52  ;;  %1384 = vmatpush.bf16.msra.mxu2 %v2139_v51  ;;  %v2464_v42 = vld [vmem:[%s3055_s1 + $0x3e4] sm:$0xf]  ;;  %v2191_v47 = vor.u32 %v2432_v38, %v2188_v39 }
  0xe2   : > { %v2122_v57 = vld [vmem:[%s3055_s1 + $0x260] sm:$0xf]  ;;  %v2418_v58 = vld [vmem:[%s3055_s1 + $0x26c] sm:$0xf0]  ;;  %v1995_v62 = vor.u32 %v2386_v56, %v1994_v54  ;;  %1398 = vmatpush.bf16.msra.mxu3 %v2267_v55  ;;  %v2316_v43 = vld [vmem:[%s3055_s1 + $0x3f0] sm:$0xf0] }
  0xe3   : > { %v2250_v59 = vld [vmem:[%s3055_s1 + $0x360] sm:$0xf]  ;;  %v2450_v60 = vld [vmem:[%s3055_s1 + $0x36c] sm:$0xf0]  ;;  %v2123_v63 = vor.u32 %v2418_v58, %v2122_v57  ;;  %1357 = vmatpush.bf16.msra.mxu0 %v1867_v61  ;;  %v2364_v48 = vld [vmem:[%s3055_s1 + $0xc4] sm:$0xf]  ;;  %v2319_v51 = vor.u32 %v2464_v42, %v2316_v43 }
  0xe4   : > { %v1850_v0 = vld [vmem:[%s3055_s1 + $0x40] sm:$0xf]  ;;  %v2350_v1 = vld [vmem:[%s3055_s1 + $0x4c] sm:$0xf0]  ;;  %v2251_v3 = vor.u32 %v2450_v60, %v2250_v59  ;;  %1371 = vmatpush.bf16.msra.mxu1 %v1995_v62  ;;  %v1916_v49 = vld [vmem:[%s3055_s1 + $0xd0] sm:$0xf0] }
  0xe5   : > { %v1978_v2 = vld [vmem:[%s3055_s1 + $0x140] sm:$0xf]  ;;  %v2382_v4 = vld [vmem:[%s3055_s1 + $0x14c] sm:$0xf0]  ;;  %v1851_v9 = vor.u32 %v2350_v1, %v1850_v0  ;;  %1385 = vmatpush.bf16.msra.mxu2 %v2123_v63  ;;  %v2396_v50 = vld [vmem:[%s3055_s1 + $0x1c4] sm:$0xf]  ;;  %v1919_v57 = vor.u32 %v2364_v48, %v1916_v49 }
  0xe6   : > { %v2106_v5 = vld [vmem:[%s3055_s1 + $0x240] sm:$0xf]  ;;  %v2414_v6 = vld [vmem:[%s3055_s1 + $0x24c] sm:$0xf0]  ;;  %v1979_v10 = vor.u32 %v2382_v4, %v1978_v2  ;;  %1399 = vmatpush.bf16.msra.mxu3 %v2251_v3  ;;  %v2044_v52 = vld [vmem:[%s3055_s1 + $0x1d0] sm:$0xf0] }
  0xe7   : > { %v2234_v7 = vld [vmem:[%s3055_s1 + $0x340] sm:$0xf]  ;;  %v2446_v8 = vld [vmem:[%s3055_s1 + $0x34c] sm:$0xf0]  ;;  %v2107_v11 = vor.u32 %v2414_v6, %v2106_v5  ;;  %1358 = vmatpush.bf16.msra.mxu0 %v1851_v9  ;;  %v2428_v53 = vld [vmem:[%s3055_s1 + $0x2c4] sm:$0xf]  ;;  %v2047_v58 = vor.u32 %v2396_v50, %v2044_v52 }
  0xe8   : > { %v1834_v12 = vld [vmem:[%s3055_s1 + $0x20] sm:$0xf]  ;;  %v2346_v13 = vld [vmem:[%s3055_s1 + $0x2c] sm:$0xf0]  ;;  %v2235_v15 = vor.u32 %v2446_v8, %v2234_v7  ;;  %1372 = vmatpush.bf16.msra.mxu1 %v1979_v10  ;;  %v2172_v54 = vld [vmem:[%s3055_s1 + $0x2d0] sm:$0xf0] }
  0xe9   : > { %v1962_v14 = vld [vmem:[%s3055_s1 + $0x120] sm:$0xf]  ;;  %v2378_v16 = vld [vmem:[%s3055_s1 + $0x12c] sm:$0xf0]  ;;  %v1835_v21 = vor.u32 %v2346_v13, %v1834_v12  ;;  %1386 = vmatpush.bf16.msra.mxu2 %v2107_v11  ;;  %v2460_v55 = vld [vmem:[%s3055_s1 + $0x3c4] sm:$0xf]  ;;  %v2175_v59 = vor.u32 %v2428_v53, %v2172_v54 }
  0xea   : > { %v2090_v17 = vld [vmem:[%s3055_s1 + $0x220] sm:$0xf]  ;;  %v2410_v18 = vld [vmem:[%s3055_s1 + $0x22c] sm:$0xf0]  ;;  %v1963_v24 = vor.u32 %v2378_v16, %v1962_v14  ;;  %1400 = vmatpush.bf16.msra.mxu3 %v2235_v15  ;;  %v2300_v56 = vld [vmem:[%s3055_s1 + $0x3d0] sm:$0xf0] }
  0xeb   : > { %v2218_v19 = vld [vmem:[%s3055_s1 + $0x320] sm:$0xf]  ;;  %v2442_v20 = vld [vmem:[%s3055_s1 + $0x32c] sm:$0xf0]  ;;  %v2091_v25 = vor.u32 %v2410_v18, %v2090_v17  ;;  %1359 = vmatpush.bf16.msra.mxu0 %v1835_v21  ;;  %v2360_v60 = vld [vmem:[%s3055_s1 + $0xa4] sm:$0xf]  ;;  %v2303_v63 = vor.u32 %v2460_v55, %v2300_v56 }
  0xec   : > { %v1818_v22 = vld [vmem:[%s3055_s1] sm:$0xf]  ;;  %v2342_v23 = vld [vmem:[%s3055_s1 + $0xc] sm:$0xf0]  ;;  %v2219_v29 = vor.u32 %v2442_v20, %v2218_v19  ;;  %1373 = vmatpush.bf16.msra.mxu1 %v1963_v24  ;;  %v1900_v61 = vld [vmem:[%s3055_s1 + $0xb0] sm:$0xf0] }
  0xed   : > { %v1946_v26 = vld [vmem:[%s3055_s1 + $0x100] sm:$0xf]  ;;  %v2374_v27 = vld [vmem:[%s3055_s1 + $0x10c] sm:$0xf0]  ;;  %v1819_v36 = vor.u32 %v2342_v23, %v1818_v22  ;;  %1387 = vmatpush.bf16.msra.mxu2 %v2091_v25  ;;  %v2392_v62 = vld [vmem:[%s3055_s1 + $0x1a4] sm:$0xf]  ;;  %v1903_v6 = vor.u32 %v2360_v60, %v1900_v61 }
  0xee   : > { %v2074_v28 = vld [vmem:[%s3055_s1 + $0x200] sm:$0xf]  ;;  %v2406_v30 = vld [vmem:[%s3055_s1 + $0x20c] sm:$0xf0]  ;;  %v1947_v40 = vor.u32 %v2374_v27, %v1946_v26  ;;  %1401 = vmatpush.bf16.msra.mxu3 %v2219_v29  ;;  %v2028_v0 = vld [vmem:[%s3055_s1 + $0x1b0] sm:$0xf0] }
  0xef   : > { %v2202_v31 = vld [vmem:[%s3055_s1 + $0x300] sm:$0xf]  ;;  %v2438_v32 = vld [vmem:[%s3055_s1 + $0x30c] sm:$0xf0]  ;;  %v2075_v41 = vor.u32 %v2406_v30, %v2074_v28  ;;  %1360 = vmatpush.bf16.msra.mxu0 %v1819_v36  ;;  %v2424_v1 = vld [vmem:[%s3055_s1 + $0x2a4] sm:$0xf]  ;;  %v2031_v10 = vor.u32 %v2392_v62, %v2028_v0 }
  0xf0   : > { %v2203_v44 = vor.u32 %v2438_v32, %v2202_v31  ;;  %1374 = vmatpush.bf16.msra.mxu1 %v1947_v40  ;;  %v2156_v2 = vld [vmem:[%s3055_s1 + $0x2b0] sm:$0xf0]  ;;  %v2456_v3 = vld [vmem:[%s3055_s1 + $0x3a4] sm:$0xf]  ;;  %v1810_v8 = vld [vmem:[%s3053_s6 + $0x8] sm:$0xf] }
  0xf1   : > { %1388 = vmatpush.bf16.msra.mxu2 %v2075_v41  ;;  %v2284_v4 = vld [vmem:[%s3055_s1 + $0x3b0] sm:$0xf0]  ;;  %v2356_v5 = vld [vmem:[%s3055_s1 + $0x84] sm:$0xf]  ;;  %v2339_v9 = vld [vmem:[%s3053_s6 + $0x14] sm:$0xf0]  ;;  %v2159_v11 = vor.u32 %v2424_v1, %v2156_v2 }
  0xf2   : > { %1402 = vmatpush.bf16.msra.mxu3 %v2203_v44  ;;  %v1884_v7 = vld [vmem:[%s3055_s1 + $0x90] sm:$0xf0]  ;;  %v2388_v12 = vld [vmem:[%s3055_s1 + $0x184] sm:$0xf]  ;;  %v3153_v13 = vor.u32 %v2339_v9, %v1810_v8  ;;  %v2337_v14 = vld [vmem:[%s3053_s6 + $0xc] sm:$0xf]  ;;  %v2287_v16 = vor.u32 %v2456_v3, %v2284_v4 }
  0xf3   : > { %1409 = vmatpush.bf16.msrb.mxu0 %v1935_v45  ;;  %v1812_v15 = vld [vmem:[%s3053_s6 + $0x18] sm:$0xf0]  ;;  %v2012_v17 = vld [vmem:[%s3055_s1 + $0x190] sm:$0xf0]  ;;  %v2420_v18 = vld [vmem:[%s3055_s1 + $0x284] sm:$0xf]  ;;  %v1887_v24 = vor.u32 %v2356_v5, %v1884_v7 }
  0xf4   : > { %1423 = vmatpush.bf16.msrb.mxu1 %v2063_v46  ;;  %v2140_v19 = vld [vmem:[%s3055_s1 + $0x290] sm:$0xf0]  ;;  %v3160_v20 = vor.u32 %v2337_v14, %v1812_v15  ;;  %v2452_v21 = vld [vmem:[%s3055_s1 + $0x384] sm:$0xf]  ;;  %1389 = vmatmul.bf16.vlgmr.msra.gmra.mxu2 %v3153_v13  ;;  %v1802_v26 = vld [vmem:[%s3053_s6] sm:$0xf]  ;;  %v2015_v28 = vor.u32 %v2388_v12, %v2012_v17 }
  0xf5   : > { %1437 = vmatpush.bf16.msrb.mxu2 %v2191_v47  ;;  %v2268_v22 = vld [vmem:[%s3055_s1 + $0x390] sm:$0xf0]  ;;  %v2352_v23 = vld [vmem:[%s3055_s1 + $0x64] sm:$0xf]  ;;  %v2338_v27 = vld [vmem:[%s3053_s6 + $0xc] sm:$0xf0]  ;;  %v2143_v29 = vor.u32 %v2420_v18, %v2140_v19 }
  0xf6   : > { %1451 = vmatpush.bf16.msrb.mxu3 %v2319_v51  ;;  %v1868_v25 = vld [vmem:[%s3055_s1 + $0x70] sm:$0xf0]  ;;  %v2384_v30 = vld [vmem:[%s3055_s1 + $0x164] sm:$0xf]  ;;  %v3171_v31 = vor.u32 %v2338_v27, %v1802_v26  ;;  %v2271_v34 = vor.u32 %v2452_v21, %v2268_v22  ;;  %v1938_v14 = vld [vmem:[%s3055_s1 + $0xe8] sm:$0xf] }
  0xf7   : > { %1410 = vmatpush.bf16.msrb.mxu0 %v1919_v57  ;;  %1403 = vmatmul.bf16.vlgmr.msra.gmra.mxu3 %v3160_v20  ;;  %v2336_v32 = vld [vmem:[%s3053_s6 + $0x4] sm:$0xf]  ;;  %v1804_v33 = vld [vmem:[%s3053_s6 + $0x10] sm:$0xf0]  ;;  %v1871_v41 = vor.u32 %v2352_v23, %v1868_v25  ;;  %v2371_v15 = vld [vmem:[%s3055_s1 + $0xf4] sm:$0xf0] }
  0xf8   : > { %1424 = vmatpush.bf16.msrb.mxu1 %v2047_v58  ;;  %v1996_v35 = vld [vmem:[%s3055_s1 + $0x170] sm:$0xf0]  ;;  %v2416_v36 = vld [vmem:[%s3055_s1 + $0x264] sm:$0xf]  ;;  %v3178_v38 = vor.u32 %v2336_v32, %v1804_v33  ;;  %1361 = vmatmul.bf16.vlgmr.msra.gmra.mxu0 %v3171_v31  ;;  %v2403_v18 = vld [vmem:[%s3055_s1 + $0x1f4] sm:$0xf0]  ;;  %v1939_v27 = vor.u32 %v2371_v15, %v1938_v14 }
  0xf9   : > { %1438 = vmatpush.bf16.msrb.mxu2 %v2175_v59  ;;  %v2124_v37 = vld [vmem:[%s3055_s1 + $0x270] sm:$0xf0]  ;;  %v2448_v39 = vld [vmem:[%s3055_s1 + $0x364] sm:$0xf]  ;;  %v1999_v42 = vor.u32 %v2384_v30, %v1996_v35  ;;  %v2194_v19 = vld [vmem:[%s3055_s1 + $0x2e8] sm:$0xf] }
  0xfa   : > { %1452 = vmatpush.bf16.msrb.mxu3 %v2303_v63  ;;  %v2252_v40 = vld [vmem:[%s3055_s1 + $0x370] sm:$0xf0]  ;;  %1375 = vmatmul.bf16.vlgmr.msra.gmra.mxu1 %v3178_v38  ;;  %v2127_v43 = vor.u32 %v2416_v36, %v2124_v37  ;;  %v2348_v44 = vld [vmem:[%s3055_s1 + $0x44] sm:$0xf]  ;;  %v2435_v21 = vld [vmem:[%s3055_s1 + $0x2f4] sm:$0xf0] }
  0xfb   : > { %1411 = vmatpush.bf16.msrb.mxu0 %v1903_v6  ;;  %v1852_v45 = vld [vmem:[%s3055_s1 + $0x50] sm:$0xf0]  ;;  %v2380_v46 = vld [vmem:[%s3055_s1 + $0x144] sm:$0xf]  ;;  %v2255_v47 = vor.u32 %v2448_v39, %v2252_v40  ;;  %v2467_v25 = vld [vmem:[%s3055_s1 + $0x3f4] sm:$0xf0] }
  0xfc   : > { %1425 = vmatpush.bf16.msrb.mxu1 %v2031_v10  ;;  %v1980_v48 = vld [vmem:[%s3055_s1 + $0x150] sm:$0xf0]  ;;  %v2412_v49 = vld [vmem:[%s3055_s1 + $0x244] sm:$0xf]  ;;  %v1855_v53 = vor.u32 %v2348_v44, %v1852_v45  ;;  %v1922_v30 = vld [vmem:[%s3055_s1 + $0xc8] sm:$0xf] }
  0xfd   : > { %1439 = vmatpush.bf16.msrb.mxu2 %v2159_v11  ;;  %v2108_v50 = vld [vmem:[%s3055_s1 + $0x250] sm:$0xf0]  ;;  %v2444_v51 = vld [vmem:[%s3055_s1 + $0x344] sm:$0xf]  ;;  %v1983_v54 = vor.u32 %v2380_v46, %v1980_v48  ;;  %v2367_v32 = vld [vmem:[%s3055_s1 + $0xd4] sm:$0xf0] }
  0xfe   : > { %1453 = vmatpush.bf16.msrb.mxu3 %v2287_v16  ;;  %v2236_v52 = vld [vmem:[%s3055_s1 + $0x350] sm:$0xf0]  ;;  %v2111_v55 = vor.u32 %v2412_v49, %v2108_v50  ;;  %v2344_v56 = vld [vmem:[%s3055_s1 + $0x24] sm:$0xf]  ;;  %v2066_v16 = vld [vmem:[%s3055_s1 + $0x1e8] sm:$0xf] }
  0xff   : > { %1412 = vmatpush.bf16.msrb.mxu0 %v1887_v24  ;;  %v1836_v57 = vld [vmem:[%s3055_s1 + $0x30] sm:$0xf0]  ;;  %v2376_v58 = vld [vmem:[%s3055_s1 + $0x124] sm:$0xf]  ;;  %v2239_v59 = vor.u32 %v2444_v51, %v2236_v52  ;;  %v2322_v24 = vld [vmem:[%s3055_s1 + $0x3e8] sm:$0xf] }
 0x100   : > { %1426 = vmatpush.bf16.msrb.mxu1 %v2015_v28  ;;  %v1964_v60 = vld [vmem:[%s3055_s1 + $0x130] sm:$0xf0]  ;;  %v2408_v61 = vld [vmem:[%s3055_s1 + $0x224] sm:$0xf]  ;;  %v1839_v1 = vor.u32 %v2344_v56, %v1836_v57  ;;  %v2067_v28 = vor.u32 %v2403_v18, %v2066_v16  ;;  %v2050_v33 = vld [vmem:[%s3055_s1 + $0x1c8] sm:$0xf] }
 0x101   : > { %1440 = vmatpush.bf16.msrb.mxu2 %v2143_v29  ;;  %v2092_v62 = vld [vmem:[%s3055_s1 + $0x230] sm:$0xf0]  ;;  %v2440_v63 = vld [vmem:[%s3055_s1 + $0x324] sm:$0xf]  ;;  %v1967_v4 = vor.u32 %v2376_v58, %v1964_v60  ;;  %v2195_v29 = vor.u32 %v2435_v21, %v2194_v19  ;;  %v2399_v35 = vld [vmem:[%s3055_s1 + $0x1d4] sm:$0xf0] }
 0x102   : > { %1454 = vmatpush.bf16.msrb.mxu3 %v2271_v34  ;;  %v2220_v0 = vld [vmem:[%s3055_s1 + $0x330] sm:$0xf0]  ;;  %v2340_v2 = vld [vmem:[%s3055_s1 + $0x4] sm:$0xf]  ;;  %v2095_v5 = vor.u32 %v2408_v61, %v2092_v62  ;;  %v2323_v34 = vor.u32 %v2467_v25, %v2322_v24  ;;  %v2178_v36 = vld [vmem:[%s3055_s1 + $0x2c8] sm:$0xf] }
 0x103   : > { %1413 = vmatpush.bf16.msrb.mxu0 %v1871_v41  ;;  %v1820_v3 = vld [vmem:[%s3055_s1 + $0x10] sm:$0xf0]  ;;  %v2372_v6 = vld [vmem:[%s3055_s1 + $0x104] sm:$0xf]  ;;  %v2223_v9 = vor.u32 %v2440_v63, %v2220_v0  ;;  %v2431_v37 = vld [vmem:[%s3055_s1 + $0x2d4] sm:$0xf0]  ;;  %v1923_v41 = vor.u32 %v2367_v32, %v1922_v30 }
 0x104   : > { %1427 = vmatpush.bf16.msrb.mxu1 %v1999_v42  ;;  %v1948_v7 = vld [vmem:[%s3055_s1 + $0x110] sm:$0xf0]  ;;  %v2404_v8 = vld [vmem:[%s3055_s1 + $0x204] sm:$0xf]  ;;  %v1823_v17 = vor.u32 %v2340_v2, %v1820_v3  ;;  %v2306_v39 = vld [vmem:[%s3055_s1 + $0x3c8] sm:$0xf]  ;;  %v2051_v42 = vor.u32 %v2399_v35, %v2050_v33 }
 0x105   : > { %1441 = vmatpush.bf16.msrb.mxu2 %v2127_v43  ;;  %v2076_v10 = vld [vmem:[%s3055_s1 + $0x210] sm:$0xf0]  ;;  %v2436_v11 = vld [vmem:[%s3055_s1 + $0x304] sm:$0xf]  ;;  %v1951_v22 = vor.u32 %v2372_v6, %v1948_v7  ;;  %v2463_v40 = vld [vmem:[%s3055_s1 + $0x3d4] sm:$0xf0]  ;;  %v2179_v43 = vor.u32 %v2431_v37, %v2178_v36 }
 0x106   : > { %1455 = vmatpush.bf16.msrb.mxu3 %v2255_v47  ;;  %v2204_v12 = vld [vmem:[%s3055_s1 + $0x310] sm:$0xf0]  ;;  %v2079_v23 = vor.u32 %v2404_v8, %v2076_v10  ;;  %v1906_v44 = vld [vmem:[%s3055_s1 + $0xa8] sm:$0xf]  ;;  %v2363_v45 = vld [vmem:[%s3055_s1 + $0xb4] sm:$0xf0]  ;;  %v2307_v47 = vor.u32 %v2463_v40, %v2306_v39 }
 0x107   : > { %1414 = vmatpush.bf16.msrb.mxu0 %v1855_v53  ;;  %v2207_v26 = vor.u32 %v2436_v11, %v2204_v12  ;;  %v2034_v46 = vld [vmem:[%s3055_s1 + $0x1a8] sm:$0xf]  ;;  %v2395_v48 = vld [vmem:[%s3055_s1 + $0x1b4] sm:$0xf0]  ;;  %v1907_v53 = vor.u32 %v2363_v45, %v1906_v44 }
 0x108   : > { %1428 = vmatpush.bf16.msrb.mxu1 %v1983_v54  ;;  %v2162_v49 = vld [vmem:[%s3055_s1 + $0x2a8] sm:$0xf]  ;;  %v2427_v50 = vld [vmem:[%s3055_s1 + $0x2b4] sm:$0xf0]  ;;  %v2035_v54 = vor.u32 %v2395_v48, %v2034_v46 }
 0x109   : > { %1442 = vmatpush.bf16.msrb.mxu2 %v2111_v55  ;;  %v2290_v51 = vld [vmem:[%s3055_s1 + $0x3a8] sm:$0xf]  ;;  %v2459_v52 = vld [vmem:[%s3055_s1 + $0x3b4] sm:$0xf0]  ;;  %v2163_v55 = vor.u32 %v2427_v50, %v2162_v49 }
 0x10a   : > { %1456 = vmatpush.bf16.msrb.mxu3 %v2239_v59  ;;  %v1890_v56 = vld [vmem:[%s3055_s1 + $0x88] sm:$0xf]  ;;  %v2359_v57 = vld [vmem:[%s3055_s1 + $0x94] sm:$0xf0]  ;;  %v2291_v59 = vor.u32 %v2459_v52, %v2290_v51 }
 0x10b   : > { %1415 = vmatpush.bf16.msrb.mxu0 %v1839_v1  ;;  %v2018_v58 = vld [vmem:[%s3055_s1 + $0x188] sm:$0xf]  ;;  %v2391_v60 = vld [vmem:[%s3055_s1 + $0x194] sm:$0xf0]  ;;  %v1891_v1 = vor.u32 %v2359_v57, %v1890_v56  ;;  %v2068_v57 = vld [vmem:[%s3055_s1 + $0x1f8] sm:$0xf0] }
 0x10c   : > { %1429 = vmatpush.bf16.msrb.mxu1 %v1967_v4  ;;  %v2146_v61 = vld [vmem:[%s3055_s1 + $0x288] sm:$0xf]  ;;  %v2423_v62 = vld [vmem:[%s3055_s1 + $0x294] sm:$0xf0]  ;;  %v2019_v2 = vor.u32 %v2391_v60, %v2018_v58  ;;  %v2433_v58 = vld [vmem:[%s3055_s1 + $0x2ec] sm:$0xf] }
 0x10d   : > { %1443 = vmatpush.bf16.msrb.mxu2 %v2095_v5  ;;  %v2274_v63 = vld [vmem:[%s3055_s1 + $0x388] sm:$0xf]  ;;  %v2455_v0 = vld [vmem:[%s3055_s1 + $0x394] sm:$0xf0]  ;;  %v2147_v3 = vor.u32 %v2423_v62, %v2146_v61  ;;  %v2465_v62 = vld [vmem:[%s3055_s1 + $0x3ec] sm:$0xf] }
 0x10e   : > { %1457 = vmatpush.bf16.msrb.mxu3 %v2223_v9  ;;  %v1874_v4 = vld [vmem:[%s3055_s1 + $0x68] sm:$0xf]  ;;  %v2355_v5 = vld [vmem:[%s3055_s1 + $0x74] sm:$0xf0]  ;;  %v2275_v7 = vor.u32 %v2455_v0, %v2274_v63  ;;  %v2324_v63 = vld [vmem:[%s3055_s1 + $0x3f8] sm:$0xf0] }
 0x10f   : > { %1416 = vmatpush.bf16.msrb.mxu0 %v1823_v17  ;;  %v2002_v6 = vld [vmem:[%s3055_s1 + $0x168] sm:$0xf]  ;;  %v2387_v8 = vld [vmem:[%s3055_s1 + $0x174] sm:$0xf0]  ;;  %v1875_v14 = vor.u32 %v2355_v5, %v1874_v4  ;;  %v2365_v4 = vld [vmem:[%s3055_s1 + $0xcc] sm:$0xf] }
 0x110   : > { %1430 = vmatpush.bf16.msrb.mxu1 %v1951_v22  ;;  %v2130_v9 = vld [vmem:[%s3055_s1 + $0x268] sm:$0xf]  ;;  %v2419_v10 = vld [vmem:[%s3055_s1 + $0x274] sm:$0xf0]  ;;  %v2003_v15 = vor.u32 %v2387_v8, %v2002_v6  ;;  %v1924_v5 = vld [vmem:[%s3055_s1 + $0xd8] sm:$0xf0] }
 0x111   : > { %1444 = vmatpush.bf16.msrb.mxu2 %v2079_v23  ;;  %v2258_v11 = vld [vmem:[%s3055_s1 + $0x368] sm:$0xf]  ;;  %v2451_v12 = vld [vmem:[%s3055_s1 + $0x374] sm:$0xf0]  ;;  %v2131_v16 = vor.u32 %v2419_v10, %v2130_v9  ;;  %v2397_v6 = vld [vmem:[%s3055_s1 + $0x1cc] sm:$0xf] }
 0x112   : > { %1458 = vmatpush.bf16.msrb.mxu3 %v2207_v26  ;;  %1417 = vmatmul.bf16.vlgmr.msrb.gmra.mxu0 %v3171_v31  ;;  %v1858_v17 = vld [vmem:[%s3055_s1 + $0x48] sm:$0xf]  ;;  %v2351_v18 = vld [vmem:[%s3055_s1 + $0x54] sm:$0xf0]  ;;  %v2259_v21 = vor.u32 %v2451_v12, %v2258_v11  ;;  %v2052_v8 = vld [vmem:[%s3055_s1 + $0x1d8] sm:$0xf0] }
 0x113   : > { %1465 = vmatpush.bf16.msra.mxu0 %v1939_v27  ;;  %1431 = vmatmul.bf16.vlgmr.msrb.gmra.mxu1 %v3178_v38  ;;  %v1986_v19 = vld [vmem:[%s3055_s1 + $0x148] sm:$0xf]  ;;  %v2383_v22 = vld [vmem:[%s3055_s1 + $0x154] sm:$0xf0]  ;;  %v1859_v27 = vor.u32 %v2351_v18, %v1858_v17  ;;  %v2429_v9 = vld [vmem:[%s3055_s1 + $0x2cc] sm:$0xf] }
 0x114   : > { %1479 = vmatpush.bf16.msra.mxu1 %v2067_v28  ;;  %1445 = vmatmul.bf16.vlgmr.msrb.gmra.mxu2 %v3153_v13  ;;  %v2114_v23 = vld [vmem:[%s3055_s1 + $0x248] sm:$0xf]  ;;  %v2415_v24 = vld [vmem:[%s3055_s1 + $0x254] sm:$0xf0]  ;;  %v1987_v28 = vor.u32 %v2383_v22, %v1986_v19  ;;  %v2180_v10 = vld [vmem:[%s3055_s1 + $0x2d8] sm:$0xf0] }
 0x115   : > { %1493 = vmatpush.bf16.msra.mxu2 %v2195_v29  ;;  %1459 = vmatmul.bf16.vlgmr.msrb.gmra.mxu3 %v3160_v20  ;;  %v2242_v25 = vld [vmem:[%s3055_s1 + $0x348] sm:$0xf]  ;;  %v2447_v26 = vld [vmem:[%s3055_s1 + $0x354] sm:$0xf0]  ;;  %v2115_v29 = vor.u32 %v2415_v24, %v2114_v23  ;;  %v2461_v11 = vld [vmem:[%s3055_s1 + $0x3cc] sm:$0xf] }
 0x116   : > { %1507 = vmatpush.bf16.msra.mxu3 %v2323_v34  ;;  %v1842_v30 = vld [vmem:[%s3055_s1 + $0x28] sm:$0xf]  ;;  %v2347_v32 = vld [vmem:[%s3055_s1 + $0x34] sm:$0xf0]  ;;  %v2243_v34 = vor.u32 %v2447_v26, %v2242_v25  ;;  %v2308_v12 = vld [vmem:[%s3055_s1 + $0x3d8] sm:$0xf0] }
 0x117   : > { %1466 = vmatpush.bf16.msra.mxu0 %v1923_v41  ;;  %v1970_v33 = vld [vmem:[%s3055_s1 + $0x128] sm:$0xf]  ;;  %v2379_v35 = vld [vmem:[%s3055_s1 + $0x134] sm:$0xf0]  ;;  %v1843_v41 = vor.u32 %v2347_v32, %v1842_v30  ;;  %v2361_v17 = vld [vmem:[%s3055_s1 + $0xac] sm:$0xf] }
 0x118   : > { %1480 = vmatpush.bf16.msra.mxu1 %v2051_v42  ;;  %v2098_v36 = vld [vmem:[%s3055_s1 + $0x228] sm:$0xf]  ;;  %v2411_v37 = vld [vmem:[%s3055_s1 + $0x234] sm:$0xf0]  ;;  %v1971_v44 = vor.u32 %v2379_v35, %v1970_v33  ;;  %v1908_v18 = vld [vmem:[%s3055_s1 + $0xb8] sm:$0xf0] }
 0x119   : > { %1494 = vmatpush.bf16.msra.mxu2 %v2179_v43  ;;  %v2226_v39 = vld [vmem:[%s3055_s1 + $0x328] sm:$0xf]  ;;  %v2443_v40 = vld [vmem:[%s3055_s1 + $0x334] sm:$0xf0]  ;;  %v2099_v45 = vor.u32 %v2411_v37, %v2098_v36  ;;  %v2393_v19 = vld [vmem:[%s3055_s1 + $0x1ac] sm:$0xf] }
 0x11a   : > { %1508 = vmatpush.bf16.msra.mxu3 %v2307_v47  ;;  %v1826_v42 = vld [vmem:[%s3055_s1 + $0x8] sm:$0xf]  ;;  %v2343_v43 = vld [vmem:[%s3055_s1 + $0x14] sm:$0xf0]  ;;  %v2227_v49 = vor.u32 %v2443_v40, %v2226_v39  ;;  %v2036_v22 = vld [vmem:[%s3055_s1 + $0x1b8] sm:$0xf0] }
 0x11b   : > { %1467 = vmatpush.bf16.msra.mxu0 %v1907_v53  ;;  %v1954_v46 = vld [vmem:[%s3055_s1 + $0x108] sm:$0xf]  ;;  %v2375_v47 = vld [vmem:[%s3055_s1 + $0x114] sm:$0xf0]  ;;  %v2369_v53 = vld [vmem:[%s3055_s1 + $0xec] sm:$0xf]  ;;  %v1827_v56 = vor.u32 %v2343_v43, %v1826_v42 }
 0x11c   : > { %1481 = vmatpush.bf16.msra.mxu1 %v2035_v54  ;;  %v2082_v48 = vld [vmem:[%s3055_s1 + $0x208] sm:$0xf]  ;;  %v2407_v50 = vld [vmem:[%s3055_s1 + $0x214] sm:$0xf0]  ;;  %v1940_v54 = vld [vmem:[%s3055_s1 + $0xf8] sm:$0xf0]  ;;  %v1955_v60 = vor.u32 %v2375_v47, %v1954_v46 }
 0x11d   : > { %1495 = vmatpush.bf16.msra.mxu2 %v2163_v55  ;;  %v2210_v51 = vld [vmem:[%s3055_s1 + $0x308] sm:$0xf]  ;;  %v2439_v52 = vld [vmem:[%s3055_s1 + $0x314] sm:$0xf0]  ;;  %v2401_v55 = vld [vmem:[%s3055_s1 + $0x1ec] sm:$0xf]  ;;  %v2083_v61 = vor.u32 %v2407_v50, %v2082_v48 }
 0x11e   : > { %1509 = vmatpush.bf16.msra.mxu3 %v2291_v59  ;;  %v2196_v59 = vld [vmem:[%s3055_s1 + $0x2f8] sm:$0xf0]  ;;  %v2211_v0 = vor.u32 %v2439_v52, %v2210_v51  ;;  %v2425_v23 = vld [vmem:[%s3055_s1 + $0x2ac] sm:$0xf] }
 0x11f   : > { %1468 = vmatpush.bf16.msra.mxu0 %v1891_v1  ;;  %v1943_v1 = vor.u32 %v2369_v53, %v1940_v54  ;;  %v2164_v24 = vld [vmem:[%s3055_s1 + $0x2b8] sm:$0xf0]  ;;  %v2457_v25 = vld [vmem:[%s3055_s1 + $0x3ac] sm:$0xf] }
 0x120   : > { %1482 = vmatpush.bf16.msra.mxu1 %v2019_v2  ;;  %v2071_v2 = vor.u32 %v2401_v55, %v2068_v57  ;;  %v2292_v26 = vld [vmem:[%s3055_s1 + $0x3b8] sm:$0xf0]  ;;  %v2357_v30 = vld [vmem:[%s3055_s1 + $0x8c] sm:$0xf] }
 0x121   : > { %1496 = vmatpush.bf16.msra.mxu2 %v2147_v3  ;;  %v2199_v3 = vor.u32 %v2433_v58, %v2196_v59  ;;  %v1892_v32 = vld [vmem:[%s3055_s1 + $0x98] sm:$0xf0]  ;;  %v2389_v33 = vld [vmem:[%s3055_s1 + $0x18c] sm:$0xf] }
 0x122   : > { %1510 = vmatpush.bf16.msra.mxu3 %v2275_v7  ;;  %v2327_v7 = vor.u32 %v2465_v62, %v2324_v63  ;;  %v2020_v35 = vld [vmem:[%s3055_s1 + $0x198] sm:$0xf0]  ;;  %v2421_v36 = vld [vmem:[%s3055_s1 + $0x28c] sm:$0xf] }
 0x123   : > { %1469 = vmatpush.bf16.msra.mxu0 %v1875_v14  ;;  %v1927_v14 = vor.u32 %v2365_v4, %v1924_v5  ;;  %v2148_v37 = vld [vmem:[%s3055_s1 + $0x298] sm:$0xf0]  ;;  %v2453_v39 = vld [vmem:[%s3055_s1 + $0x38c] sm:$0xf]  ;;  %v2023_v42 = vor.u32 %v2389_v33, %v2020_v35 }
 0x124   : > { %1483 = vmatpush.bf16.msra.mxu1 %v2003_v15  ;;  %v2055_v15 = vor.u32 %v2397_v6, %v2052_v8  ;;  %v2276_v40 = vld [vmem:[%s3055_s1 + $0x398] sm:$0xf0]  ;;  %v2151_v43 = vor.u32 %v2421_v36, %v2148_v37  ;;  %v2385_v46 = vld [vmem:[%s3055_s1 + $0x16c] sm:$0xf] }
 0x125   : > { %1497 = vmatpush.bf16.msra.mxu2 %v2131_v16  ;;  %v2183_v16 = vor.u32 %v2429_v9, %v2180_v10  ;;  %v2279_v47 = vor.u32 %v2453_v39, %v2276_v40  ;;  %v2004_v48 = vld [vmem:[%s3055_s1 + $0x178] sm:$0xf0]  ;;  %v2449_v51 = vld [vmem:[%s3055_s1 + $0x36c] sm:$0xf]  ;;  %v553_v39 = vld [vmem:[#allocation2 + $0x30] sm:$0xff] }
 0x126   : > { %1511 = vmatpush.bf16.msra.mxu3 %v2259_v21  ;;  %v2311_v21 = vor.u32 %v2461_v11, %v2308_v12  ;;  %v2132_v50 = vld [vmem:[%s3055_s1 + $0x278] sm:$0xf0]  ;;  %v2007_v54 = vor.u32 %v2385_v46, %v2004_v48  ;;  %v2381_v58 = vld [vmem:[%s3055_s1 + $0x14c] sm:$0xf] }
 0x127   : > { %1470 = vmatpush.bf16.msra.mxu0 %v1859_v27  ;;  %v1911_v27 = vor.u32 %v2361_v17, %v1908_v18  ;;  %v2260_v52 = vld [vmem:[%s3055_s1 + $0x378] sm:$0xf0]  ;;  %v2445_v63 = vld [vmem:[%s3055_s1 + $0x34c] sm:$0xf] }
 0x128   : > { %1484 = vmatpush.bf16.msra.mxu1 %v1987_v28  ;;  %v2039_v28 = vor.u32 %v2393_v19, %v2036_v22  ;;  %v1860_v57 = vld [vmem:[%s3055_s1 + $0x58] sm:$0xf0]  ;;  %v2263_v59 = vor.u32 %v2449_v51, %v2260_v52  ;;  %v2345_v4 = vld [vmem:[%s3055_s1 + $0x2c] sm:$0xf] }
 0x129   : > { %1498 = vmatpush.bf16.msra.mxu2 %v2115_v29  ;;  %v2167_v29 = vor.u32 %v2425_v23, %v2164_v24  ;;  %v2116_v62 = vld [vmem:[%s3055_s1 + $0x258] sm:$0xf0]  ;;  %v2377_v6 = vld [vmem:[%s3055_s1 + $0x12c] sm:$0xf] }
 0x12a   : > { %1512 = vmatpush.bf16.msra.mxu3 %v2243_v34  ;;  %v2295_v34 = vor.u32 %v2457_v25, %v2292_v26  ;;  %v1844_v5 = vld [vmem:[%s3055_s1 + $0x38] sm:$0xf0]  ;;  %v2409_v9 = vld [vmem:[%s3055_s1 + $0x22c] sm:$0xf] }
 0x12b   : > { %1471 = vmatpush.bf16.msra.mxu0 %v1843_v41  ;;  %v1895_v41 = vor.u32 %v2357_v30, %v1892_v32  ;;  %v1972_v8 = vld [vmem:[%s3055_s1 + $0x138] sm:$0xf0]  ;;  %v2441_v11 = vld [vmem:[%s3055_s1 + $0x32c] sm:$0xf] }
 0x12c   : > { %1485 = vmatpush.bf16.msra.mxu1 %v1971_v44  ;;  %v2353_v44 = vld [vmem:[%s3055_s1 + $0x6c] sm:$0xf]  ;;  %v2100_v10 = vld [vmem:[%s3055_s1 + $0x238] sm:$0xf0] }
 0x12d   : > { %1499 = vmatpush.bf16.msra.mxu2 %v2099_v45  ;;  %v1876_v45 = vld [vmem:[%s3055_s1 + $0x78] sm:$0xf0]  ;;  %v2341_v17 = vld [vmem:[%s3055_s1 + $0xc] sm:$0xf] }
 0x12e   : > { %1513 = vmatpush.bf16.msra.mxu3 %v2227_v49  ;;  %v2417_v49 = vld [vmem:[%s3055_s1 + $0x26c] sm:$0xf]  ;;  %v1879_v53 = vor.u32 %v2353_v44, %v1876_v45  ;;  %v2228_v12 = vld [vmem:[%s3055_s1 + $0x338] sm:$0xf0] }
 0x12f   : > { %1472 = vmatpush.bf16.msra.mxu0 %v1827_v56  ;;  %v2135_v55 = vor.u32 %v2417_v49, %v2132_v50  ;;  %v2349_v56 = vld [vmem:[%s3055_s1 + $0x4c] sm:$0xf]  ;;  %v1828_v18 = vld [vmem:[%s3055_s1 + $0x18] sm:$0xf0] }
 0x130   : > { %1486 = vmatpush.bf16.msra.mxu1 %v1955_v60  ;;  %v1988_v60 = vld [vmem:[%s3055_s1 + $0x158] sm:$0xf0]  ;;  %v2373_v19 = vld [vmem:[%s3055_s1 + $0x10c] sm:$0xf] }
 0x131   : > { %1500 = vmatpush.bf16.msra.mxu2 %v2083_v61  ;;  %v2413_v61 = vld [vmem:[%s3055_s1 + $0x24c] sm:$0xf]  ;;  %v1956_v22 = vld [vmem:[%s3055_s1 + $0x118] sm:$0xf0] }
 0x132   : > { %1514 = vmatpush.bf16.msra.mxu3 %v2211_v0  ;;  %1473 = vmatmul.bf16.vlgmr.msra.gmra.mxu0 %v3171_v31  ;;  %v2244_v0 = vld [vmem:[%s3055_s1 + $0x358] sm:$0xf0]  ;;  %v2405_v23 = vld [vmem:[%s3055_s1 + $0x20c] sm:$0xf] }
 0x133   : > { %1521 = vmatpush.bf16.msrb.mxu0 %v1943_v1  ;;  %1487 = vmatmul.bf16.vlgmr.msra.gmra.mxu1 %v3178_v38  ;;  %v1863_v1 = vor.u32 %v2349_v56, %v1860_v57  ;;  %v2084_v24 = vld [vmem:[%s3055_s1 + $0x218] sm:$0xf0]  ;;  %v2437_v25 = vld [vmem:[%s3055_s1 + $0x30c] sm:$0xf] }
 0x134   : > { %1535 = vmatpush.bf16.msrb.mxu1 %v2071_v2  ;;  %1501 = vmatmul.bf16.vlgmr.msra.gmra.mxu2 %v3153_v13  ;;  %v1991_v2 = vor.u32 %v2381_v58, %v1988_v60  ;;  %v2212_v26 = vld [vmem:[%s3055_s1 + $0x318] sm:$0xf0]  ;;  %v557_v46 = vld [vmem:[#allocation2 + $0x8] sm:$0xff] }
 0x135   : > { %1549 = vmatpush.bf16.msrb.mxu2 %v2199_v3  ;;  %1515 = vmatmul.bf16.vlgmr.msra.gmra.mxu3 %v3160_v20  ;;  %v2119_v3 = vor.u32 %v2413_v61, %v2116_v62  ;;  %v2215_v30 = vor.u32 %v2437_v25, %v2212_v26  ;;  %v558_v62 = vld [vmem:[#allocation2 + $0x20] sm:$0xff] }
 0x136   : > { %1563 = vmatpush.bf16.msrb.mxu3 %v2327_v7  ;;  %v2247_v7 = vor.u32 %v2445_v63, %v2244_v0 }
 0x137   : > { %1522 = vmatpush.bf16.msrb.mxu0 %v1927_v14  ;;  %v1847_v14 = vor.u32 %v2345_v4, %v1844_v5 }
 0x138   : > { %1536 = vmatpush.bf16.msrb.mxu1 %v2055_v15  ;;  %v1975_v15 = vor.u32 %v2377_v6, %v1972_v8 }
 0x139   : > { %1550 = vmatpush.bf16.msrb.mxu2 %v2183_v16  ;;  %v2103_v16 = vor.u32 %v2409_v9, %v2100_v10 }
 0x13a   : > { %1564 = vmatpush.bf16.msrb.mxu3 %v2311_v21  ;;  %v2231_v21 = vor.u32 %v2441_v11, %v2228_v12 }
 0x13b   : > { %1523 = vmatpush.bf16.msrb.mxu0 %v1911_v27  ;;  %v1831_v27 = vor.u32 %v2341_v17, %v1828_v18  ;;  %v559_v17 = vld [vmem:[#allocation2 + $0x28] sm:$0xff] }
 0x13c   : > { %1537 = vmatpush.bf16.msrb.mxu1 %v2039_v28  ;;  %v1959_v28 = vor.u32 %v2373_v19, %v1956_v22 }
 0x13d   : > { %1551 = vmatpush.bf16.msrb.mxu2 %v2167_v29  ;;  %v2087_v29 = vor.u32 %v2405_v23, %v2084_v24 }
 0x13e   : > { %1565 = vmatpush.bf16.msrb.mxu3 %v2295_v34 }
 0x13f   : > { %1524 = vmatpush.bf16.msrb.mxu0 %v1895_v41 }
 0x140   : > { %1538 = vmatpush.bf16.msrb.mxu1 %v2023_v42 }
 0x141   : > { %1552 = vmatpush.bf16.msrb.mxu2 %v2151_v43 }
 0x142   : > { %1566 = vmatpush.bf16.msrb.mxu3 %v2279_v47 }
 0x143   : > { %1525 = vmatpush.bf16.msrb.mxu0 %v1879_v53  ;;  %v554_v53 = vld [vmem:[#allocation2] sm:$0xff] }
 0x144   : > { %1539 = vmatpush.bf16.msrb.mxu1 %v2007_v54 }
 0x145   : > { %1553 = vmatpush.bf16.msrb.mxu2 %v2135_v55 }
 0x146   : > { %1567 = vmatpush.bf16.msrb.mxu3 %v2263_v59 }
 0x147   : > { %1526 = vmatpush.bf16.msrb.mxu0 %v1863_v1 }
 0x148   : > { %1540 = vmatpush.bf16.msrb.mxu1 %v1991_v2 }
 0x149   : > { %1554 = vmatpush.bf16.msrb.mxu2 %v2119_v3 }
 0x14a   : > { %1568 = vmatpush.bf16.msrb.mxu3 %v2247_v7  ;;  %v555_v7 = vld [vmem:[#allocation2 + $0x18] sm:$0xff] }
 0x14b   : > { %1527 = vmatpush.bf16.msrb.mxu0 %v1847_v14 }
 0x14c   : > { %1541 = vmatpush.bf16.msrb.mxu1 %v1975_v15 }
 0x14d   : > { %1555 = vmatpush.bf16.msrb.mxu2 %v2103_v16 }
 0x14e   : > { %1569 = vmatpush.bf16.msrb.mxu3 %v2231_v21 }
 0x14f   : > { %1528 = vmatpush.bf16.msrb.mxu0 %v1831_v27  ;;  %v556_v27 = vld [vmem:[#allocation2 + $0x10] sm:$0xff] }
 0x150   : > { %1542 = vmatpush.bf16.msrb.mxu1 %v1959_v28 }
 0x151   : > { %1556 = vmatpush.bf16.msrb.mxu2 %v2087_v29 }
 0x152   : > { %1570 = vmatpush.bf16.msrb.mxu3 %v2215_v30  ;;  %1529 = vmatmul.bf16.vlgmr.msrb.gmra.mxu0 %v3171_v31 }
 0x153   : > { %1543 = vmatmul.bf16.vlgmr.msrb.gmra.mxu1 %v3178_v38 }
 0x154   : > { %1557 = vmatmul.bf16.vlgmr.msrb.gmra.mxu2 %v3153_v13 }
 0x155   : > { %1571 = vmatmul.bf16.vlgmr.msrb.gmra.mxu3 %v3160_v20 }
 0x175   : > { %v1362_v32 = vpop.f32.mrf.mxu0 }
 0x177   : > { %v1376_v33 = vpop.f32.mrf.mxu1  ;;  %v1390_v35 = vpop.f32.mrf.mxu2 }
 0x178   : > { %v1377_v34 = vadd.f32 %v1376_v33, %v1362_v32 }
 0x17a   : > { %v1404_v36 = vpop.f32.mrf.mxu3  ;;  %v1391_v37 = vadd.f32 %v1390_v35, %v1377_v34 }
 0x17c   : > { %v1405_v40 = vadd.f32 %v1404_v36, %v1391_v37  ;;  %v560_v36 = vld [vmem:[#allocation2 + $0x38] sm:$0xff] }
 0x17d   : > { %v1364_v42 = vpop.f32.mrf.mxu0 }
 0x17e   : > { %v1577_v41 = vadd.f32 %v1405_v40, %v553_v39 }
 0x17f   : > { %v1378_v43 = vpop.f32.mrf.mxu1  ;;  %v1392_v31 = vpop.f32.mrf.mxu2 }
 0x180   : > { %1585 = vst [vmem:[#allocation2 + $0x30] sm:$0xff] %v1577_v41  ;;  %v1379_v44 = vadd.f32 %v1378_v43, %v1364_v42 }
 0x182   : > { %v1406_v45 = vpop.f32.mrf.mxu3  ;;  %v1393_v38 = vadd.f32 %v1392_v31, %v1379_v44 }
 0x184   : > { %v1407_v13 = vadd.f32 %v1406_v45, %v1393_v38 }
 0x186   : > { %v1581_v47 = vadd.f32 %v1407_v13, %v557_v46 }
 0x188   : > { %1589 = vst [vmem:[#allocation2 + $0x8] sm:$0xff] %v1581_v47 }
 0x18f   : > { %v1418_v20 = vpop.f32.mrf.mxu0 }
 0x190   : > { %v1432_v48 = vpop.f32.mrf.mxu1 }
 0x191   : > { %v1433_v49 = vadd.f32 %v1432_v48, %v1418_v20 }
 0x197   : > { %v1446_v50 = vpop.f32.mrf.mxu2  ;;  %v1420_v55 = vpop.f32.mrf.mxu0 }
 0x198   : > { %v1447_v51 = vadd.f32 %v1446_v50, %v1433_v49  ;;  %v1460_v52 = vpop.f32.mrf.mxu3  ;;  %v1434_v56 = vpop.f32.mrf.mxu1 }
 0x199   : > { %v1435_v58 = vadd.f32 %v1434_v56, %v1420_v55 }
 0x19a   : > { %v1461_v54 = vadd.f32 %v1460_v52, %v1447_v51 }
 0x19c   : > { %v1578_v57 = vadd.f32 %v1461_v54, %v554_v53 }
 0x19e   : > { %1586 = vst [vmem:[#allocation2] sm:$0xff] %v1578_v57 }
 0x19f   : > { %v1448_v59 = vpop.f32.mrf.mxu2 }
 0x1a0   : > { %v1449_v60 = vadd.f32 %v1448_v59, %v1435_v58  ;;  %v1462_v61 = vpop.f32.mrf.mxu3 }
 0x1a2   : > { %v1463_v63 = vadd.f32 %v1462_v61, %v1449_v60 }
 0x1a4   : > { %v1582_v0 = vadd.f32 %v1463_v63, %v558_v62 }
 0x1a6   : > { %1590 = vst [vmem:[#allocation2 + $0x20] sm:$0xff] %v1582_v0 }
 0x1af   : > { %v1474_v1 = vpop.f32.mrf.mxu0 }
 0x1b0   : > { %v1488_v2 = vpop.f32.mrf.mxu1 }
 0x1b1   : > { %v1489_v3 = vadd.f32 %v1488_v2, %v1474_v1 }
 0x1b7   : > { %v1502_v4 = vpop.f32.mrf.mxu2  ;;  %v1476_v9 = vpop.f32.mrf.mxu0 }
 0x1b8   : > { %v1503_v5 = vadd.f32 %v1502_v4, %v1489_v3  ;;  %v1516_v6 = vpop.f32.mrf.mxu3  ;;  %v1490_v10 = vpop.f32.mrf.mxu1 }
 0x1b9   : > { %v1491_v12 = vadd.f32 %v1490_v10, %v1476_v9 }
 0x1ba   : > { %v1517_v8 = vadd.f32 %v1516_v6, %v1503_v5 }
 0x1bc   : > { %v1579_v11 = vadd.f32 %v1517_v8, %v555_v7 }
 0x1be   : > { %1587 = vst [vmem:[#allocation2 + $0x18] sm:$0xff] %v1579_v11 }
 0x1bf   : > { %v1504_v14 = vpop.f32.mrf.mxu2 }
 0x1c0   : > { %v1505_v15 = vadd.f32 %v1504_v14, %v1491_v12  ;;  %v1518_v16 = vpop.f32.mrf.mxu3 }
 0x1c2   : > { %v1519_v18 = vadd.f32 %v1518_v16, %v1505_v15 }
 0x1c4   : > { %v1583_v19 = vadd.f32 %v1519_v18, %v559_v17 }
 0x1c6   : > { %1591 = vst [vmem:[#allocation2 + $0x28] sm:$0xff] %v1583_v19 }
 0x1cf   : > { %v1530_v21 = vpop.f32.mrf.mxu0 }
 0x1d0   : > { %v1544_v22 = vpop.f32.mrf.mxu1 }
 0x1d1   : > { %v1545_v23 = vadd.f32 %v1544_v22, %v1530_v21 }
 0x1d7   : > { %v1558_v24 = vpop.f32.mrf.mxu2  ;;  %v1532_v29 = vpop.f32.mrf.mxu0 }
 0x1d8   : > { %v1559_v25 = vadd.f32 %v1558_v24, %v1545_v23  ;;  %v1572_v26 = vpop.f32.mrf.mxu3  ;;  %v1546_v30 = vpop.f32.mrf.mxu1 }
 0x1d9   : > { %v1547_v33 = vadd.f32 %v1546_v30, %v1532_v29 }
 0x1da   : > { %v1573_v28 = vadd.f32 %v1572_v26, %v1559_v25 }
 0x1dc   : > { %v1580_v32 = vadd.f32 %v1573_v28, %v556_v27 }
 0x1de   : > { %1588 = vst [vmem:[#allocation2 + $0x10] sm:$0xff] %v1580_v32 }
 0x1df   : > { %v1560_v34 = vpop.f32.mrf.mxu2 }
 0x1e0   : > { %v1561_v35 = vadd.f32 %v1560_v34, %v1547_v33  ;;  %v1574_v37 = vpop.f32.mrf.mxu3 }
 0x1e2   : > { %v1575_v39 = vadd.f32 %v1574_v37, %v1561_v35  ;;  %1596 = sbr.rel (%p2328_p5) target bundleno = 501 (0x1f5), region = 86 }
 0x1e4   : > { %v1584_v40 = vadd.f32 %v1575_v39, %v560_v36 }
 0x1e6   : > { %1592 = vst [vmem:[#allocation2 + $0x38] sm:$0xff] %v1584_v40 }
 0x1e7   : > { %v1597_v41 = vld [vmem:[#allocation2 + $0x30] sm:$0xff]  ;;  %v1598_v42 = vld [vmem:[#allocation2] sm:$0xff]  ;;  %v1599_v45 = vld [vmem:[#allocation2 + $0x18] sm:$0xff] }
 0x1e8   : > { %v1605_v43 = vld [vmem:[%s537_s5] sm:$0xf]  ;;  %v1600_v38 = vld [vmem:[#allocation2 + $0x10] sm:$0xff]  ;;  %v1601_v47 = vld [vmem:[#allocation2 + $0x8] sm:$0xff] }
 0x1e9   : > { %v1607_v44 = vperm.slane %v1605_v43, 0  ;;  %v1608_v31 = vperm.slane %v1605_v43, 1  ;;  %v1609_v46 = vperm.slane %v1605_v43, 2  ;;  %v1610_v13 = vperm.slane %v1605_v43, 3  ;;  %v1602_v20 = vld [vmem:[#allocation2 + $0x20] sm:$0xff]  ;;  %v1603_v48 = vld [vmem:[#allocation2 + $0x28] sm:$0xff] }
 0x1eb   : > { %v1615_v49 = vadd.f32 %v1607_v44, %v1597_v41  ;;  %v1616_v50 = vadd.f32 %v1608_v31, %v1598_v42  ;;  %v1617_v51 = vadd.f32 %v1609_v46, %v1599_v45  ;;  %v1618_v52 = vadd.f32 %v1610_v13, %v1600_v38 }
 0x1ec   : > { %v1619_v54 = vadd.f32 %v1607_v44, %v1601_v47  ;;  %v1620_v55 = vadd.f32 %v1608_v31, %v1602_v20  ;;  %v1621_v56 = vadd.f32 %v1609_v46, %v1603_v48 }
 0x1ed   : > { %v1604_v53 = vld [vmem:[#allocation2 + $0x38] sm:$0xff]  ;;  %v1623_v58 = vmax.f32 %v1615_v49, 0.0  ;;  %v1624_v59 = vmax.f32 %v1616_v50, 0.0  ;;  %v1625_v60 = vmax.f32 %v1617_v51, 0.0  ;;  %v1626_v61 = vmax.f32 %v1618_v52, 0.0 }
 0x1ee   : > { %v1622_v57 = vadd.f32 %v1610_v13, %v1604_v53  ;;  %v1627_v62 = vmax.f32 %v1619_v54, 0.0  ;;  %v1628_v63 = vmax.f32 %v1620_v55, 0.0  ;;  %v1629_v0 = vmax.f32 %v1621_v56, 0.0 }
 0x1ef   : > { %v1631_v2 = vpack.c.bf16 %v1624_v59, %v1623_v58  ;;  %v1632_v3 = vpack.c.bf16 %v1626_v61, %v1625_v60 }
 0x1f0   : > { %v1630_v1 = vmax.f32 %v1622_v57, 0.0  ;;  %v1633_v4 = vpack.c.bf16 %v1628_v63, %v1627_v62 }
 0x1f1   : > { %1635 = vst [vmem:[%s3057_s25] sm:$0xff] %v1631_v2 }
 0x1f2   : > { %v1634_v5 = vpack.c.bf16 %v1630_v1, %v1629_v0  ;;  %1636 = vst [vmem:[%s3057_s25 + $0x8] sm:$0xff] %v1632_v3 }
 0x1f3   : > { %1637 = vst [vmem:[%s3057_s25 + $0x10] sm:$0xff] %v1633_v4 }
 0x1f4   : > { %1638 = vst [vmem:[%s3057_s25 + $0x18] sm:$0xff] %v1634_v5 }
 0x1f5 PF: > { %1645 = sbr.rel (!%p2761_p12) target bundleno = 509 (0x1fd), region = 90  ;;  %s2468_s14 = sshll.u32 (%p2761_p12), %s2632_s19, 4 }
 0x1f6   : > { %s1651_s0 = scalar_lea.vmem (%p2761_p12), %s3404_s3, %s2468_s14 }
 0x1f8   : > { %v1664_v6 = vld [vmem:[%s3057_s25] sm:$0xff] (%p2761_p12) }
 0x1f9   : > { %v1666_v7 = vld [vmem:[%s3057_s25 + $0x8] sm:$0xff] (%p2761_p12)  ;;  %1665 = vst [vmem:[%s1651_s0] sm:$0xff] (%p2761_p12), %v1664_v6 }
 0x1fa   : > { %v1668_v8 = vld [vmem:[%s3057_s25 + $0x10] sm:$0xff]  ;;  %1667 = vst [vmem:[%s1651_s0 + $0x8] sm:$0xff] %v1666_v7 }
 0x1fb   : > { %v1670_v9 = vld [vmem:[%s3057_s25 + $0x18] sm:$0xff]  ;;  %1669 = vst [vmem:[%s1651_s0 + $0x40] sm:$0xff] %v1668_v8 }
 0x1fc   : > { %1671 = vst [vmem:[%s1651_s0 + $0x48] sm:$0xff] %v1670_v9 }
 0x1fd PF: > { %s13_s22 = sadd.s32 1, %s2644_s22   ;;  %s3414_s10 = sld [smem:[#allocation6_spill]] }
 0x1fe   : > { %p10_p6 = scmp.ge.s32.totalorder %s13_s22, 66   ;;  %s3415_s12 = smov %s2608_s13 }
 0x1ff   : > { %s3416_s13 = smov %s2759_s9  ;;  %s3417_s14 = smov %s2616_s15 }
 0x200   : > { %s3418_s15 = smov %s2756_s8  ;;  %s3419_s16 = smov %s2624_s17 }
 0x201   : > { %s3420_s17 = smov %s2742_s30  ;;  %s3421_s18 = smov %s2636_s20 }
 0x202   : > { %s3422_s19 = smov %s2640_s21  ;;  %s3423_s20 = smov %s3426_s24 }
 0x203   : > { %s3424_s21 = smov %s3414_s10  ;;  %12 = sbr.rel (!%p10_p6) target bundleno = 9 (0x9), region = 155 }

// kernel: convnet_forward.26
= control target key start
LH: loop header
LB: loop body
LE: loop exit
PB: predicated region body
PF: predicated region fallthrough
CT: control target
= control target key end

     0   :  { %s3401_s0 = inlined_call_operand.vmem [shape: bf16[16,2048], index: 0, kind: input, shape index: {}]   ;;  %s3402_s1 = inlined_call_operand.vmem [shape: bf16[2048,1024], index: 1, kind: input, shape index: {}]   ;;  %s3403_s2 = inlined_call_operand.vmem [shape: f32[1,1024], index: 2, kind: input, shape index: {}]   ;;  %s3404_s3 = inlined_call_operand.vmem [shape: bf16[16,1024], index: 3, kind: output, shape index: {}]  }
   0x1   :  { %3406 = sst [smem:[#allocation7_spill]] %s3401_s0 }
   0x2   :  { %3407 = sst [smem:[#allocation8_spill]] %s3402_s1 }
   0x3   :  { %s2667_s12 = smov 0   ;;  %s2669_s13 = smov 0  }
   0x4   :  { %s2671_s14 = smov 0   ;;  %s2673_s15 = smov 0  }
   0x5   :  { %s2675_s16 = smov 0   ;;  %s2677_s17 = smov 0  }
   0x6   :  { %s2679_s18 = smov 0   ;;  %s2681_s19 = smov 0  }
   0x7   :  { %s2683_s20 = smov 0   ;;  %s2685_s21 = smov 0  }
   0x8   :  { %s2687_s22 = smov 0  }
   0x9 LB: > { %s1782_s23 = sadd.s32 4294967295, %s2644_s22   ;;  %s25_s24 = sadd.s32 1, %s2636_s20  ;;  %s2644_s22 = sphi %s2687_s22, %s13_s22   ;;  %s2640_s21 = sphi %s2685_s21, %s3424_s21   ;;  %s2636_s20 = sphi %s2683_s20, %s3423_s20   ;;  %s2632_s19 = sphi %s2681_s19, %s3422_s19   ;;  %s2628_s18 = sphi %s2679_s18, %s3421_s18   ;;  %s2624_s17 = sphi %s2677_s17, %s3420_s17   ;;  %s2620_s16 = sphi %s2675_s16, %s3419_s16   ;;  %s2616_s15 = sphi %s2673_s15, %s3418_s15   ;;  %s2612_s14 = sphi %s2671_s14, %s3417_s14   ;;  %s2608_s13 = sphi %s2669_s13, %s3416_s13   ;;  %s2604_s12 = sphi %s2667_s12, %s3415_s12  }
   0xa   : > { %p26_p0 = scmp.ge.s32.totalorder %s25_s24, 4  ;;  %s28_s25 = sadd.s32 1, %s2640_s21 }
   0xb   : > { %s41_s26 = sadd.s32 1, %s2624_s17  ;;  %p48_p1 = scmp.ne.s32.totalorder %s2624_s17, %s2620_s16 }
   0xc   : > { %s3426_s24 = smov (%p26_p0, %s25_s24), 0  ;;  %s3428_s25 = smov (!%p26_p0, %s28_s25), %s2640_s21 }
   0xd   : > { %s37_s27 = ssub.s32 %s2636_s20, %s3426_s24  ;;  %p49_p2 = scmp.eq.s32.totalorder %s2644_s22, 0 }
   0xe   : > { %p30_p3 = scmp.ge.s32.totalorder %s3428_s25, 2  ;;  %p39_p4 = scmp.eq.s32.totalorder %s37_s27, 0 }
   0xf   : > { %p2734_p5 = por %p49_p2, %p48_p1  ;;  %s69_s29 = sadd.s32 1, %s2616_s15 }
  0x10   : > { %s3430_s25 = smov (%p30_p3, %s3428_s25), 0  ;;  %p76_p6 = scmp.ne.s32.totalorder %s2616_s15, %s2612_s14 }
  0x11   : > { %3409 = sst [smem:[#allocation6_spill]] %s3430_s25  ;;  %s65_s4 = ssub.s32 %s2640_s21, %s3430_s25 }
  0x12   : > { %s2742_s30 = scalar_select %p39_p4, %s2624_s17, %s41_s26  }
  0x13   : > { %s66_s5 = sor.u32 %s65_s4, %s37_s27  ;;  %p121_p7 = scmp.eq.s32.totalorder %s65_s4, 0 }
  0x14   : > { %p67_p8 = scmp.eq.s32.totalorder %s66_s5, 0  ;;  %p2748_p9 = por %p76_p6, %p49_p2 }
  0x15   : > { %s123_s7 = sadd.s32 1, %s2608_s13  ;;  %p133_p10 = scmp.ne.s32.totalorder %s2608_s13, %s2604_s12 }
  0x16   : > { %s2756_s8 = scalar_select %p67_p8, %s2616_s15, %s69_s29  }
  0x17   : > { %s2759_s9 = scalar_select %p121_p7, %s2608_s13, %s123_s7  }
  0x18   : > { %p134_p11 = scmp.eq.s32.totalorder %s1782_s23, 7  ;;  %p1785_p13 = scmp.ge.s32.totalorder %s2644_s22, 8 }
  0x1a   : > { %p2761_p12 = por %p134_p11, %p133_p10  ;;  %156 = sbr.rel (%p1785_p13) target bundleno = 183 (0xb7), region = 16 }
  0x1f   : > { %159 = sbr.rel (!%p2734_p5) target bundleno = 45 (0x2d), region = 20  ;;  %s161_s11 = sand.u32 (%p2734_p5), 1, %s2624_s17  }
  0x20   : > { %s2334_s26 = sshll.u32 (%p2734_p5), %s2636_s20, 4  ;;  %s1786_s27 = sshll.u32 (%p2734_p5), %s161_s11, 5 }
  0x21   : > { %s3412_s0 = sld [smem:[#allocation7_spill]] (%p2734_p5)  ;;  %s163_s23 = scalar_lea.vmem (%p2734_p5), [#allocation3], %s1786_s27 }
  0x27   : > { %s169_s5 = scalar_lea.vmem %s3412_s0, %s2334_s26 }
  0x28   : > { %v182_v0 = vld [vmem:[%s169_s5] sm:$0xff]  ;;  %v184_v1 = vld [vmem:[%s169_s5 + $0x8] sm:$0xff] }
  0x29   : > { %v186_v2 = vld [vmem:[%s169_s5 + $0x40] sm:$0xff]  ;;  %183 = vst [vmem:[%s163_s23] sm:$0xff] %v182_v0  ;;  %v188_v3 = vld [vmem:[%s169_s5 + $0x48] sm:$0xff] }
  0x2a   : > { %185 = vst [vmem:[%s163_s23 + $0x8] sm:$0xff] %v184_v1 }
  0x2b   : > { %187 = vst [vmem:[%s163_s23 + $0x10] sm:$0xff] %v186_v2 }
  0x2c   : > { %189 = vst [vmem:[%s163_s23 + $0x18] sm:$0xff] %v188_v3 }
  0x2d PF: > { %195 = sbr.rel (!%p2748_p9) target bundleno = 183 (0xb7), region = 43  ;;  %s197_s28 = sand.u32 (%p2748_p9), 1, %s2616_s15  }
  0x2e   : > { %s1791_s7 = sshll.u32 (%p2748_p9), %s2640_s21, 2  ;;  %s1789_s11 = sshll.u32 (%p2748_p9), %s197_s28, 10 }
  0x2f   : > { %s2335_s26 = sshll.u32 (%p2748_p9), %s2636_s20, 9  ;;  %s3413_s1 = sld [smem:[#allocation8_spill]] (%p2748_p9) }
  0x30   : > { %s203_s29 = sadd.s32 (%p2748_p9), %s2335_s26, %s1791_s7  ;;  %s2786_s6 = scalar_lea.vmem (%p2748_p9), [#allocation4], %s1789_s11 }
  0x31   : > { %s1793_s4 = sshll.u32 (%p2748_p9), %s203_s29, 2 }
  0x35   : > { %s2781_s5 = scalar_lea.vmem %s3413_s1, %s1793_s4 }
  0x36   : > { %v218_v4 = vld [vmem:[%s2781_s5] sm:$0xff]  ;;  %v220_v5 = vld [vmem:[%s2781_s5 + $0x8] sm:$0xff] }
  0x37   : > { %v222_v6 = vld [vmem:[%s2781_s5 + $0x20] sm:$0xff]  ;;  %219 = vst [vmem:[%s2786_s6] sm:$0xff] %v218_v4  ;;  %v224_v7 = vld [vmem:[%s2781_s5 + $0x28] sm:$0xff] }
  0x38   : > { %221 = vst [vmem:[%s2786_s6 + $0x8] sm:$0xff] %v220_v5  ;;  %v226_v8 = vld [vmem:[%s2781_s5 + $0x40] sm:$0xff]  ;;  %v228_v9 = vld [vmem:[%s2781_s5 + $0x48] sm:$0xff] }
  0x39   : > { %223 = vst [vmem:[%s2786_s6 + $0x10] sm:$0xff] %v222_v6  ;;  %v230_v10 = vld [vmem:[%s2781_s5 + $0x60] sm:$0xff]  ;;  %v232_v11 = vld [vmem:[%s2781_s5 + $0x68] sm:$0xff] }
  0x3a   : > { %225 = vst [vmem:[%s2786_s6 + $0x18] sm:$0xff] %v224_v7  ;;  %v234_v12 = vld [vmem:[%s2781_s5 + $0x80] sm:$0xff]  ;;  %v236_v13 = vld [vmem:[%s2781_s5 + $0x88] sm:$0xff] }
  0x3b   : > { %227 = vst [vmem:[%s2786_s6 + $0x20] sm:$0xff] %v226_v8  ;;  %v238_v14 = vld [vmem:[%s2781_s5 + $0xa0] sm:$0xff]  ;;  %v240_v15 = vld [vmem:[%s2781_s5 + $0xa8] sm:$0xff] }
  0x3c   : > { %229 = vst [vmem:[%s2786_s6 + $0x28] sm:$0xff] %v228_v9  ;;  %v242_v16 = vld [vmem:[%s2781_s5 + $0xc0] sm:$0xff]  ;;  %v244_v17 = vld [vmem:[%s2781_s5 + $0xc8] sm:$0xff] }
  0x3d   : > { %231 = vst [vmem:[%s2786_s6 + $0x30] sm:$0xff] %v230_v10  ;;  %v246_v18 = vld [vmem:[%s2781_s5 + $0xe0] sm:$0xff]  ;;  %v248_v19 = vld [vmem:[%s2781_s5 + $0xe8] sm:$0xff] }
  0x3e   : > { %233 = vst [vmem:[%s2786_s6 + $0x38] sm:$0xff] %v232_v11  ;;  %v250_v20 = vld [vmem:[%s2781_s5 + $0x100] sm:$0xff]  ;;  %v252_v21 = vld [vmem:[%s2781_s5 + $0x108] sm:$0xff] }
  0x3f   : > { %235 = vst [vmem:[%s2786_s6 + $0x40] sm:$0xff] %v234_v12  ;;  %v254_v22 = vld [vmem:[%s2781_s5 + $0x120] sm:$0xff]  ;;  %v256_v23 = vld [vmem:[%s2781_s5 + $0x128] sm:$0xff] }
  0x40   : > { %237 = vst [vmem:[%s2786_s6 + $0x48] sm:$0xff] %v236_v13  ;;  %v258_v24 = vld [vmem:[%s2781_s5 + $0x140] sm:$0xff]  ;;  %v260_v25 = vld [vmem:[%s2781_s5 + $0x148] sm:$0xff] }
  0x41   : > { %239 = vst [vmem:[%s2786_s6 + $0x50] sm:$0xff] %v238_v14  ;;  %v262_v26 = vld [vmem:[%s2781_s5 + $0x160] sm:$0xff]  ;;  %v264_v27 = vld [vmem:[%s2781_s5 + $0x168] sm:$0xff] }
  0x42   : > { %241 = vst [vmem:[%s2786_s6 + $0x58] sm:$0xff] %v240_v15  ;;  %v266_v28 = vld [vmem:[%s2781_s5 + $0x180] sm:$0xff]  ;;  %v268_v29 = vld [vmem:[%s2781_s5 + $0x188] sm:$0xff] }
  0x43   : > { %243 = vst [vmem:[%s2786_s6 + $0x60] sm:$0xff] %v242_v16  ;;  %v270_v30 = vld [vmem:[%s2781_s5 + $0x1a0] sm:$0xff]  ;;  %v272_v31 = vld [vmem:[%s2781_s5 + $0x1a8] sm:$0xff] }
  0x44   : > { %245 = vst [vmem:[%s2786_s6 + $0x68] sm:$0xff] %v244_v17  ;;  %v274_v32 = vld [vmem:[%s2781_s5 + $0x1c0] sm:$0xff]  ;;  %v276_v33 = vld [vmem:[%s2781_s5 + $0x1c8] sm:$0xff] }
  0x45   : > { %247 = vst [vmem:[%s2786_s6 + $0x70] sm:$0xff] %v246_v18  ;;  %v278_v34 = vld [vmem:[%s2781_s5 + $0x1e0] sm:$0xff]  ;;  %v280_v35 = vld [vmem:[%s2781_s5 + $0x1e8] sm:$0xff] }
  0x46   : > { %249 = vst [vmem:[%s2786_s6 + $0x78] sm:$0xff] %v248_v19  ;;  %v282_v36 = vld [vmem:[%s2781_s5 + $0x200] sm:$0xff]  ;;  %v284_v37 = vld [vmem:[%s2781_s5 + $0x208] sm:$0xff] }
  0x47   : > { %251 = vst [vmem:[%s2786_s6 + $0x80] sm:$0xff] %v250_v20  ;;  %v286_v38 = vld [vmem:[%s2781_s5 + $0x220] sm:$0xff]  ;;  %v288_v39 = vld [vmem:[%s2781_s5 + $0x228] sm:$0xff] }
  0x48   : > { %253 = vst [vmem:[%s2786_s6 + $0x88] sm:$0xff] %v252_v21  ;;  %v290_v40 = vld [vmem:[%s2781_s5 + $0x240] sm:$0xff]  ;;  %v292_v41 = vld [vmem:[%s2781_s5 + $0x248] sm:$0xff] }
  0x49   : > { %255 = vst [vmem:[%s2786_s6 + $0x90] sm:$0xff] %v254_v22  ;;  %v294_v42 = vld [vmem:[%s2781_s5 + $0x260] sm:$0xff]  ;;  %v296_v43 = vld [vmem:[%s2781_s5 + $0x268] sm:$0xff] }
  0x4a   : > { %257 = vst [vmem:[%s2786_s6 + $0x98] sm:$0xff] %v256_v23  ;;  %v298_v44 = vld [vmem:[%s2781_s5 + $0x280] sm:$0xff]  ;;  %v300_v45 = vld [vmem:[%s2781_s5 + $0x288] sm:$0xff] }
  0x4b   : > { %259 = vst [vmem:[%s2786_s6 + $0xa0] sm:$0xff] %v258_v24  ;;  %v302_v46 = vld [vmem:[%s2781_s5 + $0x2a0] sm:$0xff]  ;;  %v304_v47 = vld [vmem:[%s2781_s5 + $0x2a8] sm:$0xff] }
  0x4c   : > { %261 = vst [vmem:[%s2786_s6 + $0xa8] sm:$0xff] %v260_v25  ;;  %v306_v48 = vld [vmem:[%s2781_s5 + $0x2c0] sm:$0xff]  ;;  %v308_v49 = vld [vmem:[%s2781_s5 + $0x2c8] sm:$0xff] }
  0x4d   : > { %263 = vst [vmem:[%s2786_s6 + $0xb0] sm:$0xff] %v262_v26  ;;  %v310_v50 = vld [vmem:[%s2781_s5 + $0x2e0] sm:$0xff]  ;;  %v312_v51 = vld [vmem:[%s2781_s5 + $0x2e8] sm:$0xff] }
  0x4e   : > { %265 = vst [vmem:[%s2786_s6 + $0xb8] sm:$0xff] %v264_v27  ;;  %v314_v52 = vld [vmem:[%s2781_s5 + $0x300] sm:$0xff]  ;;  %v316_v53 = vld [vmem:[%s2781_s5 + $0x308] sm:$0xff] }
  0x4f   : > { %267 = vst [vmem:[%s2786_s6 + $0xc0] sm:$0xff] %v266_v28  ;;  %v318_v54 = vld [vmem:[%s2781_s5 + $0x320] sm:$0xff]  ;;  %v320_v55 = vld [vmem:[%s2781_s5 + $0x328] sm:$0xff] }
  0x50   : > { %269 = vst [vmem:[%s2786_s6 + $0xc8] sm:$0xff] %v268_v29  ;;  %v322_v56 = vld [vmem:[%s2781_s5 + $0x340] sm:$0xff]  ;;  %v324_v57 = vld [vmem:[%s2781_s5 + $0x348] sm:$0xff] }
  0x51   : > { %271 = vst [vmem:[%s2786_s6 + $0xd0] sm:$0xff] %v270_v30  ;;  %v326_v58 = vld [vmem:[%s2781_s5 + $0x360] sm:$0xff]  ;;  %v328_v59 = vld [vmem:[%s2781_s5 + $0x368] sm:$0xff] }
  0x52   : > { %273 = vst [vmem:[%s2786_s6 + $0xd8] sm:$0xff] %v272_v31  ;;  %v330_v60 = vld [vmem:[%s2781_s5 + $0x380] sm:$0xff]  ;;  %v332_v61 = vld [vmem:[%s2781_s5 + $0x388] sm:$0xff] }
  0x53   : > { %275 = vst [vmem:[%s2786_s6 + $0xe0] sm:$0xff] %v274_v32  ;;  %v334_v62 = vld [vmem:[%s2781_s5 + $0x3a0] sm:$0xff]  ;;  %v336_v63 = vld [vmem:[%s2781_s5 + $0x3a8] sm:$0xff] }
  0x54   : > { %277 = vst [vmem:[%s2786_s6 + $0xe8] sm:$0xff] %v276_v33  ;;  %v338_v0 = vld [vmem:[%s2781_s5 + $0x3c0] sm:$0xff]  ;;  %v340_v1 = vld [vmem:[%s2781_s5 + $0x3c8] sm:$0xff] }
  0x55   : > { %279 = vst [vmem:[%s2786_s6 + $0xf0] sm:$0xff] %v278_v34  ;;  %v342_v2 = vld [vmem:[%s2781_s5 + $0x3e0] sm:$0xff]  ;;  %v344_v3 = vld [vmem:[%s2781_s5 + $0x3e8] sm:$0xff] }
  0x56   : > { %281 = vst [vmem:[%s2786_s6 + $0xf8] sm:$0xff] %v280_v35  ;;  %v346_v4 = vld [vmem:[%s2781_s5 + $0x400] sm:$0xff]  ;;  %v348_v5 = vld [vmem:[%s2781_s5 + $0x408] sm:$0xff] }
  0x57   : > { %283 = vst [vmem:[%s2786_s6 + $0x100] sm:$0xff] %v282_v36  ;;  %v350_v6 = vld [vmem:[%s2781_s5 + $0x420] sm:$0xff]  ;;  %v352_v7 = vld [vmem:[%s2781_s5 + $0x428] sm:$0xff] }
  0x58   : > { %285 = vst [vmem:[%s2786_s6 + $0x108] sm:$0xff] %v284_v37  ;;  %v354_v8 = vld [vmem:[%s2781_s5 + $0x440] sm:$0xff]  ;;  %v356_v9 = vld [vmem:[%s2781_s5 + $0x448] sm:$0xff] }
  0x59   : > { %287 = vst [vmem:[%s2786_s6 + $0x110] sm:$0xff] %v286_v38  ;;  %v358_v10 = vld [vmem:[%s2781_s5 + $0x460] sm:$0xff]  ;;  %v360_v11 = vld [vmem:[%s2781_s5 + $0x468] sm:$0xff] }
  0x5a   : > { %289 = vst [vmem:[%s2786_s6 + $0x118] sm:$0xff] %v288_v39  ;;  %v362_v12 = vld [vmem:[%s2781_s5 + $0x480] sm:$0xff]  ;;  %v364_v13 = vld [vmem:[%s2781_s5 + $0x488] sm:$0xff] }
  0x5b   : > { %291 = vst [vmem:[%s2786_s6 + $0x120] sm:$0xff] %v290_v40  ;;  %v366_v14 = vld [vmem:[%s2781_s5 + $0x4a0] sm:$0xff]  ;;  %v368_v15 = vld [vmem:[%s2781_s5 + $0x4a8] sm:$0xff] }
  0x5c   : > { %293 = vst [vmem:[%s2786_s6 + $0x128] sm:$0xff] %v292_v41  ;;  %v370_v16 = vld [vmem:[%s2781_s5 + $0x4c0] sm:$0xff]  ;;  %v372_v17 = vld [vmem:[%s2781_s5 + $0x4c8] sm:$0xff] }
  0x5d   : > { %295 = vst [vmem:[%s2786_s6 + $0x130] sm:$0xff] %v294_v42  ;;  %v374_v18 = vld [vmem:[%s2781_s5 + $0x4e0] sm:$0xff]  ;;  %v376_v19 = vld [vmem:[%s2781_s5 + $0x4e8] sm:$0xff] }
  0x5e   : > { %297 = vst [vmem:[%s2786_s6 + $0x138] sm:$0xff] %v296_v43  ;;  %v378_v20 = vld [vmem:[%s2781_s5 + $0x500] sm:$0xff]  ;;  %v380_v21 = vld [vmem:[%s2781_s5 + $0x508] sm:$0xff] }
  0x5f   : > { %299 = vst [vmem:[%s2786_s6 + $0x140] sm:$0xff] %v298_v44  ;;  %v382_v22 = vld [vmem:[%s2781_s5 + $0x520] sm:$0xff]  ;;  %v384_v23 = vld [vmem:[%s2781_s5 + $0x528] sm:$0xff] }
  0x60   : > { %301 = vst [vmem:[%s2786_s6 + $0x148] sm:$0xff] %v300_v45  ;;  %v386_v24 = vld [vmem:[%s2781_s5 + $0x540] sm:$0xff]  ;;  %v388_v25 = vld [vmem:[%s2781_s5 + $0x548] sm:$0xff] }
  0x61   : > { %303 = vst [vmem:[%s2786_s6 + $0x150] sm:$0xff] %v302_v46  ;;  %v390_v26 = vld [vmem:[%s2781_s5 + $0x560] sm:$0xff]  ;;  %v392_v27 = vld [vmem:[%s2781_s5 + $0x568] sm:$0xff] }
  0x62   : > { %305 = vst [vmem:[%s2786_s6 + $0x158] sm:$0xff] %v304_v47  ;;  %v394_v28 = vld [vmem:[%s2781_s5 + $0x580] sm:$0xff]  ;;  %v396_v29 = vld [vmem:[%s2781_s5 + $0x588] sm:$0xff] }
  0x63   : > { %307 = vst [vmem:[%s2786_s6 + $0x160] sm:$0xff] %v306_v48  ;;  %v398_v30 = vld [vmem:[%s2781_s5 + $0x5a0] sm:$0xff]  ;;  %v400_v31 = vld [vmem:[%s2781_s5 + $0x5a8] sm:$0xff] }
  0x64   : > { %309 = vst [vmem:[%s2786_s6 + $0x168] sm:$0xff] %v308_v49  ;;  %v402_v32 = vld [vmem:[%s2781_s5 + $0x5c0] sm:$0xff]  ;;  %v404_v33 = vld [vmem:[%s2781_s5 + $0x5c8] sm:$0xff] }
  0x65   : > { %311 = vst [vmem:[%s2786_s6 + $0x170] sm:$0xff] %v310_v50  ;;  %v406_v34 = vld [vmem:[%s2781_s5 + $0x5e0] sm:$0xff]  ;;  %v408_v35 = vld [vmem:[%s2781_s5 + $0x5e8] sm:$0xff] }
  0x66   : > { %313 = vst [vmem:[%s2786_s6 + $0x178] sm:$0xff] %v312_v51  ;;  %v410_v36 = vld [vmem:[%s2781_s5 + $0x600] sm:$0xff]  ;;  %v412_v37 = vld [vmem:[%s2781_s5 + $0x608] sm:$0xff] }
  0x67   : > { %315 = vst [vmem:[%s2786_s6 + $0x180] sm:$0xff] %v314_v52  ;;  %v414_v38 = vld [vmem:[%s2781_s5 + $0x620] sm:$0xff]  ;;  %v416_v39 = vld [vmem:[%s2781_s5 + $0x628] sm:$0xff] }
  0x68   : > { %317 = vst [vmem:[%s2786_s6 + $0x188] sm:$0xff] %v316_v53  ;;  %v418_v40 = vld [vmem:[%s2781_s5 + $0x640] sm:$0xff]  ;;  %v420_v41 = vld [vmem:[%s2781_s5 + $0x648] sm:$0xff] }
  0x69   : > { %319 = vst [vmem:[%s2786_s6 + $0x190] sm:$0xff] %v318_v54  ;;  %v422_v42 = vld [vmem:[%s2781_s5 + $0x660] sm:$0xff]  ;;  %v424_v43 = vld [vmem:[%s2781_s5 + $0x668] sm:$0xff] }
  0x6a   : > { %321 = vst [vmem:[%s2786_s6 + $0x198] sm:$0xff] %v320_v55  ;;  %v426_v44 = vld [vmem:[%s2781_s5 + $0x680] sm:$0xff]  ;;  %v428_v45 = vld [vmem:[%s2781_s5 + $0x688] sm:$0xff] }
  0x6b   : > { %323 = vst [vmem:[%s2786_s6 + $0x1a0] sm:$0xff] %v322_v56  ;;  %v430_v46 = vld [vmem:[%s2781_s5 + $0x6a0] sm:$0xff]  ;;  %v432_v47 = vld [vmem:[%s2781_s5 + $0x6a8] sm:$0xff] }
  0x6c   : > { %325 = vst [vmem:[%s2786_s6 + $0x1a8] sm:$0xff] %v324_v57  ;;  %v434_v48 = vld [vmem:[%s2781_s5 + $0x6c0] sm:$0xff]  ;;  %v436_v49 = vld [vmem:[%s2781_s5 + $0x6c8] sm:$0xff] }
  0x6d   : > { %327 = vst [vmem:[%s2786_s6 + $0x1b0] sm:$0xff] %v326_v58  ;;  %v438_v50 = vld [vmem:[%s2781_s5 + $0x6e0] sm:$0xff]  ;;  %v440_v51 = vld [vmem:[%s2781_s5 + $0x6e8] sm:$0xff] }
  0x6e   : > { %329 = vst [vmem:[%s2786_s6 + $0x1b8] sm:$0xff] %v328_v59  ;;  %v442_v52 = vld [vmem:[%s2781_s5 + $0x700] sm:$0xff]  ;;  %v444_v53 = vld [vmem:[%s2781_s5 + $0x708] sm:$0xff] }
  0x6f   : > { %331 = vst [vmem:[%s2786_s6 + $0x1c0] sm:$0xff] %v330_v60  ;;  %v446_v54 = vld [vmem:[%s2781_s5 + $0x720] sm:$0xff]  ;;  %v448_v55 = vld [vmem:[%s2781_s5 + $0x728] sm:$0xff] }
  0x70   : > { %333 = vst [vmem:[%s2786_s6 + $0x1c8] sm:$0xff] %v332_v61  ;;  %v450_v56 = vld [vmem:[%s2781_s5 + $0x740] sm:$0xff]  ;;  %v452_v57 = vld [vmem:[%s2781_s5 + $0x748] sm:$0xff] }
  0x71   : > { %335 = vst [vmem:[%s2786_s6 + $0x1d0] sm:$0xff] %v334_v62  ;;  %v454_v58 = vld [vmem:[%s2781_s5 + $0x760] sm:$0xff]  ;;  %v456_v59 = vld [vmem:[%s2781_s5 + $0x768] sm:$0xff] }
  0x72   : > { %337 = vst [vmem:[%s2786_s6 + $0x1d8] sm:$0xff] %v336_v63  ;;  %v458_v60 = vld [vmem:[%s2781_s5 + $0x780] sm:$0xff]  ;;  %v460_v61 = vld [vmem:[%s2781_s5 + $0x788] sm:$0xff] }
  0x73   : > { %339 = vst [vmem:[%s2786_s6 + $0x1e0] sm:$0xff] %v338_v0  ;;  %v462_v62 = vld [vmem:[%s2781_s5 + $0x7a0] sm:$0xff]  ;;  %v464_v63 = vld [vmem:[%s2781_s5 + $0x7a8] sm:$0xff] }
  0x74   : > { %341 = vst [vmem:[%s2786_s6 + $0x1e8] sm:$0xff] %v340_v1  ;;  %v466_v0 = vld [vmem:[%s2781_s5 + $0x7c0] sm:$0xff]  ;;  %v468_v1 = vld [vmem:[%s2781_s5 + $0x7c8] sm:$0xff] }
  0x75   : > { %343 = vst [vmem:[%s2786_s6 + $0x1f0] sm:$0xff] %v342_v2  ;;  %v470_v2 = vld [vmem:[%s2781_s5 + $0x7e0] sm:$0xff] }
  0x76   : > { %345 = vst [vmem:[%s2786_s6 + $0x1f8] sm:$0xff] %v344_v3  ;;  %v472_v3 = vld [vmem:[%s2781_s5 + $0x7e8] sm:$0xff] }
  0x77   : > { %347 = vst [vmem:[%s2786_s6 + $0x200] sm:$0xff] %v346_v4 }
  0x78   : > { %349 = vst [vmem:[%s2786_s6 + $0x208] sm:$0xff] %v348_v5 }
  0x79   : > { %351 = vst [vmem:[%s2786_s6 + $0x210] sm:$0xff] %v350_v6 }
  0x7a   : > { %353 = vst [vmem:[%s2786_s6 + $0x218] sm:$0xff] %v352_v7 }
  0x7b   : > { %355 = vst [vmem:[%s2786_s6 + $0x220] sm:$0xff] %v354_v8 }
  0x7c   : > { %357 = vst [vmem:[%s2786_s6 + $0x228] sm:$0xff] %v356_v9 }
  0x7d   : > { %359 = vst [vmem:[%s2786_s6 + $0x230] sm:$0xff] %v358_v10 }
  0x7e   : > { %361 = vst [vmem:[%s2786_s6 + $0x238] sm:$0xff] %v360_v11 }
  0x7f   : > { %363 = vst [vmem:[%s2786_s6 + $0x240] sm:$0xff] %v362_v12 }
  0x80   : > { %365 = vst [vmem:[%s2786_s6 + $0x248] sm:$0xff] %v364_v13 }
  0x81   : > { %367 = vst [vmem:[%s2786_s6 + $0x250] sm:$0xff] %v366_v14 }
  0x82   : > { %369 = vst [vmem:[%s2786_s6 + $0x258] sm:$0xff] %v368_v15 }
  0x83   : > { %371 = vst [vmem:[%s2786_s6 + $0x260] sm:$0xff] %v370_v16 }
  0x84   : > { %373 = vst [vmem:[%s2786_s6 + $0x268] sm:$0xff] %v372_v17 }
  0x85   : > { %375 = vst [vmem:[%s2786_s6 + $0x270] sm:$0xff] %v374_v18 }
  0x86   : > { %377 = vst [vmem:[%s2786_s6 + $0x278] sm:$0xff] %v376_v19 }
  0x87   : > { %379 = vst [vmem:[%s2786_s6 + $0x280] sm:$0xff] %v378_v20 }
  0x88   : > { %381 = vst [vmem:[%s2786_s6 + $0x288] sm:$0xff] %v380_v21 }
  0x89   : > { %383 = vst [vmem:[%s2786_s6 + $0x290] sm:$0xff] %v382_v22 }
  0x8a   : > { %385 = vst [vmem:[%s2786_s6 + $0x298] sm:$0xff] %v384_v23 }
  0x8b   : > { %387 = vst [vmem:[%s2786_s6 + $0x2a0] sm:$0xff] %v386_v24 }
  0x8c   : > { %389 = vst [vmem:[%s2786_s6 + $0x2a8] sm:$0xff] %v388_v25 }
  0x8d   : > { %391 = vst [vmem:[%s2786_s6 + $0x2b0] sm:$0xff] %v390_v26 }
  0x8e   : > { %393 = vst [vmem:[%s2786_s6 + $0x2b8] sm:$0xff] %v392_v27 }
  0x8f   : > { %395 = vst [vmem:[%s2786_s6 + $0x2c0] sm:$0xff] %v394_v28 }
  0x90   : > { %397 = vst [vmem:[%s2786_s6 + $0x2c8] sm:$0xff] %v396_v29 }
  0x91   : > { %399 = vst [vmem:[%s2786_s6 + $0x2d0] sm:$0xff] %v398_v30 }
  0x92   : > { %401 = vst [vmem:[%s2786_s6 + $0x2d8] sm:$0xff] %v400_v31 }
  0x93   : > { %403 = vst [vmem:[%s2786_s6 + $0x2e0] sm:$0xff] %v402_v32 }
  0x94   : > { %405 = vst [vmem:[%s2786_s6 + $0x2e8] sm:$0xff] %v404_v33 }
  0x95   : > { %407 = vst [vmem:[%s2786_s6 + $0x2f0] sm:$0xff] %v406_v34 }
  0x96   : > { %409 = vst [vmem:[%s2786_s6 + $0x2f8] sm:$0xff] %v408_v35 }
  0x97   : > { %411 = vst [vmem:[%s2786_s6 + $0x300] sm:$0xff] %v410_v36 }
  0x98   : > { %413 = vst [vmem:[%s2786_s6 + $0x308] sm:$0xff] %v412_v37 }
  0x99   : > { %415 = vst [vmem:[%s2786_s6 + $0x310] sm:$0xff] %v414_v38 }
  0x9a   : > { %417 = vst [vmem:[%s2786_s6 + $0x318] sm:$0xff] %v416_v39 }
  0x9b   : > { %419 = vst [vmem:[%s2786_s6 + $0x320] sm:$0xff] %v418_v40 }
  0x9c   : > { %421 = vst [vmem:[%s2786_s6 + $0x328] sm:$0xff] %v420_v41 }
  0x9d   : > { %423 = vst [vmem:[%s2786_s6 + $0x330] sm:$0xff] %v422_v42 }
  0x9e   : > { %425 = vst [vmem:[%s2786_s6 + $0x338] sm:$0xff] %v424_v43 }
  0x9f   : > { %427 = vst [vmem:[%s2786_s6 + $0x340] sm:$0xff] %v426_v44 }
  0xa0   : > { %429 = vst [vmem:[%s2786_s6 + $0x348] sm:$0xff] %v428_v45 }
  0xa1   : > { %431 = vst [vmem:[%s2786_s6 + $0x350] sm:$0xff] %v430_v46 }
  0xa2   : > { %433 = vst [vmem:[%s2786_s6 + $0x358] sm:$0xff] %v432_v47 }
  0xa3   : > { %435 = vst [vmem:[%s2786_s6 + $0x360] sm:$0xff] %v434_v48 }
  0xa4   : > { %437 = vst [vmem:[%s2786_s6 + $0x368] sm:$0xff] %v436_v49 }
  0xa5   : > { %439 = vst [vmem:[%s2786_s6 + $0x370] sm:$0xff] %v438_v50 }
  0xa6   : > { %441 = vst [vmem:[%s2786_s6 + $0x378] sm:$0xff] %v440_v51 }
  0xa7   : > { %443 = vst [vmem:[%s2786_s6 + $0x380] sm:$0xff] %v442_v52 }
  0xa8   : > { %445 = vst [vmem:[%s2786_s6 + $0x388] sm:$0xff] %v444_v53 }
  0xa9   : > { %447 = vst [vmem:[%s2786_s6 + $0x390] sm:$0xff] %v446_v54 }
  0xaa   : > { %449 = vst [vmem:[%s2786_s6 + $0x398] sm:$0xff] %v448_v55 }
  0xab   : > { %451 = vst [vmem:[%s2786_s6 + $0x3a0] sm:$0xff] %v450_v56 }
  0xac   : > { %453 = vst [vmem:[%s2786_s6 + $0x3a8] sm:$0xff] %v452_v57 }
  0xad   : > { %455 = vst [vmem:[%s2786_s6 + $0x3b0] sm:$0xff] %v454_v58 }
  0xae   : > { %457 = vst [vmem:[%s2786_s6 + $0x3b8] sm:$0xff] %v456_v59 }
  0xaf   : > { %459 = vst [vmem:[%s2786_s6 + $0x3c0] sm:$0xff] %v458_v60 }
  0xb0   : > { %461 = vst [vmem:[%s2786_s6 + $0x3c8] sm:$0xff] %v460_v61 }
  0xb1   : > { %463 = vst [vmem:[%s2786_s6 + $0x3d0] sm:$0xff] %v462_v62 }
  0xb2   : > { %465 = vst [vmem:[%s2786_s6 + $0x3d8] sm:$0xff] %v464_v63 }
  0xb3   : > { %467 = vst [vmem:[%s2786_s6 + $0x3e0] sm:$0xff] %v466_v0 }
  0xb4   : > { %469 = vst [vmem:[%s2786_s6 + $0x3e8] sm:$0xff] %v468_v1 }
  0xb5   : > { %471 = vst [vmem:[%s2786_s6 + $0x3f0] sm:$0xff] %v470_v2 }
  0xb6   : > { %473 = vst [vmem:[%s2786_s6 + $0x3f8] sm:$0xff] %v472_v3 }
  0xb7 PF: > { %p1794_p0 = scmp.ge.s32.totalorder %s2644_s22, 1  ;;  %p486_p1 = scmp.lt.s32.totalorder %s2644_s22, 9 }
  0xb9   : > { %p487_p2 = pnand %p1794_p0, %p486_p1 }
  0xba   : > { %s493_s0 = sand.u32 (!%p487_p2), 1, %s2620_s16   ;;  %s500_s23 = sand.u32 (!%p487_p2), 1, %s2612_s14  }
  0xbb   : > { %490 = sbr.rel (%p487_p2) target bundleno = 509 (0x1fd), region = 70  ;;  %s1795_s28 = sshll.u32 (!%p487_p2), %s493_s0, 5 }
  0xbc   : > { %s1796_s7 = sshll.u32 (!%p487_p2), %s500_s23, 10  ;;  %s527_s11 = sand.u32 (!%p487_p2), 1, %s2604_s12  }
  0xbd   : > { %s1798_s26 = sshll.u32 (!%p487_p2), %s2632_s19, 2  ;;  %s1797_s29 = sshll.u32 (!%p487_p2), %s527_s11, 5 }
  0xbe   : > { %p535_p3 = scmp.lt.s32.totalorder (!%p487_p2), %s1798_s26, 7  ;;  %s3053_s6 = scalar_lea.vmem (!%p487_p2), [#allocation3], %s1795_s28 }
  0xbf   : > { %s3055_s1 = scalar_lea.vmem (!%p487_p2), [#allocation4], %s1796_s7  ;;  %s3057_s25 = scalar_lea.vmem (!%p487_p2), [#allocation5], %s1797_s29 }
  0xc0   : > { %s3432_s26 = smov (!%p535_p3, %s1798_s26), 7  ;;  %p1799_p4 = scmp.ne.s32.totalorder %s2628_s18, 0 }
  0xc1   : > { %s537_s5 = scalar_lea.vmem %s3403_s2, %s3432_s26 }
  0xc2   : > { %544 = sbr.rel (%p1799_p4) target bundleno = 208 (0xd0), region = 82 }
  0xc7   : > { %v2646_v4 = vmov 0.0  }
  0xc8   : > { %545 = vst [vmem:[#allocation2 + $0x30] sm:$0xff] %v2646_v4 }
  0xc9   : > { %546 = vst [vmem:[#allocation2] sm:$0xff] %v2646_v4 }
  0xca   : > { %547 = vst [vmem:[#allocation2 + $0x18] sm:$0xff] %v2646_v4 }
  0xcb   : > { %548 = vst [vmem:[#allocation2 + $0x10] sm:$0xff] %v2646_v4 }
  0xcc   : > { %549 = vst [vmem:[#allocation2 + $0x8] sm:$0xff] %v2646_v4 }
  0xcd   : > { %550 = vst [vmem:[#allocation2 + $0x20] sm:$0xff] %v2646_v4 }
  0xce   : > { %551 = vst [vmem:[#allocation2 + $0x28] sm:$0xff] %v2646_v4 }
  0xcf   : > { %552 = vst [vmem:[#allocation2 + $0x38] sm:$0xff] %v2646_v4 }
  0xd0 PF: > { %v1930_v5 = vld [vmem:[%s3055_s1 + $0xe0] sm:$0xf]  ;;  %v2370_v6 = vld [vmem:[%s3055_s1 + $0xec] sm:$0xf0]  ;;  %p2328_p5 = scmp.ne.s32.totalorder %s2628_s18, 3 }
  0xd1   : > { %v2058_v7 = vld [vmem:[%s3055_s1 + $0x1e0] sm:$0xf]  ;;  %v1931_v8 = vor.u32 %v2370_v6, %v1930_v5  ;;  %v2402_v9 = vld [vmem:[%s3055_s1 + $0x1ec] sm:$0xf0] }
  0xd2   : > { %v2186_v10 = vld [vmem:[%s3055_s1 + $0x2e0] sm:$0xf]  ;;  %v2434_v11 = vld [vmem:[%s3055_s1 + $0x2ec] sm:$0xf0]  ;;  %v2059_v12 = vor.u32 %v2402_v9, %v2058_v7 }
  0xd3   : > { %v2187_v13 = vor.u32 %v2434_v11, %v2186_v10  ;;  %v2314_v14 = vld [vmem:[%s3055_s1 + $0x3e0] sm:$0xf]  ;;  %v2466_v15 = vld [vmem:[%s3055_s1 + $0x3ec] sm:$0xf0]  ;;  %1353 = vmatpush.bf16.msra.mxu0 %v1931_v8 }
  0xd4   : > { %v1914_v16 = vld [vmem:[%s3055_s1 + $0xc0] sm:$0xf]  ;;  %v2315_v17 = vor.u32 %v2466_v15, %v2314_v14  ;;  %v2366_v18 = vld [vmem:[%s3055_s1 + $0xcc] sm:$0xf0]  ;;  %1367 = vmatpush.bf16.msra.mxu1 %v2059_v12 }
  0xd5   : > { %v2042_v19 = vld [vmem:[%s3055_s1 + $0x1c0] sm:$0xf]  ;;  %v2398_v20 = vld [vmem:[%s3055_s1 + $0x1cc] sm:$0xf0]  ;;  %1381 = vmatpush.bf16.msra.mxu2 %v2187_v13  ;;  %v1915_v21 = vor.u32 %v2366_v18, %v1914_v16 }
  0xd6   : > { %v2043_v22 = vor.u32 %v2398_v20, %v2042_v19  ;;  %v2170_v23 = vld [vmem:[%s3055_s1 + $0x2c0] sm:$0xf]  ;;  %v2430_v24 = vld [vmem:[%s3055_s1 + $0x2cc] sm:$0xf0]  ;;  %1395 = vmatpush.bf16.msra.mxu3 %v2315_v17 }
  0xd7   : > { %v2298_v25 = vld [vmem:[%s3055_s1 + $0x3c0] sm:$0xf]  ;;  %v2171_v26 = vor.u32 %v2430_v24, %v2170_v23  ;;  %v2462_v27 = vld [vmem:[%s3055_s1 + $0x3cc] sm:$0xf0]  ;;  %1354 = vmatpush.bf16.msra.mxu0 %v1915_v21 }
  0xd8   : > { %v1898_v28 = vld [vmem:[%s3055_s1 + $0xa0] sm:$0xf]  ;;  %v2362_v29 = vld [vmem:[%s3055_s1 + $0xac] sm:$0xf0]  ;;  %v2299_v30 = vor.u32 %v2462_v27, %v2298_v25  ;;  %1368 = vmatpush.bf16.msra.mxu1 %v2043_v22 }
  0xd9   : > { %v2026_v31 = vld [vmem:[%s3055_s1 + $0x1a0] sm:$0xf]  ;;  %v2394_v32 = vld [vmem:[%s3055_s1 + $0x1ac] sm:$0xf0]  ;;  %v1899_v34 = vor.u32 %v2362_v29, %v1898_v28  ;;  %1382 = vmatpush.bf16.msra.mxu2 %v2171_v26 }
  0xda   : > { %v2154_v33 = vld [vmem:[%s3055_s1 + $0x2a0] sm:$0xf]  ;;  %v2426_v35 = vld [vmem:[%s3055_s1 + $0x2ac] sm:$0xf0]  ;;  %v2027_v38 = vor.u32 %v2394_v32, %v2026_v31  ;;  %1396 = vmatpush.bf16.msra.mxu3 %v2299_v30 }
  0xdb   : > { %v2282_v36 = vld [vmem:[%s3055_s1 + $0x3a0] sm:$0xf]  ;;  %v2458_v37 = vld [vmem:[%s3055_s1 + $0x3ac] sm:$0xf0]  ;;  %v2155_v39 = vor.u32 %v2426_v35, %v2154_v33  ;;  %1355 = vmatpush.bf16.msra.mxu0 %v1899_v34  ;;  %v2368_v33 = vld [vmem:[%s3055_s1 + $0xe4] sm:$0xf] }
  0xdc   : > { %v1882_v40 = vld [vmem:[%s3055_s1 + $0x80] sm:$0xf]  ;;  %v2358_v41 = vld [vmem:[%s3055_s1 + $0x8c] sm:$0xf0]  ;;  %v2283_v43 = vor.u32 %v2458_v37, %v2282_v36  ;;  %1369 = vmatpush.bf16.msra.mxu1 %v2027_v38  ;;  %v1932_v34 = vld [vmem:[%s3055_s1 + $0xf0] sm:$0xf0] }
  0xdd   : > { %v2010_v42 = vld [vmem:[%s3055_s1 + $0x180] sm:$0xf]  ;;  %v2390_v44 = vld [vmem:[%s3055_s1 + $0x18c] sm:$0xf0]  ;;  %v1883_v49 = vor.u32 %v2358_v41, %v1882_v40  ;;  %1383 = vmatpush.bf16.msra.mxu2 %v2155_v39  ;;  %v2400_v35 = vld [vmem:[%s3055_s1 + $0x1e4] sm:$0xf] }
  0xde   : > { %v2138_v45 = vld [vmem:[%s3055_s1 + $0x280] sm:$0xf]  ;;  %v2422_v46 = vld [vmem:[%s3055_s1 + $0x28c] sm:$0xf0]  ;;  %v2011_v50 = vor.u32 %v2390_v44, %v2010_v42  ;;  %1397 = vmatpush.bf16.msra.mxu3 %v2283_v43  ;;  %v2060_v37 = vld [vmem:[%s3055_s1 + $0x1f0] sm:$0xf0] }
  0xdf   : > { %v2266_v47 = vld [vmem:[%s3055_s1 + $0x380] sm:$0xf]  ;;  %v2454_v48 = vld [vmem:[%s3055_s1 + $0x38c] sm:$0xf0]  ;;  %v2139_v51 = vor.u32 %v2422_v46, %v2138_v45  ;;  %1356 = vmatpush.bf16.msra.mxu0 %v1883_v49  ;;  %v2432_v38 = vld [vmem:[%s3055_s1 + $0x2e4] sm:$0xf]  ;;  %v1935_v45 = vor.u32 %v2368_v33, %v1932_v34  ;;  %v2063_v46 = vor.u32 %v2400_v35, %v2060_v37 }
  0xe0   : > { %v1866_v52 = vld [vmem:[%s3055_s1 + $0x60] sm:$0xf]  ;;  %v2354_v53 = vld [vmem:[%s3055_s1 + $0x6c] sm:$0xf0]  ;;  %v2267_v55 = vor.u32 %v2454_v48, %v2266_v47  ;;  %1370 = vmatpush.bf16.msra.mxu1 %v2011_v50  ;;  %v2188_v39 = vld [vmem:[%s3055_s1 + $0x2f0] sm:$0xf0] }
  0xe1   : > { %v1994_v54 = vld [vmem:[%s3055_s1 + $0x160] sm:$0xf]  ;;  %v2386_v56 = vld [vmem:[%s3055_s1 + $0x16c] sm:$0xf0]  ;;  %v1867_v61 = vor.u32 %v2354_v53, %v1866_v52  ;;  %1384 = vmatpush.bf16.msra.mxu2 %v2139_v51  ;;  %v2464_v42 = vld [vmem:[%s3055_s1 + $0x3e4] sm:$0xf]  ;;  %v2191_v47 = vor.u32 %v2432_v38, %v2188_v39 }
  0xe2   : > { %v2122_v57 = vld [vmem:[%s3055_s1 + $0x260] sm:$0xf]  ;;  %v2418_v58 = vld [vmem:[%s3055_s1 + $0x26c] sm:$0xf0]  ;;  %v1995_v62 = vor.u32 %v2386_v56, %v1994_v54  ;;  %1398 = vmatpush.bf16.msra.mxu3 %v2267_v55  ;;  %v2316_v43 = vld [vmem:[%s3055_s1 + $0x3f0] sm:$0xf0] }
  0xe3   : > { %v2250_v59 = vld [vmem:[%s3055_s1 + $0x360] sm:$0xf]  ;;  %v2450_v60 = vld [vmem:[%s3055_s1 + $0x36c] sm:$0xf0]  ;;  %v2123_v63 = vor.u32 %v2418_v58, %v2122_v57  ;;  %1357 = vmatpush.bf16.msra.mxu0 %v1867_v61  ;;  %v2364_v48 = vld [vmem:[%s3055_s1 + $0xc4] sm:$0xf]  ;;  %v2319_v51 = vor.u32 %v2464_v42, %v2316_v43 }
  0xe4   : > { %v1850_v0 = vld [vmem:[%s3055_s1 + $0x40] sm:$0xf]  ;;  %v2350_v1 = vld [vmem:[%s3055_s1 + $0x4c] sm:$0xf0]  ;;  %v2251_v3 = vor.u32 %v2450_v60, %v2250_v59  ;;  %1371 = vmatpush.bf16.msra.mxu1 %v1995_v62  ;;  %v1916_v49 = vld [vmem:[%s3055_s1 + $0xd0] sm:$0xf0] }
  0xe5   : > { %v1978_v2 = vld [vmem:[%s3055_s1 + $0x140] sm:$0xf]  ;;  %v2382_v4 = vld [vmem:[%s3055_s1 + $0x14c] sm:$0xf0]  ;;  %v1851_v9 = vor.u32 %v2350_v1, %v1850_v0  ;;  %1385 = vmatpush.bf16.msra.mxu2 %v2123_v63  ;;  %v2396_v50 = vld [vmem:[%s3055_s1 + $0x1c4] sm:$0xf]  ;;  %v1919_v57 = vor.u32 %v2364_v48, %v1916_v49 }
  0xe6   : > { %v2106_v5 = vld [vmem:[%s3055_s1 + $0x240] sm:$0xf]  ;;  %v2414_v6 = vld [vmem:[%s3055_s1 + $0x24c] sm:$0xf0]  ;;  %v1979_v10 = vor.u32 %v2382_v4, %v1978_v2  ;;  %1399 = vmatpush.bf16.msra.mxu3 %v2251_v3  ;;  %v2044_v52 = vld [vmem:[%s3055_s1 + $0x1d0] sm:$0xf0] }
  0xe7   : > { %v2234_v7 = vld [vmem:[%s3055_s1 + $0x340] sm:$0xf]  ;;  %v2446_v8 = vld [vmem:[%s3055_s1 + $0x34c] sm:$0xf0]  ;;  %v2107_v11 = vor.u32 %v2414_v6, %v2106_v5  ;;  %1358 = vmatpush.bf16.msra.mxu0 %v1851_v9  ;;  %v2428_v53 = vld [vmem:[%s3055_s1 + $0x2c4] sm:$0xf]  ;;  %v2047_v58 = vor.u32 %v2396_v50, %v2044_v52 }
  0xe8   : > { %v1834_v12 = vld [vmem:[%s3055_s1 + $0x20] sm:$0xf]  ;;  %v2346_v13 = vld [vmem:[%s3055_s1 + $0x2c] sm:$0xf0]  ;;  %v2235_v15 = vor.u32 %v2446_v8, %v2234_v7  ;;  %1372 = vmatpush.bf16.msra.mxu1 %v1979_v10  ;;  %v2172_v54 = vld [vmem:[%s3055_s1 + $0x2d0] sm:$0xf0] }
  0xe9   : > { %v1962_v14 = vld [vmem:[%s3055_s1 + $0x120] sm:$0xf]  ;;  %v2378_v16 = vld [vmem:[%s3055_s1 + $0x12c] sm:$0xf0]  ;;  %v1835_v21 = vor.u32 %v2346_v13, %v1834_v12  ;;  %1386 = vmatpush.bf16.msra.mxu2 %v2107_v11  ;;  %v2460_v55 = vld [vmem:[%s3055_s1 + $0x3c4] sm:$0xf]  ;;  %v2175_v59 = vor.u32 %v2428_v53, %v2172_v54 }
  0xea   : > { %v2090_v17 = vld [vmem:[%s3055_s1 + $0x220] sm:$0xf]  ;;  %v2410_v18 = vld [vmem:[%s3055_s1 + $0x22c] sm:$0xf0]  ;;  %v1963_v24 = vor.u32 %v2378_v16, %v1962_v14  ;;  %1400 = vmatpush.bf16.msra.mxu3 %v2235_v15  ;;  %v2300_v56 = vld [vmem:[%s3055_s1 + $0x3d0] sm:$0xf0] }
  0xeb   : > { %v2218_v19 = vld [vmem:[%s3055_s1 + $0x320] sm:$0xf]  ;;  %v2442_v20 = vld [vmem:[%s3055_s1 + $0x32c] sm:$0xf0]  ;;  %v2091_v25 = vor.u32 %v2410_v18, %v2090_v17  ;;  %1359 = vmatpush.bf16.msra.mxu0 %v1835_v21  ;;  %v2360_v60 = vld [vmem:[%s3055_s1 + $0xa4] sm:$0xf]  ;;  %v2303_v63 = vor.u32 %v2460_v55, %v2300_v56 }
  0xec   : > { %v1818_v22 = vld [vmem:[%s3055_s1] sm:$0xf]  ;;  %v2342_v23 = vld [vmem:[%s3055_s1 + $0xc] sm:$0xf0]  ;;  %v2219_v29 = vor.u32 %v2442_v20, %v2218_v19  ;;  %1373 = vmatpush.bf16.msra.mxu1 %v1963_v24  ;;  %v1900_v61 = vld [vmem:[%s3055_s1 + $0xb0] sm:$0xf0] }
  0xed   : > { %v1946_v26 = vld [vmem:[%s3055_s1 + $0x100] sm:$0xf]  ;;  %v2374_v27 = vld [vmem:[%s3055_s1 + $0x10c] sm:$0xf0]  ;;  %v1819_v36 = vor.u32 %v2342_v23, %v1818_v22  ;;  %1387 = vmatpush.bf16.msra.mxu2 %v2091_v25  ;;  %v2392_v62 = vld [vmem:[%s3055_s1 + $0x1a4] sm:$0xf]  ;;  %v1903_v6 = vor.u32 %v2360_v60, %v1900_v61 }
  0xee   : > { %v2074_v28 = vld [vmem:[%s3055_s1 + $0x200] sm:$0xf]  ;;  %v2406_v30 = vld [vmem:[%s3055_s1 + $0x20c] sm:$0xf0]  ;;  %v1947_v40 = vor.u32 %v2374_v27, %v1946_v26  ;;  %1401 = vmatpush.bf16.msra.mxu3 %v2219_v29  ;;  %v2028_v0 = vld [vmem:[%s3055_s1 + $0x1b0] sm:$0xf0] }
  0xef   : > { %v2202_v31 = vld [vmem:[%s3055_s1 + $0x300] sm:$0xf]  ;;  %v2438_v32 = vld [vmem:[%s3055_s1 + $0x30c] sm:$0xf0]  ;;  %v2075_v41 = vor.u32 %v2406_v30, %v2074_v28  ;;  %1360 = vmatpush.bf16.msra.mxu0 %v1819_v36  ;;  %v2424_v1 = vld [vmem:[%s3055_s1 + $0x2a4] sm:$0xf]  ;;  %v2031_v10 = vor.u32 %v2392_v62, %v2028_v0 }
  0xf0   : > { %v2203_v44 = vor.u32 %v2438_v32, %v2202_v31  ;;  %1374 = vmatpush.bf16.msra.mxu1 %v1947_v40  ;;  %v2156_v2 = vld [vmem:[%s3055_s1 + $0x2b0] sm:$0xf0]  ;;  %v2456_v3 = vld [vmem:[%s3055_s1 + $0x3a4] sm:$0xf]  ;;  %v1810_v8 = vld [vmem:[%s3053_s6 + $0x8] sm:$0xf] }
  0xf1   : > { %1388 = vmatpush.bf16.msra.mxu2 %v2075_v41  ;;  %v2284_v4 = vld [vmem:[%s3055_s1 + $0x3b0] sm:$0xf0]  ;;  %v2356_v5 = vld [vmem:[%s3055_s1 + $0x84] sm:$0xf]  ;;  %v2339_v9 = vld [vmem:[%s3053_s6 + $0x14] sm:$0xf0]  ;;  %v2159_v11 = vor.u32 %v2424_v1, %v2156_v2 }
  0xf2   : > { %1402 = vmatpush.bf16.msra.mxu3 %v2203_v44  ;;  %v1884_v7 = vld [vmem:[%s3055_s1 + $0x90] sm:$0xf0]  ;;  %v2388_v12 = vld [vmem:[%s3055_s1 + $0x184] sm:$0xf]  ;;  %v3153_v13 = vor.u32 %v2339_v9, %v1810_v8  ;;  %v2337_v14 = vld [vmem:[%s3053_s6 + $0xc] sm:$0xf]  ;;  %v2287_v16 = vor.u32 %v2456_v3, %v2284_v4 }
  0xf3   : > { %1409 = vmatpush.bf16.msrb.mxu0 %v1935_v45  ;;  %v1812_v15 = vld [vmem:[%s3053_s6 + $0x18] sm:$0xf0]  ;;  %v2012_v17 = vld [vmem:[%s3055_s1 + $0x190] sm:$0xf0]  ;;  %v2420_v18 = vld [vmem:[%s3055_s1 + $0x284] sm:$0xf]  ;;  %v1887_v24 = vor.u32 %v2356_v5, %v1884_v7 }
  0xf4   : > { %1423 = vmatpush.bf16.msrb.mxu1 %v2063_v46  ;;  %v2140_v19 = vld [vmem:[%s3055_s1 + $0x290] sm:$0xf0]  ;;  %v3160_v20 = vor.u32 %v2337_v14, %v1812_v15  ;;  %v2452_v21 = vld [vmem:[%s3055_s1 + $0x384] sm:$0xf]  ;;  %1389 = vmatmul.bf16.vlgmr.msra.gmra.mxu2 %v3153_v13  ;;  %v1802_v26 = vld [vmem:[%s3053_s6] sm:$0xf]  ;;  %v2015_v28 = vor.u32 %v2388_v12, %v2012_v17 }
  0xf5   : > { %1437 = vmatpush.bf16.msrb.mxu2 %v2191_v47  ;;  %v2268_v22 = vld [vmem:[%s3055_s1 + $0x390] sm:$0xf0]  ;;  %v2352_v23 = vld [vmem:[%s3055_s1 + $0x64] sm:$0xf]  ;;  %v2338_v27 = vld [vmem:[%s3053_s6 + $0xc] sm:$0xf0]  ;;  %v2143_v29 = vor.u32 %v2420_v18, %v2140_v19 }
  0xf6   : > { %1451 = vmatpush.bf16.msrb.mxu3 %v2319_v51  ;;  %v1868_v25 = vld [vmem:[%s3055_s1 + $0x70] sm:$0xf0]  ;;  %v2384_v30 = vld [vmem:[%s3055_s1 + $0x164] sm:$0xf]  ;;  %v3171_v31 = vor.u32 %v2338_v27, %v1802_v26  ;;  %v2271_v34 = vor.u32 %v2452_v21, %v2268_v22  ;;  %v1938_v14 = vld [vmem:[%s3055_s1 + $0xe8] sm:$0xf] }
  0xf7   : > { %1410 = vmatpush.bf16.msrb.mxu0 %v1919_v57  ;;  %1403 = vmatmul.bf16.vlgmr.msra.gmra.mxu3 %v3160_v20  ;;  %v2336_v32 = vld [vmem:[%s3053_s6 + $0x4] sm:$0xf]  ;;  %v1804_v33 = vld [vmem:[%s3053_s6 + $0x10] sm:$0xf0]  ;;  %v1871_v41 = vor.u32 %v2352_v23, %v1868_v25  ;;  %v2371_v15 = vld [vmem:[%s3055_s1 + $0xf4] sm:$0xf0] }
  0xf8   : > { %1424 = vmatpush.bf16.msrb.mxu1 %v2047_v58  ;;  %v1996_v35 = vld [vmem:[%s3055_s1 + $0x170] sm:$0xf0]  ;;  %v2416_v36 = vld [vmem:[%s3055_s1 + $0x264] sm:$0xf]  ;;  %v3178_v38 = vor.u32 %v2336_v32, %v1804_v33  ;;  %1361 = vmatmul.bf16.vlgmr.msra.gmra.mxu0 %v3171_v31  ;;  %v2403_v18 = vld [vmem:[%s3055_s1 + $0x1f4] sm:$0xf0]  ;;  %v1939_v27 = vor.u32 %v2371_v15, %v1938_v14 }
  0xf9   : > { %1438 = vmatpush.bf16.msrb.mxu2 %v2175_v59  ;;  %v2124_v37 = vld [vmem:[%s3055_s1 + $0x270] sm:$0xf0]  ;;  %v2448_v39 = vld [vmem:[%s3055_s1 + $0x364] sm:$0xf]  ;;  %v1999_v42 = vor.u32 %v2384_v30, %v1996_v35  ;;  %v2194_v19 = vld [vmem:[%s3055_s1 + $0x2e8] sm:$0xf] }
  0xfa   : > { %1452 = vmatpush.bf16.msrb.mxu3 %v2303_v63  ;;  %v2252_v40 = vld [vmem:[%s3055_s1 + $0x370] sm:$0xf0]  ;;  %1375 = vmatmul.bf16.vlgmr.msra.gmra.mxu1 %v3178_v38  ;;  %v2127_v43 = vor.u32 %v2416_v36, %v2124_v37  ;;  %v2348_v44 = vld [vmem:[%s3055_s1 + $0x44] sm:$0xf]  ;;  %v2435_v21 = vld [vmem:[%s3055_s1 + $0x2f4] sm:$0xf0] }
  0xfb   : > { %1411 = vmatpush.bf16.msrb.mxu0 %v1903_v6  ;;  %v1852_v45 = vld [vmem:[%s3055_s1 + $0x50] sm:$0xf0]  ;;  %v2380_v46 = vld [vmem:[%s3055_s1 + $0x144] sm:$0xf]  ;;  %v2255_v47 = vor.u32 %v2448_v39, %v2252_v40  ;;  %v2467_v25 = vld [vmem:[%s3055_s1 + $0x3f4] sm:$0xf0] }
  0xfc   : > { %1425 = vmatpush.bf16.msrb.mxu1 %v2031_v10  ;;  %v1980_v48 = vld [vmem:[%s3055_s1 + $0x150] sm:$0xf0]  ;;  %v2412_v49 = vld [vmem:[%s3055_s1 + $0x244] sm:$0xf]  ;;  %v1855_v53 = vor.u32 %v2348_v44, %v1852_v45  ;;  %v1922_v30 = vld [vmem:[%s3055_s1 + $0xc8] sm:$0xf] }
  0xfd   : > { %1439 = vmatpush.bf16.msrb.mxu2 %v2159_v11  ;;  %v2108_v50 = vld [vmem:[%s3055_s1 + $0x250] sm:$0xf0]  ;;  %v2444_v51 = vld [vmem:[%s3055_s1 + $0x344] sm:$0xf]  ;;  %v1983_v54 = vor.u32 %v2380_v46, %v1980_v48  ;;  %v2367_v32 = vld [vmem:[%s3055_s1 + $0xd4] sm:$0xf0] }
  0xfe   : > { %1453 = vmatpush.bf16.msrb.mxu3 %v2287_v16  ;;  %v2236_v52 = vld [vmem:[%s3055_s1 + $0x350] sm:$0xf0]  ;;  %v2111_v55 = vor.u32 %v2412_v49, %v2108_v50  ;;  %v2344_v56 = vld [vmem:[%s3055_s1 + $0x24] sm:$0xf]  ;;  %v2066_v16 = vld [vmem:[%s3055_s1 + $0x1e8] sm:$0xf] }
  0xff   : > { %1412 = vmatpush.bf16.msrb.mxu0 %v1887_v24  ;;  %v1836_v57 = vld [vmem:[%s3055_s1 + $0x30] sm:$0xf0]  ;;  %v2376_v58 = vld [vmem:[%s3055_s1 + $0x124] sm:$0xf]  ;;  %v2239_v59 = vor.u32 %v2444_v51, %v2236_v52  ;;  %v2322_v24 = vld [vmem:[%s3055_s1 + $0x3e8] sm:$0xf] }
 0x100   : > { %1426 = vmatpush.bf16.msrb.mxu1 %v2015_v28  ;;  %v1964_v60 = vld [vmem:[%s3055_s1 + $0x130] sm:$0xf0]  ;;  %v2408_v61 = vld [vmem:[%s3055_s1 + $0x224] sm:$0xf]  ;;  %v1839_v1 = vor.u32 %v2344_v56, %v1836_v57  ;;  %v2067_v28 = vor.u32 %v2403_v18, %v2066_v16  ;;  %v2050_v33 = vld [vmem:[%s3055_s1 + $0x1c8] sm:$0xf] }
 0x101   : > { %1440 = vmatpush.bf16.msrb.mxu2 %v2143_v29  ;;  %v2092_v62 = vld [vmem:[%s3055_s1 + $0x230] sm:$0xf0]  ;;  %v2440_v63 = vld [vmem:[%s3055_s1 + $0x324] sm:$0xf]  ;;  %v1967_v4 = vor.u32 %v2376_v58, %v1964_v60  ;;  %v2195_v29 = vor.u32 %v2435_v21, %v2194_v19  ;;  %v2399_v35 = vld [vmem:[%s3055_s1 + $0x1d4] sm:$0xf0] }
 0x102   : > { %1454 = vmatpush.bf16.msrb.mxu3 %v2271_v34  ;;  %v2220_v0 = vld [vmem:[%s3055_s1 + $0x330] sm:$0xf0]  ;;  %v2340_v2 = vld [vmem:[%s3055_s1 + $0x4] sm:$0xf]  ;;  %v2095_v5 = vor.u32 %v2408_v61, %v2092_v62  ;;  %v2323_v34 = vor.u32 %v2467_v25, %v2322_v24  ;;  %v2178_v36 = vld [vmem:[%s3055_s1 + $0x2c8] sm:$0xf] }
 0x103   : > { %1413 = vmatpush.bf16.msrb.mxu0 %v1871_v41  ;;  %v1820_v3 = vld [vmem:[%s3055_s1 + $0x10] sm:$0xf0]  ;;  %v2372_v6 = vld [vmem:[%s3055_s1 + $0x104] sm:$0xf]  ;;  %v2223_v9 = vor.u32 %v2440_v63, %v2220_v0  ;;  %v2431_v37 = vld [vmem:[%s3055_s1 + $0x2d4] sm:$0xf0]  ;;  %v1923_v41 = vor.u32 %v2367_v32, %v1922_v30 }
 0x104   : > { %1427 = vmatpush.bf16.msrb.mxu1 %v1999_v42  ;;  %v1948_v7 = vld [vmem:[%s3055_s1 + $0x110] sm:$0xf0]  ;;  %v2404_v8 = vld [vmem:[%s3055_s1 + $0x204] sm:$0xf]  ;;  %v1823_v17 = vor.u32 %v2340_v2, %v1820_v3  ;;  %v2306_v39 = vld [vmem:[%s3055_s1 + $0x3c8] sm:$0xf]  ;;  %v2051_v42 = vor.u32 %v2399_v35, %v2050_v33 }
 0x105   : > { %1441 = vmatpush.bf16.msrb.mxu2 %v2127_v43  ;;  %v2076_v10 = vld [vmem:[%s3055_s1 + $0x210] sm:$0xf0]  ;;  %v2436_v11 = vld [vmem:[%s3055_s1 + $0x304] sm:$0xf]  ;;  %v1951_v22 = vor.u32 %v2372_v6, %v1948_v7  ;;  %v2463_v40 = vld [vmem:[%s3055_s1 + $0x3d4] sm:$0xf0]  ;;  %v2179_v43 = vor.u32 %v2431_v37, %v2178_v36 }
 0x106   : > { %1455 = vmatpush.bf16.msrb.mxu3 %v2255_v47  ;;  %v2204_v12 = vld [vmem:[%s3055_s1 + $0x310] sm:$0xf0]  ;;  %v2079_v23 = vor.u32 %v2404_v8, %v2076_v10  ;;  %v1906_v44 = vld [vmem:[%s3055_s1 + $0xa8] sm:$0xf]  ;;  %v2363_v45 = vld [vmem:[%s3055_s1 + $0xb4] sm:$0xf0]  ;;  %v2307_v47 = vor.u32 %v2463_v40, %v2306_v39 }
 0x107   : > { %1414 = vmatpush.bf16.msrb.mxu0 %v1855_v53  ;;  %v2207_v26 = vor.u32 %v2436_v11, %v2204_v12  ;;  %v2034_v46 = vld [vmem:[%s3055_s1 + $0x1a8] sm:$0xf]  ;;  %v2395_v48 = vld [vmem:[%s3055_s1 + $0x1b4] sm:$0xf0]  ;;  %v1907_v53 = vor.u32 %v2363_v45, %v1906_v44 }
 0x108   : > { %1428 = vmatpush.bf16.msrb.mxu1 %v1983_v54  ;;  %v2162_v49 = vld [vmem:[%s3055_s1 + $0x2a8] sm:$0xf]  ;;  %v2427_v50 = vld [vmem:[%s3055_s1 + $0x2b4] sm:$0xf0]  ;;  %v2035_v54 = vor.u32 %v2395_v48, %v2034_v46 }
 0x109   : > { %1442 = vmatpush.bf16.msrb.mxu2 %v2111_v55  ;;  %v2290_v51 = vld [vmem:[%s3055_s1 + $0x3a8] sm:$0xf]  ;;  %v2459_v52 = vld [vmem:[%s3055_s1 + $0x3b4] sm:$0xf0]  ;;  %v2163_v55 = vor.u32 %v2427_v50, %v2162_v49 }
 0x10a   : > { %1456 = vmatpush.bf16.msrb.mxu3 %v2239_v59  ;;  %v1890_v56 = vld [vmem:[%s3055_s1 + $0x88] sm:$0xf]  ;;  %v2359_v57 = vld [vmem:[%s3055_s1 + $0x94] sm:$0xf0]  ;;  %v2291_v59 = vor.u32 %v2459_v52, %v2290_v51 }
 0x10b   : > { %1415 = vmatpush.bf16.msrb.mxu0 %v1839_v1  ;;  %v2018_v58 = vld [vmem:[%s3055_s1 + $0x188] sm:$0xf]  ;;  %v2391_v60 = vld [vmem:[%s3055_s1 + $0x194] sm:$0xf0]  ;;  %v1891_v1 = vor.u32 %v2359_v57, %v1890_v56  ;;  %v2068_v57 = vld [vmem:[%s3055_s1 + $0x1f8] sm:$0xf0] }
 0x10c   : > { %1429 = vmatpush.bf16.msrb.mxu1 %v1967_v4  ;;  %v2146_v61 = vld [vmem:[%s3055_s1 + $0x288] sm:$0xf]  ;;  %v2423_v62 = vld [vmem:[%s3055_s1 + $0x294] sm:$0xf0]  ;;  %v2019_v2 = vor.u32 %v2391_v60, %v2018_v58  ;;  %v2433_v58 = vld [vmem:[%s3055_s1 + $0x2ec] sm:$0xf] }
 0x10d   : > { %1443 = vmatpush.bf16.msrb.mxu2 %v2095_v5  ;;  %v2274_v63 = vld [vmem:[%s3055_s1 + $0x388] sm:$0xf]  ;;  %v2455_v0 = vld [vmem:[%s3055_s1 + $0x394] sm:$0xf0]  ;;  %v2147_v3 = vor.u32 %v2423_v62, %v2146_v61  ;;  %v2465_v62 = vld [vmem:[%s3055_s1 + $0x3ec] sm:$0xf] }
 0x10e   : > { %1457 = vmatpush.bf16.msrb.mxu3 %v2223_v9  ;;  %v1874_v4 = vld [vmem:[%s3055_s1 + $0x68] sm:$0xf]  ;;  %v2355_v5 = vld [vmem:[%s3055_s1 + $0x74] sm:$0xf0]  ;;  %v2275_v7 = vor.u32 %v2455_v0, %v2274_v63  ;;  %v2324_v63 = vld [vmem:[%s3055_s1 + $0x3f8] sm:$0xf0] }
 0x10f   : > { %1416 = vmatpush.bf16.msrb.mxu0 %v1823_v17  ;;  %v2002_v6 = vld [vmem:[%s3055_s1 + $0x168] sm:$0xf]  ;;  %v2387_v8 = vld [vmem:[%s3055_s1 + $0x174] sm:$0xf0]  ;;  %v1875_v14 = vor.u32 %v2355_v5, %v1874_v4  ;;  %v2365_v4 = vld [vmem:[%s3055_s1 + $0xcc] sm:$0xf] }
 0x110   : > { %1430 = vmatpush.bf16.msrb.mxu1 %v1951_v22  ;;  %v2130_v9 = vld [vmem:[%s3055_s1 + $0x268] sm:$0xf]  ;;  %v2419_v10 = vld [vmem:[%s3055_s1 + $0x274] sm:$0xf0]  ;;  %v2003_v15 = vor.u32 %v2387_v8, %v2002_v6  ;;  %v1924_v5 = vld [vmem:[%s3055_s1 + $0xd8] sm:$0xf0] }
 0x111   : > { %1444 = vmatpush.bf16.msrb.mxu2 %v2079_v23  ;;  %v2258_v11 = vld [vmem:[%s3055_s1 + $0x368] sm:$0xf]  ;;  %v2451_v12 = vld [vmem:[%s3055_s1 + $0x374] sm:$0xf0]  ;;  %v2131_v16 = vor.u32 %v2419_v10, %v2130_v9  ;;  %v2397_v6 = vld [vmem:[%s3055_s1 + $0x1cc] sm:$0xf] }
 0x112   : > { %1458 = vmatpush.bf16.msrb.mxu3 %v2207_v26  ;;  %1417 = vmatmul.bf16.vlgmr.msrb.gmra.mxu0 %v3171_v31  ;;  %v1858_v17 = vld [vmem:[%s3055_s1 + $0x48] sm:$0xf]  ;;  %v2351_v18 = vld [vmem:[%s3055_s1 + $0x54] sm:$0xf0]  ;;  %v2259_v21 = vor.u32 %v2451_v12, %v2258_v11  ;;  %v2052_v8 = vld [vmem:[%s3055_s1 + $0x1d8] sm:$0xf0] }
 0x113   : > { %1465 = vmatpush.bf16.msra.mxu0 %v1939_v27  ;;  %1431 = vmatmul.bf16.vlgmr.msrb.gmra.mxu1 %v3178_v38  ;;  %v1986_v19 = vld [vmem:[%s3055_s1 + $0x148] sm:$0xf]  ;;  %v2383_v22 = vld [vmem:[%s3055_s1 + $0x154] sm:$0xf0]  ;;  %v1859_v27 = vor.u32 %v2351_v18, %v1858_v17  ;;  %v2429_v9 = vld [vmem:[%s3055_s1 + $0x2cc] sm:$0xf] }
 0x114   : > { %1479 = vmatpush.bf16.msra.mxu1 %v2067_v28  ;;  %1445 = vmatmul.bf16.vlgmr.msrb.gmra.mxu2 %v3153_v13  ;;  %v2114_v23 = vld [vmem:[%s3055_s1 + $0x248] sm:$0xf]  ;;  %v2415_v24 = vld [vmem:[%s3055_s1 + $0x254] sm:$0xf0]  ;;  %v1987_v28 = vor.u32 %v2383_v22, %v1986_v19  ;;  %v2180_v10 = vld [vmem:[%s3055_s1 + $0x2d8] sm:$0xf0] }
 0x115   : > { %1493 = vmatpush.bf16.msra.mxu2 %v2195_v29  ;;  %1459 = vmatmul.bf16.vlgmr.msrb.gmra.mxu3 %v3160_v20  ;;  %v2242_v25 = vld [vmem:[%s3055_s1 + $0x348] sm:$0xf]  ;;  %v2447_v26 = vld [vmem:[%s3055_s1 + $0x354] sm:$0xf0]  ;;  %v2115_v29 = vor.u32 %v2415_v24, %v2114_v23  ;;  %v2461_v11 = vld [vmem:[%s3055_s1 + $0x3cc] sm:$0xf] }
 0x116   : > { %1507 = vmatpush.bf16.msra.mxu3 %v2323_v34  ;;  %v1842_v30 = vld [vmem:[%s3055_s1 + $0x28] sm:$0xf]  ;;  %v2347_v32 = vld [vmem:[%s3055_s1 + $0x34] sm:$0xf0]  ;;  %v2243_v34 = vor.u32 %v2447_v26, %v2242_v25  ;;  %v2308_v12 = vld [vmem:[%s3055_s1 + $0x3d8] sm:$0xf0] }
 0x117   : > { %1466 = vmatpush.bf16.msra.mxu0 %v1923_v41  ;;  %v1970_v33 = vld [vmem:[%s3055_s1 + $0x128] sm:$0xf]  ;;  %v2379_v35 = vld [vmem:[%s3055_s1 + $0x134] sm:$0xf0]  ;;  %v1843_v41 = vor.u32 %v2347_v32, %v1842_v30  ;;  %v2361_v17 = vld [vmem:[%s3055_s1 + $0xac] sm:$0xf] }
 0x118   : > { %1480 = vmatpush.bf16.msra.mxu1 %v2051_v42  ;;  %v2098_v36 = vld [vmem:[%s3055_s1 + $0x228] sm:$0xf]  ;;  %v2411_v37 = vld [vmem:[%s3055_s1 + $0x234] sm:$0xf0]  ;;  %v1971_v44 = vor.u32 %v2379_v35, %v1970_v33  ;;  %v1908_v18 = vld [vmem:[%s3055_s1 + $0xb8] sm:$0xf0] }
 0x119   : > { %1494 = vmatpush.bf16.msra.mxu2 %v2179_v43  ;;  %v2226_v39 = vld [vmem:[%s3055_s1 + $0x328] sm:$0xf]  ;;  %v2443_v40 = vld [vmem:[%s3055_s1 + $0x334] sm:$0xf0]  ;;  %v2099_v45 = vor.u32 %v2411_v37, %v2098_v36  ;;  %v2393_v19 = vld [vmem:[%s3055_s1 + $0x1ac] sm:$0xf] }
 0x11a   : > { %1508 = vmatpush.bf16.msra.mxu3 %v2307_v47  ;;  %v1826_v42 = vld [vmem:[%s3055_s1 + $0x8] sm:$0xf]  ;;  %v2343_v43 = vld [vmem:[%s3055_s1 + $0x14] sm:$0xf0]  ;;  %v2227_v49 = vor.u32 %v2443_v40, %v2226_v39  ;;  %v2036_v22 = vld [vmem:[%s3055_s1 + $0x1b8] sm:$0xf0] }
 0x11b   : > { %1467 = vmatpush.bf16.msra.mxu0 %v1907_v53  ;;  %v1954_v46 = vld [vmem:[%s3055_s1 + $0x108] sm:$0xf]  ;;  %v2375_v47 = vld [vmem:[%s3055_s1 + $0x114] sm:$0xf0]  ;;  %v2369_v53 = vld [vmem:[%s3055_s1 + $0xec] sm:$0xf]  ;;  %v1827_v56 = vor.u32 %v2343_v43, %v1826_v42 }
 0x11c   : > { %1481 = vmatpush.bf16.msra.mxu1 %v2035_v54  ;;  %v2082_v48 = vld [vmem:[%s3055_s1 + $0x208] sm:$0xf]  ;;  %v2407_v50 = vld [vmem:[%s3055_s1 + $0x214] sm:$0xf0]  ;;  %v1940_v54 = vld [vmem:[%s3055_s1 + $0xf8] sm:$0xf0]  ;;  %v1955_v60 = vor.u32 %v2375_v47, %v1954_v46 }
 0x11d   : > { %1495 = vmatpush.bf16.msra.mxu2 %v2163_v55  ;;  %v2210_v51 = vld [vmem:[%s3055_s1 + $0x308] sm:$0xf]  ;;  %v2439_v52 = vld [vmem:[%s3055_s1 + $0x314] sm:$0xf0]  ;;  %v2401_v55 = vld [vmem:[%s3055_s1 + $0x1ec] sm:$0xf]  ;;  %v2083_v61 = vor.u32 %v2407_v50, %v2082_v48 }
 0x11e   : > { %1509 = vmatpush.bf16.msra.mxu3 %v2291_v59  ;;  %v2196_v59 = vld [vmem:[%s3055_s1 + $0x2f8] sm:$0xf0]  ;;  %v2211_v0 = vor.u32 %v2439_v52, %v2210_v51  ;;  %v2425_v23 = vld [vmem:[%s3055_s1 + $0x2ac] sm:$0xf] }
 0x11f   : > { %1468 = vmatpush.bf16.msra.mxu0 %v1891_v1  ;;  %v1943_v1 = vor.u32 %v2369_v53, %v1940_v54  ;;  %v2164_v24 = vld [vmem:[%s3055_s1 + $0x2b8] sm:$0xf0]  ;;  %v2457_v25 = vld [vmem:[%s3055_s1 + $0x3ac] sm:$0xf] }
 0x120   : > { %1482 = vmatpush.bf16.msra.mxu1 %v2019_v2  ;;  %v2071_v2 = vor.u32 %v2401_v55, %v2068_v57  ;;  %v2292_v26 = vld [vmem:[%s3055_s1 + $0x3b8] sm:$0xf0]  ;;  %v2357_v30 = vld [vmem:[%s3055_s1 + $0x8c] sm:$0xf] }
 0x121   : > { %1496 = vmatpush.bf16.msra.mxu2 %v2147_v3  ;;  %v2199_v3 = vor.u32 %v2433_v58, %v2196_v59  ;;  %v1892_v32 = vld [vmem:[%s3055_s1 + $0x98] sm:$0xf0]  ;;  %v2389_v33 = vld [vmem:[%s3055_s1 + $0x18c] sm:$0xf] }
 0x122   : > { %1510 = vmatpush.bf16.msra.mxu3 %v2275_v7  ;;  %v2327_v7 = vor.u32 %v2465_v62, %v2324_v63  ;;  %v2020_v35 = vld [vmem:[%s3055_s1 + $0x198] sm:$0xf0]  ;;  %v2421_v36 = vld [vmem:[%s3055_s1 + $0x28c] sm:$0xf] }
 0x123   : > { %1469 = vmatpush.bf16.msra.mxu0 %v1875_v14  ;;  %v1927_v14 = vor.u32 %v2365_v4, %v1924_v5  ;;  %v2148_v37 = vld [vmem:[%s3055_s1 + $0x298] sm:$0xf0]  ;;  %v2453_v39 = vld [vmem:[%s3055_s1 + $0x38c] sm:$0xf]  ;;  %v2023_v42 = vor.u32 %v2389_v33, %v2020_v35 }
 0x124   : > { %1483 = vmatpush.bf16.msra.mxu1 %v2003_v15  ;;  %v2055_v15 = vor.u32 %v2397_v6, %v2052_v8  ;;  %v2276_v40 = vld [vmem:[%s3055_s1 + $0x398] sm:$0xf0]  ;;  %v2151_v43 = vor.u32 %v2421_v36, %v2148_v37  ;;  %v2385_v46 = vld [vmem:[%s3055_s1 + $0x16c] sm:$0xf] }
 0x125   : > { %1497 = vmatpush.bf16.msra.mxu2 %v2131_v16  ;;  %v2183_v16 = vor.u32 %v2429_v9, %v2180_v10  ;;  %v2279_v47 = vor.u32 %v2453_v39, %v2276_v40  ;;  %v2004_v48 = vld [vmem:[%s3055_s1 + $0x178] sm:$0xf0]  ;;  %v2449_v51 = vld [vmem:[%s3055_s1 + $0x36c] sm:$0xf]  ;;  %v553_v39 = vld [vmem:[#allocation2 + $0x30] sm:$0xff] }
 0x126   : > { %1511 = vmatpush.bf16.msra.mxu3 %v2259_v21  ;;  %v2311_v21 = vor.u32 %v2461_v11, %v2308_v12  ;;  %v2132_v50 = vld [vmem:[%s3055_s1 + $0x278] sm:$0xf0]  ;;  %v2007_v54 = vor.u32 %v2385_v46, %v2004_v48  ;;  %v2381_v58 = vld [vmem:[%s3055_s1 + $0x14c] sm:$0xf] }
 0x127   : > { %1470 = vmatpush.bf16.msra.mxu0 %v1859_v27  ;;  %v1911_v27 = vor.u32 %v2361_v17, %v1908_v18  ;;  %v2260_v52 = vld [vmem:[%s3055_s1 + $0x378] sm:$0xf0]  ;;  %v2445_v63 = vld [vmem:[%s3055_s1 + $0x34c] sm:$0xf] }
 0x128   : > { %1484 = vmatpush.bf16.msra.mxu1 %v1987_v28  ;;  %v2039_v28 = vor.u32 %v2393_v19, %v2036_v22  ;;  %v1860_v57 = vld [vmem:[%s3055_s1 + $0x58] sm:$0xf0]  ;;  %v2263_v59 = vor.u32 %v2449_v51, %v2260_v52  ;;  %v2345_v4 = vld [vmem:[%s3055_s1 + $0x2c] sm:$0xf] }
 0x129   : > { %1498 = vmatpush.bf16.msra.mxu2 %v2115_v29  ;;  %v2167_v29 = vor.u32 %v2425_v23, %v2164_v24  ;;  %v2116_v62 = vld [vmem:[%s3055_s1 + $0x258] sm:$0xf0]  ;;  %v2377_v6 = vld [vmem:[%s3055_s1 + $0x12c] sm:$0xf] }
 0x12a   : > { %1512 = vmatpush.bf16.msra.mxu3 %v2243_v34  ;;  %v2295_v34 = vor.u32 %v2457_v25, %v2292_v26  ;;  %v1844_v5 = vld [vmem:[%s3055_s1 + $0x38] sm:$0xf0]  ;;  %v2409_v9 = vld [vmem:[%s3055_s1 + $0x22c] sm:$0xf] }
 0x12b   : > { %1471 = vmatpush.bf16.msra.mxu0 %v1843_v41  ;;  %v1895_v41 = vor.u32 %v2357_v30, %v1892_v32  ;;  %v1972_v8 = vld [vmem:[%s3055_s1 + $0x138] sm:$0xf0]  ;;  %v2441_v11 = vld [vmem:[%s3055_s1 + $0x32c] sm:$0xf] }
 0x12c   : > { %1485 = vmatpush.bf16.msra.mxu1 %v1971_v44  ;;  %v2353_v44 = vld [vmem:[%s3055_s1 + $0x6c] sm:$0xf]  ;;  %v2100_v10 = vld [vmem:[%s3055_s1 + $0x238] sm:$0xf0] }
 0x12d   : > { %1499 = vmatpush.bf16.msra.mxu2 %v2099_v45  ;;  %v1876_v45 = vld [vmem:[%s3055_s1 + $0x78] sm:$0xf0]  ;;  %v2341_v17 = vld [vmem:[%s3055_s1 + $0xc] sm:$0xf] }
 0x12e   : > { %1513 = vmatpush.bf16.msra.mxu3 %v2227_v49  ;;  %v2417_v49 = vld [vmem:[%s3055_s1 + $0x26c] sm:$0xf]  ;;  %v1879_v53 = vor.u32 %v2353_v44, %v1876_v45  ;;  %v2228_v12 = vld [vmem:[%s3055_s1 + $0x338] sm:$0xf0] }
 0x12f   : > { %1472 = vmatpush.bf16.msra.mxu0 %v1827_v56  ;;  %v2135_v55 = vor.u32 %v2417_v49, %v2132_v50  ;;  %v2349_v56 = vld [vmem:[%s3055_s1 + $0x4c] sm:$0xf]  ;;  %v1828_v18 = vld [vmem:[%s3055_s1 + $0x18] sm:$0xf0] }
 0x130   : > { %1486 = vmatpush.bf16.msra.mxu1 %v1955_v60  ;;  %v1988_v60 = vld [vmem:[%s3055_s1 + $0x158] sm:$0xf0]  ;;  %v2373_v19 = vld [vmem:[%s3055_s1 + $0x10c] sm:$0xf] }
 0x131   : > { %1500 = vmatpush.bf16.msra.mxu2 %v2083_v61  ;;  %v2413_v61 = vld [vmem:[%s3055_s1 + $0x24c] sm:$0xf]  ;;  %v1956_v22 = vld [vmem:[%s3055_s1 + $0x118] sm:$0xf0] }
 0x132   : > { %1514 = vmatpush.bf16.msra.mxu3 %v2211_v0  ;;  %1473 = vmatmul.bf16.vlgmr.msra.gmra.mxu0 %v3171_v31  ;;  %v2244_v0 = vld [vmem:[%s3055_s1 + $0x358] sm:$0xf0]  ;;  %v2405_v23 = vld [vmem:[%s3055_s1 + $0x20c] sm:$0xf] }
 0x133   : > { %1521 = vmatpush.bf16.msrb.mxu0 %v1943_v1  ;;  %1487 = vmatmul.bf16.vlgmr.msra.gmra.mxu1 %v3178_v38  ;;  %v1863_v1 = vor.u32 %v2349_v56, %v1860_v57  ;;  %v2084_v24 = vld [vmem:[%s3055_s1 + $0x218] sm:$0xf0]  ;;  %v2437_v25 = vld [vmem:[%s3055_s1 + $0x30c] sm:$0xf] }
 0x134   : > { %1535 = vmatpush.bf16.msrb.mxu1 %v2071_v2  ;;  %1501 = vmatmul.bf16.vlgmr.msra.gmra.mxu2 %v3153_v13  ;;  %v1991_v2 = vor.u32 %v2381_v58, %v1988_v60  ;;  %v2212_v26 = vld [vmem:[%s3055_s1 + $0x318] sm:$0xf0]  ;;  %v557_v46 = vld [vmem:[#allocation2 + $0x8] sm:$0xff] }
 0x135   : > { %1549 = vmatpush.bf16.msrb.mxu2 %v2199_v3  ;;  %1515 = vmatmul.bf16.vlgmr.msra.gmra.mxu3 %v3160_v20  ;;  %v2119_v3 = vor.u32 %v2413_v61, %v2116_v62  ;;  %v2215_v30 = vor.u32 %v2437_v25, %v2212_v26  ;;  %v558_v62 = vld [vmem:[#allocation2 + $0x20] sm:$0xff] }
 0x136   : > { %1563 = vmatpush.bf16.msrb.mxu3 %v2327_v7  ;;  %v2247_v7 = vor.u32 %v2445_v63, %v2244_v0 }
 0x137   : > { %1522 = vmatpush.bf16.msrb.mxu0 %v1927_v14  ;;  %v1847_v14 = vor.u32 %v2345_v4, %v1844_v5 }
 0x138   : > { %1536 = vmatpush.bf16.msrb.mxu1 %v2055_v15  ;;  %v1975_v15 = vor.u32 %v2377_v6, %v1972_v8 }
 0x139   : > { %1550 = vmatpush.bf16.msrb.mxu2 %v2183_v16  ;;  %v2103_v16 = vor.u32 %v2409_v9, %v2100_v10 }
 0x13a   : > { %1564 = vmatpush.bf16.msrb.mxu3 %v2311_v21  ;;  %v2231_v21 = vor.u32 %v2441_v11, %v2228_v12 }
 0x13b   : > { %1523 = vmatpush.bf16.msrb.mxu0 %v1911_v27  ;;  %v1831_v27 = vor.u32 %v2341_v17, %v1828_v18  ;;  %v559_v17 = vld [vmem:[#allocation2 + $0x28] sm:$0xff] }
 0x13c   : > { %1537 = vmatpush.bf16.msrb.mxu1 %v2039_v28  ;;  %v1959_v28 = vor.u32 %v2373_v19, %v1956_v22 }
 0x13d   : > { %1551 = vmatpush.bf16.msrb.mxu2 %v2167_v29  ;;  %v2087_v29 = vor.u32 %v2405_v23, %v2084_v24 }
 0x13e   : > { %1565 = vmatpush.bf16.msrb.mxu3 %v2295_v34 }
 0x13f   : > { %1524 = vmatpush.bf16.msrb.mxu0 %v1895_v41 }
 0x140   : > { %1538 = vmatpush.bf16.msrb.mxu1 %v2023_v42 }
 0x141   : > { %1552 = vmatpush.bf16.msrb.mxu2 %v2151_v43 }
 0x142   : > { %1566 = vmatpush.bf16.msrb.mxu3 %v2279_v47 }
 0x143   : > { %1525 = vmatpush.bf16.msrb.mxu0 %v1879_v53  ;;  %v554_v53 = vld [vmem:[#allocation2] sm:$0xff] }
 0x144   : > { %1539 = vmatpush.bf16.msrb.mxu1 %v2007_v54 }
 0x145   : > { %1553 = vmatpush.bf16.msrb.mxu2 %v2135_v55 }
 0x146   : > { %1567 = vmatpush.bf16.msrb.mxu3 %v2263_v59 }
 0x147   : > { %1526 = vmatpush.bf16.msrb.mxu0 %v1863_v1 }
 0x148   : > { %1540 = vmatpush.bf16.msrb.mxu1 %v1991_v2 }
 0x149   : > { %1554 = vmatpush.bf16.msrb.mxu2 %v2119_v3 }
 0x14a   : > { %1568 = vmatpush.bf16.msrb.mxu3 %v2247_v7  ;;  %v555_v7 = vld [vmem:[#allocation2 + $0x18] sm:$0xff] }
 0x14b   : > { %1527 = vmatpush.bf16.msrb.mxu0 %v1847_v14 }
 0x14c   : > { %1541 = vmatpush.bf16.msrb.mxu1 %v1975_v15 }
 0x14d   : > { %1555 = vmatpush.bf16.msrb.mxu2 %v2103_v16 }
 0x14e   : > { %1569 = vmatpush.bf16.msrb.mxu3 %v2231_v21 }
 0x14f   : > { %1528 = vmatpush.bf16.msrb.mxu0 %v1831_v27  ;;  %v556_v27 = vld [vmem:[#allocation2 + $0x10] sm:$0xff] }
 0x150   : > { %1542 = vmatpush.bf16.msrb.mxu1 %v1959_v28 }
 0x151   : > { %1556 = vmatpush.bf16.msrb.mxu2 %v2087_v29 }
 0x152   : > { %1570 = vmatpush.bf16.msrb.mxu3 %v2215_v30  ;;  %1529 = vmatmul.bf16.vlgmr.msrb.gmra.mxu0 %v3171_v31 }
 0x153   : > { %1543 = vmatmul.bf16.vlgmr.msrb.gmra.mxu1 %v3178_v38 }
 0x154   : > { %1557 = vmatmul.bf16.vlgmr.msrb.gmra.mxu2 %v3153_v13 }
 0x155   : > { %1571 = vmatmul.bf16.vlgmr.msrb.gmra.mxu3 %v3160_v20 }
 0x175   : > { %v1362_v32 = vpop.f32.mrf.mxu0 }
 0x177   : > { %v1376_v33 = vpop.f32.mrf.mxu1  ;;  %v1390_v35 = vpop.f32.mrf.mxu2 }
 0x178   : > { %v1377_v34 = vadd.f32 %v1376_v33, %v1362_v32 }
 0x17a   : > { %v1404_v36 = vpop.f32.mrf.mxu3  ;;  %v1391_v37 = vadd.f32 %v1390_v35, %v1377_v34 }
 0x17c   : > { %v1405_v40 = vadd.f32 %v1404_v36, %v1391_v37  ;;  %v560_v36 = vld [vmem:[#allocation2 + $0x38] sm:$0xff] }
 0x17d   : > { %v1364_v42 = vpop.f32.mrf.mxu0 }
 0x17e   : > { %v1577_v41 = vadd.f32 %v1405_v40, %v553_v39 }
 0x17f   : > { %v1378_v43 = vpop.f32.mrf.mxu1  ;;  %v1392_v31 = vpop.f32.mrf.mxu2 }
 0x180   : > { %1585 = vst [vmem:[#allocation2 + $0x30] sm:$0xff] %v1577_v41  ;;  %v1379_v44 = vadd.f32 %v1378_v43, %v1364_v42 }
 0x182   : > { %v1406_v45 = vpop.f32.mrf.mxu3  ;;  %v1393_v38 = vadd.f32 %v1392_v31, %v1379_v44 }
 0x184   : > { %v1407_v13 = vadd.f32 %v1406_v45, %v1393_v38 }
 0x186   : > { %v1581_v47 = vadd.f32 %v1407_v13, %v557_v46 }
 0x188   : > { %1589 = vst [vmem:[#allocation2 + $0x8] sm:$0xff] %v1581_v47 }
 0x18f   : > { %v1418_v20 = vpop.f32.mrf.mxu0 }
 0x190   : > { %v1432_v48 = vpop.f32.mrf.mxu1 }
 0x191   : > { %v1433_v49 = vadd.f32 %v1432_v48, %v1418_v20 }
 0x197   : > { %v1446_v50 = vpop.f32.mrf.mxu2  ;;  %v1420_v55 = vpop.f32.mrf.mxu0 }
 0x198   : > { %v1447_v51 = vadd.f32 %v1446_v50, %v1433_v49  ;;  %v1460_v52 = vpop.f32.mrf.mxu3  ;;  %v1434_v56 = vpop.f32.mrf.mxu1 }
 0x199   : > { %v1435_v58 = vadd.f32 %v1434_v56, %v1420_v55 }
 0x19a   : > { %v1461_v54 = vadd.f32 %v1460_v52, %v1447_v51 }
 0x19c   : > { %v1578_v57 = vadd.f32 %v1461_v54, %v554_v53 }
 0x19e   : > { %1586 = vst [vmem:[#allocation2] sm:$0xff] %v1578_v57 }
 0x19f   : > { %v1448_v59 = vpop.f32.mrf.mxu2 }
 0x1a0   : > { %v1449_v60 = vadd.f32 %v1448_v59, %v1435_v58  ;;  %v1462_v61 = vpop.f32.mrf.mxu3 }
 0x1a2   : > { %v1463_v63 = vadd.f32 %v1462_v61, %v1449_v60 }
 0x1a4   : > { %v1582_v0 = vadd.f32 %v1463_v63, %v558_v62 }
 0x1a6   : > { %1590 = vst [vmem:[#allocation2 + $0x20] sm:$0xff] %v1582_v0 }
 0x1af   : > { %v1474_v1 = vpop.f32.mrf.mxu0 }
 0x1b0   : > { %v1488_v2 = vpop.f32.mrf.mxu1 }
 0x1b1   : > { %v1489_v3 = vadd.f32 %v1488_v2, %v1474_v1 }
 0x1b7   : > { %v1502_v4 = vpop.f32.mrf.mxu2  ;;  %v1476_v9 = vpop.f32.mrf.mxu0 }
 0x1b8   : > { %v1503_v5 = vadd.f32 %v1502_v4, %v1489_v3  ;;  %v1516_v6 = vpop.f32.mrf.mxu3  ;;  %v1490_v10 = vpop.f32.mrf.mxu1 }
 0x1b9   : > { %v1491_v12 = vadd.f32 %v1490_v10, %v1476_v9 }
 0x1ba   : > { %v1517_v8 = vadd.f32 %v1516_v6, %v1503_v5 }
 0x1bc   : > { %v1579_v11 = vadd.f32 %v1517_v8, %v555_v7 }
 0x1be   : > { %1587 = vst [vmem:[#allocation2 + $0x18] sm:$0xff] %v1579_v11 }
 0x1bf   : > { %v1504_v14 = vpop.f32.mrf.mxu2 }
 0x1c0   : > { %v1505_v15 = vadd.f32 %v1504_v14, %v1491_v12  ;;  %v1518_v16 = vpop.f32.mrf.mxu3 }
 0x1c2   : > { %v1519_v18 = vadd.f32 %v1518_v16, %v1505_v15 }
 0x1c4   : > { %v1583_v19 = vadd.f32 %v1519_v18, %v559_v17 }
 0x1c6   : > { %1591 = vst [vmem:[#allocation2 + $0x28] sm:$0xff] %v1583_v19 }
 0x1cf   : > { %v1530_v21 = vpop.f32.mrf.mxu0 }
 0x1d0   : > { %v1544_v22 = vpop.f32.mrf.mxu1 }
 0x1d1   : > { %v1545_v23 = vadd.f32 %v1544_v22, %v1530_v21 }
 0x1d7   : > { %v1558_v24 = vpop.f32.mrf.mxu2  ;;  %v1532_v29 = vpop.f32.mrf.mxu0 }
 0x1d8   : > { %v1559_v25 = vadd.f32 %v1558_v24, %v1545_v23  ;;  %v1572_v26 = vpop.f32.mrf.mxu3  ;;  %v1546_v30 = vpop.f32.mrf.mxu1 }
 0x1d9   : > { %v1547_v33 = vadd.f32 %v1546_v30, %v1532_v29 }
 0x1da   : > { %v1573_v28 = vadd.f32 %v1572_v26, %v1559_v25 }
 0x1dc   : > { %v1580_v32 = vadd.f32 %v1573_v28, %v556_v27 }
 0x1de   : > { %1588 = vst [vmem:[#allocation2 + $0x10] sm:$0xff] %v1580_v32 }
 0x1df   : > { %v1560_v34 = vpop.f32.mrf.mxu2 }
 0x1e0   : > { %v1561_v35 = vadd.f32 %v1560_v34, %v1547_v33  ;;  %v1574_v37 = vpop.f32.mrf.mxu3 }
 0x1e2   : > { %v1575_v39 = vadd.f32 %v1574_v37, %v1561_v35  ;;  %1596 = sbr.rel (%p2328_p5) target bundleno = 501 (0x1f5), region = 86 }
 0x1e4   : > { %v1584_v40 = vadd.f32 %v1575_v39, %v560_v36 }
 0x1e6   : > { %1592 = vst [vmem:[#allocation2 + $0x38] sm:$0xff] %v1584_v40 }
 0x1e7   : > { %v1597_v41 = vld [vmem:[#allocation2 + $0x30] sm:$0xff]  ;;  %v1598_v42 = vld [vmem:[#allocation2] sm:$0xff]  ;;  %v1599_v45 = vld [vmem:[#allocation2 + $0x18] sm:$0xff] }
 0x1e8   : > { %v1605_v43 = vld [vmem:[%s537_s5] sm:$0xf]  ;;  %v1600_v38 = vld [vmem:[#allocation2 + $0x10] sm:$0xff]  ;;  %v1601_v47 = vld [vmem:[#allocation2 + $0x8] sm:$0xff] }
 0x1e9   : > { %v1607_v44 = vperm.slane %v1605_v43, 0  ;;  %v1608_v31 = vperm.slane %v1605_v43, 1  ;;  %v1609_v46 = vperm.slane %v1605_v43, 2  ;;  %v1610_v13 = vperm.slane %v1605_v43, 3  ;;  %v1602_v20 = vld [vmem:[#allocation2 + $0x20] sm:$0xff]  ;;  %v1603_v48 = vld [vmem:[#allocation2 + $0x28] sm:$0xff] }
 0x1eb   : > { %v1615_v49 = vadd.f32 %v1607_v44, %v1597_v41  ;;  %v1616_v50 = vadd.f32 %v1608_v31, %v1598_v42  ;;  %v1617_v51 = vadd.f32 %v1609_v46, %v1599_v45  ;;  %v1618_v52 = vadd.f32 %v1610_v13, %v1600_v38 }
 0x1ec   : > { %v1619_v54 = vadd.f32 %v1607_v44, %v1601_v47  ;;  %v1620_v55 = vadd.f32 %v1608_v31, %v1602_v20  ;;  %v1621_v56 = vadd.f32 %v1609_v46, %v1603_v48 }
 0x1ed   : > { %v1604_v53 = vld [vmem:[#allocation2 + $0x38] sm:$0xff]  ;;  %v1623_v58 = vmax.f32 %v1615_v49, 0.0  ;;  %v1624_v59 = vmax.f32 %v1616_v50, 0.0  ;;  %v1625_v60 = vmax.f32 %v1617_v51, 0.0  ;;  %v1626_v61 = vmax.f32 %v1618_v52, 0.0 }
 0x1ee   : > { %v1622_v57 = vadd.f32 %v1610_v13, %v1604_v53  ;;  %v1627_v62 = vmax.f32 %v1619_v54, 0.0  ;;  %v1628_v63 = vmax.f32 %v1620_v55, 0.0  ;;  %v1629_v0 = vmax.f32 %v1621_v56, 0.0 }
 0x1ef   : > { %v1631_v2 = vpack.c.bf16 %v1624_v59, %v1623_v58  ;;  %v1632_v3 = vpack.c.bf16 %v1626_v61, %v1625_v60 }
 0x1f0   : > { %v1630_v1 = vmax.f32 %v1622_v57, 0.0  ;;  %v1633_v4 = vpack.c.bf16 %v1628_v63, %v1627_v62 }
 0x1f1   : > { %1635 = vst [vmem:[%s3057_s25] sm:$0xff] %v1631_v2 }
 0x1f2   : > { %v1634_v5 = vpack.c.bf16 %v1630_v1, %v1629_v0  ;;  %1636 = vst [vmem:[%s3057_s25 + $0x8] sm:$0xff] %v1632_v3 }
 0x1f3   : > { %1637 = vst [vmem:[%s3057_s25 + $0x10] sm:$0xff] %v1633_v4 }
 0x1f4   : > { %1638 = vst [vmem:[%s3057_s25 + $0x18] sm:$0xff] %v1634_v5 }
 0x1f5 PF: > { %1645 = sbr.rel (!%p2761_p12) target bundleno = 509 (0x1fd), region = 90  ;;  %s2468_s14 = sshll.u32 (%p2761_p12), %s2632_s19, 4 }
 0x1f6   : > { %s1651_s0 = scalar_lea.vmem (%p2761_p12), %s3404_s3, %s2468_s14 }
 0x1f8   : > { %v1664_v6 = vld [vmem:[%s3057_s25] sm:$0xff] (%p2761_p12) }
 0x1f9   : > { %v1666_v7 = vld [vmem:[%s3057_s25 + $0x8] sm:$0xff] (%p2761_p12)  ;;  %1665 = vst [vmem:[%s1651_s0] sm:$0xff] (%p2761_p12), %v1664_v6 }
 0x1fa   : > { %v1668_v8 = vld [vmem:[%s3057_s25 + $0x10] sm:$0xff]  ;;  %1667 = vst [vmem:[%s1651_s0 + $0x8] sm:$0xff] %v1666_v7 }
 0x1fb   : > { %v1670_v9 = vld [vmem:[%s3057_s25 + $0x18] sm:$0xff]  ;;  %1669 = vst [vmem:[%s1651_s0 + $0x20] sm:$0xff] %v1668_v8 }
 0x1fc   : > { %1671 = vst [vmem:[%s1651_s0 + $0x28] sm:$0xff] %v1670_v9 }
 0x1fd PF: > { %s13_s22 = sadd.s32 1, %s2644_s22   ;;  %s3414_s10 = sld [smem:[#allocation6_spill]] }
 0x1fe   : > { %p10_p6 = scmp.ge.s32.totalorder %s13_s22, 10   ;;  %s3415_s12 = smov %s2608_s13 }
 0x1ff   : > { %s3416_s13 = smov %s2759_s9  ;;  %s3417_s14 = smov %s2616_s15 }
 0x200   : > { %s3418_s15 = smov %s2756_s8  ;;  %s3419_s16 = smov %s2624_s17 }
 0x201   : > { %s3420_s17 = smov %s2742_s30  ;;  %s3421_s18 = smov %s2636_s20 }
 0x202   : > { %s3422_s19 = smov %s2640_s21  ;;  %s3423_s20 = smov %s3426_s24 }
 0x203   : > { %s3424_s21 = smov %s3414_s10  ;;  %12 = sbr.rel (!%p10_p6) target bundleno = 9 (0x9), region = 155 }

// kernel: convnet_forward.27
= control target key start
LH: loop header
LB: loop body
LE: loop exit
PB: predicated region body
PF: predicated region fallthrough
CT: control target
= control target key end

     0   :  { %s1345_s1 = inlined_call_operand.vmem [shape: bf16[1024,128], index: 1, kind: input, shape index: {}]   ;;  %s1346_s0 = inlined_call_operand.vmem [shape: bf16[16,1024], index: 0, kind: input, shape index: {}]   ;;  %s1347_s2 = inlined_call_operand.vmem [shape: f32[1,128], index: 2, kind: input, shape index: {}]   ;;  %s1348_s3 = inlined_call_operand.vmem [shape: f32[16,128], index: 3, kind: output, shape index: {}]  }
   0x1   :  { %v1018_v0 = vld [vmem:[%s1345_s1 + $0x38] sm:$0xff]  ;;  %v1017_v4 = vld [vmem:[%s1345_s1 + $0x30] sm:$0xff]  ;;  %v1016_v8 = vld [vmem:[%s1345_s1 + $0x28] sm:$0xff] }
   0x2   :  { %v1026_v1 = vld [vmem:[%s1345_s1 + $0x78] sm:$0xff]  ;;  %582 = vmatpush.bf16.msra.mxu0 %v1018_v0  ;;  %v1025_v5 = vld [vmem:[%s1345_s1 + $0x70] sm:$0xff]  ;;  %v1024_v9 = vld [vmem:[%s1345_s1 + $0x68] sm:$0xff] }
   0x3   :  { %v1034_v2 = vld [vmem:[%s1345_s1 + $0xb8] sm:$0xff]  ;;  %596 = vmatpush.bf16.msra.mxu1 %v1026_v1  ;;  %v1033_v6 = vld [vmem:[%s1345_s1 + $0xb0] sm:$0xff]  ;;  %v1032_v10 = vld [vmem:[%s1345_s1 + $0xa8] sm:$0xff] }
   0x4   :  { %v1042_v3 = vld [vmem:[%s1345_s1 + $0xf8] sm:$0xff]  ;;  %610 = vmatpush.bf16.msra.mxu2 %v1034_v2  ;;  %v1041_v7 = vld [vmem:[%s1345_s1 + $0xf0] sm:$0xff]  ;;  %v1040_v11 = vld [vmem:[%s1345_s1 + $0xe8] sm:$0xff] }
   0x5   :  { %624 = vmatpush.bf16.msra.mxu3 %v1042_v3  ;;  %v1015_v12 = vld [vmem:[%s1345_s1 + $0x20] sm:$0xff]  ;;  %v1014_v16 = vld [vmem:[%s1345_s1 + $0x18] sm:$0xff]  ;;  %v1013_v20 = vld [vmem:[%s1345_s1 + $0x10] sm:$0xff] }
   0x6   :  { %583 = vmatpush.bf16.msra.mxu0 %v1017_v4  ;;  %v1023_v13 = vld [vmem:[%s1345_s1 + $0x60] sm:$0xff]  ;;  %v1022_v17 = vld [vmem:[%s1345_s1 + $0x58] sm:$0xff]  ;;  %v1021_v21 = vld [vmem:[%s1345_s1 + $0x50] sm:$0xff] }
   0x7   :  { %597 = vmatpush.bf16.msra.mxu1 %v1025_v5  ;;  %v1031_v14 = vld [vmem:[%s1345_s1 + $0xa0] sm:$0xff]  ;;  %v1030_v18 = vld [vmem:[%s1345_s1 + $0x98] sm:$0xff]  ;;  %v1029_v22 = vld [vmem:[%s1345_s1 + $0x90] sm:$0xff] }
   0x8   :  { %611 = vmatpush.bf16.msra.mxu2 %v1033_v6  ;;  %v1039_v15 = vld [vmem:[%s1345_s1 + $0xe0] sm:$0xff]  ;;  %v1038_v19 = vld [vmem:[%s1345_s1 + $0xd8] sm:$0xff]  ;;  %v1037_v23 = vld [vmem:[%s1345_s1 + $0xd0] sm:$0xff] }
   0x9   :  { %625 = vmatpush.bf16.msra.mxu3 %v1041_v7  ;;  %v1012_v24 = vld [vmem:[%s1345_s1 + $0x8] sm:$0xff]  ;;  %v1011_v28 = vld [vmem:[%s1345_s1] sm:$0xff]  ;;  %v1050_v32 = vld [vmem:[%s1345_s1 + $0x138] sm:$0xff] }
   0xa   :  { %584 = vmatpush.bf16.msra.mxu0 %v1016_v8  ;;  %v1020_v25 = vld [vmem:[%s1345_s1 + $0x48] sm:$0xff]  ;;  %v1019_v29 = vld [vmem:[%s1345_s1 + $0x40] sm:$0xff]  ;;  %v1058_v33 = vld [vmem:[%s1345_s1 + $0x178] sm:$0xff] }
   0xb   :  { %598 = vmatpush.bf16.msra.mxu1 %v1024_v9  ;;  %v1028_v26 = vld [vmem:[%s1345_s1 + $0x88] sm:$0xff]  ;;  %v1027_v30 = vld [vmem:[%s1345_s1 + $0x80] sm:$0xff]  ;;  %v1066_v42 = vld [vmem:[%s1345_s1 + $0x1b8] sm:$0xff] }
   0xc   :  { %612 = vmatpush.bf16.msra.mxu2 %v1032_v10  ;;  %v1036_v27 = vld [vmem:[%s1345_s1 + $0xc8] sm:$0xff]  ;;  %v1035_v31 = vld [vmem:[%s1345_s1 + $0xc0] sm:$0xff]  ;;  %v1074_v43 = vld [vmem:[%s1345_s1 + $0x1f8] sm:$0xff] }
   0xd   :  { %626 = vmatpush.bf16.msra.mxu3 %v1040_v11  ;;  %v725_v34 = vld [vmem:[%s1346_s0 + $0x8] sm:$0xf]  ;;  %v1004_v36 = vld [vmem:[%s1346_s0 + $0xc] sm:$0xf]  ;;  %v717_v38 = vld [vmem:[%s1346_s0] sm:$0xf] }
   0xe   :  { %585 = vmatpush.bf16.msra.mxu0 %v1015_v12  ;;  %v1008_v35 = vld [vmem:[%s1346_s0 + $0x24] sm:$0xf0]  ;;  %v727_v37 = vld [vmem:[%s1346_s0 + $0x28] sm:$0xf0]  ;;  %v1007_v39 = vld [vmem:[%s1346_s0 + $0x1c] sm:$0xf0] }
   0xf   :  { %599 = vmatpush.bf16.msra.mxu1 %v1023_v13  ;;  %v1003_v40 = vld [vmem:[%s1346_s0 + $0x4] sm:$0xf]  ;;  %v726_v44 = vor.u32 %v1008_v35, %v725_v34  ;;  %v730_v45 = vor.u32 %v1004_v36, %v727_v37  ;;  %v718_v46 = vor.u32 %v1007_v39, %v717_v38  ;;  %v1049_v48 = vld [vmem:[%s1345_s1 + $0x130] sm:$0xff]  ;;  %v1048_v52 = vld [vmem:[%s1345_s1 + $0x128] sm:$0xff] }
  0x10   :  { %613 = vmatpush.bf16.msra.mxu2 %v1031_v14  ;;  %v719_v41 = vld [vmem:[%s1346_s0 + $0x20] sm:$0xf0]  ;;  %v1057_v49 = vld [vmem:[%s1345_s1 + $0x170] sm:$0xff]  ;;  %v1056_v53 = vld [vmem:[%s1345_s1 + $0x168] sm:$0xff] }
  0x11   :  { %627 = vmatpush.bf16.msra.mxu3 %v1039_v15  ;;  %v722_v47 = vor.u32 %v1003_v40, %v719_v41  ;;  %v1065_v50 = vld [vmem:[%s1345_s1 + $0x1b0] sm:$0xff]  ;;  %v1064_v54 = vld [vmem:[%s1345_s1 + $0x1a8] sm:$0xff]  ;;  %v1047_v56 = vld [vmem:[%s1345_s1 + $0x120] sm:$0xff] }
  0x12   :  { %586 = vmatpush.bf16.msra.mxu0 %v1014_v16  ;;  %v1073_v51 = vld [vmem:[%s1345_s1 + $0x1f0] sm:$0xff]  ;;  %v1072_v55 = vld [vmem:[%s1345_s1 + $0x1e8] sm:$0xff]  ;;  %v1055_v57 = vld [vmem:[%s1345_s1 + $0x160] sm:$0xff] }
  0x13   :  { %600 = vmatpush.bf16.msra.mxu1 %v1022_v17  ;;  %v1063_v58 = vld [vmem:[%s1345_s1 + $0x1a0] sm:$0xff]  ;;  %v1046_v60 = vld [vmem:[%s1345_s1 + $0x118] sm:$0xff]  ;;  %v1045_v0 = vld [vmem:[%s1345_s1 + $0x110] sm:$0xff] }
  0x14   :  { %614 = vmatpush.bf16.msra.mxu2 %v1030_v18  ;;  %v1071_v59 = vld [vmem:[%s1345_s1 + $0x1e0] sm:$0xff]  ;;  %v1054_v61 = vld [vmem:[%s1345_s1 + $0x158] sm:$0xff]  ;;  %v1053_v1 = vld [vmem:[%s1345_s1 + $0x150] sm:$0xff] }
  0x15   :  { %628 = vmatpush.bf16.msra.mxu3 %v1038_v19  ;;  %v1062_v62 = vld [vmem:[%s1345_s1 + $0x198] sm:$0xff]  ;;  %v1061_v2 = vld [vmem:[%s1345_s1 + $0x190] sm:$0xff]  ;;  %v1044_v4 = vld [vmem:[%s1345_s1 + $0x108] sm:$0xff] }
  0x16   :  { %587 = vmatpush.bf16.msra.mxu0 %v1013_v20  ;;  %v1070_v63 = vld [vmem:[%s1345_s1 + $0x1d8] sm:$0xff]  ;;  %v1069_v3 = vld [vmem:[%s1345_s1 + $0x1d0] sm:$0xff]  ;;  %v1052_v5 = vld [vmem:[%s1345_s1 + $0x148] sm:$0xff] }
  0x17   :  { %601 = vmatpush.bf16.msra.mxu1 %v1021_v21  ;;  %v1060_v6 = vld [vmem:[%s1345_s1 + $0x188] sm:$0xff]  ;;  %v1043_v8 = vld [vmem:[%s1345_s1 + $0x100] sm:$0xff]  ;;  %v733_v12 = vld [vmem:[%s1346_s0 + $0x10] sm:$0xf] }
  0x18   :  { %615 = vmatpush.bf16.msra.mxu2 %v1029_v22  ;;  %v1068_v7 = vld [vmem:[%s1345_s1 + $0x1c8] sm:$0xff]  ;;  %v1051_v9 = vld [vmem:[%s1345_s1 + $0x140] sm:$0xff]  ;;  %v1009_v13 = vld [vmem:[%s1346_s0 + $0x2c] sm:$0xf0] }
  0x19   :  { %629 = vmatpush.bf16.msra.mxu3 %v1037_v23  ;;  %v1059_v10 = vld [vmem:[%s1345_s1 + $0x180] sm:$0xff]  ;;  %v1005_v14 = vld [vmem:[%s1346_s0 + $0x14] sm:$0xf]  ;;  %v741_v16 = vld [vmem:[%s1346_s0 + $0x18] sm:$0xf]  ;;  %v734_v20 = vor.u32 %v1009_v13, %v733_v12 }
  0x1a   :  { %588 = vmatpush.bf16.msra.mxu0 %v1012_v24  ;;  %v1067_v11 = vld [vmem:[%s1345_s1 + $0x1c0] sm:$0xff]  ;;  %v735_v15 = vld [vmem:[%s1346_s0 + $0x30] sm:$0xf0]  ;;  %v1010_v17 = vld [vmem:[%s1346_s0 + $0x34] sm:$0xf0] }
  0x1b   :  { %602 = vmatpush.bf16.msra.mxu1 %v1020_v25  ;;  %v1006_v18 = vld [vmem:[%s1346_s0 + $0x1c] sm:$0xf]  ;;  %v738_v21 = vor.u32 %v1005_v14, %v735_v15  ;;  %v742_v22 = vor.u32 %v1010_v17, %v741_v16 }
  0x1c   :  { %616 = vmatpush.bf16.msra.mxu2 %v1028_v26  ;;  %v743_v19 = vld [vmem:[%s1346_s0 + $0x38] sm:$0xf0] }
  0x1d   :  { %630 = vmatpush.bf16.msra.mxu3 %v1036_v27  ;;  %v746_v23 = vor.u32 %v1006_v18, %v743_v19 }
  0x1e   :  { %589 = vmatpush.bf16.msra.mxu0 %v1011_v28 }
  0x1f   :  { %603 = vmatpush.bf16.msra.mxu1 %v1019_v29 }
  0x20   :  { %617 = vmatpush.bf16.msra.mxu2 %v1027_v30 }
  0x21   :  { %631 = vmatpush.bf16.msra.mxu3 %v1035_v31  ;;  %590 = vmatmul.bf16.vlgmr.msra.gmra.mxu0 %v718_v46 }
  0x22   :  { %638 = vmatpush.bf16.msrb.mxu0 %v1050_v32  ;;  %604 = vmatmul.bf16.vlgmr.msra.gmra.mxu1 %v722_v47 }
  0x23   :  { %652 = vmatpush.bf16.msrb.mxu1 %v1058_v33  ;;  %618 = vmatmul.bf16.vlgmr.msra.gmra.mxu2 %v726_v44 }
  0x24   :  { %666 = vmatpush.bf16.msrb.mxu2 %v1066_v42  ;;  %632 = vmatmul.bf16.vlgmr.msra.gmra.mxu3 %v730_v45  ;;  %v1075_v45 = vld [vmem:[%s1347_s2] ss:$0 sm:$0xff] }
  0x25   :  { %680 = vmatpush.bf16.msrb.mxu3 %v1074_v43 }
  0x26   :  { %639 = vmatpush.bf16.msrb.mxu0 %v1049_v48 }
  0x27   :  { %653 = vmatpush.bf16.msrb.mxu1 %v1057_v49 }
  0x28   :  { %667 = vmatpush.bf16.msrb.mxu2 %v1065_v50 }
  0x29   :  { %681 = vmatpush.bf16.msrb.mxu3 %v1073_v51 }
  0x2a   :  { %640 = vmatpush.bf16.msrb.mxu0 %v1048_v52 }
  0x2b   :  { %654 = vmatpush.bf16.msrb.mxu1 %v1056_v53 }
  0x2c   :  { %668 = vmatpush.bf16.msrb.mxu2 %v1064_v54 }
  0x2d   :  { %682 = vmatpush.bf16.msrb.mxu3 %v1072_v55 }
  0x2e   :  { %641 = vmatpush.bf16.msrb.mxu0 %v1047_v56 }
  0x2f   :  { %655 = vmatpush.bf16.msrb.mxu1 %v1055_v57 }
  0x30   :  { %669 = vmatpush.bf16.msrb.mxu2 %v1063_v58 }
  0x31   :  { %683 = vmatpush.bf16.msrb.mxu3 %v1071_v59 }
  0x32   :  { %642 = vmatpush.bf16.msrb.mxu0 %v1046_v60 }
  0x33   :  { %656 = vmatpush.bf16.msrb.mxu1 %v1054_v61 }
  0x34   :  { %670 = vmatpush.bf16.msrb.mxu2 %v1062_v62 }
  0x35   :  { %684 = vmatpush.bf16.msrb.mxu3 %v1070_v63 }
  0x36   :  { %643 = vmatpush.bf16.msrb.mxu0 %v1045_v0 }
  0x37   :  { %657 = vmatpush.bf16.msrb.mxu1 %v1053_v1 }
  0x38   :  { %671 = vmatpush.bf16.msrb.mxu2 %v1061_v2 }
  0x39   :  { %685 = vmatpush.bf16.msrb.mxu3 %v1069_v3 }
  0x3a   :  { %644 = vmatpush.bf16.msrb.mxu0 %v1044_v4 }
  0x3b   :  { %658 = vmatpush.bf16.msrb.mxu1 %v1052_v5 }
  0x3c   :  { %672 = vmatpush.bf16.msrb.mxu2 %v1060_v6 }
  0x3d   :  { %686 = vmatpush.bf16.msrb.mxu3 %v1068_v7 }
  0x3e   :  { %645 = vmatpush.bf16.msrb.mxu0 %v1043_v8 }
  0x3f   :  { %659 = vmatpush.bf16.msrb.mxu1 %v1051_v9 }
  0x40   :  { %673 = vmatpush.bf16.msrb.mxu2 %v1059_v10 }
  0x41   :  { %687 = vmatpush.bf16.msrb.mxu3 %v1067_v11  ;;  %646 = vmatmul.bf16.vlgmr.msrb.gmra.mxu0 %v734_v20 }
  0x42   :  { %660 = vmatmul.bf16.vlgmr.msrb.gmra.mxu1 %v738_v21 }
  0x43   :  { %674 = vmatmul.bf16.vlgmr.msrb.gmra.mxu2 %v742_v22 }
  0x44   :  { %688 = vmatmul.bf16.vlgmr.msrb.gmra.mxu3 %v746_v23 }
  0x9e   :  { %v591_v24 = vpop.f32.mrf.mxu0 }
  0x9f   :  { %v605_v25 = vpop.f32.mrf.mxu1 }
  0xa0   :  { %v606_v28 = vadd.f32 %v605_v25, %v591_v24 }
  0xa6   :  { %v619_v26 = vpop.f32.mrf.mxu2  ;;  %v593_v29 = vpop.f32.mrf.mxu0 }
  0xa7   :  { %v633_v27 = vpop.f32.mrf.mxu3  ;;  %v607_v30 = vpop.f32.mrf.mxu1  ;;  %v620_v31 = vadd.f32 %v619_v26, %v606_v28 }
  0xa8   :  { %v608_v35 = vadd.f32 %v607_v30, %v593_v29 }
  0xa9   :  { %v634_v34 = vadd.f32 %v633_v27, %v620_v31 }
  0xae   :  { %v621_v32 = vpop.f32.mrf.mxu2 }
  0xaf   :  { %v635_v33 = vpop.f32.mrf.mxu3  ;;  %v622_v39 = vadd.f32 %v621_v32, %v608_v35 }
  0xb1   :  { %v636_v43 = vadd.f32 %v635_v33, %v622_v39 }
  0xbe   :  { %v647_v36 = vpop.f32.mrf.mxu0 }
  0xbf   :  { %v648_v37 = vadd.f32 %v647_v36, %v634_v34  ;;  %v661_v38 = vpop.f32.mrf.mxu1 }
  0xc1   :  { %v662_v40 = vadd.f32 %v661_v38, %v648_v37 }
  0xc6   :  { %v675_v41 = vpop.f32.mrf.mxu2  ;;  %v649_v46 = vpop.f32.mrf.mxu0 }
  0xc7   :  { %v689_v42 = vpop.f32.mrf.mxu3  ;;  %v676_v44 = vadd.f32 %v675_v41, %v662_v40  ;;  %v650_v48 = vadd.f32 %v649_v46, %v636_v43  ;;  %v663_v50 = vpop.f32.mrf.mxu1 }
  0xc9   :  { %v690_v47 = vadd.f32 %v689_v42, %v676_v44  ;;  %v664_v51 = vadd.f32 %v663_v50, %v650_v48 }
  0xcb   :  { %v707_v49 = vadd.f32 %v1075_v45, %v690_v47 }
  0xcd   :  { %709 = vst [vmem:[%s1348_s3] sm:$0xff] %v707_v49 }
  0xce   :  { %v677_v52 = vpop.f32.mrf.mxu2 }
  0xcf   :  { %v678_v53 = vadd.f32 %v677_v52, %v664_v51  ;;  %v691_v54 = vpop.f32.mrf.mxu3 }
  0xd1   :  { %v692_v55 = vadd.f32 %v691_v54, %v678_v53 }
  0xd3   :  { %v708_v56 = vadd.f32 %v1075_v45, %v692_v55 }
  0xd5   :  { %710 = vst [vmem:[%s1348_s3 + $0x8] sm:$0xff] %v708_v56 }

</bundles_post_ra>
